<compile_context>
chip_gen: v7x
topology: tpu7x:2x2x1
jax: 0.10.0
libtpu: 0.0.40
codegen_flags: <defaults>
</compile_context>

<pallas_src>
import math
import functools

import jax
import jax.numpy as jnp
from jax import lax
from jax.experimental import pallas as pl
from jax.experimental.pallas import tpu as pltpu


def _layernorm(x, w, b, eps):
    mean = jnp.mean(x, axis=-1, keepdims=True)
    var = jnp.mean((x - mean) ** 2, axis=-1, keepdims=True)
    return (x - mean) * lax.rsqrt(var + eps) * w + b


def _gelu(x):
    # OpenAI tanh-approx gelu (matches gelu_impl in the PyTorch module).
    return 0.5 * x * (1.0 + jnp.tanh(0.7978845608028654 * x * (1.0 + 0.044715 * x * x)))


def _transformer_layer_kernel(
        x_ref,
        ln1w_ref, ln1b_ref,
        wqkv_ref, bqkv_ref,
        wo_ref, bo_ref,
        ln2w_ref, ln2b_ref,
        w1_ref, b1_ref,
        w2_ref, b2_ref,
        o_ref,
        ln1_scr, q_scr, m_scr, l_scr, acc_scr, k_cache, v_cache,
        *, num_heads, eps):
    _, tq, H = x_ref.shape
    tk = k_cache.shape[1]            # == tq (equal q/kv tiles)
    hn = H // num_heads
    scale = 1.0 / math.sqrt(hn)
    i = pl.program_id(1)             # query-tile index
    j = pl.program_id(2)             # key/value-tile index
    bf16 = jnp.bfloat16
    f32 = jnp.float32

    # ---- first kv step for this (batch, q-tile): LN1 + scaled bf16 Q,
    #      reset the online-softmax state ----
    @pl.when(j == 0)
    def _init():
        ln1_q = _layernorm(x_ref[0], ln1w_ref[...], ln1b_ref[...], eps)
        ln1_b = ln1_q.astype(bf16)
        ln1_scr[...] = ln1_b                           # reused on the diagonal step
        q = jnp.dot(ln1_b, wqkv_ref[:, 0:H],
                    preferred_element_type=f32) + bqkv_ref[:, 0:H]
        q_scr[...] = (q * scale).astype(bf16)          # fold 1/sqrt(hn) into Q
        m_scr[...] = jnp.full_like(m_scr, -1e30)
        l_scr[...] = jnp.zeros_like(l_scr)
        acc_scr[...] = jnp.zeros_like(acc_scr)

    # ---- contributing (not fully masked) blocks only: j <= i ----
    @pl.when(j <= i)
    def _process():
        # K/V for kv-block j is produced exactly once, on the diagonal step
        # (its rows are exactly the resident, already-LayerNormed q rows), and
        # cached in persistent bf16 VMEM for later q-tiles.
        @pl.when(j == i)
        def _project_kv():
            kv = jnp.dot(ln1_scr[...], wqkv_ref[:, H:3 * H],
                         preferred_element_type=f32) + bqkv_ref[:, H:3 * H]
            k_cache[j] = kv[:, 0:H].astype(bf16)
            v_cache[j] = kv[:, H:2 * H].astype(bf16)

        k = k_cache[j]                                 # (tk, H) bf16
        v = v_cache[j]

        # Causal mask generated in-kernel (no (S,S) mask DMA): off-diagonal
        # contributing blocks (j < i) are fully visible; the diagonal block is
        # lower-triangular.  A single select per element replaces mul+add.
        row = lax.broadcasted_iota(jnp.int32, (tq, tk), 0)
        col = lax.broadcasted_iota(jnp.int32, (tq, tk), 1)
        allowed = jnp.logical_or(row >= col, j != i)

        # per-head flash (online softmax) update; static lane slices keep the
        # MXU contraction width at head_dim without in-kernel transposes.
        for h in range(num_heads):
            sl = slice(h * hn, (h + 1) * hn)
            s = lax.dot_general(q_scr[:, sl], k[:, sl],
                                dimension_numbers=(((1,), (1,)), ((), ())),
                                preferred_element_type=f32)      # (tq, tk)
            s = jnp.where(allowed, s, -10000.0)
            m_prev = m_scr[h]
            m_new = jnp.maximum(m_prev, jnp.max(s, axis=-1, keepdims=True))
            alpha = jnp.exp(m_prev - m_new)
            p = jnp.exp(s - m_new)
            l_scr[h] = alpha * l_scr[h] + jnp.sum(p, axis=-1, keepdims=True)
            acc_scr[:, sl] = alpha * acc_scr[:, sl] + jnp.dot(
                p.astype(bf16), v[:, sl], preferred_element_type=f32)
            m_scr[h] = m_new

    # ---- diagonal block == last contributing kv block for this q-tile:
    #      normalize, out-proj, residual, LN2, MLP, residual.  Remaining
    #      (fully masked) j steps for this q-tile are pure no-ops. ----
    @pl.when(j == i)
    def _finalize():
        for h in range(num_heads):
            sl = slice(h * hn, (h + 1) * hn)
            acc_scr[:, sl] = acc_scr[:, sl] * pl.reciprocal(l_scr[h], approx=True)
        attn = jnp.dot(acc_scr[...].astype(bf16), wo_ref[...],
                       preferred_element_type=f32) + bo_ref[...]
        res1 = x_ref[0] + attn
        ln2 = _layernorm(res1, ln2w_ref[...], ln2b_ref[...], eps)
        h4 = _gelu(jnp.dot(ln2.astype(bf16), w1_ref[...],
                           preferred_element_type=f32) + b1_ref[...])
        mlp = jnp.dot(h4.astype(bf16), w2_ref[...],
                      preferred_element_type=f32) + b2_ref[...]
        o_ref[0] = (res1 + mlp).astype(o_ref.dtype)
    # TODO(synk): attention / output dropout are eval-mode no-ops and are omitted.


def _vmem_limit_bytes():
    """Scoped VMEM limit: physical capacity minus headroom for compiler scratch."""
    try:
        cap = int(pltpu.get_tpu_info().vmem_capacity_bytes)
    except Exception:
        return None          # fall back to the compiler default
    return max(cap - 16 * 1024 * 1024, 32 * 1024 * 1024)


def gpt2_transformer_layer(x, params, *, num_heads, eps=1e-5, block=256):
    """Fused GPT2 transformer layer.

    The left-to-right (causal) attention mask is generated in-kernel.
    TODO(synk): an arbitrary (non-causal) ltor_mask would require restoring the
                mask input and dropping the causal block-skip.
    """
    B, S, H = x.shape
    assert H % num_heads == 0
    block = min(block, S)
    assert S % block == 0 and block % 8 == 0

    (ln1w, ln1b, wqkv, bqkv, wo, bo, ln2w, ln2b, w1, b1, w2, b2) = params

    bf16 = jnp.bfloat16
    # Weights feeding the MXU go to bf16 (halves VMEM footprint + HBM DMA bytes);
    # biases and layernorm parameters stay f32.
    wqkv_b, wo_b, w1_b, w2_b = (w.astype(bf16) for w in (wqkv, wo, w1, w2))

    n_blk = S // block
    grid = (B, n_blk, n_blk)

    def rep(shape):   # whole-array block, constant index map (weights / biases)
        return pl.BlockSpec(shape, lambda b, i, j: (0, 0))

    in_specs = [
        pl.BlockSpec((1, block, H), lambda b, i, j: (b, i, 0)),   # x (query rows)
        rep((1, H)), rep((1, H)),               # ln1 w, b
        rep((H, 3 * H)), rep((1, 3 * H)),       # fused qkv
        rep((H, H)), rep((1, H)),               # attn out proj
        rep((1, H)), rep((1, H)),               # ln2 w, b
        rep((H, 4 * H)), rep((1, 4 * H)),       # mlp fc1
        rep((4 * H, H)), rep((1, H)),           # mlp fc2
    ]

    scratch_shapes = [
        pltpu.VMEM((block, H), bf16),                     # LN1 of current q rows
        pltpu.VMEM((block, H), bf16),                     # cached scaled Q
        pltpu.VMEM((num_heads, block, 1), jnp.float32),   # running row max
        pltpu.VMEM((num_heads, block, 1), jnp.float32),   # running row sum
        pltpu.VMEM((block, H), jnp.float32),              # merged ctx accumulator
        pltpu.VMEM((n_blk, block, H), bf16),              # K cache (whole sequence)
        pltpu.VMEM((n_blk, block, H), bf16),              # V cache (whole sequence)
    ]

    cp_kwargs = dict(
        # The K/V cache scratch carries a dependence across the q-tile axis
        # (diagonal step writes, later q-tiles read), so that axis must stay
        # "arbitrary"; batches are fully independent.
        dimension_semantics=("parallel", "arbitrary", "arbitrary"))
    vmem_limit = _vmem_limit_bytes()
    if vmem_limit is not None:
        cp_kwargs["vmem_limit_bytes"] = vmem_limit

    kernel = functools.partial(_transformer_layer_kernel,
                               num_heads=num_heads, eps=eps)
    return pl.pallas_call(
        kernel,
        out_shape=jax.ShapeDtypeStruct((B, S, H), x.dtype),
        grid=grid,
        in_specs=in_specs,
        out_specs=pl.BlockSpec((1, block, H), lambda b, i, j: (b, i, 0)),
        scratch_shapes=scratch_shapes,
        compiler_params=pltpu.CompilerParams(**cp_kwargs),
    )(x, ln1w, ln1b, wqkv_b, bqkv, wo_b, bo, ln2w, ln2b, w1_b, b1, w2_b, b2)


def _reference(x, mask, params, num_heads, eps=1e-5):
    """Pure-JAX f32 reference of the same forward pass."""
    (ln1w, ln1b, wqkv, bqkv, wo, bo, ln2w, ln2b, w1, b1, w2, b2) = params
    B, S, H = x.shape
    hn = H // num_heads

    ln1 = _layernorm(x, ln1w, ln1b, eps)
    qkv = ln1 @ wqkv + bqkv
    q, k, v = jnp.split(qkv, 3, axis=-1)

    def heads(t):  # [B,S,H] -> [B,n,S,hn]
        return t.reshape(B, S, num_heads, hn).transpose(0, 2, 1, 3)

    qh, kh, vh = heads(q), heads(k), heads(v)
    scores = jnp.einsum("bnqd,bnkd->bnqk", qh, kh) / math.sqrt(hn)
    scores = scores * mask - 10000.0 * (1.0 - mask)
    probs = jax.nn.softmax(scores, axis=-1)
    ctx = jnp.einsum("bnqk,bnkd->bnqd", probs, vh)
    ctx = ctx.transpose(0, 2, 1, 3).reshape(B, S, H)
    attn_out = ctx @ wo + bo
    res1 = x + attn_out
    ln2 = _layernorm(res1, ln2w, ln2b, eps)
    mlp = _gelu(ln2 @ w1 + b1) @ w2 + b2
    return res1 + mlp


if __name__ == "__main__":
    # Shapes chosen to exercise the multi-tile flash path (diagonal, off-diagonal
    # and skipped blocks) while keeping block dims aligned to the TPU (8, 128) tile.
    B, S, H, N_HEADS = 2, 256, 128, 4
    key = jax.random.PRNGKey(0)
    keys = jax.random.split(key, 12)
    init = lambda k, shape: 0.02 * jax.random.normal(k, shape, dtype=jnp.float32)

    x = jax.random.normal(keys[0], (B, S, H), dtype=jnp.float32)

    params = (
        1.0 + 0.1 * jax.random.normal(keys[1], (1, H), dtype=jnp.float32),  # ln1 w
        0.02 * jax.random.normal(keys[2], (1, H), dtype=jnp.float32),       # ln1 b
        init(keys[3], (H, 3 * H)),                                          # qkv W (in,out)
        0.01 * jax.random.normal(keys[4], (1, 3 * H), dtype=jnp.float32),   # qkv b
        init(keys[5], (H, H)),                                              # attn out W
        0.01 * jax.random.normal(keys[6], (1, H), dtype=jnp.float32),       # attn out b
        1.0 + 0.1 * jax.random.normal(keys[7], (1, H), dtype=jnp.float32),  # ln2 w
        0.02 * jax.random.normal(keys[8], (1, H), dtype=jnp.float32),       # ln2 b
        init(keys[9], (H, 4 * H)),                                          # fc1 W
        0.01 * jax.random.normal(keys[10], (1, 4 * H), dtype=jnp.float32),  # fc1 b
        init(keys[11], (4 * H, H)),                                         # fc2 W
        jnp.zeros((1, H), jnp.float32),                                     # fc2 b
    )

    out = gpt2_transformer_layer(x, params, num_heads=N_HEADS, block=128)
    out = jax.block_until_ready(out)

    mask = jnp.tril(jnp.ones((S, S), dtype=jnp.float32))  # ltor (causal) mask
    ref = _reference(x, mask, params, N_HEADS)
    assert out.shape == (B, S, H)
    max_err = float(jnp.max(jnp.abs(out - ref)))
    assert jnp.allclose(out, ref, rtol=2e-2, atol=2e-2), \
        f"mismatch vs reference (max abs err {max_err})"
    print("KERNEL_OK")
</pallas_src>

<mosaic_0001>
module attributes {stable_mosaic.version = 11 : i64} {
  func.func @_transformer_layer_kernel(%arg0: i32, %arg1: i32, %arg2: i32, %arg3: memref<1x128x128xf32, #tpu.memory_space<vmem>>, %arg4: memref<1x128xf32, #tpu.memory_space<vmem>>, %arg5: memref<1x128xf32, #tpu.memory_space<vmem>>, %arg6: memref<128x384xbf16, #tpu.memory_space<vmem>>, %arg7: memref<1x384xf32, #tpu.memory_space<vmem>>, %arg8: memref<128x128xbf16, #tpu.memory_space<vmem>>, %arg9: memref<1x128xf32, #tpu.memory_space<vmem>>, %arg10: memref<1x128xf32, #tpu.memory_space<vmem>>, %arg11: memref<1x128xf32, #tpu.memory_space<vmem>>, %arg12: memref<128x512xbf16, #tpu.memory_space<vmem>>, %arg13: memref<1x512xf32, #tpu.memory_space<vmem>>, %arg14: memref<512x128xbf16, #tpu.memory_space<vmem>>, %arg15: memref<1x128xf32, #tpu.memory_space<vmem>>, %arg16: memref<1x128x128xf32, #tpu.memory_space<vmem>>, %arg17: memref<128x128xbf16, #tpu.memory_space<vmem>>, %arg18: memref<128x128xbf16, #tpu.memory_space<vmem>>, %arg19: memref<4x128x1xf32, #tpu.memory_space<vmem>>, %arg20: memref<4x128x1xf32, #tpu.memory_space<vmem>>, %arg21: memref<128x128xf32, #tpu.memory_space<vmem>>, %arg22: memref<2x128x128xbf16, #tpu.memory_space<vmem>>, %arg23: memref<2x128x128xbf16, #tpu.memory_space<vmem>>) attributes {dimension_semantics = [#tpu.dimension_semantics<parallel>, #tpu.dimension_semantics<arbitrary>, #tpu.dimension_semantics<arbitrary>], iteration_bounds = array<i64: 2, 2, 2>, scalar_prefetch = 0 : i64, scratch_operands = 7 : i64, tpu.core_type = #tpu.core_type<tc>, window_params = [{transform_indices = @transform_0, window_bounds = array<i64: 1, 128, 128>}, {pipeline_mode = #tpu.pipeline_mode<synchronous>, transform_indices = @transform_1, window_bounds = array<i64: 1, 128>}, {pipeline_mode = #tpu.pipeline_mode<synchronous>, transform_indices = @transform_2, window_bounds = array<i64: 1, 128>}, {pipeline_mode = #tpu.pipeline_mode<synchronous>, transform_indices = @transform_3, window_bounds = array<i64: 128, 384>}, {pipeline_mode = #tpu.pipeline_mode<synchronous>, transform_indices = @transform_4, window_bounds = array<i64: 1, 384>}, {pipeline_mode = #tpu.pipeline_mode<synchronous>, transform_indices = @transform_5, window_bounds = array<i64: 128, 128>}, {pipeline_mode = #tpu.pipeline_mode<synchronous>, transform_indices = @transform_6, window_bounds = array<i64: 1, 128>}, {pipeline_mode = #tpu.pipeline_mode<synchronous>, transform_indices = @transform_7, window_bounds = array<i64: 1, 128>}, {pipeline_mode = #tpu.pipeline_mode<synchronous>, transform_indices = @transform_8, window_bounds = array<i64: 1, 128>}, {pipeline_mode = #tpu.pipeline_mode<synchronous>, transform_indices = @transform_9, window_bounds = array<i64: 128, 512>}, {pipeline_mode = #tpu.pipeline_mode<synchronous>, transform_indices = @transform_10, window_bounds = array<i64: 1, 512>}, {pipeline_mode = #tpu.pipeline_mode<synchronous>, transform_indices = @transform_11, window_bounds = array<i64: 512, 128>}, {pipeline_mode = #tpu.pipeline_mode<synchronous>, transform_indices = @transform_12, window_bounds = array<i64: 1, 128>}, {transform_indices = @transform_13, window_bounds = array<i64: 1, 128, 128>}]} {
    %c0_i32 = arith.constant 0 : i32
    %0 = arith.cmpi eq, %arg2, %c0_i32 : i32
    %1 = arith.extui %0 : i1 to i32
    %c0_i32_0 = arith.constant 0 : i32
    %2 = arith.cmpi ne, %1, %c0_i32_0 : i32
    scf.if %2 {
      %c0 = arith.constant 0 : index
      %c0_3 = arith.constant 0 : index
      %c0_4 = arith.constant 0 : index
      %9 = vector.load %arg3[%c0, %c0_3, %c0_4] : memref<1x128x128xf32, #tpu.memory_space<vmem>>, vector<1x128x128xf32>
      %10 = vector.shape_cast %9 : vector<1x128x128xf32> to vector<128x128xf32>
      %c0_5 = arith.constant 0 : index
      %c0_6 = arith.constant 0 : index
      %11 = vector.load %arg4[%c0_5, %c0_6] : memref<1x128xf32, #tpu.memory_space<vmem>>, vector<1x128xf32>
      %c0_7 = arith.constant 0 : index
      %c0_8 = arith.constant 0 : index
      %12 = vector.load %arg5[%c0_7, %c0_8] : memref<1x128xf32, #tpu.memory_space<vmem>>, vector<1x128xf32>
      %cst = arith.constant dense<0.000000e+00> : vector<128xf32>
      %13 = vector.multi_reduction <add>, %10, %cst [1] : vector<128x128xf32> to vector<128xf32>
      %14 = vector.shape_cast %13 : vector<128xf32> to vector<128x1xf32>
      %cst_9 = arith.constant 1.280000e+02 : f32
      %15 = vector.broadcast %cst_9 : f32 to vector<128x1xf32>
      %16 = arith.divf %14, %15 : vector<128x1xf32>
      %17 = vector.broadcast %16 : vector<128x1xf32> to vector<128x128xf32>
      %18 = arith.subf %10, %17 : vector<128x128xf32>
      %19 = arith.mulf %18, %18 : vector<128x128xf32>
      %cst_10 = arith.constant dense<0.000000e+00> : vector<128xf32>
      %20 = vector.multi_reduction <add>, %19, %cst_10 [1] : vector<128x128xf32> to vector<128xf32>
      %21 = vector.shape_cast %20 : vector<128xf32> to vector<128x1xf32>
      %cst_11 = arith.constant 1.280000e+02 : f32
      %22 = vector.broadcast %cst_11 : f32 to vector<128x1xf32>
      %23 = arith.divf %21, %22 : vector<128x1xf32>
      %24 = vector.broadcast %16 : vector<128x1xf32> to vector<128x128xf32>
      %25 = arith.subf %10, %24 : vector<128x128xf32>
      %cst_12 = arith.constant 9.99999974E-6 : f32
      %26 = vector.broadcast %cst_12 : f32 to vector<128x1xf32>
      %27 = arith.addf %23, %26 : vector<128x1xf32>
      %28 = math.rsqrt %27 : vector<128x1xf32>
      %29 = vector.broadcast %28 : vector<128x1xf32> to vector<128x128xf32>
      %30 = arith.mulf %25, %29 : vector<128x128xf32>
      %31 = vector.broadcast %11 : vector<1x128xf32> to vector<128x128xf32>
      %32 = arith.mulf %30, %31 : vector<128x128xf32>
      %33 = vector.broadcast %12 : vector<1x128xf32> to vector<128x128xf32>
      %34 = arith.addf %32, %33 : vector<128x128xf32>
      %35 = arith.truncf %34 : vector<128x128xf32> to vector<128x128xbf16>
      %c0_13 = arith.constant 0 : index
      %c0_14 = arith.constant 0 : index
      %36 = vector.load %arg17[%c0_13, %c0_14] : memref<128x128xbf16, #tpu.memory_space<vmem>>, vector<128x128xbf16>
      tpu.vector_store %arg17[%c0_13, %c0_14], %35 {strides = array<i32>} : memref<128x128xbf16, #tpu.memory_space<vmem>>, vector<128x128xbf16>,
      %c0_15 = arith.constant 0 : index
      %c0_16 = arith.constant 0 : index
      %37 = vector.load %arg6[%c0_15, %c0_16] : memref<128x384xbf16, #tpu.memory_space<vmem>>, vector<128x128xbf16>
      %cst_17 = arith.constant dense<0.000000e+00> : vector<128x128xf32>
      %38 = tpu.matmul %35, %37, %cst_17 {dimension_numbers = #tpu.dot_dimension_numbers<[1], [0], [0], [1], [0, 0, 1, 1], [], []>} : vector<128x128xbf16>, vector<128x128xbf16>, vector<128x128xf32> -> vector<128x128xf32>
      %c0_18 = arith.constant 0 : index
      %c0_19 = arith.constant 0 : index
      %39 = vector.load %arg7[%c0_18, %c0_19] : memref<1x384xf32, #tpu.memory_space<vmem>>, vector<1x128xf32>
      %40 = vector.broadcast %39 : vector<1x128xf32> to vector<128x128xf32>
      %41 = arith.addf %38, %40 : vector<128x128xf32>
      %cst_20 = arith.constant 0.176776692 : f32
      %42 = vector.broadcast %cst_20 : f32 to vector<128x128xf32>
      %43 = arith.mulf %41, %42 : vector<128x128xf32>
      %44 = arith.truncf %43 : vector<128x128xf32> to vector<128x128xbf16>
      %c0_21 = arith.constant 0 : index
      %c0_22 = arith.constant 0 : index
      %45 = vector.load %arg18[%c0_21, %c0_22] : memref<128x128xbf16, #tpu.memory_space<vmem>>, vector<128x128xbf16>
      tpu.vector_store %arg18[%c0_21, %c0_22], %44 {strides = array<i32>} : memref<128x128xbf16, #tpu.memory_space<vmem>>, vector<128x128xbf16>,
      %cst_23 = arith.constant -1.000000e+30 : f32
      %46 = vector.broadcast %cst_23 : f32 to vector<4x128x1xf32>
      %c0_24 = arith.constant 0 : index
      %c0_25 = arith.constant 0 : index
      %c0_26 = arith.constant 0 : index
      %47 = vector.load %arg19[%c0_24, %c0_25, %c0_26] : memref<4x128x1xf32, #tpu.memory_space<vmem>>, vector<4x128x1xf32>
      tpu.vector_store %arg19[%c0_24, %c0_25, %c0_26], %46 {strides = array<i32>} : memref<4x128x1xf32, #tpu.memory_space<vmem>>, vector<4x128x1xf32>,
      %cst_27 = arith.constant 0.000000e+00 : f32
      %48 = vector.broadcast %cst_27 : f32 to vector<4x128x1xf32>
      %c0_28 = arith.constant 0 : index
      %c0_29 = arith.constant 0 : index
      %c0_30 = arith.constant 0 : index
      %49 = vector.load %arg20[%c0_28, %c0_29, %c0_30] : memref<4x128x1xf32, #tpu.memory_space<vmem>>, vector<4x128x1xf32>
      tpu.vector_store %arg20[%c0_28, %c0_29, %c0_30], %48 {strides = array<i32>} : memref<4x128x1xf32, #tpu.memory_space<vmem>>, vector<4x128x1xf32>,
      %cst_31 = arith.constant 0.000000e+00 : f32
      %50 = vector.broadcast %cst_31 : f32 to vector<128x128xf32>
      %c0_32 = arith.constant 0 : index
      %c0_33 = arith.constant 0 : index
      %51 = vector.load %arg21[%c0_32, %c0_33] : memref<128x128xf32, #tpu.memory_space<vmem>>, vector<128x128xf32>
      tpu.vector_store %arg21[%c0_32, %c0_33], %50 {strides = array<i32>} : memref<128x128xf32, #tpu.memory_space<vmem>>, vector<128x128xf32>,
    } else {
    }
    %3 = arith.cmpi sle, %arg2, %arg1 : i32
    %4 = arith.extui %3 : i1 to i32
    %c0_i32_1 = arith.constant 0 : i32
    %5 = arith.cmpi ne, %4, %c0_i32_1 : i32
    scf.if %5 {
      %9 = arith.cmpi eq, %arg2, %arg1 : i32
      %10 = arith.extui %9 : i1 to i32
      %c0_i32_3 = arith.constant 0 : i32
      %11 = arith.cmpi ne, %10, %c0_i32_3 : i32
      scf.if %11 {
        %c0_92 = arith.constant 0 : index
        %c0_93 = arith.constant 0 : index
        %164 = vector.load %arg17[%c0_92, %c0_93] : memref<128x128xbf16, #tpu.memory_space<vmem>>, vector<128x128xbf16>
        %c0_94 = arith.constant 0 : index
        %c128 = arith.constant 128 : index
        %165 = vector.load %arg6[%c0_94, %c128] : memref<128x384xbf16, #tpu.memory_space<vmem>>, vector<128x256xbf16>
        %cst_95 = arith.constant dense<0.000000e+00> : vector<128x256xf32>
        %166 = tpu.matmul %164, %165, %cst_95 {dimension_numbers = #tpu.dot_dimension_numbers<[1], [0], [0], [1], [0, 0, 1, 1], [], []>} : vector<128x128xbf16>, vector<128x256xbf16>, vector<128x256xf32> -> vector<128x256xf32>
        %c0_96 = arith.constant 0 : index
        %c128_97 = arith.constant 128 : index
        %167 = vector.load %arg7[%c0_96, %c128_97] : memref<1x384xf32, #tpu.memory_space<vmem>>, vector<1x256xf32>
        %168 = vector.broadcast %167 : vector<1x256xf32> to vector<128x256xf32>
        %169 = arith.addf %166, %168 : vector<128x256xf32>
        %170 = vector.extract_strided_slice %169 {offsets = [0, 0], sizes = [128, 128], strides = [1, 1]} : vector<128x256xf32> to vector<128x128xf32>
        %171 = arith.truncf %170 : vector<128x128xf32> to vector<128x128xbf16>
        %172 = arith.index_cast %arg2 : i32 to index
        %c0_98 = arith.constant 0 : index
        %c0_99 = arith.constant 0 : index
        %173 = vector.load %arg22[%172, %c0_98, %c0_99] : memref<2x128x128xbf16, #tpu.memory_space<vmem>>, vector<1x128x128xbf16>
        %174 = vector.shape_cast %173 : vector<1x128x128xbf16> to vector<128x128xbf16>
        %175 = vector.shape_cast %171 : vector<128x128xbf16> to vector<1x128x128xbf16>
        tpu.vector_store %arg22[%172, %c0_98, %c0_99], %175 {strides = array<i32>} : memref<2x128x128xbf16, #tpu.memory_space<vmem>>, vector<1x128x128xbf16>,
        %176 = vector.extract_strided_slice %169 {offsets = [0, 128], sizes = [128, 128], strides = [1, 1]} : vector<128x256xf32> to vector<128x128xf32>
        %177 = arith.truncf %176 : vector<128x128xf32> to vector<128x128xbf16>
        %178 = arith.index_cast %arg2 : i32 to index
        %c0_100 = arith.constant 0 : index
        %c0_101 = arith.constant 0 : index
        %179 = vector.load %arg23[%178, %c0_100, %c0_101] : memref<2x128x128xbf16, #tpu.memory_space<vmem>>, vector<1x128x128xbf16>
        %180 = vector.shape_cast %179 : vector<1x128x128xbf16> to vector<128x128xbf16>
        %181 = vector.shape_cast %177 : vector<128x128xbf16> to vector<1x128x128xbf16>
        tpu.vector_store %arg23[%178, %c0_100, %c0_101], %181 {strides = array<i32>} : memref<2x128x128xbf16, #tpu.memory_space<vmem>>, vector<1x128x128xbf16>,
      } else {
      }
      %12 = arith.index_cast %arg2 : i32 to index
      %c0 = arith.constant 0 : index
      %c0_4 = arith.constant 0 : index
      %13 = vector.load %arg22[%12, %c0, %c0_4] : memref<2x128x128xbf16, #tpu.memory_space<vmem>>, vector<1x128x128xbf16>
      %14 = vector.shape_cast %13 : vector<1x128x128xbf16> to vector<128x128xbf16>
      %15 = arith.index_cast %arg2 : i32 to index
      %c0_5 = arith.constant 0 : index
      %c0_6 = arith.constant 0 : index
      %16 = vector.load %arg23[%15, %c0_5, %c0_6] : memref<2x128x128xbf16, #tpu.memory_space<vmem>>, vector<1x128x128xbf16>
      %17 = vector.shape_cast %16 : vector<1x128x128xbf16> to vector<128x128xbf16>
      %18 = tpu.iota {dimensions = array<i32: 0>} : vector<128x128xi32>
      %19 = tpu.iota {dimensions = array<i32: 1>} : vector<128x128xi32>
      %20 = arith.cmpi sge, %18, %19 : vector<128x128xi32>
      %21 = arith.cmpi ne, %arg2, %arg1 : i32
      %22 = vector.broadcast %21 : i1 to vector<128x128xi1>
      %23 = arith.ori %20, %22 : vector<128x128xi1>
      %c0_7 = arith.constant 0 : index
      %c0_8 = arith.constant 0 : index
      %24 = vector.load %arg18[%c0_7, %c0_8] : memref<128x128xbf16, #tpu.memory_space<vmem>>, vector<128x32xbf16>
      %25 = vector.extract_strided_slice %14 {offsets = [0, 0], sizes = [128, 32], strides = [1, 1]} : vector<128x128xbf16> to vector<128x32xbf16>
      %cst = arith.constant dense<0.000000e+00> : vector<128x128xf32>
      %26 = tpu.matmul %24, %25, %cst {dimension_numbers = #tpu.dot_dimension_numbers<[1], [1], [0], [0], [0, 0, 1, 0], [], []>} : vector<128x32xbf16>, vector<128x32xbf16>, vector<128x128xf32> -> vector<128x128xf32>
      %cst_9 = arith.constant -1.000000e+04 : f32
      %27 = vector.broadcast %cst_9 : f32 to vector<128x128xf32>
      %28 = arith.select %23, %26, %27 : vector<128x128xi1>, vector<128x128xf32>
      %c0_10 = arith.constant 0 : index
      %c0_11 = arith.constant 0 : index
      %c0_12 = arith.constant 0 : index
      %29 = vector.load %arg19[%c0_10, %c0_11, %c0_12] : memref<4x128x1xf32, #tpu.memory_space<vmem>>, vector<1x128x1xf32>
      %30 = vector.shape_cast %29 : vector<1x128x1xf32> to vector<128x1xf32>
      %cst_13 = arith.constant dense<0xFF800000> : vector<128xf32>
      %31 = vector.multi_reduction <maximumf>, %28, %cst_13 [1] : vector<128x128xf32> to vector<128xf32>
      %32 = vector.shape_cast %31 : vector<128xf32> to vector<128x1xf32>
      %33 = arith.maximumf %30, %32 : vector<128x1xf32>
      %34 = arith.subf %30, %33 : vector<128x1xf32>
      %35 = math.exp %34 : vector<128x1xf32>
      %36 = vector.broadcast %33 : vector<128x1xf32> to vector<128x128xf32>
      %37 = arith.subf %28, %36 : vector<128x128xf32>
      %38 = math.exp %37 : vector<128x128xf32>
      %c0_14 = arith.constant 0 : index
      %c0_15 = arith.constant 0 : index
      %c0_16 = arith.constant 0 : index
      %39 = vector.load %arg20[%c0_14, %c0_15, %c0_16] : memref<4x128x1xf32, #tpu.memory_space<vmem>>, vector<1x128x1xf32>
      %40 = vector.shape_cast %39 : vector<1x128x1xf32> to vector<128x1xf32>
      %41 = arith.mulf %35, %40 : vector<128x1xf32>
      %cst_17 = arith.constant dense<0.000000e+00> : vector<128xf32>
      %42 = vector.multi_reduction <add>, %38, %cst_17 [1] : vector<128x128xf32> to vector<128xf32>
      %43 = vector.shape_cast %42 : vector<128xf32> to vector<128x1xf32>
      %44 = arith.addf %41, %43 : vector<128x1xf32>
      %c0_18 = arith.constant 0 : index
      %c0_19 = arith.constant 0 : index
      %c0_20 = arith.constant 0 : index
      %45 = vector.load %arg20[%c0_18, %c0_19, %c0_20] : memref<4x128x1xf32, #tpu.memory_space<vmem>>, vector<1x128x1xf32>
      %46 = vector.shape_cast %45 : vector<1x128x1xf32> to vector<128x1xf32>
      %47 = vector.shape_cast %44 : vector<128x1xf32> to vector<1x128x1xf32>
      tpu.vector_store %arg20[%c0_18, %c0_19, %c0_20], %47 {strides = array<i32>} : memref<4x128x1xf32, #tpu.memory_space<vmem>>, vector<1x128x1xf32>,
      %c0_21 = arith.constant 0 : index
      %c0_22 = arith.constant 0 : index
      %48 = vector.load %arg21[%c0_21, %c0_22] : memref<128x128xf32, #tpu.memory_space<vmem>>, vector<128x32xf32>
      %49 = vector.broadcast %35 : vector<128x1xf32> to vector<128x32xf32>
      %50 = arith.mulf %49, %48 : vector<128x32xf32>
      %51 = arith.truncf %38 : vector<128x128xf32> to vector<128x128xbf16>
      %52 = vector.extract_strided_slice %17 {offsets = [0, 0], sizes = [128, 32], strides = [1, 1]} : vector<128x128xbf16> to vector<128x32xbf16>
      %cst_23 = arith.constant dense<0.000000e+00> : vector<128x32xf32>
      %53 = tpu.matmul %51, %52, %cst_23 {dimension_numbers = #tpu.dot_dimension_numbers<[1], [0], [0], [1], [0, 0, 1, 1], [], []>} : vector<128x128xbf16>, vector<128x32xbf16>, vector<128x32xf32> -> vector<128x32xf32>
      %54 = arith.addf %50, %53 : vector<128x32xf32>
      %c0_24 = arith.constant 0 : index
      %c0_25 = arith.constant 0 : index
      %55 = vector.load %arg21[%c0_24, %c0_25] : memref<128x128xf32, #tpu.memory_space<vmem>>, vector<128x32xf32>
      tpu.vector_store %arg21[%c0_24, %c0_25], %54 {strides = array<i32>} : memref<128x128xf32, #tpu.memory_space<vmem>>, vector<128x32xf32>,
      %c0_26 = arith.constant 0 : index
      %c0_27 = arith.constant 0 : index
      %c0_28 = arith.constant 0 : index
      %56 = vector.load %arg19[%c0_26, %c0_27, %c0_28] : memref<4x128x1xf32, #tpu.memory_space<vmem>>, vector<1x128x1xf32>
      %57 = vector.shape_cast %56 : vector<1x128x1xf32> to vector<128x1xf32>
      %58 = vector.shape_cast %33 : vector<128x1xf32> to vector<1x128x1xf32>
      tpu.vector_store %arg19[%c0_26, %c0_27, %c0_28], %58 {strides = array<i32>} : memref<4x128x1xf32, #tpu.memory_space<vmem>>, vector<1x128x1xf32>,
      %c0_29 = arith.constant 0 : index
      %c32 = arith.constant 32 : index
      %59 = vector.load %arg18[%c0_29, %c32] : memref<128x128xbf16, #tpu.memory_space<vmem>>, vector<128x32xbf16>
      %60 = vector.extract_strided_slice %14 {offsets = [0, 32], sizes = [128, 32], strides = [1, 1]} : vector<128x128xbf16> to vector<128x32xbf16>
      %cst_30 = arith.constant dense<0.000000e+00> : vector<128x128xf32>
      %61 = tpu.matmul %59, %60, %cst_30 {dimension_numbers = #tpu.dot_dimension_numbers<[1], [1], [0], [0], [0, 0, 1, 0], [], []>} : vector<128x32xbf16>, vector<128x32xbf16>, vector<128x128xf32> -> vector<128x128xf32>
      %cst_31 = arith.constant -1.000000e+04 : f32
      %62 = vector.broadcast %cst_31 : f32 to vector<128x128xf32>
      %63 = arith.select %23, %61, %62 : vector<128x128xi1>, vector<128x128xf32>
      %c1 = arith.constant 1 : index
      %c0_32 = arith.constant 0 : index
      %c0_33 = arith.constant 0 : index
      %64 = vector.load %arg19[%c1, %c0_32, %c0_33] : memref<4x128x1xf32, #tpu.memory_space<vmem>>, vector<1x128x1xf32>
      %65 = vector.shape_cast %64 : vector<1x128x1xf32> to vector<128x1xf32>
      %cst_34 = arith.constant dense<0xFF800000> : vector<128xf32>
      %66 = vector.multi_reduction <maximumf>, %63, %cst_34 [1] : vector<128x128xf32> to vector<128xf32>
      %67 = vector.shape_cast %66 : vector<128xf32> to vector<128x1xf32>
      %68 = arith.maximumf %65, %67 : vector<128x1xf32>
      %69 = arith.subf %65, %68 : vector<128x1xf32>
      %70 = math.exp %69 : vector<128x1xf32>
      %71 = vector.broadcast %68 : vector<128x1xf32> to vector<128x128xf32>
      %72 = arith.subf %63, %71 : vector<128x128xf32>
      %73 = math.exp %72 : vector<128x128xf32>
      %c1_35 = arith.constant 1 : index
      %c0_36 = arith.constant 0 : index
      %c0_37 = arith.constant 0 : index
      %74 = vector.load %arg20[%c1_35, %c0_36, %c0_37] : memref<4x128x1xf32, #tpu.memory_space<vmem>>, vector<1x128x1xf32>
      %75 = vector.shape_cast %74 : vector<1x128x1xf32> to vector<128x1xf32>
      %76 = arith.mulf %70, %75 : vector<128x1xf32>
      %cst_38 = arith.constant dense<0.000000e+00> : vector<128xf32>
      %77 = vector.multi_reduction <add>, %73, %cst_38 [1] : vector<128x128xf32> to vector<128xf32>
      %78 = vector.shape_cast %77 : vector<128xf32> to vector<128x1xf32>
      %79 = arith.addf %76, %78 : vector<128x1xf32>
      %c1_39 = arith.constant 1 : index
      %c0_40 = arith.constant 0 : index
      %c0_41 = arith.constant 0 : index
      %80 = vector.load %arg20[%c1_39, %c0_40, %c0_41] : memref<4x128x1xf32, #tpu.memory_space<vmem>>, vector<1x128x1xf32>
      %81 = vector.shape_cast %80 : vector<1x128x1xf32> to vector<128x1xf32>
      %82 = vector.shape_cast %79 : vector<128x1xf32> to vector<1x128x1xf32>
      tpu.vector_store %arg20[%c1_39, %c0_40, %c0_41], %82 {strides = array<i32>} : memref<4x128x1xf32, #tpu.memory_space<vmem>>, vector<1x128x1xf32>,
      %c0_42 = arith.constant 0 : index
      %c32_43 = arith.constant 32 : index
      %83 = vector.load %arg21[%c0_42, %c32_43] : memref<128x128xf32, #tpu.memory_space<vmem>>, vector<128x32xf32>
      %84 = vector.broadcast %70 : vector<128x1xf32> to vector<128x32xf32>
      %85 = arith.mulf %84, %83 : vector<128x32xf32>
      %86 = arith.truncf %73 : vector<128x128xf32> to vector<128x128xbf16>
      %87 = vector.extract_strided_slice %17 {offsets = [0, 32], sizes = [128, 32], strides = [1, 1]} : vector<128x128xbf16> to vector<128x32xbf16>
      %cst_44 = arith.constant dense<0.000000e+00> : vector<128x32xf32>
      %88 = tpu.matmul %86, %87, %cst_44 {dimension_numbers = #tpu.dot_dimension_numbers<[1], [0], [0], [1], [0, 0, 1, 1], [], []>} : vector<128x128xbf16>, vector<128x32xbf16>, vector<128x32xf32> -> vector<128x32xf32>
      %89 = arith.addf %85, %88 : vector<128x32xf32>
      %c0_45 = arith.constant 0 : index
      %c32_46 = arith.constant 32 : index
      %90 = vector.load %arg21[%c0_45, %c32_46] : memref<128x128xf32, #tpu.memory_space<vmem>>, vector<128x32xf32>
      tpu.vector_store %arg21[%c0_45, %c32_46], %89 {strides = array<i32>} : memref<128x128xf32, #tpu.memory_space<vmem>>, vector<128x32xf32>,
      %c1_47 = arith.constant 1 : index
      %c0_48 = arith.constant 0 : index
      %c0_49 = arith.constant 0 : index
      %91 = vector.load %arg19[%c1_47, %c0_48, %c0_49] : memref<4x128x1xf32, #tpu.memory_space<vmem>>, vector<1x128x1xf32>
      %92 = vector.shape_cast %91 : vector<1x128x1xf32> to vector<128x1xf32>
      %93 = vector.shape_cast %68 : vector<128x1xf32> to vector<1x128x1xf32>
      tpu.vector_store %arg19[%c1_47, %c0_48, %c0_49], %93 {strides = array<i32>} : memref<4x128x1xf32, #tpu.memory_space<vmem>>, vector<1x128x1xf32>,
      %c0_50 = arith.constant 0 : index
      %c64 = arith.constant 64 : index
      %94 = vector.load %arg18[%c0_50, %c64] : memref<128x128xbf16, #tpu.memory_space<vmem>>, vector<128x32xbf16>
      %95 = vector.extract_strided_slice %14 {offsets = [0, 64], sizes = [128, 32], strides = [1, 1]} : vector<128x128xbf16> to vector<128x32xbf16>
      %cst_51 = arith.constant dense<0.000000e+00> : vector<128x128xf32>
      %96 = tpu.matmul %94, %95, %cst_51 {dimension_numbers = #tpu.dot_dimension_numbers<[1], [1], [0], [0], [0, 0, 1, 0], [], []>} : vector<128x32xbf16>, vector<128x32xbf16>, vector<128x128xf32> -> vector<128x128xf32>
      %cst_52 = arith.constant -1.000000e+04 : f32
      %97 = vector.broadcast %cst_52 : f32 to vector<128x128xf32>
      %98 = arith.select %23, %96, %97 : vector<128x128xi1>, vector<128x128xf32>
      %c2 = arith.constant 2 : index
      %c0_53 = arith.constant 0 : index
      %c0_54 = arith.constant 0 : index
      %99 = vector.load %arg19[%c2, %c0_53, %c0_54] : memref<4x128x1xf32, #tpu.memory_space<vmem>>, vector<1x128x1xf32>
      %100 = vector.shape_cast %99 : vector<1x128x1xf32> to vector<128x1xf32>
      %cst_55 = arith.constant dense<0xFF800000> : vector<128xf32>
      %101 = vector.multi_reduction <maximumf>, %98, %cst_55 [1] : vector<128x128xf32> to vector<128xf32>
      %102 = vector.shape_cast %101 : vector<128xf32> to vector<128x1xf32>
      %103 = arith.maximumf %100, %102 : vector<128x1xf32>
      %104 = arith.subf %100, %103 : vector<128x1xf32>
      %105 = math.exp %104 : vector<128x1xf32>
      %106 = vector.broadcast %103 : vector<128x1xf32> to vector<128x128xf32>
      %107 = arith.subf %98, %106 : vector<128x128xf32>
      %108 = math.exp %107 : vector<128x128xf32>
      %c2_56 = arith.constant 2 : index
      %c0_57 = arith.constant 0 : index
      %c0_58 = arith.constant 0 : index
      %109 = vector.load %arg20[%c2_56, %c0_57, %c0_58] : memref<4x128x1xf32, #tpu.memory_space<vmem>>, vector<1x128x1xf32>
      %110 = vector.shape_cast %109 : vector<1x128x1xf32> to vector<128x1xf32>
      %111 = arith.mulf %105, %110 : vector<128x1xf32>
      %cst_59 = arith.constant dense<0.000000e+00> : vector<128xf32>
      %112 = vector.multi_reduction <add>, %108, %cst_59 [1] : vector<128x128xf32> to vector<128xf32>
      %113 = vector.shape_cast %112 : vector<128xf32> to vector<128x1xf32>
      %114 = arith.addf %111, %113 : vector<128x1xf32>
      %c2_60 = arith.constant 2 : index
      %c0_61 = arith.constant 0 : index
      %c0_62 = arith.constant 0 : index
      %115 = vector.load %arg20[%c2_60, %c0_61, %c0_62] : memref<4x128x1xf32, #tpu.memory_space<vmem>>, vector<1x128x1xf32>
      %116 = vector.shape_cast %115 : vector<1x128x1xf32> to vector<128x1xf32>
      %117 = vector.shape_cast %114 : vector<128x1xf32> to vector<1x128x1xf32>
      tpu.vector_store %arg20[%c2_60, %c0_61, %c0_62], %117 {strides = array<i32>} : memref<4x128x1xf32, #tpu.memory_space<vmem>>, vector<1x128x1xf32>,
      %c0_63 = arith.constant 0 : index
      %c64_64 = arith.constant 64 : index
      %118 = vector.load %arg21[%c0_63, %c64_64] : memref<128x128xf32, #tpu.memory_space<vmem>>, vector<128x32xf32>
      %119 = vector.broadcast %105 : vector<128x1xf32> to vector<128x32xf32>
      %120 = arith.mulf %119, %118 : vector<128x32xf32>
      %121 = arith.truncf %108 : vector<128x128xf32> to vector<128x128xbf16>
      %122 = vector.extract_strided_slice %17 {offsets = [0, 64], sizes = [128, 32], strides = [1, 1]} : vector<128x128xbf16> to vector<128x32xbf16>
      %cst_65 = arith.constant dense<0.000000e+00> : vector<128x32xf32>
      %123 = tpu.matmul %121, %122, %cst_65 {dimension_numbers = #tpu.dot_dimension_numbers<[1], [0], [0], [1], [0, 0, 1, 1], [], []>} : vector<128x128xbf16>, vector<128x32xbf16>, vector<128x32xf32> -> vector<128x32xf32>
      %124 = arith.addf %120, %123 : vector<128x32xf32>
      %c0_66 = arith.constant 0 : index
      %c64_67 = arith.constant 64 : index
      %125 = vector.load %arg21[%c0_66, %c64_67] : memref<128x128xf32, #tpu.memory_space<vmem>>, vector<128x32xf32>
      tpu.vector_store %arg21[%c0_66, %c64_67], %124 {strides = array<i32>} : memref<128x128xf32, #tpu.memory_space<vmem>>, vector<128x32xf32>,
      %c2_68 = arith.constant 2 : index
      %c0_69 = arith.constant 0 : index
      %c0_70 = arith.constant 0 : index
      %126 = vector.load %arg19[%c2_68, %c0_69, %c0_70] : memref<4x128x1xf32, #tpu.memory_space<vmem>>, vector<1x128x1xf32>
      %127 = vector.shape_cast %126 : vector<1x128x1xf32> to vector<128x1xf32>
      %128 = vector.shape_cast %103 : vector<128x1xf32> to vector<1x128x1xf32>
      tpu.vector_store %arg19[%c2_68, %c0_69, %c0_70], %128 {strides = array<i32>} : memref<4x128x1xf32, #tpu.memory_space<vmem>>, vector<1x128x1xf32>,
      %c0_71 = arith.constant 0 : index
      %c96 = arith.constant 96 : index
      %129 = vector.load %arg18[%c0_71, %c96] : memref<128x128xbf16, #tpu.memory_space<vmem>>, vector<128x32xbf16>
      %130 = vector.extract_strided_slice %14 {offsets = [0, 96], sizes = [128, 32], strides = [1, 1]} : vector<128x128xbf16> to vector<128x32xbf16>
      %cst_72 = arith.constant dense<0.000000e+00> : vector<128x128xf32>
      %131 = tpu.matmul %129, %130, %cst_72 {dimension_numbers = #tpu.dot_dimension_numbers<[1], [1], [0], [0], [0, 0, 1, 0], [], []>} : vector<128x32xbf16>, vector<128x32xbf16>, vector<128x128xf32> -> vector<128x128xf32>
      %cst_73 = arith.constant -1.000000e+04 : f32
      %132 = vector.broadcast %cst_73 : f32 to vector<128x128xf32>
      %133 = arith.select %23, %131, %132 : vector<128x128xi1>, vector<128x128xf32>
      %c3 = arith.constant 3 : index
      %c0_74 = arith.constant 0 : index
      %c0_75 = arith.constant 0 : index
      %134 = vector.load %arg19[%c3, %c0_74, %c0_75] : memref<4x128x1xf32, #tpu.memory_space<vmem>>, vector<1x128x1xf32>
      %135 = vector.shape_cast %134 : vector<1x128x1xf32> to vector<128x1xf32>
      %cst_76 = arith.constant dense<0xFF800000> : vector<128xf32>
      %136 = vector.multi_reduction <maximumf>, %133, %cst_76 [1] : vector<128x128xf32> to vector<128xf32>
      %137 = vector.shape_cast %136 : vector<128xf32> to vector<128x1xf32>
      %138 = arith.maximumf %135, %137 : vector<128x1xf32>
      %139 = arith.subf %135, %138 : vector<128x1xf32>
      %140 = math.exp %139 : vector<128x1xf32>
      %141 = vector.broadcast %138 : vector<128x1xf32> to vector<128x128xf32>
      %142 = arith.subf %133, %141 : vector<128x128xf32>
      %143 = math.exp %142 : vector<128x128xf32>
      %c3_77 = arith.constant 3 : index
      %c0_78 = arith.constant 0 : index
      %c0_79 = arith.constant 0 : index
      %144 = vector.load %arg20[%c3_77, %c0_78, %c0_79] : memref<4x128x1xf32, #tpu.memory_space<vmem>>, vector<1x128x1xf32>
      %145 = vector.shape_cast %144 : vector<1x128x1xf32> to vector<128x1xf32>
      %146 = arith.mulf %140, %145 : vector<128x1xf32>
      %cst_80 = arith.constant dense<0.000000e+00> : vector<128xf32>
      %147 = vector.multi_reduction <add>, %143, %cst_80 [1] : vector<128x128xf32> to vector<128xf32>
      %148 = vector.shape_cast %147 : vector<128xf32> to vector<128x1xf32>
      %149 = arith.addf %146, %148 : vector<128x1xf32>
      %c3_81 = arith.constant 3 : index
      %c0_82 = arith.constant 0 : index
      %c0_83 = arith.constant 0 : index
      %150 = vector.load %arg20[%c3_81, %c0_82, %c0_83] : memref<4x128x1xf32, #tpu.memory_space<vmem>>, vector<1x128x1xf32>
      %151 = vector.shape_cast %150 : vector<1x128x1xf32> to vector<128x1xf32>
      %152 = vector.shape_cast %149 : vector<128x1xf32> to vector<1x128x1xf32>
      tpu.vector_store %arg20[%c3_81, %c0_82, %c0_83], %152 {strides = array<i32>} : memref<4x128x1xf32, #tpu.memory_space<vmem>>, vector<1x128x1xf32>,
      %c0_84 = arith.constant 0 : index
      %c96_85 = arith.constant 96 : index
      %153 = vector.load %arg21[%c0_84, %c96_85] : memref<128x128xf32, #tpu.memory_space<vmem>>, vector<128x32xf32>
      %154 = vector.broadcast %140 : vector<128x1xf32> to vector<128x32xf32>
      %155 = arith.mulf %154, %153 : vector<128x32xf32>
      %156 = arith.truncf %143 : vector<128x128xf32> to vector<128x128xbf16>
      %157 = vector.extract_strided_slice %17 {offsets = [0, 96], sizes = [128, 32], strides = [1, 1]} : vector<128x128xbf16> to vector<128x32xbf16>
      %cst_86 = arith.constant dense<0.000000e+00> : vector<128x32xf32>
      %158 = tpu.matmul %156, %157, %cst_86 {dimension_numbers = #tpu.dot_dimension_numbers<[1], [0], [0], [1], [0, 0, 1, 1], [], []>} : vector<128x128xbf16>, vector<128x32xbf16>, vector<128x32xf32> -> vector<128x32xf32>
      %159 = arith.addf %155, %158 : vector<128x32xf32>
      %c0_87 = arith.constant 0 : index
      %c96_88 = arith.constant 96 : index
      %160 = vector.load %arg21[%c0_87, %c96_88] : memref<128x128xf32, #tpu.memory_space<vmem>>, vector<128x32xf32>
      tpu.vector_store %arg21[%c0_87, %c96_88], %159 {strides = array<i32>} : memref<128x128xf32, #tpu.memory_space<vmem>>, vector<128x32xf32>,
      %c3_89 = arith.constant 3 : index
      %c0_90 = arith.constant 0 : index
      %c0_91 = arith.constant 0 : index
      %161 = vector.load %arg19[%c3_89, %c0_90, %c0_91] : memref<4x128x1xf32, #tpu.memory_space<vmem>>, vector<1x128x1xf32>
      %162 = vector.shape_cast %161 : vector<1x128x1xf32> to vector<128x1xf32>
      %163 = vector.shape_cast %138 : vector<128x1xf32> to vector<1x128x1xf32>
      tpu.vector_store %arg19[%c3_89, %c0_90, %c0_91], %163 {strides = array<i32>} : memref<4x128x1xf32, #tpu.memory_space<vmem>>, vector<1x128x1xf32>,
    } else {
    }
    %6 = arith.cmpi eq, %arg2, %arg1 : i32
    %7 = arith.extui %6 : i1 to i32
    %c0_i32_2 = arith.constant 0 : i32
    %8 = arith.cmpi ne, %7, %c0_i32_2 : i32
    scf.if %8 {
      %c0 = arith.constant 0 : index
      %c0_3 = arith.constant 0 : index
      %9 = vector.load %arg21[%c0, %c0_3] : memref<128x128xf32, #tpu.memory_space<vmem>>, vector<128x32xf32>
      %c0_4 = arith.constant 0 : index
      %c0_5 = arith.constant 0 : index
      %c0_6 = arith.constant 0 : index
      %10 = vector.load %arg20[%c0_4, %c0_5, %c0_6] : memref<4x128x1xf32, #tpu.memory_space<vmem>>, vector<1x128x1xf32>
      %11 = vector.shape_cast %10 : vector<1x128x1xf32> to vector<128x1xf32>
      %12 = tpu.reciprocal %11 {approx = true} : vector<128x1xf32> -> vector<128x1xf32>
      %13 = vector.broadcast %12 : vector<128x1xf32> to vector<128x32xf32>
      %14 = arith.mulf %9, %13 : vector<128x32xf32>
      %c0_7 = arith.constant 0 : index
      %c0_8 = arith.constant 0 : index
      %15 = vector.load %arg21[%c0_7, %c0_8] : memref<128x128xf32, #tpu.memory_space<vmem>>, vector<128x32xf32>
      tpu.vector_store %arg21[%c0_7, %c0_8], %14 {strides = array<i32>} : memref<128x128xf32, #tpu.memory_space<vmem>>, vector<128x32xf32>,
      %c0_9 = arith.constant 0 : index
      %c32 = arith.constant 32 : index
      %16 = vector.load %arg21[%c0_9, %c32] : memref<128x128xf32, #tpu.memory_space<vmem>>, vector<128x32xf32>
      %c1 = arith.constant 1 : index
      %c0_10 = arith.constant 0 : index
      %c0_11 = arith.constant 0 : index
      %17 = vector.load %arg20[%c1, %c0_10, %c0_11] : memref<4x128x1xf32, #tpu.memory_space<vmem>>, vector<1x128x1xf32>
      %18 = vector.shape_cast %17 : vector<1x128x1xf32> to vector<128x1xf32>
      %19 = tpu.reciprocal %18 {approx = true} : vector<128x1xf32> -> vector<128x1xf32>
      %20 = vector.broadcast %19 : vector<128x1xf32> to vector<128x32xf32>
      %21 = arith.mulf %16, %20 : vector<128x32xf32>
      %c0_12 = arith.constant 0 : index
      %c32_13 = arith.constant 32 : index
      %22 = vector.load %arg21[%c0_12, %c32_13] : memref<128x128xf32, #tpu.memory_space<vmem>>, vector<128x32xf32>
      tpu.vector_store %arg21[%c0_12, %c32_13], %21 {strides = array<i32>} : memref<128x128xf32, #tpu.memory_space<vmem>>, vector<128x32xf32>,
      %c0_14 = arith.constant 0 : index
      %c64 = arith.constant 64 : index
      %23 = vector.load %arg21[%c0_14, %c64] : memref<128x128xf32, #tpu.memory_space<vmem>>, vector<128x32xf32>
      %c2 = arith.constant 2 : index
      %c0_15 = arith.constant 0 : index
      %c0_16 = arith.constant 0 : index
      %24 = vector.load %arg20[%c2, %c0_15, %c0_16] : memref<4x128x1xf32, #tpu.memory_space<vmem>>, vector<1x128x1xf32>
      %25 = vector.shape_cast %24 : vector<1x128x1xf32> to vector<128x1xf32>
      %26 = tpu.reciprocal %25 {approx = true} : vector<128x1xf32> -> vector<128x1xf32>
      %27 = vector.broadcast %26 : vector<128x1xf32> to vector<128x32xf32>
      %28 = arith.mulf %23, %27 : vector<128x32xf32>
      %c0_17 = arith.constant 0 : index
      %c64_18 = arith.constant 64 : index
      %29 = vector.load %arg21[%c0_17, %c64_18] : memref<128x128xf32, #tpu.memory_space<vmem>>, vector<128x32xf32>
      tpu.vector_store %arg21[%c0_17, %c64_18], %28 {strides = array<i32>} : memref<128x128xf32, #tpu.memory_space<vmem>>, vector<128x32xf32>,
      %c0_19 = arith.constant 0 : index
      %c96 = arith.constant 96 : index
      %30 = vector.load %arg21[%c0_19, %c96] : memref<128x128xf32, #tpu.memory_space<vmem>>, vector<128x32xf32>
      %c3 = arith.constant 3 : index
      %c0_20 = arith.constant 0 : index
      %c0_21 = arith.constant 0 : index
      %31 = vector.load %arg20[%c3, %c0_20, %c0_21] : memref<4x128x1xf32, #tpu.memory_space<vmem>>, vector<1x128x1xf32>
      %32 = vector.shape_cast %31 : vector<1x128x1xf32> to vector<128x1xf32>
      %33 = tpu.reciprocal %32 {approx = true} : vector<128x1xf32> -> vector<128x1xf32>
      %34 = vector.broadcast %33 : vector<128x1xf32> to vector<128x32xf32>
      %35 = arith.mulf %30, %34 : vector<128x32xf32>
      %c0_22 = arith.constant 0 : index
      %c96_23 = arith.constant 96 : index
      %36 = vector.load %arg21[%c0_22, %c96_23] : memref<128x128xf32, #tpu.memory_space<vmem>>, vector<128x32xf32>
      tpu.vector_store %arg21[%c0_22, %c96_23], %35 {strides = array<i32>} : memref<128x128xf32, #tpu.memory_space<vmem>>, vector<128x32xf32>,
      %c0_24 = arith.constant 0 : index
      %c0_25 = arith.constant 0 : index
      %37 = vector.load %arg21[%c0_24, %c0_25] : memref<128x128xf32, #tpu.memory_space<vmem>>, vector<128x128xf32>
      %38 = arith.truncf %37 : vector<128x128xf32> to vector<128x128xbf16>
      %c0_26 = arith.constant 0 : index
      %c0_27 = arith.constant 0 : index
      %39 = vector.load %arg8[%c0_26, %c0_27] : memref<128x128xbf16, #tpu.memory_space<vmem>>, vector<128x128xbf16>
      %cst = arith.constant dense<0.000000e+00> : vector<128x128xf32>
      %40 = tpu.matmul %38, %39, %cst {dimension_numbers = #tpu.dot_dimension_numbers<[1], [0], [0], [1], [0, 0, 1, 1], [], []>} : vector<128x128xbf16>, vector<128x128xbf16>, vector<128x128xf32> -> vector<128x128xf32>
      %c0_28 = arith.constant 0 : index
      %c0_29 = arith.constant 0 : index
      %41 = vector.load %arg9[%c0_28, %c0_29] : memref<1x128xf32, #tpu.memory_space<vmem>>, vector<1x128xf32>
      %42 = vector.broadcast %41 : vector<1x128xf32> to vector<128x128xf32>
      %43 = arith.addf %40, %42 : vector<128x128xf32>
      %c0_30 = arith.constant 0 : index
      %c0_31 = arith.constant 0 : index
      %c0_32 = arith.constant 0 : index
      %44 = vector.load %arg3[%c0_30, %c0_31, %c0_32] : memref<1x128x128xf32, #tpu.memory_space<vmem>>, vector<1x128x128xf32>
      %45 = vector.shape_cast %44 : vector<1x128x128xf32> to vector<128x128xf32>
      %46 = arith.addf %45, %43 : vector<128x128xf32>
      %c0_33 = arith.constant 0 : index
      %c0_34 = arith.constant 0 : index
      %47 = vector.load %arg10[%c0_33, %c0_34] : memref<1x128xf32, #tpu.memory_space<vmem>>, vector<1x128xf32>
      %c0_35 = arith.constant 0 : index
      %c0_36 = arith.constant 0 : index
      %48 = vector.load %arg11[%c0_35, %c0_36] : memref<1x128xf32, #tpu.memory_space<vmem>>, vector<1x128xf32>
      %cst_37 = arith.constant dense<0.000000e+00> : vector<128xf32>
      %49 = vector.multi_reduction <add>, %46, %cst_37 [1] : vector<128x128xf32> to vector<128xf32>
      %50 = vector.shape_cast %49 : vector<128xf32> to vector<128x1xf32>
      %cst_38 = arith.constant 1.280000e+02 : f32
      %51 = vector.broadcast %cst_38 : f32 to vector<128x1xf32>
      %52 = arith.divf %50, %51 : vector<128x1xf32>
      %53 = vector.broadcast %52 : vector<128x1xf32> to vector<128x128xf32>
      %54 = arith.subf %46, %53 : vector<128x128xf32>
      %55 = arith.mulf %54, %54 : vector<128x128xf32>
      %cst_39 = arith.constant dense<0.000000e+00> : vector<128xf32>
      %56 = vector.multi_reduction <add>, %55, %cst_39 [1] : vector<128x128xf32> to vector<128xf32>
      %57 = vector.shape_cast %56 : vector<128xf32> to vector<128x1xf32>
      %cst_40 = arith.constant 1.280000e+02 : f32
      %58 = vector.broadcast %cst_40 : f32 to vector<128x1xf32>
      %59 = arith.divf %57, %58 : vector<128x1xf32>
      %60 = vector.broadcast %52 : vector<128x1xf32> to vector<128x128xf32>
      %61 = arith.subf %46, %60 : vector<128x128xf32>
      %cst_41 = arith.constant 9.99999974E-6 : f32
      %62 = vector.broadcast %cst_41 : f32 to vector<128x1xf32>
      %63 = arith.addf %59, %62 : vector<128x1xf32>
      %64 = math.rsqrt %63 : vector<128x1xf32>
      %65 = vector.broadcast %64 : vector<128x1xf32> to vector<128x128xf32>
      %66 = arith.mulf %61, %65 : vector<128x128xf32>
      %67 = vector.broadcast %47 : vector<1x128xf32> to vector<128x128xf32>
      %68 = arith.mulf %66, %67 : vector<128x128xf32>
      %69 = vector.broadcast %48 : vector<1x128xf32> to vector<128x128xf32>
      %70 = arith.addf %68, %69 : vector<128x128xf32>
      %71 = arith.truncf %70 : vector<128x128xf32> to vector<128x128xbf16>
      %c0_42 = arith.constant 0 : index
      %c0_43 = arith.constant 0 : index
      %72 = vector.load %arg12[%c0_42, %c0_43] : memref<128x512xbf16, #tpu.memory_space<vmem>>, vector<128x512xbf16>
      %cst_44 = arith.constant dense<0.000000e+00> : vector<128x512xf32>
      %73 = tpu.matmul %71, %72, %cst_44 {dimension_numbers = #tpu.dot_dimension_numbers<[1], [0], [0], [1], [0, 0, 1, 1], [], []>} : vector<128x128xbf16>, vector<128x512xbf16>, vector<128x512xf32> -> vector<128x512xf32>
      %c0_45 = arith.constant 0 : index
      %c0_46 = arith.constant 0 : index
      %74 = vector.load %arg13[%c0_45, %c0_46] : memref<1x512xf32, #tpu.memory_space<vmem>>, vector<1x512xf32>
      %75 = vector.broadcast %74 : vector<1x512xf32> to vector<128x512xf32>
      %76 = arith.addf %73, %75 : vector<128x512xf32>
      %cst_47 = arith.constant 5.000000e-01 : f32
      %77 = vector.broadcast %cst_47 : f32 to vector<128x512xf32>
      %78 = arith.mulf %77, %76 : vector<128x512xf32>
      %cst_48 = arith.constant 0.797884583 : f32
      %79 = vector.broadcast %cst_48 : f32 to vector<128x512xf32>
      %80 = arith.mulf %79, %76 : vector<128x512xf32>
      %cst_49 = arith.constant 4.471500e-02 : f32
      %81 = vector.broadcast %cst_49 : f32 to vector<128x512xf32>
      %82 = arith.mulf %81, %76 : vector<128x512xf32>
      %83 = arith.mulf %82, %76 : vector<128x512xf32>
      %cst_50 = arith.constant 1.000000e+00 : f32
      %84 = vector.broadcast %cst_50 : f32 to vector<128x512xf32>
      %85 = arith.addf %84, %83 : vector<128x512xf32>
      %86 = arith.mulf %80, %85 : vector<128x512xf32>
      %87 = math.tanh %86 : vector<128x512xf32>
      %cst_51 = arith.constant 1.000000e+00 : f32
      %88 = vector.broadcast %cst_51 : f32 to vector<128x512xf32>
      %89 = arith.addf %88, %87 : vector<128x512xf32>
      %90 = arith.mulf %78, %89 : vector<128x512xf32>
      %91 = arith.truncf %90 : vector<128x512xf32> to vector<128x512xbf16>
      %c0_52 = arith.constant 0 : index
      %c0_53 = arith.constant 0 : index
      %92 = vector.load %arg14[%c0_52, %c0_53] : memref<512x128xbf16, #tpu.memory_space<vmem>>, vector<512x128xbf16>
      %cst_54 = arith.constant dense<0.000000e+00> : vector<128x128xf32>
      %93 = tpu.matmul %91, %92, %cst_54 {dimension_numbers = #tpu.dot_dimension_numbers<[1], [0], [0], [1], [0, 0, 1, 1], [], []>} : vector<128x512xbf16>, vector<512x128xbf16>, vector<128x128xf32> -> vector<128x128xf32>
      %c0_55 = arith.constant 0 : index
      %c0_56 = arith.constant 0 : index
      %94 = vector.load %arg15[%c0_55, %c0_56] : memref<1x128xf32, #tpu.memory_space<vmem>>, vector<1x128xf32>
      %95 = vector.broadcast %94 : vector<1x128xf32> to vector<128x128xf32>
      %96 = arith.addf %93, %95 : vector<128x128xf32>
      %97 = arith.addf %46, %96 : vector<128x128xf32>
      %c0_57 = arith.constant 0 : index
      %c0_58 = arith.constant 0 : index
      %c0_59 = arith.constant 0 : index
      %98 = vector.load %arg16[%c0_57, %c0_58, %c0_59] : memref<1x128x128xf32, #tpu.memory_space<vmem>>, vector<1x128x128xf32>
      %99 = vector.shape_cast %98 : vector<1x128x128xf32> to vector<128x128xf32>
      %100 = vector.shape_cast %97 : vector<128x128xf32> to vector<1x128x128xf32>
      tpu.vector_store %arg16[%c0_57, %c0_58, %c0_59], %100 {strides = array<i32>} : memref<1x128x128xf32, #tpu.memory_space<vmem>>, vector<1x128x128xf32>,
    } else {
    }
    return
  }
  func.func @transform_0(%arg0: i32, %arg1: i32, %arg2: i32) -> (i32, i32, i32) {
    %c0_i32 = arith.constant 0 : i32
    %c0_i32_0 = arith.constant 0 : i32
    return %arg0, %arg1, %c0_i32 : i32, i32, i32
  }
  func.func @transform_1(%arg0: i32, %arg1: i32, %arg2: i32) -> (i32, i32) {
    %c0_i32 = arith.constant 0 : i32
    %c0_i32_0 = arith.constant 0 : i32
    %c0_i32_1 = arith.constant 0 : i32
    return %c0_i32, %c0_i32_0 : i32, i32
  }
  func.func @transform_2(%arg0: i32, %arg1: i32, %arg2: i32) -> (i32, i32) {
    %c0_i32 = arith.constant 0 : i32
    %c0_i32_0 = arith.constant 0 : i32
    %c0_i32_1 = arith.constant 0 : i32
    return %c0_i32, %c0_i32_0 : i32, i32
  }
  func.func @transform_3(%arg0: i32, %arg1: i32, %arg2: i32) -> (i32, i32) {
    %c0_i32 = arith.constant 0 : i32
    %c0_i32_0 = arith.constant 0 : i32
    %c0_i32_1 = arith.constant 0 : i32
    return %c0_i32, %c0_i32_0 : i32, i32
  }
  func.func @transform_4(%arg0: i32, %arg1: i32, %arg2: i32) -> (i32, i32) {
    %c0_i32 = arith.constant 0 : i32
    %c0_i32_0 = arith.constant 0 : i32
    %c0_i32_1 = arith.constant 0 : i32
    return %c0_i32, %c0_i32_0 : i32, i32
  }
  func.func @transform_5(%arg0: i32, %arg1: i32, %arg2: i32) -> (i32, i32) {
    %c0_i32 = arith.constant 0 : i32
    %c0_i32_0 = arith.constant 0 : i32
    %c0_i32_1 = arith.constant 0 : i32
    return %c0_i32, %c0_i32_0 : i32, i32
  }
  func.func @transform_6(%arg0: i32, %arg1: i32, %arg2: i32) -> (i32, i32) {
    %c0_i32 = arith.constant 0 : i32
    %c0_i32_0 = arith.constant 0 : i32
    %c0_i32_1 = arith.constant 0 : i32
    return %c0_i32, %c0_i32_0 : i32, i32
  }
  func.func @transform_7(%arg0: i32, %arg1: i32, %arg2: i32) -> (i32, i32) {
    %c0_i32 = arith.constant 0 : i32
    %c0_i32_0 = arith.constant 0 : i32
    %c0_i32_1 = arith.constant 0 : i32
    return %c0_i32, %c0_i32_0 : i32, i32
  }
  func.func @transform_8(%arg0: i32, %arg1: i32, %arg2: i32) -> (i32, i32) {
    %c0_i32 = arith.constant 0 : i32
    %c0_i32_0 = arith.constant 0 : i32
    %c0_i32_1 = arith.constant 0 : i32
    return %c0_i32, %c0_i32_0 : i32, i32
  }
  func.func @transform_9(%arg0: i32, %arg1: i32, %arg2: i32) -> (i32, i32) {
    %c0_i32 = arith.constant 0 : i32
    %c0_i32_0 = arith.constant 0 : i32
    %c0_i32_1 = arith.constant 0 : i32
    return %c0_i32, %c0_i32_0 : i32, i32
  }
  func.func @transform_10(%arg0: i32, %arg1: i32, %arg2: i32) -> (i32, i32) {
    %c0_i32 = arith.constant 0 : i32
    %c0_i32_0 = arith.constant 0 : i32
    %c0_i32_1 = arith.constant 0 : i32
    return %c0_i32, %c0_i32_0 : i32, i32
  }
  func.func @transform_11(%arg0: i32, %arg1: i32, %arg2: i32) -> (i32, i32) {
    %c0_i32 = arith.constant 0 : i32
    %c0_i32_0 = arith.constant 0 : i32
    %c0_i32_1 = arith.constant 0 : i32
    return %c0_i32, %c0_i32_0 : i32, i32
  }
  func.func @transform_12(%arg0: i32, %arg1: i32, %arg2: i32) -> (i32, i32) {
    %c0_i32 = arith.constant 0 : i32
    %c0_i32_0 = arith.constant 0 : i32
    %c0_i32_1 = arith.constant 0 : i32
    return %c0_i32, %c0_i32_0 : i32, i32
  }
  func.func @transform_13(%arg0: i32, %arg1: i32, %arg2: i32) -> (i32, i32, i32) {
    %c0_i32 = arith.constant 0 : i32
    %c0_i32_0 = arith.constant 0 : i32
    return %arg0, %arg1, %c0_i32 : i32, i32, i32
  }
}

</mosaic_0001>

<bundles_post_ra>
// kernel: tpu_custom_call.1
= control target key start
LH: loop header
LB: loop body
LE: loop exit
PB: predicated region body
PF: predicated region fallthrough
CT: control target
= control target key end

     0   :  { %s14593_s0 = inlined_call_operand.hbm [shape: f32[2,256,128], index: 0, kind: input, shape index: {}]   ;;  %s14594_s1 = inlined_call_operand.hbm [shape: f32[1,128], index: 1, kind: input, shape index: {}]   ;;  %s14595_s2 = inlined_call_operand.hbm [shape: f32[1,128], index: 2, kind: input, shape index: {}]   ;;  %s14596_s3 = inlined_call_operand.hbm [shape: bf16[128,384], index: 3, kind: input, shape index: {}]   ;;  %s14597_s4 = inlined_call_operand.vmem [shape: f32[1,384], index: 4, kind: input, shape index: {}]   ;;  %s14598_s5 = inlined_call_operand.hbm [shape: bf16[128,128], index: 5, kind: input, shape index: {}]   ;;  %s14599_s6 = inlined_call_operand.vmem [shape: f32[1,128], index: 6, kind: input, shape index: {}]   ;;  %s14600_s7 = inlined_call_operand.vmem [shape: f32[1,128], index: 7, kind: input, shape index: {}]   ;;  %s14601_s8 = inlined_call_operand.vmem [shape: f32[1,128], index: 8, kind: input, shape index: {}]   ;;  %s14602_s9 = inlined_call_operand.hbm [shape: bf16[128,512], index: 9, kind: input, shape index: {}]   ;;  %s14603_s10 = inlined_call_operand.vmem [shape: f32[1,512], index: 10, kind: input, shape index: {}]   ;;  %s14604_s11 = inlined_call_operand.hbm [shape: bf16[512,128], index: 11, kind: input, shape index: {}]   ;;  %s14605_s12 = inlined_call_operand.vmem [shape: f32[1,128], index: 12, kind: input, shape index: {}]   ;;  %s14606_s13 = inlined_call_operand.hbm [shape: f32[2,256,128], index: 13, kind: output, shape index: {}]  }
   0x1   :  { %14810 = sst [smem:[#allocation168_spill]] %s14594_s1 }
   0x2   :  { %14811 = sst [smem:[#allocation169_spill]] %s14595_s2 }
   0x3   :  { %14812 = sst [smem:[#allocation170_spill]] %s14596_s3 }
   0x4   :  { %14813 = sst [smem:[#allocation171_spill]] %s14597_s4 }
   0x5   :  { %14814 = sst [smem:[#allocation172_spill]] %s14598_s5 }
   0x6   :  { %14815 = sst [smem:[#allocation173_spill]] %s14599_s6 }
   0x7   :  { %14816 = sst [smem:[#allocation174_spill]] %s14600_s7 }
   0x8   :  { %14817 = sst [smem:[#allocation175_spill]] %s14601_s8 }
   0x9   :  { %14818 = sst [smem:[#allocation176_spill]] %s14602_s9 }
   0xa   :  { %14819 = sst [smem:[#allocation177_spill]] %s14603_s10 }
   0xb   :  { %14820 = sst [smem:[#allocation178_spill]] %s14604_s11 }
   0xc   :  { %14821 = sst [smem:[#allocation179_spill]] %s14605_s12 }
   0xd   :  { %14822 = sst [smem:[#allocation180_spill]] %s14606_s13 }
   0xe   :  { %18 = vsyncpa [#allocation10], 0 }
   0xf   :  { %20 = vsyncpa [#allocation10 + $0x1], 0 }
  0x10   :  { %21 = vsyncpa [#allocation13], 0 }
  0x11   :  { %22 = vsyncpa [#allocation16], 0 }
  0x12   :  { %23 = vsyncpa [#allocation19], 0 }
  0x13   :  { %24 = vsyncpa [#allocation11], 0 }
  0x14   :  { %26 = vsyncpa [#allocation11 + $0x1], 0  ;;  %s10036_s25 = smov 0   ;;  %s10038_s26 = smov 0  }
  0x15   :  { %s10040_s27 = smov 0   ;;  %s10042_s28 = smov 0  }
  0x16   :  { %s10044_s29 = smov 0   ;;  %s10046_s30 = smov 0  }
  0x17   :  { %s10048_s14 = smov 0   ;;  %s10050_s15 = smov 0  }
  0x18   :  { %s10052_s16 = smov 0   ;;  %s10054_s17 = smov 0  }
  0x19 LB: > { %14823 = sst [smem:[#allocation27_spill]] %s9914_s28  ;;  %s14607_s18 = sadd.s32 4294967295, %s9938_s17   ;;  %s9938_s17 = sphi %s10054_s17, %s32_s17   ;;  %s9934_s16 = sphi %s10052_s16, %s15566_s16   ;;  %s9930_s15 = sphi %s10050_s15, %s15565_s15   ;;  %s9926_s14 = sphi %s10048_s14, %s15564_s14   ;;  %s9922_s30 = sphi %s10046_s30, %s15563_s30   ;;  %s9918_s29 = sphi %s10044_s29, %s15562_s29   ;;  %s9914_s28 = sphi %s10042_s28, %s15561_s28   ;;  %s9910_s27 = sphi %s10040_s27, %s15560_s27   ;;  %s9906_s26 = sphi %s10038_s26, %s15559_s26   ;;  %s9902_s25 = sphi %s10036_s25, %s15558_s25  }
  0x1a   : > { %14824 = sst [smem:[#allocation28_spill]] %s9918_s29  ;;  %p7837_p0 = scmp.ge.s32.totalorder %s9938_s17, 1 }
  0x1b   : > { %14825 = sst [smem:[#allocation29_spill]] %s9922_s30  ;;  %p10090_p1 = scmp.eq.s32.totalorder %s14607_s18, 0 }
  0x1c   : > { %p364_p2 = scmp.lt.s32.totalorder %s9938_s17, 9  ;;  %s9940_s21 = smov [#allocation12]  }
  0x1d   : > { %s14826_s19 = scalar_select %p10090_p1, 1, 0 }
  0x1e   : > { %p10095_p3 = pnand %p7837_p0, %p364_p2  ;;  %s377_s22 = sshll.u32 %s9940_s21, 4  ;;  %s378_s22 = int_to_ptr.vmem [resolvable:$true] %s377_s22 }
  0x1f   : > { %s9941_s23 = smov [#allocation15]   ;;  %s9942_s13 = smov [#allocation18]  }
  0x20   : > { %s14827_s20 = scalar_select %p10095_p3, 1, 0 }
  0x21   : > { %p8729_p4 = pneg %p10095_p3  ;;  %s398_s24 = sshll.u32 %s9941_s23, 4  ;;  %s10107_s24 = int_to_ptr.vmem [resolvable:$true] %s398_s24 }
  0x22   : > { %14828 = sst [smem:[#allocation30_spill]] %s14827_s20  ;;  %s10109_s30 = sshll.u32 %s9942_s13, 4  ;;  %s437_s30 = int_to_ptr.vmem [resolvable:$true] %s10109_s30 }
  0x23   : > { %p10103_p5 = pnand %p8729_p4, %p10090_p1  ;;  %s14830_s1 = sld [smem:[#allocation168_spill]] }
  0x25   : > { %p10119_p7 = pneg %p10103_p5 }
  0x29   : > { %s9614_s21 = scalar_lea.hbm %s14830_s1, 16 }
  0x2a   : > { %p9615_p6 = scmp.ne.s32.totalorder %s14830_s1, %s9614_s21  ;;  %p9621_p10 = scmp.lt.u32.totalorder %s9614_s21, %s14830_s1 }
  0x2c   : > { %p9617_p8 = pnand %p10119_p7, %p9615_p6 }
  0x2e   : > { %p9618_p9 = pneg %p9617_p8 }
  0x30   : > { %p9623_p11 = pnand %p9621_p10, %p9618_p9 }
  0x32   : > { %9626 = shalt.err (!%p9623_p11)
}
  0x33   : > { %s9627_s10 = scalar_lea.vmem %s378_s22, 16  ;;  %s9634_s7 = scalar_lea.vmem %s378_s22, 32 }
  0x34   : > { %p9628_p12 = scmp.ne.s32.totalorder %s378_s22, %s9627_s10  ;;  %p9635_p2 = scmp.lt.s32.totalorder %s378_s22, %s378_s22 }
  0x35   : > { %p9636_p4 = scmp.lt.s32.totalorder %s9634_s7, %s9627_s10 }
  0x36   : > { %p9630_p13 = pnand %p9628_p12, %p10119_p7 }
  0x37   : > { %p9637_p3 = por %p9636_p4, %p9635_p2 }
  0x38   : > { %p9631_p0 = pneg %p9630_p13 }
  0x3a   : > { %p9638_p1 = pnand %p9637_p3, %p9631_p0 }
  0x3c   : > { %9641 = shalt.err (!%p9638_p1)
}
  0x3d   : > { %8732 = dma.hbm_to_vmem [thread:$0]  (!%p10103_p5), %s14830_s1, 16, %s378_s22, [#allocation13]  }
  0x3e   : > { %s14832_s3 = sld [smem:[#allocation170_spill]] }
  0x44   : > { %s9642_s13 = scalar_lea.hbm %s14832_s3, 3072 }
  0x45   : > { %p9643_p6 = scmp.ne.s32.totalorder %s14832_s3, %s9642_s13  ;;  %p9649_p1 = scmp.lt.u32.totalorder %s9642_s13, %s14832_s3 }
  0x47   : > { %p9645_p8 = pnand %p9643_p6, %p10119_p7 }
  0x49   : > { %p9646_p9 = pneg %p9645_p8 }
  0x4b   : > { %p9651_p3 = pnand %p9649_p1, %p9646_p9 }
  0x4d   : > { %9654 = shalt.err (!%p9651_p3)
}
  0x4e   : > { %s9655_s22 = scalar_lea.vmem %s10107_s24, 3072  ;;  %p9663_p13 = scmp.lt.s32.totalorder %s10107_s24, %s10107_s24 }
  0x4f   : > { %p9656_p10 = scmp.ne.s32.totalorder %s10107_s24, %s9655_s22  ;;  %p9664_p0 = scmp.lt.s32.totalorder %s9655_s22, %s9655_s22 }
  0x51   : > { %p9658_p11 = pnand %p9656_p10, %p10119_p7  ;;  %p9665_p2 = por %p9664_p0, %p9663_p13 }
  0x53   : > { %p9659_p12 = pneg %p9658_p11 }
  0x55   : > { %p9666_p4 = pnand %p9665_p2, %p9659_p12 }
  0x57   : > { %9669 = shalt.err (!%p9666_p4)
}
  0x58   : > { %s9943_s4 = smov 192   ;;  %s9944_s29 = smov 12  }
  0x59   : > { %8738 = dma.hbm_to_vmem [thread:$0]  (!%p10103_p5), %s14832_s3, 3072, %s10107_s24, [#allocation16], %s9943_s4, %s9943_s4, %s9944_s29  }
  0x5a   : > { %s14833_s9 = sld [smem:[#allocation176_spill]] }
  0x60   : > { %s9670_s13 = scalar_lea.hbm %s14833_s9, 4096 }
  0x61   : > { %p9671_p6 = scmp.ne.s32.totalorder %s14833_s9, %s9670_s13  ;;  %p9677_p1 = scmp.lt.u32.totalorder %s9670_s13, %s14833_s9 }
  0x63   : > { %p9673_p8 = pnand %p9671_p6, %p10119_p7 }
  0x65   : > { %p9674_p9 = pneg %p9673_p8 }
  0x67   : > { %p9679_p3 = pnand %p9677_p1, %p9674_p9 }
  0x69   : > { %9682 = shalt.err (!%p9679_p3)
}
  0x6a   : > { %s9683_s8 = scalar_lea.vmem %s437_s30, 4096  ;;  %p9691_p13 = scmp.lt.s32.totalorder %s437_s30, %s437_s30 }
  0x6b   : > { %p9684_p10 = scmp.ne.s32.totalorder %s437_s30, %s9683_s8  ;;  %p9692_p0 = scmp.lt.s32.totalorder %s9683_s8, %s9683_s8 }
  0x6d   : > { %p9686_p11 = pnand %p9684_p10, %p10119_p7  ;;  %p9693_p2 = por %p9692_p0, %p9691_p13 }
  0x6f   : > { %p9687_p12 = pneg %p9686_p11 }
  0x71   : > { %p9694_p4 = pnand %p9693_p2, %p9687_p12 }
  0x73   : > { %9697 = shalt.err (!%p9694_p4)
}
  0x74   : > { %s9945_s24 = smov 256   ;;  %s9946_s4 = smov 16  }
  0x75   : > { %8744 = dma.hbm_to_vmem [thread:$0]  (!%p10103_p5), %s14833_s9, 4096, %s437_s30, [#allocation19], %s9945_s24, %s9945_s24, %s9946_s4  }
  0x76   : > { %s9947_s12 = smov [#allocation14]   ;;  %s9948_s21 = smov [#allocation17]  }
  0x77   : > { %s388_s6 = sshll.u32 %s9947_s12, 4  ;;  %s414_s13 = sshll.u32 %s9948_s21, 4  ;;  %s389_s6 = int_to_ptr.vmem [resolvable:$true] %s388_s6  ;;  %s415_s13 = int_to_ptr.vmem [resolvable:$true] %s414_s13 }
  0x78   : > { %s14834_s2 = sld [smem:[#allocation169_spill]] }
  0x7e   : > { %s9698_s22 = scalar_lea.hbm %s14834_s2, 16 }
  0x7f   : > { %p9699_p6 = scmp.ne.s32.totalorder %s14834_s2, %s9698_s22  ;;  %p9705_p1 = scmp.lt.u32.totalorder %s9698_s22, %s14834_s2 }
  0x81   : > { %p9701_p8 = pnand %p9699_p6, %p10119_p7 }
  0x83   : > { %p9702_p9 = pneg %p9701_p8 }
  0x85   : > { %p9707_p3 = pnand %p9705_p1, %p9702_p9 }
  0x87   : > { %9710 = shalt.err (!%p9707_p3)
}
  0x88   : > { %s9711_s30 = scalar_lea.vmem %s389_s6, 16  ;;  %s9718_s24 = scalar_lea.vmem %s389_s6, 32 }
  0x89   : > { %p9712_p10 = scmp.ne.s32.totalorder %s389_s6, %s9711_s30  ;;  %p9719_p13 = scmp.lt.s32.totalorder %s389_s6, %s389_s6 }
  0x8a   : > { %p9720_p0 = scmp.lt.s32.totalorder %s9718_s24, %s9711_s30 }
  0x8b   : > { %p9714_p11 = pnand %p9712_p10, %p10119_p7 }
  0x8c   : > { %p9721_p2 = por %p9720_p0, %p9719_p13 }
  0x8d   : > { %p9715_p12 = pneg %p9714_p11 }
  0x8f   : > { %p9722_p4 = pnand %p9721_p2, %p9715_p12 }
  0x91   : > { %9725 = shalt.err (!%p9722_p4)
}
  0x92   : > { %8735 = dma.hbm_to_vmem [thread:$0]  (!%p10103_p5), %s14834_s2, 16, %s389_s6, [#allocation13]  }
  0x93   : > { %s14835_s5 = sld [smem:[#allocation172_spill]] }
  0x99   : > { %s9726_s1 = scalar_lea.hbm %s14835_s5, 1024 }
  0x9a   : > { %p9727_p6 = scmp.ne.s32.totalorder %s14835_s5, %s9726_s1  ;;  %p9733_p1 = scmp.lt.u32.totalorder %s9726_s1, %s14835_s5 }
  0x9c   : > { %p9729_p8 = pnand %p9727_p6, %p10119_p7 }
  0x9e   : > { %p9730_p9 = pneg %p9729_p8 }
  0xa0   : > { %p9735_p3 = pnand %p9733_p1, %p9730_p9 }
  0xa2   : > { %9738 = shalt.err (!%p9735_p3)
}
  0xa3   : > { %s9739_s7 = scalar_lea.vmem %s415_s13, 1024  ;;  %p9747_p13 = scmp.lt.s32.totalorder %s415_s13, %s415_s13 }
  0xa4   : > { %p9740_p10 = scmp.ne.s32.totalorder %s415_s13, %s9739_s7  ;;  %p9748_p0 = scmp.lt.s32.totalorder %s9739_s7, %s9739_s7 }
  0xa6   : > { %p9742_p11 = pnand %p9740_p10, %p10119_p7  ;;  %p9749_p2 = por %p9748_p0, %p9747_p13 }
  0xa8   : > { %p9743_p12 = pneg %p9742_p11 }
  0xaa   : > { %p9750_p4 = pnand %p9749_p2, %p9743_p12 }
  0xac   : > { %9753 = shalt.err (!%p9750_p4)
}
  0xad   : > { %s9949_s6 = smov 64   ;;  %s9950_s22 = smov 4  }
  0xae   : > { %8741 = dma.hbm_to_vmem [thread:$0]  (!%p10103_p5), %s14835_s5, 1024, %s415_s13, [#allocation16], %s9949_s6, %s9949_s6, %s9950_s22  }
  0xaf   : > { %s9951_s24 = smov [#allocation20]   ;;  %s14836_s11 = sld [smem:[#allocation178_spill]] }
  0xb0   : > { %s452_s3 = sshll.u32 %s9951_s24, 4  ;;  %s453_s3 = int_to_ptr.vmem [resolvable:$true] %s452_s3 }
  0xb5   : > { %s9754_s20 = scalar_lea.hbm %s14836_s11, 4096 }
  0xb6   : > { %p9755_p6 = scmp.ne.s32.totalorder %s14836_s11, %s9754_s20  ;;  %p9761_p1 = scmp.lt.u32.totalorder %s9754_s20, %s14836_s11 }
  0xb8   : > { %p9757_p8 = pnand %p9755_p6, %p10119_p7 }
  0xba   : > { %p9758_p9 = pneg %p9757_p8 }
  0xbc   : > { %p9763_p3 = pnand %p9761_p1, %p9758_p9 }
  0xbe   : > { %9766 = shalt.err (!%p9763_p3)
}
  0xbf   : > { %s9767_s13 = scalar_lea.vmem %s453_s3, 4096  ;;  %p9775_p13 = scmp.lt.s32.totalorder %s453_s3, %s453_s3 }
  0xc0   : > { %p9768_p10 = scmp.ne.s32.totalorder %s453_s3, %s9767_s13  ;;  %p9776_p0 = scmp.lt.s32.totalorder %s9767_s13, %s9767_s13 }
  0xc2   : > { %p9770_p11 = pnand %p9768_p10, %p10119_p7  ;;  %p9777_p2 = por %p9776_p0, %p9775_p13 }
  0xc4   : > { %p9771_p12 = pneg %p9770_p11 }
  0xc6   : > { %p9778_p4 = pnand %p9777_p2, %p9771_p12 }
  0xc8   : > { %9781 = shalt.err (!%p9778_p4)
}
  0xc9   : > { %8747 = dma.hbm_to_vmem [thread:$0]  (!%p10103_p5), %s14836_s11, 4096, %s453_s3, [#allocation19], %s9949_s6, %s9949_s6, %s9950_s22  }
  0xca   : > { %s7836_s23 = sadd.s32 4294967294, %s9938_s17   ;;  %s44_s18 = sadd.s32 1, %s9926_s14 }
  0xcb   : > { %p45_p7 = scmp.ge.s32.totalorder %s44_s18, 2  ;;  %s47_s8 = sadd.s32 1, %s9930_s15 }
  0xcc   : > { %s51_s30 = sadd.s32 1, %s9934_s16  ;;  %s60_s24 = sadd.s32 1, %s9910_s27 }
  0xcd   : > { %s15568_s18 = smov (%p45_p7, %s44_s18), 0  ;;  %s15570_s8 = smov (!%p45_p7, %s47_s8), %s9930_s15 }
  0xce   : > { %p67_p6 = scmp.ne.s32.totalorder %s9910_s27, %s9906_s26  ;;  %p68_p8 = scmp.eq.s32.totalorder %s9938_s17, 0 }
  0xcf   : > { %p49_p9 = scmp.ge.s32.totalorder %s15570_s8, 2  ;;  %p73_p1 = scmp.ne.s32.totalorder %s9906_s26, %s9902_s25 }
  0xd0   : > { %p10244_p5 = por %p68_p8, %p67_p6  ;;  %s14838_s22 = sadd.s32 4294967295, %s9938_s17  }
  0xd1   : > { %p351_p3 = scmp.eq.s32.totalorder %s14838_s22, 7  ;;  %s15572_s8 = smov (%p49_p9, %s15570_s8), 0 }
  0xd2   : > { %14839 = sst [smem:[#allocation31_spill]] %s15572_s8  ;;  %s15574_s30 = smov (!%p49_p9, %s51_s30), %s9934_s16 }
  0xd3   : > { %s56_s3 = ssub.s32 %s9930_s15, %s15572_s8  ;;  %p14840_p10 = scmp.ne.s32.totalorder %s14826_s19, 0 }
  0xd4   : > { %p53_p12 = scmp.ge.s32.totalorder %s15574_s30, 2  ;;  %p10261_p13 = por %p351_p3, %p67_p6 }
  0xd5   : > { %p10257_p11 = por %p14840_p10, %p73_p1  ;;  %p357_p0 = scmp.eq.s32.totalorder %s7836_s23, 7 }
  0xd6   : > { %s14842_s28 = scalar_select %p10261_p13, 1, 0 }
  0xd7   : > { %p8762_p2 = scmp.lt.s32.totalorder %s9938_s17, 8  ;;  %s15576_s30 = smov (%p53_p12, %s15574_s30), 0 }
  0xd8   : > { %p10268_p4 = por %p357_p0, %p73_p1  ;;  %s469_s1 = sand.u32 1, %s9910_s27  }
  0xd9   : > { %s55_s29 = ssub.s32 %s9934_s16, %s15576_s30  ;;  %s7845_s21 = sshll.u32 %s469_s1, 7 }
  0xda   : > { %s14843_s20 = scalar_select %p10268_p4, 1, 0 }
  0xdb   : > { %s57_s12 = sor.u32 %s56_s3, %s55_s29  ;;  %s7846_s13 = sshll.u32 %s9930_s15, 4 }
  0xdc   : > { %p58_p7 = scmp.eq.s32.totalorder %s57_s12, 0  ;;  %s7847_s10 = sshll.u32 %s9934_s16, 5 }
  0xdd   : > { %s479_s23 = sadd.s32 %s7847_s10, %s7846_s13  ;;  %s473_s22 = scalar_lea.vmem [#allocation9], %s7845_s21 }
  0xde   : > { %s10278_s7 = scalar_select %p58_p7, %s9910_s27, %s60_s24  }
  0xdf   : > { %s482_s2 = sshll.u32 %s473_s22, 4  ;;  %s7848_s5 = sshll.u32 %s479_s23, 7  ;;  %s10280_s2 = int_to_ptr.vmem [resolvable:$true] %s482_s2 }
  0xe0   : > { %s10285_s8 = scalar_lea.hbm %s14593_s0, %s7848_s5  ;;  %p10291_p6 = pnand %p8762_p2, %p10244_p5 }
  0xe1   : > { %s10295_s3 = scalar_lea.sflag [#allocation10], %s469_s1  ;;  %s9782_s29 = scalar_lea.hbm %s10285_s8, 2048 }
  0xe2   : > { %p9783_p8 = scmp.ne.s32.totalorder %s10285_s8, %s9782_s29  ;;  %p9784_p9 = pneg %p10291_p6 }
  0xe3   : > { %s9787_s11 = scalar_lea.hbm %s14593_s0, 8192  ;;  %p9788_p5 = scmp.lt.u32.totalorder %s10285_s8, %s14593_s0 }
  0xe4   : > { %p9785_p1 = pnand %p9784_p9, %p9783_p8  ;;  %p9789_p10 = scmp.lt.u32.totalorder %s9787_s11, %s9782_s29 }
  0xe5   : > { %p9791_p0 = scmp.lt.u32.totalorder %s9782_s29, %s10285_s8 }
  0xe6   : > { %p9786_p3 = pneg %p9785_p1  ;;  %p9790_p12 = por %p9789_p10, %p9788_p5 }
  0xe8   : > { %p9792_p2 = por %p9791_p0, %p9790_p12 }
  0xea   : > { %p9793_p7 = pnand %p9792_p2, %p9786_p3 }
  0xec   : > { %9796 = shalt.err (!%p9793_p7)
}
  0xed   : > { %s9797_s1 = scalar_lea.vmem %s10280_s2, 2048  ;;  %s9952_s21 = smov [#allocation9]  }
  0xee   : > { %p9798_p8 = scmp.ne.s32.totalorder %s10280_s2, %s9797_s1  ;;  %s9802_s13 = sshll.u32 %s9952_s21, 4  ;;  %s9803_s13 = int_to_ptr.vmem [resolvable:$false] %s9802_s13 }
  0xef   : > { %s9804_s10 = scalar_lea.vmem %s9803_s13, 4096  ;;  %p9805_p13 = scmp.lt.s32.totalorder %s10280_s2, %s9803_s13 }
  0xf0   : > { %p9800_p1 = pnand %p9798_p8, %p9784_p9  ;;  %p9806_p5 = scmp.lt.s32.totalorder %s9804_s10, %s9797_s1 }
  0xf2   : > { %p9801_p4 = pneg %p9800_p1  ;;  %p9807_p10 = por %p9806_p5, %p9805_p13 }
  0xf4   : > { %p9808_p12 = pnand %p9807_p10, %p9801_p4 }
  0xf6   : > { %9811 = shalt.err (!%p9808_p12)
}
  0xf7   : > { %s9953_s23 = smov 128   ;;  %s9954_s22 = smov 8  }
  0xf8   : > { %8751 = dma.hbm_to_vmem [thread:$0]  (!%p10291_p6), %s10285_s8, 2048, %s10280_s2, %s10295_s3, %s9953_s23, %s9953_s23, %s9954_s22  }
  0xf9   : > { %s14845_s29 = sld [smem:[#allocation30_spill]] }
  0xff   : > { %p14846_p9 = scmp.ne.s32.totalorder %s14845_s29, 0 }
 0x100   : > { %s10326_s5 = sand.u32 (!%p14846_p9), 1, %s9906_s26  }
 0x101   : > { %494 = sbr.rel (%p14846_p9) target bundleno = 5328 (0x14d0), region = 72  ;;  %s7850_s9 = sshll.u32 (!%p14846_p9), %s10326_s5, 7 }
 0x102   : > { %s497_s11 = scalar_lea.sflag (!%p14846_p9), [#allocation10], %s10326_s5  ;;  %s10330_s6 = scalar_lea.vmem (!%p14846_p9), [#allocation9], %s7850_s9 }
 0x108   : > { %9881 = dma.done.wait (%p10257_p11), %s497_s11, 2048  }
 0x109   : > { %9883 = vsyncadd (%p10257_p11), %s497_s11, 4294965248  ;;  %p14847_p13 = scmp.ne.s32.totalorder %s14826_s19, 0 }
 0x10b   : > { %9885 = dma.done.wait (%p14847_p13), [#allocation13], 32  }
 0x10c   : > { %9887 = vsyncadd (%p14847_p13), [#allocation13], 4294967264 }
 0x10d   : > { %9889 = dma.done.wait (%p14847_p13), [#allocation16], 4096  }
 0x10e   : > { %9891 = vsyncadd (%p14847_p13), [#allocation16], 4294963200 }
 0x10f   : > { %9893 = dma.done.wait (%p14847_p13), [#allocation19], 8192  }
 0x110   : > { %9895 = vsyncadd (%p14847_p13), [#allocation19], 4294959104  ;;  %s10348_s2 = scalar_lea.vmem [#allocation21], %s7850_s9  ;;  %s14848_s8 = sld [smem:[#allocation27_spill]] }
 0x116   : > { %p7858_p11 = scmp.ne.s32.totalorder %s14848_s8, 0 }
 0x117   : > { %v574_v0 = vld [vmem:[%s10330_s6] sm:$0xff] (!%p7858_p11)  ;;  %v575_v2 = vld [vmem:[%s10330_s6 + $0x8] sm:$0xff] (!%p7858_p11)  ;;  %v576_v4 = vld [vmem:[%s10330_s6 + $0x10] sm:$0xff] (!%p7858_p11)  ;;  %vm1029_vm0 = vcmask (!%p7858_p11), 7168   ;;  %s14849_s24 = sld [smem:[#allocation171_spill]] (!%p7858_p11) }
 0x118   : > { %573 = sbr.rel (%p7858_p11) target bundleno = 847 (0x34f), region = 104  ;;  %v582_v1 = vld [vmem:[%s10330_s6 + $0x40] sm:$0xff] (!%p7858_p11)  ;;  %592 = vadd.xlane.f32.xlu0 (!%p7858_p11), %v574_v0  ;;  %v583_v3 = vld [vmem:[%s10330_s6 + $0x48] sm:$0xff] (!%p7858_p11)  ;;  %v577_v5 = vld [vmem:[%s10330_s6 + $0x18] sm:$0xff] (!%p7858_p11) }
 0x119   : > { %608 = vadd.xlane.f32.xlu1 (!%p7858_p11), %v582_v1  ;;  %v584_v6 = vld [vmem:[%s10330_s6 + $0x50] sm:$0xff] (!%p7858_p11)  ;;  %v585_v7 = vld [vmem:[%s10330_s6 + $0x58] sm:$0xff] (!%p7858_p11)  ;;  %v578_v8 = vld [vmem:[%s10330_s6 + $0x20] sm:$0xff] (!%p7858_p11) }
 0x11a   : > { %v579_v9 = vld [vmem:[%s10330_s6 + $0x28] sm:$0xff] (!%p7858_p11)  ;;  %v10362_v10 = vld [vmem:[%s10330_s6 + $0x60] sm:$0xff] (!%p7858_p11)  ;;  %v10370_v12 = vld [vmem:[%s10330_s6 + $0x30] sm:$0xff] (!%p7858_p11) }
 0x11b   : > { %v10365_v11 = vld [vmem:[%s10330_s6 + $0x68] sm:$0xff] (!%p7858_p11)  ;;  %v10373_v13 = vld [vmem:[%s10330_s6 + $0x38] sm:$0xff] (!%p7858_p11)  ;;  %v10378_v14 = vld [vmem:[%s10330_s6 + $0x70] sm:$0xff] (!%p7858_p11) }
 0x11c   : > { %594 = vadd.xlane.f32.xlu0 (!%p7858_p11), %v575_v2  ;;  %v10381_v15 = vld [vmem:[%s10330_s6 + $0x78] sm:$0xff] (!%p7858_p11)  ;;  %v8874_v59 = vld [vmem:[#allocation15] ss:$12 sps:$4 sm:$0xff] (!%p7858_p11)  }
 0x11d   : > { %610 = vadd.xlane.f32.xlu1 (!%p7858_p11), %v583_v3  ;;  %8301 = vmatprep.subr.bf16.mxu0 (!%p7858_p11), %v8874_v59 }
 0x11e   : > { %8621 = vmatprep.subr.bf16.mxu1 (!%p7858_p11), %v8874_v59  ;;  %8302 = vmatpush3.bf16.msra.mxu0 (!%p7858_p11), %v8874_v59 }
 0x11f   : > { %8629 = vmatpush3.bf16.msra.mxu1 %v8874_v59 }
 0x120   : > { %596 = vadd.xlane.f32.xlu0 %v576_v4 }
 0x121   : > { %598 = vadd.xlane.f32.xlu1 %v577_v5 }
 0x124   : > { %612 = vadd.xlane.f32.xlu0 %v584_v6 }
 0x125   : > { %614 = vadd.xlane.f32.xlu1 %v585_v7 }
 0x128   : > { %600 = vadd.xlane.f32.xlu0 %v578_v8 }
 0x129   : > { %602 = vadd.xlane.f32.xlu1 %v579_v9 }
 0x12c   : > { %616 = vadd.xlane.f32.xlu0 %v10362_v10 }
 0x12d   : > { %618 = vadd.xlane.f32.xlu1 %v10365_v11 }
 0x130   : > { %604 = vadd.xlane.f32.xlu0 %v10370_v12 }
 0x131   : > { %606 = vadd.xlane.f32.xlu1 %v10373_v13 }
 0x134   : > { %620 = vadd.xlane.f32.xlu0 %v10378_v14 }
 0x135   : > { %622 = vadd.xlane.f32.xlu1 %v10381_v15 }
 0x1a5   : > { %v593_v16 = vpop.xlane.xlu0 %592 }
 0x1a6   : > { %v609_v17 = vpop.xlane.xlu1 %608  ;;  %v625_v18 = vmul.f32 0.0078125, %v593_v16 }
 0x1a7   : > { %v633_v19 = vmul.f32 0.0078125, %v609_v17 }
 0x1a8   : > { %v10385_v20 = vsub.f32 %v574_v0, %v625_v18  ;;  %v8876_v18 = vld [vmem:[#allocation15 + $0x30] ss:$12 sps:$4 sm:$0xff]  }
 0x1a9   : > { %v10387_v21 = vsub.f32 %v582_v1, %v633_v19  ;;  %v595_v22 = vpop.xlane.xlu0 %594 }
 0x1aa   : > { %v611_v23 = vpop.xlane.xlu1 %610  ;;  %v626_v24 = vmul.f32 0.0078125, %v595_v22  ;;  %v657_v25 = vmul.f32 %v10385_v20, %v10385_v20  ;;  %v8877_v22 = vld [vmem:[#allocation15 + $0x48] ss:$12 sps:$4 sm:$0xff]  }
 0x1ab   : > { %v634_v26 = vmul.f32 0.0078125, %v611_v23  ;;  %v665_v29 = vmul.f32 %v10387_v21, %v10387_v21  ;;  %v8879_v23 = vld [vmem:[#allocation15 + $0x78] ss:$12 sps:$4 sm:$0xff]  }
 0x1ac   : > { %v10391_v27 = vsub.f32 %v575_v2, %v626_v24  ;;  %673 = vadd.xlane.f32.xlu0 %v657_v25  ;;  %v8880_v24 = vld [vmem:[#allocation15 + $0x90] ss:$12 sps:$4 sm:$0xff]   ;;  %v8881_v25 = vld [vmem:[#allocation15 + $0xa8] ss:$12 sps:$4 sm:$0xff]  }
 0x1ad   : > { %v10393_v28 = vsub.f32 %v583_v3, %v634_v26  ;;  %v597_v30 = vpop.xlane.xlu0 %596 }
 0x1ae   : > { %v599_v31 = vpop.xlane.xlu1 %598  ;;  %v627_v32 = vmul.f32 0.0078125, %v597_v30  ;;  %v658_v33 = vmul.f32 %v10391_v27, %v10391_v27 }
 0x1af   : > { %v628_v34 = vmul.f32 0.0078125, %v599_v31  ;;  %v666_v37 = vmul.f32 %v10393_v28, %v10393_v28 }
 0x1b0   : > { %v10399_v35 = vsub.f32 %v576_v4, %v627_v32  ;;  %689 = vadd.xlane.f32.xlu0 %v665_v29  ;;  %675 = vadd.xlane.f32.xlu1 %v658_v33 }
 0x1b1   : > { %v10401_v36 = vsub.f32 %v577_v5, %v628_v34  ;;  %v613_v38 = vpop.xlane.xlu0 %612 }
 0x1b2   : > { %v615_v39 = vpop.xlane.xlu1 %614  ;;  %v635_v40 = vmul.f32 0.0078125, %v613_v38  ;;  %v659_v41 = vmul.f32 %v10399_v35, %v10399_v35 }
 0x1b3   : > { %v636_v42 = vmul.f32 0.0078125, %v615_v39  ;;  %v660_v45 = vmul.f32 %v10401_v36, %v10401_v36 }
 0x1b4   : > { %v10407_v43 = vsub.f32 %v584_v6, %v635_v40  ;;  %691 = vadd.xlane.f32.xlu1 %v666_v37  ;;  %677 = vadd.xlane.f32.xlu0 %v659_v41 }
 0x1b5   : > { %v10409_v44 = vsub.f32 %v585_v7, %v636_v42  ;;  %v601_v46 = vpop.xlane.xlu0 %600  ;;  %v8875_v7 = vld [vmem:[#allocation15 + $0x18] ss:$12 sps:$4 sm:$0xff]  }
 0x1b6   : > { %v603_v47 = vpop.xlane.xlu1 %602  ;;  %v629_v48 = vmul.f32 0.0078125, %v601_v46  ;;  %v667_v49 = vmul.f32 %v10407_v43, %v10407_v43  ;;  %8303 = vmatprep.subr.bf16.mxu0 %v8875_v7  ;;  %8622 = vmatprep.subr.bf16.mxu1 %v8875_v7 }
 0x1b7   : > { %v630_v50 = vmul.f32 0.0078125, %v603_v47  ;;  %v668_v53 = vmul.f32 %v10409_v44, %v10409_v44  ;;  %8304 = vmatpush3.bf16.msra.mxu0 %v8875_v7  ;;  %8630 = vmatpush3.bf16.msra.mxu1 %v8875_v7 }
 0x1b8   : > { %v10415_v51 = vsub.f32 %v578_v8, %v629_v48  ;;  %679 = vadd.xlane.f32.xlu1 %v660_v45  ;;  %693 = vadd.xlane.f32.xlu0 %v667_v49 }
 0x1b9   : > { %v10417_v52 = vsub.f32 %v579_v9, %v630_v50  ;;  %v617_v54 = vpop.xlane.xlu0 %616  ;;  %8305 = vmatprep.subr.bf16.mxu0 %v8876_v18  ;;  %8623 = vmatprep.subr.bf16.mxu1 %v8876_v18 }
 0x1ba   : > { %v619_v55 = vpop.xlane.xlu1 %618  ;;  %v637_v56 = vmul.f32 0.0078125, %v617_v54  ;;  %v661_v57 = vmul.f32 %v10415_v51, %v10415_v51 }
 0x1bb   : > { %v638_v58 = vmul.f32 0.0078125, %v619_v55  ;;  %v662_v62 = vmul.f32 %v10417_v52, %v10417_v52  ;;  %8306 = vmatpush3.bf16.msra.mxu0 %v8876_v18  ;;  %8631 = vmatpush3.bf16.msra.mxu1 %v8876_v18 }
 0x1bc   : > { %v10424_v60 = vsub.f32 %v10362_v10, %v637_v56  ;;  %695 = vadd.xlane.f32.xlu1 %v668_v53  ;;  %681 = vadd.xlane.f32.xlu0 %v661_v57 }
 0x1bd   : > { %v10427_v61 = vsub.f32 %v10365_v11, %v638_v58  ;;  %v605_v63 = vpop.xlane.xlu0 %604  ;;  %8307 = vmatprep.subr.bf16.mxu0 %v8877_v22  ;;  %8624 = vmatprep.subr.bf16.mxu1 %v8877_v22 }
 0x1be   : > { %v607_v0 = vpop.xlane.xlu1 %606  ;;  %v631_v1 = vmul.f32 0.0078125, %v605_v63  ;;  %v669_v2 = vmul.f32 %v10424_v60, %v10424_v60  ;;  %v10456_v63 = vld [vmem:[#allocation12] ss:$0 sm:$0xff] }
 0x1bf   : > { %v632_v3 = vmul.f32 0.0078125, %v607_v0  ;;  %v670_v6 = vmul.f32 %v10427_v61, %v10427_v61  ;;  %8308 = vmatpush3.bf16.msra.mxu0 %v8877_v22  ;;  %8632 = vmatpush3.bf16.msra.mxu1 %v8877_v22 }
 0x1c0   : > { %v10434_v4 = vsub.f32 %v10370_v12, %v631_v1  ;;  %683 = vadd.xlane.f32.xlu1 %v662_v62  ;;  %697 = vadd.xlane.f32.xlu0 %v669_v2 }
 0x1c1   : > { %v10437_v5 = vsub.f32 %v10373_v13, %v632_v3  ;;  %v621_v8 = vpop.xlane.xlu0 %620 }
 0x1c2   : > { %v623_v9 = vpop.xlane.xlu1 %622  ;;  %v639_v10 = vmul.f32 0.0078125, %v621_v8  ;;  %v663_v11 = vmul.f32 %v10434_v4, %v10434_v4 }
 0x1c3   : > { %v640_v16 = vmul.f32 0.0078125, %v623_v9  ;;  %v664_v17 = vmul.f32 %v10437_v5, %v10437_v5 }
 0x1c4   : > { %v10444_v12 = vsub.f32 %v10378_v14, %v639_v10  ;;  %699 = vadd.xlane.f32.xlu1 %v670_v6  ;;  %685 = vadd.xlane.f32.xlu0 %v663_v11 }
 0x1c5   : > { %v10447_v13 = vsub.f32 %v10381_v15, %v640_v16  ;;  %v8878_v15 = vld [vmem:[#allocation15 + $0x60] ss:$12 sps:$4 sm:$0xff]  }
 0x1c6   : > { %v671_v19 = vmul.f32 %v10444_v12, %v10444_v12  ;;  %8309 = vmatprep.subr.bf16.mxu0 %v8878_v15  ;;  %8625 = vmatprep.subr.bf16.mxu1 %v8878_v15 }
 0x1c7   : > { %v672_v14 = vmul.f32 %v10447_v13, %v10447_v13  ;;  %8310 = vmatpush3.bf16.msra.mxu0 %v8878_v15  ;;  %8633 = vmatpush3.bf16.msra.mxu1 %v8878_v15 }
 0x1c8   : > { %687 = vadd.xlane.f32.xlu1 %v664_v17  ;;  %701 = vadd.xlane.f32.xlu0 %v671_v19 }
 0x1c9   : > { %8311 = vmatprep.subr.bf16.mxu0 %v8879_v23  ;;  %8626 = vmatprep.subr.bf16.mxu1 %v8879_v23 }
 0x1cb   : > { %8312 = vmatpush3.bf16.msra.mxu0 %v8879_v23  ;;  %8634 = vmatpush3.bf16.msra.mxu1 %v8879_v23 }
 0x1cc   : > { %703 = vadd.xlane.f32.xlu1 %v672_v14  ;;  %8313 = vmatprep.subr.bf16.mxu0 %v8880_v24 }
 0x1cd   : > { %8627 = vmatprep.subr.bf16.mxu1 %v8880_v24 }
 0x1cf   : > { %8314 = vmatpush3.bf16.msra.mxu0 %v8880_v24  ;;  %8635 = vmatpush3.bf16.msra.mxu1 %v8880_v24 }
 0x1d0   : > { %8315 = vmatprep.subr.bf16.mxu0 %v8881_v25  ;;  %8628 = vmatprep.subr.bf16.mxu1 %v8881_v25 }
 0x1d3   : > { %8316 = vmatpush3.bf16.msra.mxu0 %v8881_v25  ;;  %8636 = vmatpush3.bf16.msra.mxu1 %v8881_v25 }
 0x239   : > { %v674_v26 = vpop.xlane.xlu0 %673 }
 0x23a   : > { %v705_v29 = vmul.f32 0.0078125, %v674_v26 }
 0x23c   : > { %v721_v30 = vadd.f32 1e-05, %v705_v29 }
 0x23d   : > { %v676_v31 = vpop.xlane.xlu1 %675  ;;  %v690_v32 = vpop.xlane.xlu0 %689 }
 0x23e   : > { %8882 = vrsqrt.f32 %v721_v30  ;;  %v706_v33 = vmul.f32 0.0078125, %v676_v31  ;;  %v713_v34 = vmul.f32 0.0078125, %v690_v32 }
 0x240   : > { %v722_v37 = vadd.f32 1e-05, %v706_v33  ;;  %v729_v38 = vadd.f32 1e-05, %v713_v34 }
 0x241   : > { %v692_v39 = vpop.xlane.xlu1 %691  ;;  %v678_v40 = vpop.xlane.xlu0 %677 }
 0x242   : > { %8884 = vrsqrt.f32 %v722_v37  ;;  %v714_v41 = vmul.f32 0.0078125, %v692_v39  ;;  %v707_v42 = vmul.f32 0.0078125, %v678_v40 }
 0x243   : > { %8886 = vrsqrt.f32 %v729_v38 }
 0x244   : > { %v730_v45 = vadd.f32 1e-05, %v714_v41  ;;  %v723_v46 = vadd.f32 1e-05, %v707_v42 }
 0x245   : > { %v680_v47 = vpop.xlane.xlu1 %679  ;;  %v694_v48 = vpop.xlane.xlu0 %693 }
 0x246   : > { %8888 = vrsqrt.f32 %v730_v45  ;;  %v708_v49 = vmul.f32 0.0078125, %v680_v47  ;;  %v715_v50 = vmul.f32 0.0078125, %v694_v48 }
 0x247   : > { %8890 = vrsqrt.f32 %v723_v46 }
 0x248   : > { %v8883_v53 = vpop.eup %8882  ;;  %v724_v54 = vadd.f32 1e-05, %v708_v49  ;;  %v731_v55 = vadd.f32 1e-05, %v715_v50 }
 0x249   : > { %v696_v56 = vpop.xlane.xlu1 %695  ;;  %v682_v57 = vpop.xlane.xlu0 %681  ;;  %v753_v58 = vmul.f32 %v8883_v53, %v10385_v20  ;;  %v10460_v20 = vld [vmem:[#allocation14] ss:$0 sm:$0xff] }
 0x24a   : > { %8892 = vrsqrt.f32 %v724_v54  ;;  %v716_v59 = vmul.f32 0.0078125, %v696_v56  ;;  %v709_v62 = vmul.f32 0.0078125, %v682_v57 }
 0x24b   : > { %8894 = vrsqrt.f32 %v731_v55  ;;  %v775_v9 = vmul.f32 %v10456_v63, %v753_v58 }
 0x24c   : > { %v8885_v0 = vpop.eup %8884  ;;  %v732_v1 = vadd.f32 1e-05, %v716_v59  ;;  %v725_v2 = vadd.f32 1e-05, %v709_v62 }
 0x24d   : > { %v8887_v3 = vpop.eup %8886  ;;  %v684_v6 = vpop.xlane.xlu1 %683  ;;  %v754_v8 = vmul.f32 %v8885_v0, %v10391_v27  ;;  %v797_v27 = vadd.f32 %v10460_v20, %v775_v9 }
 0x24e   : > { %v698_v7 = vpop.xlane.xlu0 %697  ;;  %8896 = vrsqrt.f32 %v732_v1  ;;  %v710_v10 = vmul.f32 0.0078125, %v684_v6  ;;  %v761_v16 = vmul.f32 %v8887_v3, %v10387_v21 }
 0x24f   : > { %v717_v11 = vmul.f32 0.0078125, %v698_v7  ;;  %8898 = vrsqrt.f32 %v725_v2  ;;  %v776_v17 = vmul.f32 %v10456_v63, %v754_v8 }
 0x250   : > { %v8889_v18 = vpop.eup %8888  ;;  %v726_v19 = vadd.f32 1e-05, %v710_v10  ;;  %v783_v26 = vmul.f32 %v10456_v63, %v761_v16 }
 0x251   : > { %v733_v14 = vadd.f32 1e-05, %v717_v11  ;;  %v8891_v22 = vpop.eup %8890  ;;  %v700_v15 = vpop.xlane.xlu1 %699  ;;  %v798_v24 = vadd.f32 %v10460_v20, %v776_v17  ;;  %v762_v25 = vmul.f32 %v8889_v18, %v10393_v28 }
 0x252   : > { %v686_v23 = vpop.xlane.xlu0 %685  ;;  %8900 = vrsqrt.f32 %v726_v19  ;;  %v718_v29 = vmul.f32 0.0078125, %v700_v15  ;;  %v755_v32 = vmul.f32 %v8891_v22, %v10399_v35  ;;  %v805_v28 = vadd.f32 %v10460_v20, %v783_v26 }
 0x253   : > { %v711_v21 = vmul.f32 0.0078125, %v686_v23  ;;  %8902 = vrsqrt.f32 %v733_v14  ;;  %v813_v30 = vpack.c.bf16 %v798_v24, %v797_v27  ;;  %v784_v31 = vmul.f32 %v10456_v63, %v762_v25 }
 0x254   : > { %v8893_v33 = vpop.eup %8892  ;;  %v734_v34 = vadd.f32 1e-05, %v718_v29  ;;  %v777_v45 = vmul.f32 %v10456_v63, %v755_v32 }
 0x255   : > { %v727_v37 = vadd.f32 1e-05, %v711_v21  ;;  %v8895_v38 = vpop.eup %8894  ;;  %v688_v39 = vpop.xlane.xlu1 %687  ;;  %821 = vst [vmem:[#allocation2] sm:$0xff] %v813_v30  ;;  %8317 = vmatprep.mubr.bf16.mxu0 %v813_v30  ;;  %v806_v41 = vadd.f32 %v10460_v20, %v784_v31  ;;  %v756_v42 = vmul.f32 %v8893_v33, %v10401_v36 }
 0x256   : > { %v702_v40 = vpop.xlane.xlu0 %701  ;;  %8904 = vrsqrt.f32 %v734_v34  ;;  %v712_v46 = vmul.f32 0.0078125, %v688_v39  ;;  %v763_v35 = vmul.f32 %v8895_v38, %v10407_v43  ;;  %v799_v36 = vadd.f32 %v10460_v20, %v777_v45 }
 0x257   : > { %v719_v47 = vmul.f32 0.0078125, %v702_v40  ;;  %8906 = vrsqrt.f32 %v727_v37  ;;  %v817_v48 = vpack.c.bf16 %v806_v41, %v805_v28  ;;  %v778_v49 = vmul.f32 %v10456_v63, %v756_v42 }
 0x258   : > { %v8897_v50 = vpop.eup %8896  ;;  %v728_v53 = vadd.f32 1e-05, %v712_v46  ;;  %v785_v59 = vmul.f32 %v10456_v63, %v763_v35  ;;  %v9955_v40 = vmov -1e+30  }
 0x259   : > { %v735_v54 = vadd.f32 1e-05, %v719_v47  ;;  %v8899_v55 = vpop.eup %8898  ;;  %v704_v56 = vpop.xlane.xlu1 %703  ;;  %825 = vst [vmem:[#allocation2 + $0x20] sm:$0xff] %v817_v48  ;;  %8325 = vmatprep.mubr.bf16.mxu1 %v817_v48  ;;  %v800_v57 = vadd.f32 %v10460_v20, %v778_v49  ;;  %v764_v58 = vmul.f32 %v8897_v50, %v10409_v44  ;;  %1030 = vst.msk [vmem:[#allocation4] sm:$0xff] %vm1029_vm0, %v9955_v40 }
 0x25a   : > { %8908 = vrsqrt.f32 %v728_v53  ;;  %v720_v43 = vmul.f32 0.0078125, %v704_v56  ;;  %v757_v62 = vmul.f32 %v8899_v55, %v10415_v51  ;;  %v807_v7 = vadd.f32 %v10460_v20, %v785_v59  ;;  %1031 = vst.msk [vmem:[#allocation4 + $0x8] sm:$0xff] %vm1029_vm0, %v9955_v40  ;;  %1032 = vst.msk [vmem:[#allocation4 + $0x10] sm:$0xff] %vm1029_vm0, %v9955_v40 }
 0x25b   : > { %8910 = vrsqrt.f32 %v735_v54  ;;  %v814_v0 = vpack.c.bf16 %v800_v57, %v799_v36  ;;  %v786_v1 = vmul.f32 %v10456_v63, %v764_v58  ;;  %1033 = vst.msk [vmem:[#allocation4 + $0x18] sm:$0xff] %vm1029_vm0, %v9955_v40  ;;  %1034 = vst.msk [vmem:[#allocation4 + $0x20] sm:$0xff] %vm1029_vm0, %v9955_v40 }
 0x25c   : > { %v8901_v2 = vpop.eup %8900  ;;  %v736_v3 = vadd.f32 1e-05, %v720_v43  ;;  %v779_v9 = vmul.f32 %v10456_v63, %v757_v62  ;;  %1035 = vst.msk [vmem:[#allocation4 + $0x28] sm:$0xff] %vm1029_vm0, %v9955_v40  ;;  %1036 = vst.msk [vmem:[#allocation4 + $0x30] sm:$0xff] %vm1029_vm0, %v9955_v40 }
 0x25d   : > { %v8903_v6 = vpop.eup %8902  ;;  %822 = vst [vmem:[#allocation2 + $0x8] sm:$0xff] %v814_v0  ;;  %8318 = vmatmul.mubr.bf16.vlgmr.msra.gmra.mrb[0].mxu0 %v814_v0  ;;  %v808_v8 = vadd.f32 %v10460_v20, %v786_v1  ;;  %v758_v44 = vmul.f32 %v8901_v2, %v10417_v52  ;;  %1037 = vst.msk [vmem:[#allocation4 + $0x38] sm:$0xff] %vm1029_vm0, %v9955_v40 }
 0x25e   : > { %8912 = vrsqrt.f32 %v736_v3  ;;  %v765_v51 = vmul.f32 %v8903_v6, %v10424_v60  ;;  %v801_v18 = vadd.f32 %v10460_v20, %v779_v9  ;;  %1038 = vst.msk [vmem:[#allocation4 + $0x40] sm:$0xff] %vm1029_vm0, %v9955_v40  ;;  %1039 = vst.msk [vmem:[#allocation4 + $0x48] sm:$0xff] %vm1029_vm0, %v9955_v40 }
 0x25f   : > { %v818_v10 = vpack.c.bf16 %v808_v8, %v807_v7  ;;  %v780_v11 = vmul.f32 %v10456_v63, %v758_v44  ;;  %1040 = vst.msk [vmem:[#allocation4 + $0x50] sm:$0xff] %vm1029_vm0, %v9955_v40  ;;  %1041 = vst.msk [vmem:[#allocation4 + $0x58] sm:$0xff] %vm1029_vm0, %v9955_v40 }
 0x260   : > { %v8905_v16 = vpop.eup %8904  ;;  %v787_v52 = vmul.f32 %v10456_v63, %v765_v51  ;;  %1042 = vst.msk [vmem:[#allocation4 + $0x60] sm:$0xff] %vm1029_vm0, %v9955_v40  ;;  %1043 = vst.msk [vmem:[#allocation4 + $0x68] sm:$0xff] %vm1029_vm0, %v9955_v40 }
 0x261   : > { %v8907_v17 = vpop.eup %8906  ;;  %826 = vst [vmem:[#allocation2 + $0x28] sm:$0xff] %v818_v10  ;;  %8326 = vmatmul.mubr.bf16.vlgmr.msra.gmra.mrb[0].mxu1 %v818_v10  ;;  %v802_v19 = vadd.f32 %v10460_v20, %v780_v11  ;;  %v766_v14 = vmul.f32 %v8905_v16, %v10427_v61  ;;  %1044 = vst.msk [vmem:[#allocation4 + $0x70] sm:$0xff] %vm1029_vm0, %v9955_v40 }
 0x262   : > { %v759_v22 = vmul.f32 %v8907_v17, %v10434_v4  ;;  %v809_v24 = vadd.f32 %v10460_v20, %v787_v52  ;;  %1045 = vst.msk [vmem:[#allocation4 + $0x78] sm:$0xff] %vm1029_vm0, %v9955_v40  ;;  %1046 = vst.msk [vmem:[#allocation4 + $0x80] sm:$0xff] %vm1029_vm0, %v9955_v40 }
 0x263   : > { %v815_v15 = vpack.c.bf16 %v802_v19, %v801_v18  ;;  %v788_v60 = vmul.f32 %v10456_v63, %v766_v14  ;;  %1047 = vst.msk [vmem:[#allocation4 + $0x88] sm:$0xff] %vm1029_vm0, %v9955_v40  ;;  %1048 = vst.msk [vmem:[#allocation4 + $0x90] sm:$0xff] %vm1029_vm0, %v9955_v40 }
 0x264   : > { %v8909_v23 = vpop.eup %8908  ;;  %v781_v29 = vmul.f32 %v10456_v63, %v759_v22  ;;  %1049 = vst.msk [vmem:[#allocation4 + $0x98] sm:$0xff] %vm1029_vm0, %v9955_v40  ;;  %1050 = vst.msk [vmem:[#allocation4 + $0xa0] sm:$0xff] %vm1029_vm0, %v9955_v40 }
 0x265   : > { %v8911_v27 = vpop.eup %8910  ;;  %823 = vst [vmem:[#allocation2 + $0x10] sm:$0xff] %v815_v15  ;;  %8321 = vmatprep.mubr.bf16.mxu0 %v815_v15  ;;  %v810_v25 = vadd.f32 %v10460_v20, %v788_v60  ;;  %v760_v26 = vmul.f32 %v8909_v23, %v10437_v5  ;;  %1051 = vst.msk [vmem:[#allocation4 + $0xa8] sm:$0xff] %vm1029_vm0, %v9955_v40 }
 0x266   : > { %v767_v61 = vmul.f32 %v8911_v27, %v10444_v12  ;;  %v803_v31 = vadd.f32 %v10460_v20, %v781_v29  ;;  %1052 = vst.msk [vmem:[#allocation4 + $0xb0] sm:$0xff] %vm1029_vm0, %v9955_v40  ;;  %1053 = vst.msk [vmem:[#allocation4 + $0xb8] sm:$0xff] %vm1029_vm0, %v9955_v40 }
 0x267   : > { %v819_v21 = vpack.c.bf16 %v810_v25, %v809_v24  ;;  %v782_v4 = vmul.f32 %v10456_v63, %v760_v26  ;;  %1054 = vst.msk [vmem:[#allocation4 + $0xc0] sm:$0xff] %vm1029_vm0, %v9955_v40  ;;  %1055 = vst.msk [vmem:[#allocation4 + $0xc8] sm:$0xff] %vm1029_vm0, %v9955_v40 }
 0x268   : > { %v8913_v30 = vpop.eup %8912  ;;  %v789_v34 = vmul.f32 %v10456_v63, %v767_v61  ;;  %1056 = vst.msk [vmem:[#allocation4 + $0xd0] sm:$0xff] %vm1029_vm0, %v9955_v40  ;;  %1057 = vst.msk [vmem:[#allocation4 + $0xd8] sm:$0xff] %vm1029_vm0, %v9955_v40 }
 0x269   : > { %827 = vst [vmem:[#allocation2 + $0x30] sm:$0xff] %v819_v21  ;;  %8329 = vmatprep.mubr.bf16.mxu1 %v819_v21  ;;  %v804_v32 = vadd.f32 %v10460_v20, %v782_v4  ;;  %v768_v33 = vmul.f32 %v8913_v30, %v10447_v13  ;;  %1058 = vst.msk [vmem:[#allocation4 + $0xe0] sm:$0xff] %vm1029_vm0, %v9955_v40  ;;  %v9956_v13 = vmov 0.0  }
 0x26a   : > { %v811_v12 = vadd.f32 %v10460_v20, %v789_v34  ;;  %1059 = vst.msk [vmem:[#allocation4 + $0xe8] sm:$0xff] %vm1029_vm0, %v9955_v40  ;;  %1060 = vst.msk [vmem:[#allocation4 + $0xf0] sm:$0xff] %vm1029_vm0, %v9955_v40 }
 0x26b   : > { %v816_v37 = vpack.c.bf16 %v804_v32, %v803_v31  ;;  %v790_v5 = vmul.f32 %v10456_v63, %v768_v33  ;;  %1061 = vst.msk [vmem:[#allocation4 + $0xf8] sm:$0xff] %vm1029_vm0, %v9955_v40  ;;  %1062 = vst.msk [vmem:[#allocation4 + $0x100] sm:$0xff] %vm1029_vm0, %v9955_v40  ;;  %v7861_v63 = vld [vmem:[%s14849_s24] ss:$0 sm:$0xff] }
 0x26c   : > { %1063 = vst.msk [vmem:[#allocation4 + $0x108] sm:$0xff] %vm1029_vm0, %v9955_v40  ;;  %1064 = vst.msk [vmem:[#allocation4 + $0x110] sm:$0xff] %vm1029_vm0, %v9955_v40 }
 0x26d   : > { %824 = vst [vmem:[#allocation2 + $0x18] sm:$0xff] %v816_v37  ;;  %8322 = vmatmul.mubr.bf16.gmra.mrb[4].mxu0 %v816_v37  ;;  %v812_v38 = vadd.f32 %v10460_v20, %v790_v5  ;;  %1065 = vst.msk [vmem:[#allocation4 + $0x118] sm:$0xff] %vm1029_vm0, %v9955_v40 }
 0x26e   : > { %1066 = vst.msk [vmem:[#allocation4 + $0x120] sm:$0xff] %vm1029_vm0, %v9955_v40  ;;  %1067 = vst.msk [vmem:[#allocation4 + $0x128] sm:$0xff] %vm1029_vm0, %v9955_v40 }
 0x26f   : > { %v820_v39 = vpack.c.bf16 %v812_v38, %v811_v12  ;;  %1068 = vst.msk [vmem:[#allocation4 + $0x130] sm:$0xff] %vm1029_vm0, %v9955_v40  ;;  %1069 = vst.msk [vmem:[#allocation4 + $0x138] sm:$0xff] %vm1029_vm0, %v9955_v40 }
 0x270   : > { %1070 = vst.msk [vmem:[#allocation4 + $0x140] sm:$0xff] %vm1029_vm0, %v9955_v40  ;;  %1071 = vst.msk [vmem:[#allocation4 + $0x148] sm:$0xff] %vm1029_vm0, %v9955_v40 }
 0x271   : > { %828 = vst [vmem:[#allocation2 + $0x38] sm:$0xff] %v820_v39  ;;  %8330 = vmatmul.mubr.bf16.gmra.mrb[4].mxu1 %v820_v39  ;;  %1072 = vst.msk [vmem:[#allocation4 + $0x150] sm:$0xff] %vm1029_vm0, %v9955_v40 }
 0x272   : > { %1073 = vst.msk [vmem:[#allocation4 + $0x158] sm:$0xff] %vm1029_vm0, %v9955_v40  ;;  %1074 = vst.msk [vmem:[#allocation4 + $0x160] sm:$0xff] %vm1029_vm0, %v9955_v40 }
 0x273   : > { %1075 = vst.msk [vmem:[#allocation4 + $0x168] sm:$0xff] %vm1029_vm0, %v9955_v40  ;;  %1076 = vst.msk [vmem:[#allocation4 + $0x170] sm:$0xff] %vm1029_vm0, %v9955_v40 }
 0x274   : > { %1077 = vst.msk [vmem:[#allocation4 + $0x178] sm:$0xff] %vm1029_vm0, %v9955_v40  ;;  %1078 = vst.msk [vmem:[#allocation4 + $0x180] sm:$0xff] %vm1029_vm0, %v9955_v40 }
 0x275   : > { %1079 = vst.msk [vmem:[#allocation4 + $0x188] sm:$0xff] %vm1029_vm0, %v9955_v40  ;;  %1080 = vst.msk [vmem:[#allocation4 + $0x190] sm:$0xff] %vm1029_vm0, %v9955_v40 }
 0x276   : > { %1081 = vst.msk [vmem:[#allocation4 + $0x198] sm:$0xff] %vm1029_vm0, %v9955_v40  ;;  %1082 = vst.msk [vmem:[#allocation4 + $0x1a0] sm:$0xff] %vm1029_vm0, %v9955_v40 }
 0x277   : > { %1083 = vst.msk [vmem:[#allocation4 + $0x1a8] sm:$0xff] %vm1029_vm0, %v9955_v40  ;;  %1084 = vst.msk [vmem:[#allocation4 + $0x1b0] sm:$0xff] %vm1029_vm0, %v9955_v40 }
 0x278   : > { %1085 = vst.msk [vmem:[#allocation4 + $0x1b8] sm:$0xff] %vm1029_vm0, %v9955_v40  ;;  %1086 = vst.msk [vmem:[#allocation4 + $0x1c0] sm:$0xff] %vm1029_vm0, %v9955_v40 }
 0x279   : > { %1087 = vst.msk [vmem:[#allocation4 + $0x1c8] sm:$0xff] %vm1029_vm0, %v9955_v40  ;;  %1088 = vst.msk [vmem:[#allocation4 + $0x1d0] sm:$0xff] %vm1029_vm0, %v9955_v40 }
 0x27a   : > { %1089 = vst.msk [vmem:[#allocation4 + $0x1d8] sm:$0xff] %vm1029_vm0, %v9955_v40  ;;  %1090 = vst.msk [vmem:[#allocation4 + $0x1e0] sm:$0xff] %vm1029_vm0, %v9955_v40 }
 0x27b   : > { %1091 = vst.msk [vmem:[#allocation4 + $0x1e8] sm:$0xff] %vm1029_vm0, %v9955_v40  ;;  %1092 = vst.msk [vmem:[#allocation4 + $0x1f0] sm:$0xff] %vm1029_vm0, %v9955_v40 }
 0x27c   : > { %1093 = vst.msk [vmem:[#allocation4 + $0x1f8] sm:$0xff] %vm1029_vm0, %v9955_v40  ;;  %1094 = vst.msk [vmem:[#allocation5] sm:$0xff] %vm1029_vm0, %v9956_v13 }
 0x27d   : > { %1095 = vst.msk [vmem:[#allocation5 + $0x8] sm:$0xff] %vm1029_vm0, %v9956_v13  ;;  %1096 = vst.msk [vmem:[#allocation5 + $0x10] sm:$0xff] %vm1029_vm0, %v9956_v13 }
 0x27e   : > { %1097 = vst.msk [vmem:[#allocation5 + $0x18] sm:$0xff] %vm1029_vm0, %v9956_v13  ;;  %1098 = vst.msk [vmem:[#allocation5 + $0x20] sm:$0xff] %vm1029_vm0, %v9956_v13 }
 0x27f   : > { %1099 = vst.msk [vmem:[#allocation5 + $0x28] sm:$0xff] %vm1029_vm0, %v9956_v13  ;;  %1100 = vst.msk [vmem:[#allocation5 + $0x30] sm:$0xff] %vm1029_vm0, %v9956_v13 }
 0x280   : > { %1101 = vst.msk [vmem:[#allocation5 + $0x38] sm:$0xff] %vm1029_vm0, %v9956_v13  ;;  %1102 = vst.msk [vmem:[#allocation5 + $0x40] sm:$0xff] %vm1029_vm0, %v9956_v13 }
 0x281   : > { %1103 = vst.msk [vmem:[#allocation5 + $0x48] sm:$0xff] %vm1029_vm0, %v9956_v13  ;;  %1104 = vst.msk [vmem:[#allocation5 + $0x50] sm:$0xff] %vm1029_vm0, %v9956_v13 }
 0x282   : > { %1105 = vst.msk [vmem:[#allocation5 + $0x58] sm:$0xff] %vm1029_vm0, %v9956_v13  ;;  %1106 = vst.msk [vmem:[#allocation5 + $0x60] sm:$0xff] %vm1029_vm0, %v9956_v13 }
 0x283   : > { %1107 = vst.msk [vmem:[#allocation5 + $0x68] sm:$0xff] %vm1029_vm0, %v9956_v13  ;;  %1108 = vst.msk [vmem:[#allocation5 + $0x70] sm:$0xff] %vm1029_vm0, %v9956_v13 }
 0x284   : > { %1109 = vst.msk [vmem:[#allocation5 + $0x78] sm:$0xff] %vm1029_vm0, %v9956_v13  ;;  %1110 = vst.msk [vmem:[#allocation5 + $0x80] sm:$0xff] %vm1029_vm0, %v9956_v13 }
 0x285   : > { %1111 = vst.msk [vmem:[#allocation5 + $0x88] sm:$0xff] %vm1029_vm0, %v9956_v13  ;;  %1112 = vst.msk [vmem:[#allocation5 + $0x90] sm:$0xff] %vm1029_vm0, %v9956_v13 }
 0x286   : > { %1113 = vst.msk [vmem:[#allocation5 + $0x98] sm:$0xff] %vm1029_vm0, %v9956_v13  ;;  %1114 = vst.msk [vmem:[#allocation5 + $0xa0] sm:$0xff] %vm1029_vm0, %v9956_v13 }
 0x287   : > { %1115 = vst.msk [vmem:[#allocation5 + $0xa8] sm:$0xff] %vm1029_vm0, %v9956_v13  ;;  %1116 = vst.msk [vmem:[#allocation5 + $0xb0] sm:$0xff] %vm1029_vm0, %v9956_v13 }
 0x288   : > { %1117 = vst.msk [vmem:[#allocation5 + $0xb8] sm:$0xff] %vm1029_vm0, %v9956_v13  ;;  %1118 = vst.msk [vmem:[#allocation5 + $0xc0] sm:$0xff] %vm1029_vm0, %v9956_v13 }
 0x289   : > { %1119 = vst.msk [vmem:[#allocation5 + $0xc8] sm:$0xff] %vm1029_vm0, %v9956_v13  ;;  %1120 = vst.msk [vmem:[#allocation5 + $0xd0] sm:$0xff] %vm1029_vm0, %v9956_v13 }
 0x28a   : > { %1121 = vst.msk [vmem:[#allocation5 + $0xd8] sm:$0xff] %vm1029_vm0, %v9956_v13  ;;  %1122 = vst.msk [vmem:[#allocation5 + $0xe0] sm:$0xff] %vm1029_vm0, %v9956_v13 }
 0x28b   : > { %1123 = vst.msk [vmem:[#allocation5 + $0xe8] sm:$0xff] %vm1029_vm0, %v9956_v13  ;;  %1124 = vst.msk [vmem:[#allocation5 + $0xf0] sm:$0xff] %vm1029_vm0, %v9956_v13 }
 0x28c   : > { %1125 = vst.msk [vmem:[#allocation5 + $0xf8] sm:$0xff] %vm1029_vm0, %v9956_v13  ;;  %1126 = vst.msk [vmem:[#allocation5 + $0x100] sm:$0xff] %vm1029_vm0, %v9956_v13 }
 0x28d   : > { %1127 = vst.msk [vmem:[#allocation5 + $0x108] sm:$0xff] %vm1029_vm0, %v9956_v13  ;;  %1128 = vst.msk [vmem:[#allocation5 + $0x110] sm:$0xff] %vm1029_vm0, %v9956_v13 }
 0x28e   : > { %1129 = vst.msk [vmem:[#allocation5 + $0x118] sm:$0xff] %vm1029_vm0, %v9956_v13  ;;  %1130 = vst.msk [vmem:[#allocation5 + $0x120] sm:$0xff] %vm1029_vm0, %v9956_v13 }
 0x28f   : > { %1131 = vst.msk [vmem:[#allocation5 + $0x128] sm:$0xff] %vm1029_vm0, %v9956_v13  ;;  %1132 = vst.msk [vmem:[#allocation5 + $0x130] sm:$0xff] %vm1029_vm0, %v9956_v13 }
 0x290   : > { %1133 = vst.msk [vmem:[#allocation5 + $0x138] sm:$0xff] %vm1029_vm0, %v9956_v13  ;;  %1134 = vst.msk [vmem:[#allocation5 + $0x140] sm:$0xff] %vm1029_vm0, %v9956_v13 }
 0x291   : > { %1135 = vst.msk [vmem:[#allocation5 + $0x148] sm:$0xff] %vm1029_vm0, %v9956_v13  ;;  %1136 = vst.msk [vmem:[#allocation5 + $0x150] sm:$0xff] %vm1029_vm0, %v9956_v13 }
 0x292   : > { %1137 = vst.msk [vmem:[#allocation5 + $0x158] sm:$0xff] %vm1029_vm0, %v9956_v13  ;;  %1138 = vst.msk [vmem:[#allocation5 + $0x160] sm:$0xff] %vm1029_vm0, %v9956_v13 }
 0x293   : > { %1139 = vst.msk [vmem:[#allocation5 + $0x168] sm:$0xff] %vm1029_vm0, %v9956_v13  ;;  %1140 = vst.msk [vmem:[#allocation5 + $0x170] sm:$0xff] %vm1029_vm0, %v9956_v13 }
 0x294   : > { %1141 = vst.msk [vmem:[#allocation5 + $0x178] sm:$0xff] %vm1029_vm0, %v9956_v13  ;;  %1142 = vst.msk [vmem:[#allocation5 + $0x180] sm:$0xff] %vm1029_vm0, %v9956_v13 }
 0x295   : > { %1143 = vst.msk [vmem:[#allocation5 + $0x188] sm:$0xff] %vm1029_vm0, %v9956_v13  ;;  %1144 = vst.msk [vmem:[#allocation5 + $0x190] sm:$0xff] %vm1029_vm0, %v9956_v13 }
 0x296   : > { %1145 = vst.msk [vmem:[#allocation5 + $0x198] sm:$0xff] %vm1029_vm0, %v9956_v13  ;;  %1146 = vst.msk [vmem:[#allocation5 + $0x1a0] sm:$0xff] %vm1029_vm0, %v9956_v13 }
 0x297   : > { %1147 = vst.msk [vmem:[#allocation5 + $0x1a8] sm:$0xff] %vm1029_vm0, %v9956_v13  ;;  %1148 = vst.msk [vmem:[#allocation5 + $0x1b0] sm:$0xff] %vm1029_vm0, %v9956_v13 }
 0x298   : > { %1149 = vst.msk [vmem:[#allocation5 + $0x1b8] sm:$0xff] %vm1029_vm0, %v9956_v13  ;;  %1150 = vst.msk [vmem:[#allocation5 + $0x1c0] sm:$0xff] %vm1029_vm0, %v9956_v13 }
 0x299   : > { %1151 = vst.msk [vmem:[#allocation5 + $0x1c8] sm:$0xff] %vm1029_vm0, %v9956_v13  ;;  %1152 = vst.msk [vmem:[#allocation5 + $0x1d0] sm:$0xff] %vm1029_vm0, %v9956_v13 }
 0x29a   : > { %1153 = vst.msk [vmem:[#allocation5 + $0x1d8] sm:$0xff] %vm1029_vm0, %v9956_v13  ;;  %1154 = vst.msk [vmem:[#allocation5 + $0x1e0] sm:$0xff] %vm1029_vm0, %v9956_v13 }
 0x29b   : > { %1155 = vst.msk [vmem:[#allocation5 + $0x1e8] sm:$0xff] %vm1029_vm0, %v9956_v13  ;;  %1156 = vst.msk [vmem:[#allocation5 + $0x1f0] sm:$0xff] %vm1029_vm0, %v9956_v13 }
 0x29c   : > { %1157 = vst.msk [vmem:[#allocation5 + $0x1f8] sm:$0xff] %vm1029_vm0, %v9956_v13  ;;  %1158 = vst [vmem:[#allocation6] sm:$0xff] %v9956_v13 }
 0x29d   : > { %1159 = vst [vmem:[#allocation6 + $0x8] sm:$0xff] %v9956_v13  ;;  %1160 = vst [vmem:[#allocation6 + $0x10] sm:$0xff] %v9956_v13 }
 0x29e   : > { %1161 = vst [vmem:[#allocation6 + $0x18] sm:$0xff] %v9956_v13  ;;  %1162 = vst [vmem:[#allocation6 + $0x20] sm:$0xff] %v9956_v13 }
 0x29f   : > { %1163 = vst [vmem:[#allocation6 + $0x28] sm:$0xff] %v9956_v13  ;;  %1164 = vst [vmem:[#allocation6 + $0x30] sm:$0xff] %v9956_v13 }
 0x2a0   : > { %1165 = vst [vmem:[#allocation6 + $0x38] sm:$0xff] %v9956_v13  ;;  %1166 = vst [vmem:[#allocation6 + $0x40] sm:$0xff] %v9956_v13 }
 0x2a1   : > { %1167 = vst [vmem:[#allocation6 + $0x48] sm:$0xff] %v9956_v13  ;;  %1168 = vst [vmem:[#allocation6 + $0x50] sm:$0xff] %v9956_v13 }
 0x2a2   : > { %1169 = vst [vmem:[#allocation6 + $0x58] sm:$0xff] %v9956_v13  ;;  %1170 = vst [vmem:[#allocation6 + $0x60] sm:$0xff] %v9956_v13 }
 0x2a3   : > { %1171 = vst [vmem:[#allocation6 + $0x68] sm:$0xff] %v9956_v13  ;;  %1172 = vst [vmem:[#allocation6 + $0x70] sm:$0xff] %v9956_v13 }
 0x2a4   : > { %1173 = vst [vmem:[#allocation6 + $0x78] sm:$0xff] %v9956_v13 }
 0x330   : > { %v8319_v20 = vpop.f32.mrb[0].mxu0 }
 0x331   : > { %v943_v28 = vadd.f32 %v8319_v20, %v7861_v63  ;;  %v934_v41 = vpop.f32.mrb[1].mxu0 }
 0x332   : > { %v935_v42 = vadd.f32 %v7861_v63, %v934_v41  ;;  %v8320_v45 = vpop.f32.mrb[2].mxu0 }
 0x333   : > { %v946_v46 = vadd.f32 %v8320_v45, %v7861_v63  ;;  %v937_v47 = vpop.f32.mrb[3].mxu0  ;;  %v999_v49 = vmul.f32 0.17677669, %v943_v28 }
 0x334   : > { %v938_v35 = vadd.f32 %v7861_v63, %v937_v47  ;;  %v8327_v48 = vpop.f32.mrb[0].mxu1  ;;  %v997_v55 = vmul.f32 0.17677669, %v935_v42 }
 0x335   : > { %v1000_v50 = vmul.f32 0.17677669, %v946_v46  ;;  %v975_v53 = vadd.f32 %v8327_v48, %v7861_v63  ;;  %v966_v54 = vpop.f32.mrb[1].mxu1 }
 0x336   : > { %v998_v56 = vmul.f32 0.17677669, %v938_v35  ;;  %v967_v36 = vadd.f32 %v7861_v63, %v966_v54  ;;  %v8328_v57 = vpop.f32.mrb[2].mxu1 }
 0x337   : > { %v1014_v58 = vpack.c.bf16 %v1000_v50, %v999_v49  ;;  %v978_v59 = vadd.f32 %v8328_v57, %v7861_v63  ;;  %v969_v43 = vpop.f32.mrb[3].mxu1  ;;  %v1007_v1 = vmul.f32 0.17677669, %v975_v53 }
 0x338   : > { %v1013_v62 = vpack.c.bf16 %v998_v56, %v997_v55  ;;  %v970_v0 = vadd.f32 %v7861_v63, %v969_v43  ;;  %v1005_v3 = vmul.f32 0.17677669, %v967_v36 }
 0x339   : > { %1022 = vst [vmem:[#allocation3 + $0x8] sm:$0xff] %v1014_v58  ;;  %v1008_v2 = vmul.f32 0.17677669, %v978_v59 }
 0x33a   : > { %1021 = vst [vmem:[#allocation3] sm:$0xff] %v1013_v62  ;;  %v1006_v6 = vmul.f32 0.17677669, %v970_v0 }
 0x33b   : > { %v1018_v7 = vpack.c.bf16 %v1008_v2, %v1007_v1 }
 0x33c   : > { %v1017_v8 = vpack.c.bf16 %v1006_v6, %v1005_v3 }
 0x33d   : > { %1026 = vst [vmem:[#allocation3 + $0x28] sm:$0xff] %v1018_v7 }
 0x33e   : > { %1025 = vst [vmem:[#allocation3 + $0x20] sm:$0xff] %v1017_v8 }
 0x340   : > { %v8323_v44 = vpop.f32.mrb[4].mxu0 }
 0x341   : > { %v959_v9 = vadd.f32 %v8323_v44, %v7861_v63  ;;  %v950_v51 = vpop.f32.mrb[5].mxu0 }
 0x342   : > { %v951_v10 = vadd.f32 %v7861_v63, %v950_v51  ;;  %v8324_v11 = vpop.f32.mrb[6].mxu0 }
 0x343   : > { %v962_v16 = vadd.f32 %v8324_v11, %v7861_v63  ;;  %v953_v17 = vpop.f32.mrb[7].mxu0  ;;  %v1003_v14 = vmul.f32 0.17677669, %v959_v9 }
 0x344   : > { %v954_v18 = vadd.f32 %v7861_v63, %v953_v17  ;;  %v8331_v19 = vpop.f32.mrb[4].mxu1  ;;  %v1001_v60 = vmul.f32 0.17677669, %v951_v10 }
 0x345   : > { %v1004_v52 = vmul.f32 0.17677669, %v962_v16  ;;  %v991_v22 = vadd.f32 %v8331_v19, %v7861_v63  ;;  %v982_v15 = vpop.f32.mrb[5].mxu1 }
 0x346   : > { %v1002_v23 = vmul.f32 0.17677669, %v954_v18  ;;  %v983_v27 = vadd.f32 %v7861_v63, %v982_v15  ;;  %v8332_v24 = vpop.f32.mrb[6].mxu1 }
 0x347   : > { %v1016_v25 = vpack.c.bf16 %v1004_v52, %v1003_v14  ;;  %v994_v26 = vadd.f32 %v8332_v24, %v7861_v63  ;;  %v985_v29 = vpop.f32.mrb[7].mxu1  ;;  %v1011_v4 = vmul.f32 0.17677669, %v991_v22 }
 0x348   : > { %v1015_v61 = vpack.c.bf16 %v1002_v23, %v1001_v60  ;;  %v986_v21 = vadd.f32 %v7861_v63, %v985_v29  ;;  %v1009_v31 = vmul.f32 0.17677669, %v983_v27 }
 0x349   : > { %1024 = vst [vmem:[#allocation3 + $0x18] sm:$0xff] %v1016_v25  ;;  %v1012_v30 = vmul.f32 0.17677669, %v994_v26 }
 0x34a   : > { %1023 = vst [vmem:[#allocation3 + $0x10] sm:$0xff] %v1015_v61  ;;  %v1010_v32 = vmul.f32 0.17677669, %v986_v21 }
 0x34b   : > { %v1020_v33 = vpack.c.bf16 %v1012_v30, %v1011_v4 }
 0x34c   : > { %v1019_v34 = vpack.c.bf16 %v1010_v32, %v1009_v31 }
 0x34d   : > { %1028 = vst [vmem:[#allocation3 + $0x38] sm:$0xff] %v1020_v33 }
 0x34e   : > { %1027 = vst [vmem:[#allocation3 + $0x30] sm:$0xff] %v1019_v34 }
 0x34f PF: > { %s14850_s3 = sld [smem:[#allocation28_spill]]  ;;  %s14851_s12 = sld [smem:[#allocation27_spill]] }
 0x355   : > { %p7870_p4 = scmp.gt.s32.totalorder %s14851_s12, %s14850_s3 }
 0x357   : > { %1177 = sbr.rel (%p7870_p4) target bundleno = 3929 (0xf59), region = 108 }
 0x35e   : > { %s14852_s1 = sld [smem:[#allocation28_spill]]  ;;  %s14853_s21 = sld [smem:[#allocation27_spill]] }
 0x364   : > { %p7871_p6 = scmp.ne.s32.totalorder %s14853_s21, %s14852_s1 }
 0x365   : > { %v8914_v37 = vld [vmem:[#allocation15 + $0x8] ss:$12 sps:$4 sm:$0xff] (!%p7871_p6)   ;;  %v8916_v5 = vld [vmem:[#allocation15 + $0x4] ss:$12 sps:$4 sm:$0xff] (!%p7871_p6)   ;;  %v9957_v12 = vmov (!%p7871_p6), 0   ;;  %v1182_v49 = vld [vmem:[#allocation2] sm:$0xff] (!%p7871_p6)  ;;  %v1208_v58 = vlaneseq (!%p7871_p6) }
 0x366   : > { %1181 = sbr.rel (%p7871_p6) target bundleno = 1147 (0x47b), region = 112  ;;  %1330 = vmatprep.mubr.bf16.mxu0 (!%p7871_p6), %v9957_v12  ;;  %1370 = vmatprep.mubr.bf16.mxu1 (!%p7871_p6), %v9957_v12  ;;  %v8917_v38 = vld [vmem:[#allocation15 + $0x20] ss:$12 sps:$4 sm:$0xff] (!%p7871_p6)   ;;  %v8919_v39 = vld [vmem:[#allocation15 + $0x1c] ss:$12 sps:$4 sm:$0xff] (!%p7871_p6)   ;;  %s14854_s13 = sld [smem:[#allocation27_spill]] (!%p7871_p6) }
 0x367   : > { %1298 = vmatprep.subr.bf16.mxu0 (!%p7871_p6), %v8914_v37  ;;  %8637 = vmatprep.subr.bf16.mxu1 (!%p7871_p6), %v8914_v37  ;;  %v8920_v40 = vld [vmem:[#allocation15 + $0x38] ss:$12 sps:$4 sm:$0xff] (!%p7871_p6)   ;;  %v8922_v13 = vld [vmem:[#allocation15 + $0x34] ss:$12 sps:$4 sm:$0xff] (!%p7871_p6)   ;;  %v8923_v63 = vld [vmem:[#allocation15 + $0x50] ss:$12 sps:$4 sm:$0xff] (!%p7871_p6)  }
 0x368   : > { %1299 = vmatpush1.bf16.msra.mxu0 (!%p7871_p6), %v8916_v5  ;;  %8645 = vmatpush1.bf16.msra.mxu1 (!%p7871_p6), %v8916_v5  ;;  %v8925_v20 = vld [vmem:[#allocation15 + $0x4c] ss:$12 sps:$4 sm:$0xff] (!%p7871_p6)   ;;  %v8926_v28 = vld [vmem:[#allocation15 + $0x68] ss:$12 sps:$4 sm:$0xff] (!%p7871_p6)   ;;  %v8928_v41 = vld [vmem:[#allocation15 + $0x64] ss:$12 sps:$4 sm:$0xff] (!%p7871_p6)  }
 0x369   : > { %1300 = vmatprep.subr.bf16.mxu0 (!%p7871_p6), %v8917_v38  ;;  %8638 = vmatprep.subr.bf16.mxu1 (!%p7871_p6), %v8917_v38  ;;  %v8929_v42 = vld [vmem:[#allocation15 + $0x80] ss:$12 sps:$4 sm:$0xff] (!%p7871_p6)   ;;  %v8931_v45 = vld [vmem:[#allocation15 + $0x7c] ss:$12 sps:$4 sm:$0xff] (!%p7871_p6)   ;;  %v8932_v46 = vld [vmem:[#allocation15 + $0x98] ss:$12 sps:$4 sm:$0xff] (!%p7871_p6)  }
 0x36a   : > { %v8934_v47 = vld [vmem:[#allocation15 + $0x94] ss:$12 sps:$4 sm:$0xff] (!%p7871_p6)   ;;  %v8935_v35 = vld [vmem:[#allocation15 + $0xb0] ss:$12 sps:$4 sm:$0xff] (!%p7871_p6)   ;;  %v8937_v48 = vld [vmem:[#allocation15 + $0xac] ss:$12 sps:$4 sm:$0xff] (!%p7871_p6)  }
 0x36b   : > { %v1186_v50 = vld [vmem:[#allocation2 + $0x20] sm:$0xff] (!%p7871_p6)  ;;  %v1183_v53 = vld [vmem:[#allocation2 + $0x8] sm:$0xff] (!%p7871_p6)  ;;  %v1184_v55 = vld [vmem:[#allocation2 + $0x10] sm:$0xff] (!%p7871_p6)  ;;  %v1209_v59 = vshrl.u32 (!%p7871_p6), %v1208_v58, 7  ;;  %s14855_s22 = sld [smem:[#allocation171_spill]] (!%p7871_p6) }
 0x36c   : > { %1301 = vmatpush1.bf16.msra.mxu0 (!%p7871_p6), %v8919_v39  ;;  %8646 = vmatpush1.bf16.msra.mxu1 (!%p7871_p6), %v8919_v39  ;;  %v1187_v54 = vld [vmem:[#allocation2 + $0x28] sm:$0xff] (!%p7871_p6)  ;;  %v1188_v56 = vld [vmem:[#allocation2 + $0x30] sm:$0xff] (!%p7871_p6)  ;;  %v1185_v36 = vld [vmem:[#allocation2 + $0x18] sm:$0xff] (!%p7871_p6)  ;;  %s8009_s29 = sshll.u32 (!%p7871_p6), %s14854_s13, 6 }
 0x36d   : > { %1302 = vmatprep.subr.bf16.mxu0 %v8920_v40  ;;  %8639 = vmatprep.subr.bf16.mxu1 %v8920_v40  ;;  %v1189_v57 = vld [vmem:[#allocation2 + $0x38] sm:$0xff]  ;;  %v1210_v43 = vsub.s32 0, %v1209_v59  ;;  %v1214_v0 = vsub.s32 1, %v1209_v59  ;;  %s10813_s9 = scalar_lea.vmem [#allocation7], %s8009_s29  ;;  %s10817_s11 = scalar_lea.vmem [#allocation8], %s8009_s29 }
 0x370   : > { %1303 = vmatpush1.bf16.msra.mxu0 %v8922_v13  ;;  %8647 = vmatpush1.bf16.msra.mxu1 %v8922_v13 }
 0x371   : > { %1304 = vmatprep.subr.bf16.mxu0 %v8923_v63  ;;  %8640 = vmatprep.subr.bf16.mxu1 %v8923_v63  ;;  %v1206_v62 = vld [vmem:[%s14855_s22 + $0x1] sm:$0x3] }
 0x372   : > { %v10800_v1 = vrot.slane %v1206_v62, %v1210_v43  ;;  %v10802_v6 = vrot.slane %v1206_v62, %v1214_v0 }
 0x374   : > { %1305 = vmatpush1.bf16.msra.mxu0 %v8925_v20  ;;  %8648 = vmatpush1.bf16.msra.mxu1 %v8925_v20 }
 0x375   : > { %1306 = vmatprep.subr.bf16.mxu0 %v8926_v28  ;;  %8641 = vmatprep.subr.bf16.mxu1 %v8926_v28 }
 0x378   : > { %1307 = vmatpush1.bf16.msra.mxu0 %v8928_v41  ;;  %8649 = vmatpush1.bf16.msra.mxu1 %v8928_v41 }
 0x379   : > { %1308 = vmatprep.subr.bf16.mxu0 %v8929_v42  ;;  %8642 = vmatprep.subr.bf16.mxu1 %v8929_v42 }
 0x37c   : > { %1309 = vmatpush1.bf16.msra.mxu0 %v8931_v45  ;;  %8650 = vmatpush1.bf16.msra.mxu1 %v8931_v45 }
 0x37d   : > { %1310 = vmatprep.subr.bf16.mxu0 %v8932_v46  ;;  %8643 = vmatprep.subr.bf16.mxu1 %v8932_v46 }
 0x380   : > { %1311 = vmatpush1.bf16.msra.mxu0 %v8934_v47  ;;  %8651 = vmatpush1.bf16.msra.mxu1 %v8934_v47 }
 0x381   : > { %1312 = vmatprep.subr.bf16.mxu0 %v8935_v35  ;;  %8644 = vmatprep.subr.bf16.mxu1 %v8935_v35 }
 0x384   : > { %1313 = vmatpush1.bf16.msra.mxu0 %v8937_v48  ;;  %8652 = vmatpush1.bf16.msra.mxu1 %v8937_v48 }
 0x387   : > { %1331 = vmatmul.mubr.bf16.vlgmr.msra.gmra.mrb[0].mxu0 %v1182_v49  ;;  %1371 = vmatmul.mubr.bf16.vlgmr.msra.gmra.mrb[0].mxu1 %v1186_v50 }
 0x388   : > { %1340 = vmatprep.mubr.bf16.mxu0 %v9957_v12  ;;  %1380 = vmatprep.mubr.bf16.mxu1 %v9957_v12 }
 0x38f   : > { %1341 = vmatmul.mubr.bf16.gmra.mrb[4].mxu0 %v1183_v53  ;;  %1381 = vmatmul.mubr.bf16.gmra.mrb[4].mxu1 %v1187_v54 }
 0x390   : > { %1350 = vmatprep.mubr.bf16.mxu0 %v9957_v12  ;;  %1390 = vmatprep.mubr.bf16.mxu1 %v9957_v12 }
 0x397   : > { %1351 = vmatmul.mubr.bf16.gmra.mrb[8].mxu0 %v1184_v55  ;;  %1391 = vmatmul.mubr.bf16.gmra.mrb[8].mxu1 %v1188_v56 }
 0x398   : > { %1360 = vmatprep.mubr.bf16.mxu0 %v9957_v12  ;;  %1400 = vmatprep.mubr.bf16.mxu1 %v9957_v12 }
 0x39f   : > { %1361 = vmatmul.mubr.bf16.gmra.mrb[12].mxu0 %v1185_v36  ;;  %1401 = vmatmul.mubr.bf16.gmra.mrb[12].mxu1 %v1189_v57 }
 0x45a   : > { %v1332_v2 = vpop.f32.mrb[0].mxu0  ;;  %v1372_v3 = vpop.f32.mrb[0].mxu1 }
 0x45b   : > { %v1334_v7 = vpop.f32.mrb[1].mxu0  ;;  %v1374_v8 = vpop.f32.mrb[1].mxu1  ;;  %v1333_v51 = vadd.f32 %v1332_v2, %v10800_v1  ;;  %v1373_v10 = vadd.f32 %v1372_v3, %v10800_v1 }
 0x45c   : > { %v1336_v44 = vpop.f32.mrb[2].mxu0  ;;  %v1376_v9 = vpop.f32.mrb[2].mxu1  ;;  %v1335_v19 = vadd.f32 %v1334_v7, %v10802_v6  ;;  %v1375_v14 = vadd.f32 %v1374_v8, %v10802_v6 }
 0x45d   : > { %v1337_v11 = vadd.f32 %v1336_v44, %v10800_v1  ;;  %v1377_v16 = vadd.f32 %v1376_v9, %v10800_v1  ;;  %v1338_v17 = vpop.f32.mrb[3].mxu0  ;;  %v1378_v18 = vpop.f32.mrb[3].mxu1 }
 0x45e   : > { %v1339_v52 = vadd.f32 %v1338_v17, %v10802_v6  ;;  %v1379_v22 = vadd.f32 %v1378_v18, %v10802_v6 }
 0x45f   : > { %v1411_v15 = vpack.c.bf16 %v1337_v11, %v1333_v51  ;;  %v1415_v60 = vpack.c.bf16 %v1377_v16, %v1373_v10 }
 0x460   : > { %v1430_v23 = vpack.c.bf16 %v1339_v52, %v1335_v19  ;;  %v1434_v27 = vpack.c.bf16 %v1379_v22, %v1375_v14 }
 0x461   : > { %1422 = vst [vmem:[%s10813_s9] sm:$0xff] %v1411_v15  ;;  %1426 = vst [vmem:[%s10813_s9 + $0x20] sm:$0xff] %v1415_v60 }
 0x462   : > { %1440 = vst [vmem:[%s10817_s11] sm:$0xff] %v1430_v23  ;;  %1444 = vst [vmem:[%s10817_s11 + $0x20] sm:$0xff] %v1434_v27  ;;  %v1342_v24 = vpop.f32.mrb[4].mxu0  ;;  %v1382_v25 = vpop.f32.mrb[4].mxu1 }
 0x463   : > { %v1344_v26 = vpop.f32.mrb[5].mxu0  ;;  %v1384_v29 = vpop.f32.mrb[5].mxu1  ;;  %v1343_v4 = vadd.f32 %v1342_v24, %v10800_v1  ;;  %v1383_v30 = vadd.f32 %v1382_v25, %v10800_v1 }
 0x464   : > { %v1346_v61 = vpop.f32.mrb[6].mxu0  ;;  %v1386_v21 = vpop.f32.mrb[6].mxu1  ;;  %v1345_v37 = vadd.f32 %v1344_v26, %v10802_v6  ;;  %v1385_v5 = vadd.f32 %v1384_v29, %v10802_v6 }
 0x465   : > { %v1347_v31 = vadd.f32 %v1346_v61, %v10800_v1  ;;  %v1387_v32 = vadd.f32 %v1386_v21, %v10800_v1  ;;  %v1348_v33 = vpop.f32.mrb[7].mxu0  ;;  %v1388_v34 = vpop.f32.mrb[7].mxu1 }
 0x466   : > { %v1349_v12 = vadd.f32 %v1348_v33, %v10802_v6  ;;  %v1389_v38 = vadd.f32 %v1388_v34, %v10802_v6 }
 0x467   : > { %v1412_v39 = vpack.c.bf16 %v1347_v31, %v1343_v4  ;;  %v1416_v40 = vpack.c.bf16 %v1387_v32, %v1383_v30 }
 0x468   : > { %v1431_v13 = vpack.c.bf16 %v1349_v12, %v1345_v37  ;;  %v1435_v63 = vpack.c.bf16 %v1389_v38, %v1385_v5 }
 0x469   : > { %1423 = vst [vmem:[%s10813_s9 + $0x8] sm:$0xff] %v1412_v39  ;;  %1427 = vst [vmem:[%s10813_s9 + $0x28] sm:$0xff] %v1416_v40 }
 0x46a   : > { %1441 = vst [vmem:[%s10817_s11 + $0x8] sm:$0xff] %v1431_v13  ;;  %1445 = vst [vmem:[%s10817_s11 + $0x28] sm:$0xff] %v1435_v63  ;;  %v1352_v20 = vpop.f32.mrb[8].mxu0  ;;  %v1392_v28 = vpop.f32.mrb[8].mxu1 }
 0x46b   : > { %v1354_v41 = vpop.f32.mrb[9].mxu0  ;;  %v1394_v42 = vpop.f32.mrb[9].mxu1  ;;  %v1353_v47 = vadd.f32 %v1352_v20, %v10800_v1  ;;  %v1393_v35 = vadd.f32 %v1392_v28, %v10800_v1 }
 0x46c   : > { %v1356_v45 = vpop.f32.mrb[10].mxu0  ;;  %v1396_v46 = vpop.f32.mrb[10].mxu1  ;;  %v1355_v54 = vadd.f32 %v1354_v41, %v10802_v6  ;;  %v1395_v55 = vadd.f32 %v1394_v42, %v10802_v6 }
 0x46d   : > { %v1357_v48 = vadd.f32 %v1356_v45, %v10800_v1  ;;  %v1397_v49 = vadd.f32 %v1396_v46, %v10800_v1  ;;  %v1358_v50 = vpop.f32.mrb[11].mxu0  ;;  %v1398_v53 = vpop.f32.mrb[11].mxu1 }
 0x46e   : > { %v1359_v56 = vadd.f32 %v1358_v50, %v10802_v6  ;;  %v1399_v36 = vadd.f32 %v1398_v53, %v10802_v6 }
 0x46f   : > { %v1413_v57 = vpack.c.bf16 %v1357_v48, %v1353_v47  ;;  %v1417_v58 = vpack.c.bf16 %v1397_v49, %v1393_v35 }
 0x470   : > { %v1432_v59 = vpack.c.bf16 %v1359_v56, %v1355_v54  ;;  %v1436_v43 = vpack.c.bf16 %v1399_v36, %v1395_v55 }
 0x471   : > { %1424 = vst [vmem:[%s10813_s9 + $0x10] sm:$0xff] %v1413_v57  ;;  %1428 = vst [vmem:[%s10813_s9 + $0x30] sm:$0xff] %v1417_v58 }
 0x472   : > { %1442 = vst [vmem:[%s10817_s11 + $0x10] sm:$0xff] %v1432_v59  ;;  %1446 = vst [vmem:[%s10817_s11 + $0x30] sm:$0xff] %v1436_v43  ;;  %v1362_v62 = vpop.f32.mrb[12].mxu0  ;;  %v1402_v0 = vpop.f32.mrb[12].mxu1 }
 0x473   : > { %v1364_v2 = vpop.f32.mrb[13].mxu0  ;;  %v1404_v3 = vpop.f32.mrb[13].mxu1  ;;  %v1363_v44 = vadd.f32 %v1362_v62, %v10800_v1  ;;  %v1403_v9 = vadd.f32 %v1402_v0, %v10800_v1 }
 0x474   : > { %v1366_v7 = vpop.f32.mrb[14].mxu0  ;;  %v1406_v8 = vpop.f32.mrb[14].mxu1  ;;  %v1365_v17 = vadd.f32 %v1364_v2, %v10802_v6  ;;  %v1405_v18 = vadd.f32 %v1404_v3, %v10802_v6 }
 0x475   : > { %v1367_v51 = vadd.f32 %v1366_v7, %v10800_v1  ;;  %v1407_v10 = vadd.f32 %v1406_v8, %v10800_v1  ;;  %v1368_v11 = vpop.f32.mrb[15].mxu0  ;;  %v1408_v16 = vpop.f32.mrb[15].mxu1 }
 0x476   : > { %v1369_v19 = vadd.f32 %v1368_v11, %v10802_v6  ;;  %v1409_v14 = vadd.f32 %v1408_v16, %v10802_v6 }
 0x477   : > { %v1414_v52 = vpack.c.bf16 %v1367_v51, %v1363_v44  ;;  %v1418_v22 = vpack.c.bf16 %v1407_v10, %v1403_v9 }
 0x478   : > { %v1433_v15 = vpack.c.bf16 %v1369_v19, %v1365_v17  ;;  %v1437_v60 = vpack.c.bf16 %v1409_v14, %v1405_v18 }
 0x479   : > { %1425 = vst [vmem:[%s10813_s9 + $0x18] sm:$0xff] %v1414_v52  ;;  %1429 = vst [vmem:[%s10813_s9 + $0x38] sm:$0xff] %v1418_v22 }
 0x47a   : > { %1443 = vst [vmem:[%s10817_s11 + $0x18] sm:$0xff] %v1433_v15  ;;  %1447 = vst [vmem:[%s10817_s11 + $0x38] sm:$0xff] %v1437_v60 }
 0x47b PF: > { %s14856_s8 = sld [smem:[#allocation27_spill]]  ;;  %vm14618_vm1 = vcmask 261120   ;;  %v10858_v1 = vld [vmem:[#allocation3] sm:$0xff]  ;;  %v10922_v5 = vld [vmem:[#allocation3 + $0x8] sm:$0xff]  ;;  %v10924_v12 = vld [vmem:[#allocation3 + $0x10] sm:$0xff]  ;;  %v1469_v20 = vlaneseq  ;;  %v14860_v48 = vmov 0 }
 0x47c   : > { %8349 = vmatprep.mubr.msk.bf16.mxu0 %vm14618_vm1, %v10858_v1  ;;  %v10930_v38 = vld [vmem:[#allocation3 + $0x18] sm:$0xff]  ;;  %v10932_v39 = vld [vmem:[#allocation3 + $0x20] sm:$0xff]  ;;  %v10938_v40 = vld [vmem:[#allocation3 + $0x28] sm:$0xff]  ;;  %s1505_s3 = scalar_select %p7871_p6, 1, 0  ;;  %v14863_v49 = vmov 0 }
 0x47d   : > { %v10940_v13 = vld [vmem:[#allocation3 + $0x30] sm:$0xff]  ;;  %v10946_v63 = vld [vmem:[#allocation3 + $0x38] sm:$0xff]  ;;  %v10950_v28 = vshrl.u32 %v1469_v20, 7  ;;  %v10956_v42 = vand.u32 127, %v1469_v20  ;;  %v14866_v58 = vmov 0  ;;  %v14869_v62 = vmov 0 }
 0x47e   : > { %v1506_v45 = vstv %s1505_s3  ;;  %v14872_v7 = vmov 0  ;;  %v14875_v9 = vmov 0  ;;  %v14878_v11 = vmov 0  ;;  %s9959_s1 = smov 96   ;;  %s9960_s21 = smov 64  }
 0x47f   : > { %v1472_v41 = vadd.s32 16, %v10950_v28  ;;  %vm10959_vm3 = vcmp.eq.s32.totalorder %v1506_v45, 1  ;;  %v1473_v47 = vadd.s32 24, %v10950_v28  ;;  %vm1488_vm4 = vcmp.ge.s32.totalorder %v10950_v28, %v10956_v42  ;;  %s9961_s13 = smov 32  }
 0x480   : > { %v1471_v35 = vadd.s32 8, %v10950_v28  ;;  %vm10975_vm6 = vmor %vm1488_vm4, %vm10959_vm3  ;;  %v1476_v50 = vadd.s32 48, %v10950_v28  ;;  %v1477_v56 = vadd.s32 56, %v10950_v28  ;;  %v1474_v59 = vadd.s32 32, %v10950_v28 }
 0x481   : > { %s8011_s19 = sshll.u32 %s14856_s8, 6  ;;  %vm1490_vm2 = vcmp.ge.s32.totalorder %v1472_v41, %v10956_v42  ;;  %v14864_v49 = vsel %vm10975_vm6, 4294967295, %v14863_v49  ;;  %vm1491_vm7 = vcmp.ge.s32.totalorder %v1473_v47, %v10956_v42  ;;  %v1475_v0 = vadd.s32 40, %v10950_v28 }
 0x482   : > { %s10864_s4 = scalar_lea.vmem [#allocation7], %s8011_s19  ;;  %vm10969_vm5 = vmor %vm1490_vm2, %vm10959_vm3  ;;  %14865 = vst [vmem:[#allocation33_spill] sm:$0xff] %v14864_v49  ;;  %vm1489_vm8 = vcmp.ge.s32.totalorder %v1471_v35, %v10956_v42  ;;  %vm1494_vm11 = vcmp.ge.s32.totalorder %v1476_v50, %v10956_v42  ;;  %vm1495_vm12 = vcmp.ge.s32.totalorder %v1477_v56, %v10956_v42  ;;  %vm1492_vm14 = vcmp.ge.s32.totalorder %v1474_v59, %v10956_v42  ;;  %s11171_s12 = scalar_lea.vmem [#allocation8], %s8011_s19 }
 0x483   : > { %v10867_v6 = vld [vmem:[%s10864_s4] sm:$0xff]  ;;  %v10870_v23 = vld [vmem:[%s10864_s4 + $0x8] sm:$0xff]  ;;  %v10881_v25 = vld [vmem:[%s10864_s4 + $0x10] sm:$0xff]  ;;  %v14861_v48 = vsel %vm10969_vm5, 4294967295, %v14860_v48  ;;  %vm1493_vm15 = vcmp.ge.s32.totalorder %v1475_v0, %v10956_v42  ;;  %v1480_v8 = vadd.s32 80, %v10950_v28  ;;  %v1481_v16 = vadd.s32 88, %v10950_v28 }
 0x484   : > { %8669 = vmatprep.subr.msk.bf16.mxu0 %vm14618_vm1, %v10867_v6  ;;  %v1558_v27 = vsel %vm14618_vm1, %v10867_v6, 0  ;;  %v1561_v24 = vsel %vm14618_vm1, %v10870_v23, 0  ;;  %v1564_v26 = vsel %vm14618_vm1, %v10881_v25, 0  ;;  %v10888_v29 = vld [vmem:[%s10864_s4 + $0x18] sm:$0xff]  ;;  %v10895_v21 = vld [vmem:[%s10864_s4 + $0x20] sm:$0xff]  ;;  %v10902_v30 = vld [vmem:[%s10864_s4 + $0x28] sm:$0xff] }
 0x485   : > { %8334 = vmatpush3.bf16.xpose.msra.mxu0 %v1558_v27  ;;  %v1567_v61 = vsel %vm14618_vm1, %v10888_v29, 0  ;;  %v1570_v4 = vsel %vm14618_vm1, %v10895_v21, 0  ;;  %v1573_v31 = vsel %vm14618_vm1, %v10902_v30, 0  ;;  %v10909_v32 = vld [vmem:[%s10864_s4 + $0x30] sm:$0xff]  ;;  %v10916_v34 = vld [vmem:[%s10864_s4 + $0x38] sm:$0xff]  ;;  %14862 = vst [vmem:[#allocation32_spill] sm:$0xff] %v14861_v48  ;;  %vm10994_vm9 = vmor %vm1491_vm7, %vm10959_vm3  ;;  %vm1498_vm7 = vcmp.ge.s32.totalorder %v1480_v8, %v10956_v42 }
 0x486   : > { %8670 = vmatprep.subr.msk.bf16.mxu0 %vm14618_vm1, %v10870_v23  ;;  %v1576_v33 = vsel %vm14618_vm1, %v10909_v32, 0  ;;  %v1579_v37 = vsel %vm14618_vm1, %v10916_v34, 0  ;;  %v14867_v58 = vsel %vm10994_vm9, 4294967295, %v14866_v58  ;;  %vm11002_vm10 = vmor %vm1489_vm8, %vm10959_vm3  ;;  %v14881_v18 = vmov 0 }
 0x487   : > { %14868 = vst [vmem:[#allocation34_spill] sm:$0xff] %v14867_v58  ;;  %v14870_v62 = vsel %vm11002_vm10, 4294967295, %v14869_v62  ;;  %vm11020_vm13 = vmor %vm1494_vm11, %vm10959_vm3  ;;  %v1478_v19 = vadd.s32 64, %v10950_v28  ;;  %v1479_v22 = vadd.s32 72, %v10950_v28  ;;  %vm1499_vm8 = vcmp.ge.s32.totalorder %v1481_v16, %v10956_v42 }
 0x488   : > { %14871 = vst [vmem:[#allocation35_spill] sm:$0xff] %v14870_v62  ;;  %v14873_v7 = vsel %vm11020_vm13, 4294967295, %v14872_v7  ;;  %vm11030_vm0 = vmor %vm1495_vm12, %vm10959_vm3  ;;  %v14884_v27 = vmov 0  ;;  %v9958_v20 = vmov 0   ;;  %v14893_v45 = vmov 0 }
 0x489   : > { %14874 = vst [vmem:[#allocation36_spill] sm:$0xff] %v14873_v7  ;;  %v14876_v9 = vsel %vm11030_vm0, 4294967295, %v14875_v9  ;;  %vm11040_vm2 = vmor %vm1492_vm14, %vm10959_vm3  ;;  %vm1496_vm12 = vcmp.ge.s32.totalorder %v1478_v19, %v10956_v42  ;;  %vm1497_vm14 = vcmp.ge.s32.totalorder %v1479_v22, %v10956_v42  ;;  %8939 = vset.pattern.permute.xlu1 %v9958_v20  ;;  %8938 = vset.pattern.permute.xlu0 %v9958_v20  ;;  %v1482_v47 = vadd.s32 96, %v10950_v28  ;;  %v11174_v19 = vld [vmem:[%s11171_s12] sm:$0xff]  ;;  %v11183_v22 = vld [vmem:[%s11171_s12 + $0x10] sm:$0xff] }
 0x48a   : > { %14877 = vst [vmem:[#allocation37_spill] sm:$0xff] %v14876_v9  ;;  %v14879_v11 = vsel %vm11040_vm2, 4294967295, %v14878_v11  ;;  %vm11047_vm4 = vmor %vm1493_vm15, %vm10959_vm3  ;;  %v14899_v59 = vmov 0  ;;  %v14902_v8 = vmov 0  ;;  %8365 = vmatprep.subr.bf16.mxu1 %v11174_v19  ;;  %v12157_v7 = vld [vmem:[#allocation4 + $0x100] sm:$0xff] }
 0x48b   : > { %14880 = vst [vmem:[#allocation38_spill] sm:$0xff] %v14879_v11  ;;  %v14882_v18 = vsel %vm11047_vm4, 4294967295, %v14881_v18  ;;  %vm11071_vm11 = vmor %vm1498_vm7, %vm10959_vm3  ;;  %8366 = vmatpush3.bf16.msra.mxu1 %v11174_v19 }
 0x48c   : > { %14883 = vst [vmem:[#allocation39_spill] sm:$0xff] %v14882_v18  ;;  %v14885_v27 = vsel %vm11071_vm11, 4294967295, %v14884_v27  ;;  %vm11082_vm15 = vmor %vm1499_vm8, %vm10959_vm3 }
 0x48d   : > { %8336 = vmatpush3.bf16.xpose.msra.mxu0 %v1561_v24  ;;  %14886 = vst [vmem:[#allocation40_spill] sm:$0xff] %v14885_v27  ;;  %v1484_v24 = vadd.s32 112, %v10950_v28  ;;  %vm11092_vm7 = vmor %vm1496_vm12, %vm10959_vm3 }
 0x48e   : > { %8671 = vmatprep.subr.msk.bf16.mxu0 %vm14618_vm1, %v10881_v25  ;;  %vm11099_vm8 = vmor %vm1497_vm14, %vm10959_vm3 }
 0x48f   : > { %v14894_v45 = vsel %vm11099_vm8, 4294967295, %v14893_v45  ;;  %vm1502_vm12 = vcmp.ge.s32.totalorder %v1484_v24, %v10956_v42  ;;  %v11188_v24 = vld [vmem:[%s11171_s12 + $0x18] sm:$0xff] }
 0x490   : > { %14895 = vst [vmem:[#allocation43_spill] sm:$0xff] %v14894_v45 }
 0x495   : > { %8338 = vmatpush3.bf16.xpose.msra.mxu0 %v1564_v26 }
 0x496   : > { %8672 = vmatprep.subr.msk.bf16.mxu0 %vm14618_vm1, %v10888_v29 }
 0x49d   : > { %8340 = vmatpush3.bf16.xpose.msra.mxu0 %v1567_v61  ;;  %v14887_v61 = vmov 0 }
 0x49e   : > { %8673 = vmatprep.subr.msk.bf16.mxu0 %vm14618_vm1, %v10895_v21  ;;  %v14888_v61 = vsel %vm11082_vm15, 4294967295, %v14887_v61 }
 0x49f   : > { %14889 = vst [vmem:[#allocation41_spill] sm:$0xff] %v14888_v61 }
 0x4a5   : > { %8342 = vmatpush3.bf16.xpose.msra.mxu0 %v1570_v4 }
 0x4a6   : > { %8674 = vmatprep.subr.msk.bf16.mxu0 %vm14618_vm1, %v10902_v30 }
 0x4ad   : > { %8344 = vmatpush3.bf16.xpose.msra.mxu0 %v1573_v31 }
 0x4ae   : > { %8675 = vmatprep.subr.msk.bf16.mxu0 %vm14618_vm1, %v10909_v32 }
 0x4b5   : > { %8346 = vmatpush3.bf16.xpose.msra.mxu0 %v1576_v33  ;;  %v14890_v33 = vmov 0 }
 0x4b6   : > { %8676 = vmatprep.subr.msk.bf16.mxu0 %vm14618_vm1, %v10916_v34  ;;  %v14891_v33 = vsel %vm11092_vm7, 4294967295, %v14890_v33 }
 0x4b7   : > { %14892 = vst [vmem:[#allocation42_spill] sm:$0xff] %v14891_v33 }
 0x4bd   : > { %8348 = vmatpush3.bf16.xpose.msra.mxu0 %v1579_v37  ;;  %v1485_v37 = vadd.s32 120, %v10950_v28 }
 0x4bf   : > { %vm1503_vm14 = vcmp.ge.s32.totalorder %v1485_v37, %v10956_v42  ;;  %v11200_v37 = vld [vmem:[#allocation4] sm:$0xff] }
 0x4c0   : > { %14910 = vst [vmem:[#allocation50_spill] sm:$0xff] %v11200_v37 }
 0x4c4   : > { %8350 = vmatmul.mubr.msk.bf16.vlgmr.msra.gmra.mrb[0].mxu0 %vm14618_vm1, %v10922_v5 }
 0x4c5   : > { %8353 = vmatprep.mubr.msk.bf16.mxu0 %vm14618_vm1, %v10924_v12 }
 0x4cc   : > { %8354 = vmatmul.mubr.msk.bf16.gmra.mrb[4].mxu0 %vm14618_vm1, %v10930_v38 }
 0x4cd   : > { %8357 = vmatprep.mubr.msk.bf16.mxu0 %vm14618_vm1, %v10932_v39 }
 0x4d4   : > { %8358 = vmatmul.mubr.msk.bf16.gmra.mrb[8].mxu0 %vm14618_vm1, %v10938_v40 }
 0x4d5   : > { %8361 = vmatprep.mubr.msk.bf16.mxu0 %vm14618_vm1, %v10940_v13 }
 0x4dc   : > { %8362 = vmatmul.mubr.msk.bf16.gmra.mrb[12].mxu0 %vm14618_vm1, %v10946_v63  ;;  %vm11123_vm1 = vmor %vm1502_vm12, %vm10959_vm3 }
 0x597   : > { %v8351_v53 = vpop.f32.mrb[0].mxu0 }
 0x598   : > { %v1615_v54 = vpop.f32.mrb[1].mxu0  ;;  %v10984_v55 = vsel %vm10969_vm5, %v8351_v53, -10000.0  ;;  %v1483_v53 = vadd.s32 104, %v10950_v28 }
 0x599   : > { %1714 = vmax.xlane.f32.xlu1 %v10984_v55  ;;  %v8352_v36 = vpop.f32.mrb[2].mxu0  ;;  %v10990_v57 = vsel %vm10975_vm6, %v1615_v54, -10000.0 }
 0x59a   : > { %1710 = vmax.xlane.f32.xlu0 %v10990_v57  ;;  %v1618_v43 = vpop.f32.mrb[3].mxu0  ;;  %v11010_v2 = vsel %vm10994_vm9, %v8352_v36, -10000.0  ;;  %v14896_v36 = vmov 0 }
 0x59b   : > { %v11016_v3 = vsel %vm11002_vm10, %v1618_v43, -10000.0  ;;  %v14897_v36 = vsel %vm11123_vm1, 4294967295, %v14896_v36 }
 0x59c   : > { %14898 = vst [vmem:[#allocation44_spill] sm:$0xff] %v14897_v36 }
 0x59d   : > { %1716 = vmax.xlane.f32.xlu1 %v11010_v2 }
 0x59e   : > { %1712 = vmax.xlane.f32.xlu0 %v11016_v3 }
 0x59f   : > { %v8355_v44 = vpop.f32.mrb[4].mxu0 }
 0x5a0   : > { %v1631_v51 = vpop.f32.mrb[5].mxu0  ;;  %v11036_v10 = vsel %vm11020_vm13, %v8355_v44, -10000.0  ;;  %v14905_v44 = vmov 0 }
 0x5a1   : > { %v8356_v17 = vpop.f32.mrb[6].mxu0  ;;  %v11062_v15 = vsel %vm11040_vm2, %v1631_v51, -10000.0 }
 0x5a2   : > { %1722 = vmax.xlane.f32.xlu0 %v11036_v10  ;;  %v11055_v14 = vsel %vm11030_vm0, %v8356_v17, -10000.0  ;;  %v1634_v52 = vpop.f32.mrb[7].mxu0 }
 0x5a3   : > { %1724 = vmax.xlane.f32.xlu1 %v11055_v14  ;;  %v11066_v60 = vsel %vm11047_vm4, %v1634_v52, -10000.0  ;;  %v11177_v52 = vld [vmem:[%s11171_s12 + $0x8] sm:$0xff] }
 0x5a4   : > { %8367 = vmatprep.subr.bf16.mxu1 %v11177_v52 }
 0x5a5   : > { %8368 = vmatpush3.bf16.msra.mxu1 %v11177_v52 }
 0x5a6   : > { %1718 = vmax.xlane.f32.xlu0 %v11062_v15  ;;  %8369 = vmatprep.subr.bf16.mxu1 %v11183_v22 }
 0x5a7   : > { %1720 = vmax.xlane.f32.xlu1 %v11066_v60  ;;  %v8359_v26 = vpop.f32.mrb[8].mxu0 }
 0x5a8   : > { %v1647_v4 = vpop.f32.mrb[9].mxu0  ;;  %v11088_v31 = vsel %vm11071_vm11, %v8359_v26, -10000.0  ;;  %vm1501_vm11 = vcmp.ge.s32.totalorder %v1483_v53, %v10956_v42  ;;  %v11193_v26 = vld [vmem:[%s11171_s12 + $0x20] sm:$0xff]  ;;  %v11208_v53 = vld [vmem:[#allocation4 + $0x18] sm:$0xff] }
 0x5a9   : > { %v8360_v41 = vpop.f32.mrb[10].mxu0  ;;  %v11114_v54 = vsel %vm11092_vm7, %v1647_v4, -10000.0  ;;  %vm11149_vm7 = vmor %vm1501_vm11, %vm10959_vm3  ;;  %8370 = vmatpush3.bf16.msra.mxu1 %v11183_v22  ;;  %14908 = vst [vmem:[#allocation48_spill] sm:$0xff] %v11193_v26  ;;  %v11198_v4 = vld [vmem:[#allocation4 + $0x10] sm:$0xff]  ;;  %vm14933_vm11 = vcmask 261120  }
 0x5aa   : > { %1730 = vmax.xlane.f32.xlu0 %v11088_v31  ;;  %v11107_v35 = vsel %vm11082_vm15, %v8360_v41, -10000.0  ;;  %v1650_v50 = vpop.f32.mrb[11].mxu0  ;;  %vm1500_vm15 = vcmp.ge.s32.totalorder %v1482_v47, %v10956_v42  ;;  %v14906_v44 = vsel %vm11149_vm7, 4294967295, %v14905_v44  ;;  %8371 = vmatprep.subr.bf16.mxu1 %v11188_v24  ;;  %14909 = vst [vmem:[#allocation49_spill] sm:$0xff] %v11198_v4  ;;  %14913 = vst [vmem:[#allocation53_spill] sm:$0xff] %v11208_v53 }
 0x5ab   : > { %1732 = vmax.xlane.f32.xlu1 %v11107_v35  ;;  %v11118_v56 = vsel %vm11099_vm8, %v1650_v50, -10000.0  ;;  %vm11133_vm8 = vmor %vm1503_vm14, %vm10959_vm3  ;;  %14907 = vst [vmem:[#allocation47_spill] sm:$0xff] %v14906_v44 }
 0x5ac   : > { %v14900_v59 = vsel %vm11133_vm8, 4294967295, %v14899_v59  ;;  %vm11143_vm12 = vmor %vm1500_vm15, %vm10959_vm3  ;;  %vm14652_vm3 = vcmask 7168  }
 0x5ad   : > { %14901 = vst [vmem:[#allocation45_spill] sm:$0xff] %v14900_v59  ;;  %v14903_v8 = vsel %vm11143_vm12, 4294967295, %v14902_v8  ;;  %8372 = vmatpush3.bf16.msra.mxu1 %v11188_v24  ;;  %vm14934_vm15 = vmmov %vm14933_vm11 }
 0x5ae   : > { %1726 = vmax.xlane.f32.xlu0 %v11114_v54  ;;  %14904 = vst [vmem:[#allocation46_spill] sm:$0xff] %v14903_v8  ;;  %8373 = vmatprep.subr.bf16.mxu1 %v11193_v26  ;;  %vm14935_vm14 = vmmov %vm14933_vm11 }
 0x5af   : > { %1728 = vmax.xlane.f32.xlu1 %v11118_v56  ;;  %v8363_v28 = vpop.f32.mrb[12].mxu0 }
 0x5b0   : > { %v1663_v43 = vpop.f32.mrb[13].mxu0  ;;  %v11139_v0 = vsel %vm11123_vm1, %v8363_v28, -10000.0  ;;  %v11226_v28 = vld [vmem:[%s11171_s12 + $0x28] sm:$0xff] }
 0x5b1   : > { %v8364_v42 = vpop.f32.mrb[14].mxu0  ;;  %v11161_v17 = vsel %vm11143_vm12, %v1663_v43, -10000.0  ;;  %8374 = vmatpush3.bf16.msra.mxu1 %v11193_v26  ;;  %v11215_v43 = vld [vmem:[#allocation4 + $0x8] sm:$0xff]  ;;  %14916 = vst [vmem:[#allocation56_spill] sm:$0xff] %v11226_v28  ;;  %v11281_v26 = vld [vmem:[#allocation4 + $0x50] sm:$0xff] }
 0x5b2   : > { %v11155_v51 = vsel %vm11133_vm8, %v8364_v42, -10000.0  ;;  %v1666_v16 = vpop.f32.mrb[15].mxu0  ;;  %1738 = vmax.xlane.f32.xlu0 %v11139_v0  ;;  %14914 = vst [vmem:[#allocation54_spill] sm:$0xff] %v11215_v43  ;;  %8375 = vmatprep.subr.bf16.mxu1 %v11226_v28  ;;  %v11247_v42 = vld [vmem:[%s11171_s12 + $0x30] sm:$0xff]  ;;  %14926 = vst [vmem:[#allocation66_spill] sm:$0xff] %v11281_v26 }
 0x5b3   : > { %1740 = vmax.xlane.f32.xlu1 %v11155_v51  ;;  %v11165_v46 = vsel %vm11149_vm7, %v1666_v16, -10000.0  ;;  %14920 = vst [vmem:[#allocation60_spill] sm:$0xff] %v11247_v42 }
 0x5b5   : > { %8376 = vmatpush3.bf16.msra.mxu1 %v11226_v28 }
 0x5b6   : > { %1734 = vmax.xlane.f32.xlu0 %v11161_v17  ;;  %8377 = vmatprep.subr.bf16.mxu1 %v11247_v42 }
 0x5b7   : > { %1736 = vmax.xlane.f32.xlu1 %v11165_v46 }
 0x5b9   : > { %8378 = vmatpush3.bf16.msra.mxu1 %v11247_v42  ;;  %v11272_v42 = vld [vmem:[%s11171_s12 + $0x38] sm:$0xff] }
 0x5ba   : > { %14925 = vst [vmem:[#allocation65_spill] sm:$0xff] %v11272_v42  ;;  %8379 = vmatprep.subr.bf16.mxu1 %v11272_v42 }
 0x5bd   : > { %8380 = vmatpush3.bf16.msra.mxu1 %v11272_v42  ;;  %v11302_v42 = vld [vmem:[#allocation4 + $0x40] sm:$0xff] }
 0x5be   : > { %14929 = vst [vmem:[#allocation69_spill] sm:$0xff] %v11302_v42 }
 0x626   : > { %v1715_v20 = vpop.xlane.xlu1 %1714 }
 0x627   : > { %v11203_v41 = vmax.f32 %v11198_v4, %v1715_v20  ;;  %v1711_v47 = vpop.xlane.xlu0 %1710 }
 0x628   : > { %v11206_v50 = vmax.f32 %v11200_v37, %v1711_v47  ;;  %v11236_v37 = vld [vmem:[#allocation4 + $0x30] sm:$0xff] }
 0x629   : > { %14911 = vst [vmem:[#allocation51_spill] sm:$0xff] %v11203_v41  ;;  %2282 = vst.msk [vmem:[#allocation4 + $0x10] sm:$0xff] %vm14652_vm3, %v11203_v41  ;;  %1818 = vperm.xlu1 %8939, %v11203_v41  }
 0x62a   : > { %14912 = vst [vmem:[#allocation52_spill] sm:$0xff] %v11206_v50  ;;  %2280 = vst.msk [vmem:[#allocation4] sm:$0xff] %vm14652_vm3, %v11206_v50  ;;  %v1717_v16 = vpop.xlane.xlu1 %1716  ;;  %1808 = vperm.xlu0 %8938, %v11206_v50  }
 0x62b   : > { %v11223_v20 = vmax.f32 %v11208_v53, %v1717_v16  ;;  %v1713_v47 = vpop.xlane.xlu0 %1712  ;;  %14918 = vst [vmem:[#allocation58_spill] sm:$0xff] %v11236_v37  ;;  %v11256_v16 = vld [vmem:[#allocation4 + $0x20] sm:$0xff] }
 0x62c   : > { %v11229_v41 = vmax.f32 %v11215_v43, %v1713_v47  ;;  %v11244_v47 = vld [vmem:[#allocation4 + $0x38] sm:$0xff]  ;;  %14923 = vst [vmem:[#allocation63_spill] sm:$0xff] %v11256_v16 }
 0x62d   : > { %14915 = vst [vmem:[#allocation55_spill] sm:$0xff] %v11223_v20  ;;  %2283 = vst.msk [vmem:[#allocation4 + $0x18] sm:$0xff] %vm14652_vm3, %v11223_v20 }
 0x62e   : > { %14917 = vst [vmem:[#allocation57_spill] sm:$0xff] %v11229_v41  ;;  %2281 = vst.msk [vmem:[#allocation4 + $0x8] sm:$0xff] %vm14652_vm3, %v11229_v41  ;;  %1813 = vperm.xlu1 %8939, %v11229_v41  }
 0x62f   : > { %14919 = vst [vmem:[#allocation59_spill] sm:$0xff] %v11244_v47  ;;  %v1723_v50 = vpop.xlane.xlu0 %1722 }
 0x630   : > { %v11250_v53 = vmax.f32 %v11236_v37, %v1723_v50  ;;  %v1725_v4 = vpop.xlane.xlu1 %1724  ;;  %v11264_v50 = vld [vmem:[#allocation4 + $0x28] sm:$0xff] }
 0x631   : > { %v11254_v28 = vmax.f32 %v11244_v47, %v1725_v4  ;;  %14924 = vst [vmem:[#allocation64_spill] sm:$0xff] %v11264_v50 }
 0x632   : > { %14921 = vst [vmem:[#allocation61_spill] sm:$0xff] %v11250_v53  ;;  %2286 = vst.msk [vmem:[#allocation4 + $0x30] sm:$0xff] %vm14652_vm3, %v11250_v53  ;;  %1823 = vperm.xlu1 %8939, %v11223_v20  }
 0x633   : > { %14922 = vst [vmem:[#allocation62_spill] sm:$0xff] %v11254_v28  ;;  %2287 = vst.msk [vmem:[#allocation4 + $0x38] sm:$0xff] %vm14652_vm3, %v11254_v28  ;;  %v1719_v4 = vpop.xlane.xlu0 %1718  ;;  %1843 = vperm.xlu0 %8938, %v11254_v28  }
 0x634   : > { %v11275_v41 = vmax.f32 %v11256_v16, %v1719_v4  ;;  %v1721_v37 = vpop.xlane.xlu1 %1720  ;;  %v11290_v4 = vld [vmem:[#allocation4 + $0x58] sm:$0xff] }
 0x635   : > { %v11279_v20 = vmax.f32 %v11264_v50, %v1721_v37  ;;  %14927 = vst [vmem:[#allocation67_spill] sm:$0xff] %v11290_v4  ;;  %v11311_v37 = vld [vmem:[#allocation4 + $0x48] sm:$0xff] }
 0x636   : > { %2284 = vst.msk [vmem:[#allocation4 + $0x20] sm:$0xff] %vm14652_vm3, %v11275_v41  ;;  %2336 = vrot.lane.b32.xlu1 %v10867_v6, %s9959_s1  ;;  %14930 = vst [vmem:[#allocation70_spill] sm:$0xff] %v11311_v37 }
 0x637   : > { %2285 = vst.msk [vmem:[#allocation4 + $0x28] sm:$0xff] %vm14652_vm3, %v11279_v20  ;;  %v1731_v28 = vpop.xlane.xlu0 %1730 }
 0x638   : > { %v11297_v47 = vmax.f32 %v11281_v26, %v1731_v28  ;;  %v1733_v43 = vpop.xlane.xlu1 %1732  ;;  %v11332_v28 = vld [vmem:[#allocation4 + $0x78] sm:$0xff] }
 0x639   : > { %v11300_v16 = vmax.f32 %v11290_v4, %v1733_v43 }
 0x63a   : > { %14928 = vst [vmem:[#allocation68_spill] sm:$0xff] %v11297_v47  ;;  %2290 = vst.msk [vmem:[#allocation4 + $0x50] sm:$0xff] %vm14652_vm3, %v11297_v47  ;;  %1858 = vperm.xlu0 %8938, %v11297_v47   ;;  %2338 = vrot.lane.b32.xlu1 %v10870_v23, %s9959_s1  ;;  %v11323_v47 = vld [vmem:[#allocation4 + $0x70] sm:$0xff] }
 0x63b   : > { %2291 = vst.msk [vmem:[#allocation4 + $0x58] sm:$0xff] %vm14652_vm3, %v11300_v16  ;;  %v1727_v43 = vpop.xlane.xlu0 %1726 }
 0x63c   : > { %v11318_v50 = vmax.f32 %v11302_v42, %v1727_v43  ;;  %v1729_v6 = vpop.xlane.xlu1 %1728 }
 0x63d   : > { %v11321_v26 = vmax.f32 %v11311_v37, %v1729_v6 }
 0x63e   : > { %14931 = vst [vmem:[#allocation71_spill] sm:$0xff] %v11318_v50  ;;  %2288 = vst.msk [vmem:[#allocation4 + $0x40] sm:$0xff] %vm14652_vm3, %v11318_v50  ;;  %1848 = vperm.xlu0 %8938, %v11318_v50   ;;  %2340 = vrot.lane.b32.xlu1 %v10881_v25, %s9959_s1  ;;  %v11344_v50 = vld [vmem:[#allocation4 + $0x60] sm:$0xff]  ;;  %v11349_v25 = vld [vmem:[#allocation4 + $0x68] sm:$0xff] }
 0x63f   : > { %2289 = vst.msk [vmem:[#allocation4 + $0x48] sm:$0xff] %vm14652_vm3, %v11321_v26  ;;  %v1739_v6 = vpop.xlane.xlu0 %1738 }
 0x640   : > { %v1741_v4 = vpop.xlane.xlu1 %1740  ;;  %v11339_v23 = vmax.f32 %v11323_v47, %v1739_v6 }
 0x641   : > { %v11342_v42 = vmax.f32 %v11332_v28, %v1741_v4 }
 0x642   : > { %1838 = vperm.xlu1 %8939, %v11250_v53   ;;  %2342 = vrot.lane.b32.xlu0 %v10888_v29, %s9959_s1  ;;  %2294 = vst.msk [vmem:[#allocation4 + $0x70] sm:$0xff] %vm14652_vm3, %v11339_v23 }
 0x643   : > { %14932 = vst [vmem:[#allocation72_spill] sm:$0xff] %v11342_v42  ;;  %2295 = vst.msk [vmem:[#allocation4 + $0x78] sm:$0xff] %vm14652_vm3, %v11342_v42  ;;  %v1735_v4 = vpop.xlane.xlu0 %1734 }
 0x644   : > { %v1737_v37 = vpop.xlane.xlu1 %1736  ;;  %v11360_v53 = vmax.f32 %v11344_v50, %v1735_v4 }
 0x645   : > { %v11363_v29 = vmax.f32 %v11349_v25, %v1737_v37 }
 0x646   : > { %1828 = vperm.xlu1 %8939, %v11275_v41   ;;  %2292 = vst.msk [vmem:[#allocation4 + $0x60] sm:$0xff] %vm14652_vm3, %v11360_v53 }
 0x647   : > { %2293 = vst.msk [vmem:[#allocation4 + $0x68] sm:$0xff] %vm14652_vm3, %v11363_v29  ;;  %1873 = vperm.xlu0 %8938, %v11363_v29   ;;  %vm14943_vm3 = vmmov %vm14933_vm11 }
 0x648   : > { %vm14944_vm7 = vmmov %vm14943_vm3 }
 0x649   : > { %vm14946_vm12 = vmmov %vm14943_vm3 }
 0x64a   : > { %1833 = vperm.xlu1 %8939, %v11279_v20   ;;  %vm14947_vm8 = vmmov %vm14943_vm3 }
 0x64b   : > { %1883 = vperm.xlu0 %8938, %v11342_v42  }
 0x64e   : > { %1863 = vperm.xlu1 %8939, %v11300_v16  }
 0x64f   : > { %2346 = vrot.lane.b32.xlu0 %v10902_v30, %s9959_s1 }
 0x652   : > { %1853 = vperm.xlu1 %8939, %v11321_v26  }
 0x653   : > { %2350 = vrot.lane.b32.xlu0 %v10916_v34, %s9959_s1 }
 0x656   : > { %1878 = vperm.xlu1 %8939, %v11339_v23  }
 0x657   : > { %2314 = vrot.lane.b32.xlu0 %v10922_v5, %s9959_s1 }
 0x65a   : > { %1868 = vperm.xlu1 %8939, %v11360_v53  }
 0x65b   : > { %2318 = vrot.lane.b32.xlu0 %v10930_v38, %s9959_s1 }
 0x65e   : > { %2344 = vrot.lane.b32.xlu1 %v10895_v21, %s9959_s1 }
 0x65f   : > { %2322 = vrot.lane.b32.xlu0 %v10938_v40, %s9959_s1 }
 0x662   : > { %2348 = vrot.lane.b32.xlu1 %v10909_v32, %s9959_s1 }
 0x663   : > { %2326 = vrot.lane.b32.xlu0 %v10946_v63, %s9959_s1 }
 0x666   : > { %2312 = vrot.lane.b32.xlu1 %v10858_v1, %s9959_s1 }
 0x667   : > { %2979 = vrot.lane.b32.xlu0 %v11174_v19, %s9959_s1 }
 0x66a   : > { %2316 = vrot.lane.b32.xlu1 %v10924_v12, %s9959_s1 }
 0x66e   : > { %2320 = vrot.lane.b32.xlu1 %v10932_v39, %s9959_s1 }
 0x672   : > { %2324 = vrot.lane.b32.xlu1 %v10940_v13, %s9959_s1 }
 0x676   : > { %2981 = vrot.lane.b32.xlu1 %v11177_v52, %s9959_s1 }
 0x6a8   : > { %v1819_v21 = vpop.permute.xlu1 %1818 }
 0x6a9   : > { %v1809_v30 = vpop.permute.xlu0 %1808  ;;  %v1888_v1 = vsub.f32 %v10984_v55, %v1819_v21 }
 0x6aa   : > { %v1886_v32 = vsub.f32 %v10990_v57, %v1809_v30 }
 0x6ab   : > { %v1906_v40 = vmul.f32 1.442695, %v1888_v1 }
 0x6ac   : > { %v1902_v34 = vmul.f32 1.442695, %v1886_v32 }
 0x6ad   : > { %v1814_v5 = vpop.permute.xlu1 %1813 }
 0x6ae   : > { %v1887_v38 = vsub.f32 %v11016_v3, %v1814_v5  ;;  %8940 = vpow2.f32 %v1902_v34 }
 0x6b0   : > { %v1904_v12 = vmul.f32 1.442695, %v1887_v38 }
 0x6b1   : > { %v1824_v39 = vpop.permute.xlu1 %1823 }
 0x6b2   : > { %8942 = vpow2.f32 %v1904_v12  ;;  %v1889_v13 = vsub.f32 %v11010_v2, %v1824_v39  ;;  %v1844_v57 = vpop.permute.xlu0 %1843 }
 0x6b3   : > { %8944 = vpow2.f32 %v1906_v40  ;;  %v1893_v39 = vsub.f32 %v11055_v14, %v1844_v57 }
 0x6b4   : > { %v1908_v63 = vmul.f32 1.442695, %v1889_v13 }
 0x6b5   : > { %v2337_v19 = vpop.permute.xlu1 %2336  ;;  %v1916_v42 = vmul.f32 1.442695, %v1893_v39 }
 0x6b6   : > { %8946 = vpow2.f32 %v1908_v63  ;;  %8677 = vmatprep.subr.msk.bf16.mxu1 %vm14933_vm11, %v2337_v19  ;;  %v2377_v5 = vsel %vm14934_vm15, %v2337_v19, 0  ;;  %vm14936_vm15 = vmmov %vm14933_vm11 }
 0x6b8   : > { %v11414_v55 = vpop.eup %8940 }
 0x6b9   : > { %v2339_v52 = vpop.permute.xlu1 %2338  ;;  %v1859_v3 = vpop.permute.xlu0 %1858 }
 0x6bc   : > { %v11416_v37 = vpop.eup %8942 }
 0x6bd   : > { %v2341_v4 = vpop.permute.xlu1 %2340  ;;  %v2143_v21 = vpack.c.bf16 %v11416_v37, %v11414_v55  ;;  %v11420_v30 = vpop.eup %8944 }
 0x6be   : > { %v1849_v34 = vpop.permute.xlu0 %1848 }
 0x6bf   : > { %8381 = vmatprep.mubr.bf16.mxu1 %v2143_v21  ;;  %v1894_v19 = vsub.f32 %v11114_v54, %v1849_v34 }
 0x6c0   : > { %v11422_v2 = vpop.eup %8946 }
 0x6c1   : > { %v1839_v32 = vpop.permute.xlu1 %1838  ;;  %v2144_v1 = vpack.c.bf16 %v11422_v2, %v11420_v30 }
 0x6c2   : > { %v1892_v38 = vsub.f32 %v11036_v10, %v1839_v32  ;;  %v2343_v63 = vpop.permute.xlu0 %2342  ;;  %v1896_v32 = vsub.f32 %v11088_v31, %v1859_v3 }
 0x6c3   : > { %8382 = vmatmul.mubr.bf16.vlgmr.msra.gmra.mrb[0].mxu1 %v2144_v1  ;;  %v2380_v1 = vsel %vm14933_vm11, %v2339_v52, 0 }
 0x6c4   : > { %8398 = vmatpush3.bf16.xpose.msra.mxu1 %v2377_v5  ;;  %v1914_v13 = vmul.f32 1.442695, %v1892_v38 }
 0x6c5   : > { %8678 = vmatprep.subr.msk.bf16.mxu1 %vm14935_vm14, %v2339_v52  ;;  %v1829_v12 = vpop.permute.xlu1 %1828  ;;  %vm14937_vm14 = vmmov %vm14933_vm11 }
 0x6c6   : > { %v1890_v40 = vsub.f32 %v11062_v15, %v1829_v12  ;;  %8948 = vpow2.f32 %v1914_v13  ;;  %v1874_v57 = vpop.permute.xlu0 %1873  ;;  %v2383_v54 = vsel %vm14937_vm14, %v2341_v4, 0  ;;  %vm14939_vm14 = vmmov %vm14933_vm11 }
 0x6c7   : > { %v1899_v34 = vsub.f32 %v11165_v46, %v1874_v57 }
 0x6c8   : > { %v1910_v21 = vmul.f32 1.442695, %v1890_v40 }
 0x6c9   : > { %v1834_v6 = vpop.permute.xlu1 %1833 }
 0x6ca   : > { %v1891_v43 = vsub.f32 %v11066_v60, %v1834_v6  ;;  %8950 = vpow2.f32 %v1910_v21  ;;  %v1918_v60 = vmul.f32 1.442695, %v1894_v19  ;;  %v1884_v12 = vpop.permute.xlu0 %1883 }
 0x6cb   : > { %v1901_v46 = vsub.f32 %v11155_v51, %v1884_v12 }
 0x6cc   : > { %v1912_v10 = vmul.f32 1.442695, %v1891_v43  ;;  %8400 = vmatpush3.bf16.xpose.msra.mxu1 %v2380_v1  ;;  %v1922_v43 = vmul.f32 1.442695, %v1896_v32 }
 0x6cd   : > { %8679 = vmatprep.subr.msk.bf16.mxu1 %vm14936_vm15, %v2341_v4  ;;  %v1864_v15 = vpop.permute.xlu1 %1863  ;;  %v1928_v4 = vmul.f32 1.442695, %v1899_v34  ;;  %vm14938_vm15 = vmmov %vm14933_vm11 }
 0x6ce   : > { %8952 = vpow2.f32 %v1912_v10  ;;  %v1897_v14 = vsub.f32 %v11107_v35, %v1864_v15  ;;  %v1932_v10 = vmul.f32 1.442695, %v1901_v46 }
 0x6cf   : > { %8954 = vpow2.f32 %v1916_v42 }
 0x6d0   : > { %v1924_v6 = vmul.f32 1.442695, %v1897_v14  ;;  %8956 = vpow2.f32 %v1918_v60  ;;  %v11441_v42 = vpop.eup %8948 }
 0x6d1   : > { %v1854_v52 = vpop.permute.xlu1 %1853 }
 0x6d2   : > { %v1895_v5 = vsub.f32 %v11118_v56, %v1854_v52  ;;  %8958 = vpow2.f32 %v1924_v6  ;;  %v2347_v6 = vpop.permute.xlu0 %2346 }
 0x6d4   : > { %v1920_v38 = vmul.f32 1.442695, %v1895_v5  ;;  %8402 = vmatpush3.bf16.xpose.msra.mxu1 %v2383_v54  ;;  %v11444_v3 = vpop.eup %8950 }
 0x6d5   : > { %8680 = vmatprep.subr.msk.bf16.mxu1 %vm14933_vm11, %v2343_v63  ;;  %v1879_v35 = vpop.permute.xlu1 %1878 }
 0x6d6   : > { %8960 = vpow2.f32 %v1920_v38  ;;  %v1900_v31 = vsub.f32 %v11139_v0, %v1879_v35  ;;  %v2386_v0 = vsel %vm14938_vm15, %v2343_v63, 0  ;;  %vm14940_vm15 = vmmov %vm14933_vm11 }
 0x6d7   : > { %8962 = vpow2.f32 %v1922_v43 }
 0x6d8   : > { %v11446_v56 = vpop.eup %8952  ;;  %v1930_v40 = vmul.f32 1.442695, %v1900_v31  ;;  %8964 = vpow2.f32 %v1928_v4 }
 0x6d9   : > { %v1869_v39 = vpop.permute.xlu1 %1868  ;;  %v2145_v13 = vpack.c.bf16 %v11446_v56, %v11444_v3  ;;  %v11451_v21 = vpop.eup %8954 }
 0x6da   : > { %v1898_v1 = vsub.f32 %v11161_v17, %v1869_v39  ;;  %v2146_v19 = vpack.c.bf16 %v11451_v21, %v11441_v42  ;;  %8966 = vpow2.f32 %v1930_v40  ;;  %v11457_v14 = vpop.eup %8956  ;;  %v2351_v40 = vpop.permute.xlu0 %2350 }
 0x6db   : > { %8385 = vmatprep.mubr.bf16.mxu1 %v2145_v13 }
 0x6dc   : > { %v1926_v15 = vmul.f32 1.442695, %v1898_v1  ;;  %8404 = vmatpush3.bf16.xpose.msra.mxu1 %v2386_v0  ;;  %v11460_v57 = vpop.eup %8958 }
 0x6dd   : > { %8386 = vmatmul.mubr.bf16.gmra.mrb[4].mxu1 %v2146_v19  ;;  %v2345_v51 = vpop.permute.xlu1 %2344 }
 0x6de   : > { %8968 = vpow2.f32 %v1926_v15  ;;  %8681 = vmatprep.subr.msk.bf16.mxu1 %vm14939_vm14, %v2345_v51  ;;  %v2389_v32 = vsel %vm14933_vm11, %v2345_v51, 0  ;;  %vm14941_vm14 = vmmov %vm14933_vm11  ;;  %v2315_v13 = vpop.permute.xlu0 %2314 }
 0x6df   : > { %8970 = vpow2.f32 %v1932_v10  ;;  %v2392_v12 = vsel %vm14941_vm14, %v2347_v6, 0  ;;  %vm14945_vm14 = vmmov %vm14943_vm3 }
 0x6e0   : > { %v11462_v17 = vpop.eup %8960  ;;  %v2398_v39 = vsel %vm14945_vm14, %v2351_v40, 0  ;;  %vm14951_vm14 = vmmov %vm14943_vm3 }
 0x6e1   : > { %v2147_v63 = vpack.c.bf16 %v11462_v17, %v11457_v14  ;;  %v11467_v60 = vpop.eup %8962  ;;  %v2349_v43 = vpop.permute.xlu1 %2348 }
 0x6e2   : > { %v2148_v52 = vpack.c.bf16 %v11460_v57, %v11467_v60  ;;  %v11472_v5 = vpop.eup %8964  ;;  %v2395_v46 = vsel %vm14943_vm3, %v2349_v43, 0  ;;  %v2319_v0 = vpop.permute.xlu0 %2318 }
 0x6e3   : > { %8389 = vmatprep.mubr.bf16.mxu1 %v2147_v63 }
 0x6e4   : > { %8406 = vmatpush3.bf16.xpose.msra.mxu1 %v2389_v32  ;;  %v11474_v54 = vpop.eup %8966 }
 0x6e5   : > { %8390 = vmatmul.mubr.bf16.gmra.mrb[8].mxu1 %v2148_v52  ;;  %8682 = vmatprep.subr.msk.bf16.mxu1 %vm14940_vm15, %v2347_v6  ;;  %v2313_v4 = vpop.permute.xlu1 %2312  ;;  %vm14942_vm15 = vmmov %vm14933_vm11 }
 0x6e6   : > { %v2323_v10 = vpop.permute.xlu0 %2322 }
 0x6e8   : > { %v11476_v34 = vpop.eup %8968 }
 0x6e9   : > { %v2149_v38 = vpack.c.bf16 %v11472_v5, %v11476_v34  ;;  %v11481_v35 = vpop.eup %8970  ;;  %v2317_v1 = vpop.permute.xlu1 %2316 }
 0x6ea   : > { %v2150_v31 = vpack.c.bf16 %v11481_v35, %v11474_v54  ;;  %v2327_v51 = vpop.permute.xlu0 %2326 }
 0x6eb   : > { %8393 = vmatprep.mubr.bf16.mxu1 %v2149_v38 }
 0x6ec   : > { %8408 = vmatpush3.bf16.xpose.msra.mxu1 %v2392_v12 }
 0x6ed   : > { %8394 = vmatmul.mubr.bf16.gmra.mrb[12].mxu1 %v2150_v31  ;;  %8683 = vmatprep.subr.msk.bf16.mxu1 %vm14933_vm11, %v2349_v43  ;;  %v2321_v19 = vpop.permute.xlu1 %2320  ;;  %vm14948_vm11 = vmmov %vm14943_vm3 }
 0x6ee   : > { %8413 = vmatprep.mubr.msk.bf16.mxu1 %vm14942_vm15, %v2313_v4  ;;  %vm14949_vm15 = vmmov %vm14943_vm3  ;;  %v2980_v43 = vpop.permute.xlu0 %2979 }
 0x6ef   : > { %8429 = vmatprep.subr.bf16.mxu0 %v2980_v43 }
 0x6f0   : > { %8430 = vmatpush3.bf16.msra.mxu0 %v2980_v43 }
 0x6f1   : > { %v2325_v15 = vpop.permute.xlu1 %2324 }
 0x6f4   : > { %8410 = vmatpush3.bf16.xpose.msra.mxu1 %v2395_v46 }
 0x6f5   : > { %8684 = vmatprep.subr.msk.bf16.mxu1 %vm14944_vm7, %v2351_v40  ;;  %vm14950_vm7 = vmmov %vm14943_vm3  ;;  %v2982_v38 = vpop.permute.xlu1 %2981 }
 0x6f6   : > { %8431 = vmatprep.subr.bf16.mxu0 %v2982_v38 }
 0x6f7   : > { %8432 = vmatpush3.bf16.msra.mxu0 %v2982_v38 }
 0x6fc   : > { %8412 = vmatpush3.bf16.xpose.msra.mxu1 %v2398_v39 }
 0x703   : > { %8414 = vmatmul.mubr.msk.bf16.vlgmr.msra.gmra.mrb[16].mxu1 %vm14946_vm12, %v2315_v13  ;;  %vm14966_vm12 = vnez %v14888_v61 }
 0x704   : > { %8417 = vmatprep.mubr.msk.bf16.mxu1 %vm14947_vm8, %v2317_v1  ;;  %vm14965_vm8 = vnez %v14885_v27 }
 0x70b   : > { %8418 = vmatmul.mubr.msk.bf16.gmra.mrb[20].mxu1 %vm14948_vm11, %v2319_v0  ;;  %vm14967_vm11 = vnez %v14891_v33 }
 0x70c   : > { %8421 = vmatprep.mubr.msk.bf16.mxu1 %vm14949_vm15, %v2321_v19  ;;  %vm14968_vm15 = vnez %v14894_v45 }
 0x713   : > { %8422 = vmatmul.mubr.msk.bf16.gmra.mrb[24].mxu1 %vm14943_vm3, %v2323_v10  ;;  %vm14969_vm3 = vnez %v14900_v59 }
 0x714   : > { %8425 = vmatprep.mubr.msk.bf16.mxu1 %vm14950_vm7, %v2325_v15  ;;  %vm14970_vm7 = vnez %v14903_v8  ;;  %v11623_v8 = vld [vmem:[#allocation4 + $0x88] sm:$0xff] }
 0x715   : > { %14976 = vst [vmem:[#allocation90_spill] sm:$0xff] %v11623_v8 }
 0x71b   : > { %8426 = vmatmul.mubr.msk.bf16.gmra.mrb[28].mxu1 %vm14951_vm14, %v2327_v51  ;;  %vm14971_vm14 = vnez %v14906_v44  ;;  %v11630_v44 = vld [vmem:[#allocation4 + $0x98] sm:$0xff] }
 0x71c   : > { %14978 = vst [vmem:[#allocation91_spill] sm:$0xff] %v11630_v44 }
 0x796   : > { %v11497_v63 = vpop.f32.mrb[0].mxu1 }
 0x797   : > { %v11499_v32 = vpop.f32.mrb[1].mxu1 }
 0x798   : > { %v11501_v6 = vpop.f32.mrb[2].mxu1 }
 0x799   : > { %14952 = vst [vmem:[#allocation73_spill] sm:$0xff] %v11501_v6  ;;  %v11503_v52 = vpop.f32.mrb[3].mxu1 }
 0x7b0   : > { %v11505_v12 = vpop.f32.mrb[4].mxu1 }
 0x7b1   : > { %14953 = vst [vmem:[#allocation74_spill] sm:$0xff] %v11505_v12  ;;  %v11507_v31 = vpop.f32.mrb[5].mxu1 }
 0x7b2   : > { %14954 = vst [vmem:[#allocation75_spill] sm:$0xff] %v11507_v31  ;;  %v11509_v4 = vpop.f32.mrb[6].mxu1 }
 0x7b3   : > { %14955 = vst [vmem:[#allocation76_spill] sm:$0xff] %v11509_v4  ;;  %v11511_v46 = vpop.f32.mrb[7].mxu1 }
 0x7b4   : > { %14956 = vst [vmem:[#allocation77_spill] sm:$0xff] %v11511_v46 }
 0x7b8   : > { %v11513_v40 = vpop.f32.mrb[8].mxu1 }
 0x7b9   : > { %14957 = vst [vmem:[#allocation78_spill] sm:$0xff] %v11513_v40  ;;  %v11515_v39 = vpop.f32.mrb[9].mxu1 }
 0x7ba   : > { %14958 = vst [vmem:[#allocation79_spill] sm:$0xff] %v11515_v39  ;;  %v11517_v13 = vpop.f32.mrb[10].mxu1 }
 0x7bb   : > { %14959 = vst [vmem:[#allocation80_spill] sm:$0xff] %v11517_v13  ;;  %v11519_v1 = vpop.f32.mrb[11].mxu1 }
 0x7bc   : > { %14960 = vst [vmem:[#allocation81_spill] sm:$0xff] %v11519_v1 }
 0x7c0   : > { %v11521_v0 = vpop.f32.mrb[12].mxu1 }
 0x7c1   : > { %14961 = vst [vmem:[#allocation82_spill] sm:$0xff] %v11521_v0  ;;  %v11523_v19 = vpop.f32.mrb[13].mxu1 }
 0x7c2   : > { %14962 = vst [vmem:[#allocation83_spill] sm:$0xff] %v11523_v19  ;;  %v11525_v10 = vpop.f32.mrb[14].mxu1 }
 0x7c3   : > { %14963 = vst [vmem:[#allocation84_spill] sm:$0xff] %v11525_v10  ;;  %v11527_v15 = vpop.f32.mrb[15].mxu1 }
 0x7c4   : > { %14964 = vst [vmem:[#allocation85_spill] sm:$0xff] %v11527_v15 }
 0x7d6   : > { %v8415_v51 = vpop.f32.mrb[16].mxu1 }
 0x7d7   : > { %v2434_v43 = vpop.f32.mrb[17].mxu1  ;;  %v11531_v38 = vsel %vm10969_vm5, %v8415_v51, -10000.0 }
 0x7d8   : > { %2534 = vmax.xlane.f32.xlu0 %v11531_v38  ;;  %v8416_v40 = vpop.f32.mrb[18].mxu1  ;;  %v11536_v39 = vsel %vm10975_vm6, %v2434_v43, -10000.0 }
 0x7d9   : > { %2530 = vmax.xlane.f32.xlu1 %v11536_v39  ;;  %v2437_v0 = vpop.f32.mrb[19].mxu1  ;;  %v11546_v51 = vsel %vm10994_vm9, %v8416_v40, -10000.0 }
 0x7da   : > { %v11541_v19 = vsel %vm11002_vm10, %v2437_v0, -10000.0 }
 0x7dc   : > { %2532 = vmax.xlane.f32.xlu0 %v11541_v19 }
 0x7dd   : > { %2536 = vmax.xlane.f32.xlu1 %v11546_v51 }
 0x7de   : > { %v8419_v10 = vpop.f32.mrb[20].mxu1 }
 0x7df   : > { %v2450_v15 = vpop.f32.mrb[21].mxu1  ;;  %v11555_v40 = vsel %vm11020_vm13, %v8419_v10, -10000.0 }
 0x7e0   : > { %v8420_v13 = vpop.f32.mrb[22].mxu1 }
 0x7e1   : > { %v2453_v43 = vpop.f32.mrb[23].mxu1  ;;  %v11560_v49 = vsel %vm11030_vm0, %v8420_v13, -10000.0 }
 0x7e6   : > { %v8423_v12 = vpop.f32.mrb[24].mxu1 }
 0x7e7   : > { %v2466_v1 = vpop.f32.mrb[25].mxu1  ;;  %v11575_v10 = vsel %vm14965_vm8, %v8423_v12, -10000.0 }
 0x7e8   : > { %v8424_v31 = vpop.f32.mrb[26].mxu1 }
 0x7e9   : > { %v2469_v4 = vpop.f32.mrb[27].mxu1  ;;  %v11580_v13 = vsel %vm14966_vm12, %v8424_v31, -10000.0 }
 0x7ee   : > { %2983 = vrot.lane.b32.xlu1 %v11183_v22, %s9959_s1  ;;  %v8427_v0 = vpop.f32.mrb[28].mxu1  ;;  %v11565_v22 = vsel %vm11040_vm2, %v2450_v15, -10000.0  ;;  %v11585_v15 = vsel %vm14967_vm11, %v2466_v1, -10000.0 }
 0x7ef   : > { %v2482_v46 = vpop.f32.mrb[29].mxu1  ;;  %v11595_v12 = vsel %vm11123_vm1, %v8427_v0, -10000.0  ;;  %v11613_v0 = vld [vmem:[#allocation4 + $0x90] sm:$0xff] }
 0x7f0   : > { %v8428_v6 = vpop.f32.mrb[30].mxu1  ;;  %v11605_v1 = vsel %vm14970_vm7, %v2482_v46, -10000.0  ;;  %14972 = vst [vmem:[#allocation86_spill] sm:$0xff] %v11613_v0 }
 0x7f1   : > { %v2485_v62 = vpop.f32.mrb[31].mxu1  ;;  %v11599_v31 = vsel %vm14969_vm3, %v8428_v6, -10000.0  ;;  %v11615_v6 = vld [vmem:[#allocation4 + $0x80] sm:$0xff] }
 0x7f2   : > { %2985 = vrot.lane.b32.xlu0 %v11188_v24, %s9959_s1  ;;  %v11570_v24 = vsel %vm11047_vm4, %v2453_v43, -10000.0  ;;  %v11590_v43 = vsel %vm14968_vm15, %v2469_v4, -10000.0  ;;  %v11610_v4 = vsel %vm14971_vm14, %v2485_v62, -10000.0  ;;  %14973 = vst [vmem:[#allocation87_spill] sm:$0xff] %v11615_v6  ;;  %vm14977_vm14 = vcmask 7168  }
 0x7f3   : > { %vm14979_vm3 = vmmov %vm14977_vm14 }
 0x811   : > { %2542 = vmax.xlane.f32.xlu0 %v11555_v40 }
 0x812   : > { %2544 = vmax.xlane.f32.xlu1 %v11560_v49 }
 0x815   : > { %2538 = vmax.xlane.f32.xlu0 %v11565_v22 }
 0x816   : > { %2540 = vmax.xlane.f32.xlu1 %v11570_v24 }
 0x819   : > { %2550 = vmax.xlane.f32.xlu0 %v11575_v10 }
 0x81a   : > { %2552 = vmax.xlane.f32.xlu1 %v11580_v13 }
 0x81d   : > { %2546 = vmax.xlane.f32.xlu0 %v11585_v15 }
 0x81e   : > { %2548 = vmax.xlane.f32.xlu1 %v11590_v43 }
 0x821   : > { %2558 = vmax.xlane.f32.xlu0 %v11595_v12 }
 0x822   : > { %2560 = vmax.xlane.f32.xlu1 %v11599_v31 }
 0x825   : > { %2554 = vmax.xlane.f32.xlu0 %v11605_v1 }
 0x826   : > { %2556 = vmax.xlane.f32.xlu1 %v11610_v4 }
 0x865   : > { %v2535_v59 = vpop.xlane.xlu0 %2534 }
 0x866   : > { %v11618_v45 = vmax.f32 %v11613_v0, %v2535_v59  ;;  %v2531_v36 = vpop.xlane.xlu1 %2530  ;;  %v14983_v0 = vld [vmem:[#allocation48_spill] sm:$0xff] }
 0x867   : > { %v11621_v46 = vmax.f32 %v11615_v6, %v2531_v36  ;;  %v14985_v59 = vld [vmem:[#allocation60_spill] sm:$0xff]  ;;  %v11697_v6 = vld [vmem:[#allocation4 + $0xd0] sm:$0xff] }
 0x868   : > { %14974 = vst [vmem:[#allocation88_spill] sm:$0xff] %v11618_v45  ;;  %3199 = vst.msk [vmem:[#allocation4 + $0x90] sm:$0xff] %vm14977_vm14, %v11618_v45  ;;  %2638 = vperm.xlu1 %8939, %v11618_v45  }
 0x869   : > { %14975 = vst [vmem:[#allocation89_spill] sm:$0xff] %v11621_v46  ;;  %3197 = vst.msk [vmem:[#allocation4 + $0x80] sm:$0xff] %vm14979_vm3, %v11621_v46  ;;  %v2533_v36 = vpop.xlane.xlu0 %2532 }
 0x86a   : > { %v11637_v61 = vmax.f32 %v11623_v8, %v2533_v36  ;;  %v2537_v33 = vpop.xlane.xlu1 %2536  ;;  %vm14982_vm14 = vmmov %vm14979_vm3  ;;  %v9196_v8 = vld [vmem:[%s10864_s4] sm:$0xff]  ;;  %14996 = vst [vmem:[#allocation98_spill] sm:$0xff] %v11697_v6 }
 0x86b   : > { %v11640_v62 = vmax.f32 %v11630_v44, %v2537_v33  ;;  %v14986_v44 = vld [vmem:[#allocation65_spill] sm:$0xff] }
 0x86c   : > { %14980 = vst [vmem:[#allocation92_spill] sm:$0xff] %v11637_v61  ;;  %3198 = vst.msk [vmem:[#allocation4 + $0x88] sm:$0xff] %vm14982_vm14, %v11637_v61  ;;  %2633 = vperm.xlu0 %8938, %v11637_v61   ;;  %2628 = vperm.xlu1 %8939, %v11621_v46   ;;  %v14984_v61 = vld [vmem:[#allocation56_spill] sm:$0xff] }
 0x86d   : > { %14981 = vst [vmem:[#allocation93_spill] sm:$0xff] %v11640_v62  ;;  %3200 = vst.msk [vmem:[#allocation4 + $0x98] sm:$0xff] %vm14979_vm3, %v11640_v62  ;;  %v2986_v36 = vpop.permute.xlu0 %2985  ;;  %v11677_v46 = vld [vmem:[#allocation4 + $0xa0] sm:$0xff] }
 0x86e   : > { %v2984_v33 = vpop.permute.xlu1 %2983  ;;  %14991 = vst [vmem:[#allocation94_spill] sm:$0xff] %v11677_v46  ;;  %vm14992_vm14 = vmmov %vm14979_vm3 }
 0x86f   : > { %8433 = vmatprep.subr.bf16.mxu0 %v2984_v33 }
 0x870   : > { %2643 = vperm.xlu0 %8938, %v11640_v62   ;;  %8434 = vmatpush3.bf16.msra.mxu0 %v2984_v33  ;;  %v9197_v62 = vld [vmem:[%s10864_s4 + $0x8] sm:$0xff]  ;;  %v9198_v33 = vld [vmem:[%s10864_s4 + $0x10] sm:$0xff] }
 0x871   : > { %8435 = vmatprep.subr.bf16.mxu0 %v2986_v36  ;;  %2987 = vrot.lane.b32.xlu1 %v14983_v0, %s9959_s1  ;;  %v11667_v0 = vld [vmem:[#allocation4 + $0xb0] sm:$0xff] }
 0x872   : > { %14987 = vst [vmem:[#allocation48_spill] sm:$0xff] %v11667_v0 }
 0x874   : > { %8436 = vmatpush3.bf16.msra.mxu0 %v2986_v36  ;;  %2989 = vrot.lane.b32.xlu0 %v14984_v61, %s9959_s1  ;;  %v11669_v36 = vld [vmem:[#allocation4 + $0xb8] sm:$0xff] }
 0x875   : > { %2991 = vrot.lane.b32.xlu1 %v14985_v59, %s9959_s1  ;;  %14988 = vst [vmem:[#allocation56_spill] sm:$0xff] %v11669_v36 }
 0x878   : > { %2993 = vrot.lane.b32.xlu0 %v14986_v44, %s9959_s1 }
 0x879   : > { %3245 = vrot.lane.b32.xlu1 %v9196_v8, %s9960_s21 }
 0x87c   : > { %3247 = vrot.lane.b32.xlu0 %v9197_v62, %s9960_s21  ;;  %v11684_v62 = vld [vmem:[#allocation4 + $0xa8] sm:$0xff] }
 0x87d   : > { %3249 = vrot.lane.b32.xlu1 %v9198_v33, %s9960_s21  ;;  %14993 = vst [vmem:[#allocation95_spill] sm:$0xff] %v11684_v62  ;;  %v11704_v33 = vld [vmem:[#allocation4 + $0xd8] sm:$0xff] }
 0x87e   : > { %14998 = vst [vmem:[#allocation99_spill] sm:$0xff] %v11704_v33 }
 0x89e   : > { %v2543_v61 = vpop.xlane.xlu0 %2542 }
 0x89f   : > { %v11672_v59 = vmax.f32 %v11667_v0, %v2543_v61  ;;  %v2545_v45 = vpop.xlane.xlu1 %2544 }
 0x8a0   : > { %v11675_v44 = vmax.f32 %v11669_v36, %v2545_v45  ;;  %v11717_v36 = vld [vmem:[#allocation4 + $0xc0] sm:$0xff] }
 0x8a1   : > { %14989 = vst [vmem:[#allocation60_spill] sm:$0xff] %v11672_v59  ;;  %3203 = vst.msk [vmem:[#allocation4 + $0xb0] sm:$0xff] %vm14992_vm14, %v11672_v59  ;;  %2658 = vperm.xlu1 %8939, %v11672_v59  }
 0x8a2   : > { %14990 = vst [vmem:[#allocation65_spill] sm:$0xff] %v11675_v44  ;;  %3204 = vst.msk [vmem:[#allocation4 + $0xb8] sm:$0xff] %vm14979_vm3, %v11675_v44  ;;  %v2539_v45 = vpop.xlane.xlu0 %2538  ;;  %2663 = vperm.xlu0 %8938, %v11675_v44  }
 0x8a3   : > { %v11692_v61 = vmax.f32 %v11677_v46, %v2539_v45  ;;  %v2541_v8 = vpop.xlane.xlu1 %2540  ;;  %vm14997_vm14 = vmmov %vm14979_vm3  ;;  %15001 = vst [vmem:[#allocation102_spill] sm:$0xff] %v11717_v36  ;;  %v11723_v45 = vld [vmem:[#allocation4 + $0xc8] sm:$0xff] }
 0x8a4   : > { %v11695_v0 = vmax.f32 %v11684_v62, %v2541_v8  ;;  %15003 = vst [vmem:[#allocation103_spill] sm:$0xff] %v11723_v45  ;;  %v11737_v62 = vld [vmem:[#allocation4 + $0xf0] sm:$0xff] }
 0x8a5   : > { %14994 = vst [vmem:[#allocation96_spill] sm:$0xff] %v11692_v61  ;;  %3201 = vst.msk [vmem:[#allocation4 + $0xa0] sm:$0xff] %vm14997_vm14, %v11692_v61  ;;  %2648 = vperm.xlu1 %8939, %v11692_v61  }
 0x8a6   : > { %14995 = vst [vmem:[#allocation97_spill] sm:$0xff] %v11695_v0  ;;  %3202 = vst.msk [vmem:[#allocation4 + $0xa8] sm:$0xff] %vm14979_vm3, %v11695_v0  ;;  %v2551_v8 = vpop.xlane.xlu0 %2550  ;;  %2653 = vperm.xlu0 %8938, %v11695_v0  }
 0x8a7   : > { %v11712_v44 = vmax.f32 %v11697_v6, %v2551_v8  ;;  %v2553_v59 = vpop.xlane.xlu1 %2552  ;;  %vm15002_vm14 = vmmov %vm14979_vm3  ;;  %15006 = vst [vmem:[#allocation106_spill] sm:$0xff] %v11737_v62 }
 0x8a8   : > { %v11715_v46 = vmax.f32 %v11704_v33, %v2553_v59  ;;  %v11743_v33 = vld [vmem:[#allocation4 + $0xf8] sm:$0xff] }
 0x8a9   : > { %14999 = vst [vmem:[#allocation100_spill] sm:$0xff] %v11712_v44  ;;  %3207 = vst.msk [vmem:[#allocation4 + $0xd0] sm:$0xff] %vm15002_vm14, %v11712_v44 }
 0x8aa   : > { %15000 = vst [vmem:[#allocation101_spill] sm:$0xff] %v11715_v46  ;;  %3208 = vst.msk [vmem:[#allocation4 + $0xd8] sm:$0xff] %vm14979_vm3, %v11715_v46  ;;  %v2547_v8 = vpop.xlane.xlu0 %2546  ;;  %2678 = vperm.xlu0 %8938, %v11712_v44   ;;  %2683 = vperm.xlu1 %8939, %v11715_v46   ;;  %v11757_v46 = vld [vmem:[#allocation4 + $0xe0] sm:$0xff] }
 0x8ab   : > { %v11732_v59 = vmax.f32 %v11717_v36, %v2547_v8  ;;  %v2549_v61 = vpop.xlane.xlu1 %2548  ;;  %vm15007_vm14 = vmmov %vm14979_vm3  ;;  %15008 = vst [vmem:[#allocation107_spill] sm:$0xff] %v11743_v33 }
 0x8ac   : > { %v11735_v6 = vmax.f32 %v11723_v45, %v2549_v61  ;;  %15011 = vst [vmem:[#allocation110_spill] sm:$0xff] %v11757_v46  ;;  %v11763_v45 = vld [vmem:[#allocation4 + $0xe8] sm:$0xff] }
 0x8ad   : > { %15004 = vst [vmem:[#allocation104_spill] sm:$0xff] %v11732_v59  ;;  %3205 = vst.msk [vmem:[#allocation4 + $0xc0] sm:$0xff] %vm15007_vm14, %v11732_v59 }
 0x8ae   : > { %15005 = vst [vmem:[#allocation105_spill] sm:$0xff] %v11735_v6  ;;  %3206 = vst.msk [vmem:[#allocation4 + $0xc8] sm:$0xff] %vm14979_vm3, %v11735_v6  ;;  %v2559_v8 = vpop.xlane.xlu0 %2558  ;;  %2668 = vperm.xlu0 %8938, %v11732_v59   ;;  %2673 = vperm.xlu1 %8939, %v11735_v6   ;;  %v9202_v59 = vld [vmem:[%s10864_s4 + $0x28] sm:$0xff] }
 0x8af   : > { %v11752_v61 = vmax.f32 %v11737_v62, %v2559_v8  ;;  %v2561_v0 = vpop.xlane.xlu1 %2560  ;;  %vm15012_vm14 = vmmov %vm14979_vm3  ;;  %15013 = vst [vmem:[#allocation111_spill] sm:$0xff] %v11763_v45 }
 0x8b0   : > { %v11755_v36 = vmax.f32 %v11743_v33, %v2561_v0  ;;  %v9199_v0 = vld [vmem:[%s10864_s4 + $0x18] sm:$0xff] }
 0x8b1   : > { %15009 = vst [vmem:[#allocation108_spill] sm:$0xff] %v11752_v61  ;;  %3211 = vst.msk [vmem:[#allocation4 + $0xf0] sm:$0xff] %vm15012_vm14, %v11752_v61 }
 0x8b2   : > { %15010 = vst [vmem:[#allocation109_spill] sm:$0xff] %v11755_v36  ;;  %3212 = vst.msk [vmem:[#allocation4 + $0xf8] sm:$0xff] %vm14979_vm3, %v11755_v36  ;;  %v2555_v8 = vpop.xlane.xlu0 %2554  ;;  %3251 = vrot.lane.b32.xlu0 %v9199_v0, %s9960_s21  ;;  %2698 = vperm.xlu1 %8939, %v11752_v61   ;;  %v3213_v61 = vld [vmem:[#allocation3] sm:$0xff]  ;;  %v9203_v0 = vld [vmem:[%s10864_s4 + $0x38] sm:$0xff] }
 0x8b3   : > { %v11773_v44 = vmax.f32 %v11757_v46, %v2555_v8  ;;  %v2557_v62 = vpop.xlane.xlu1 %2556  ;;  %vm15016_vm14 = vmmov %vm14979_vm3  ;;  %v9200_v8 = vld [vmem:[%s10864_s4 + $0x20] sm:$0xff]  ;;  %v3214_v46 = vld [vmem:[#allocation3 + $0x8] sm:$0xff] }
 0x8b4   : > { %v11776_v6 = vmax.f32 %v11763_v45, %v2557_v62  ;;  %v9201_v62 = vld [vmem:[%s10864_s4 + $0x30] sm:$0xff] }
 0x8b5   : > { %15014 = vst [vmem:[#allocation112_spill] sm:$0xff] %v11773_v44  ;;  %3209 = vst.msk [vmem:[#allocation4 + $0xe0] sm:$0xff] %vm15016_vm14, %v11773_v44  ;;  %vm15017_vm14 = vcmask 261120  }
 0x8b6   : > { %15015 = vst [vmem:[#allocation113_spill] sm:$0xff] %v11776_v6  ;;  %3210 = vst.msk [vmem:[#allocation4 + $0xe8] sm:$0xff] %vm14979_vm3, %v11776_v6  ;;  %2688 = vperm.xlu1 %8939, %v11773_v44   ;;  %2693 = vperm.xlu0 %8938, %v11776_v6   ;;  %v3215_v44 = vld [vmem:[#allocation3 + $0x10] sm:$0xff] }
 0x8b7   : > { %vm15018_vm3 = vmmov %vm15017_vm14 }
 0x8b8   : > { %vm15019_vm7 = vmmov %vm15018_vm3 }
 0x8b9   : > { %vm15038_vm15 = vmmov %vm15018_vm3 }
 0x8ba   : > { %3253 = vrot.lane.b32.xlu1 %v9200_v8, %s9960_s21  ;;  %2703 = vperm.xlu0 %8938, %v11755_v36   ;;  %v3217_v8 = vld [vmem:[#allocation3 + $0x20] sm:$0xff]  ;;  %v3216_v36 = vld [vmem:[#allocation3 + $0x18] sm:$0xff]  ;;  %vm15039_vm1 = vmmov %vm15018_vm3 }
 0x8bb   : > { %vm15040_vm12 = vmmov %vm15039_vm1 }
 0x8bc   : > { %vm15042_vm11 = vmmov %vm15039_vm1 }
 0x8be   : > { %3257 = vrot.lane.b32.xlu1 %v9201_v62, %s9960_s21  ;;  %3255 = vrot.lane.b32.xlu0 %v9202_v59, %s9960_s21  ;;  %v3219_v62 = vld [vmem:[#allocation3 + $0x30] sm:$0xff]  ;;  %v3218_v59 = vld [vmem:[#allocation3 + $0x28] sm:$0xff] }
 0x8c2   : > { %3229 = vrot.lane.b32.xlu1 %v3213_v61, %s9960_s21  ;;  %3259 = vrot.lane.b32.xlu0 %v9203_v0, %s9960_s21  ;;  %v3220_v61 = vld [vmem:[#allocation3 + $0x38] sm:$0xff] }
 0x8c6   : > { %3233 = vrot.lane.b32.xlu1 %v3215_v44, %s9960_s21  ;;  %3231 = vrot.lane.b32.xlu0 %v3214_v46, %s9960_s21 }
 0x8ca   : > { %3237 = vrot.lane.b32.xlu1 %v3217_v8, %s9960_s21  ;;  %3235 = vrot.lane.b32.xlu0 %v3216_v36, %s9960_s21 }
 0x8ce   : > { %3241 = vrot.lane.b32.xlu1 %v3219_v62, %s9960_s21  ;;  %3239 = vrot.lane.b32.xlu0 %v3218_v59, %s9960_s21  ;;  %v15027_v59 = vld [vmem:[#allocation50_spill] sm:$0xff] }
 0x8d2   : > { %3243 = vrot.lane.b32.xlu0 %v3220_v61, %s9960_s21 }
 0x8e7   : > { %v2639_v0 = vpop.permute.xlu1 %2638 }
 0x8e8   : > { %v2708_v44 = vsub.f32 %v11531_v38, %v2639_v0 }
 0x8ea   : > { %v2726_v9 = vmul.f32 1.442695, %v2708_v44 }
 0x8eb   : > { %v2634_v33 = vpop.permute.xlu0 %2633  ;;  %v2629_v46 = vpop.permute.xlu1 %2628 }
 0x8ec   : > { %v2707_v6 = vsub.f32 %v11541_v19, %v2634_v33  ;;  %v2706_v8 = vsub.f32 %v11536_v39, %v2629_v46 }
 0x8ee   : > { %v2724_v45 = vmul.f32 1.442695, %v2707_v6  ;;  %v2722_v36 = vmul.f32 1.442695, %v2706_v8  ;;  %v15025_v6 = vld [vmem:[#allocation51_spill] sm:$0xff] }
 0x8ef   : > { %v2644_v27 = vpop.permute.xlu0 %2643  ;;  %v2988_v11 = vpop.permute.xlu1 %2987 }
 0x8f0   : > { %8972 = vpow2.f32 %v2724_v45  ;;  %v2709_v62 = vsub.f32 %v11546_v51, %v2644_v27  ;;  %8437 = vmatprep.subr.bf16.mxu0 %v2988_v11  ;;  %v15024_v51 = vld [vmem:[#allocation49_spill] sm:$0xff] }
 0x8f1   : > { %8974 = vpow2.f32 %v2722_v36  ;;  %1968 = vadd.xlane.f32.xlu0 %v11416_v37  ;;  %8438 = vmatpush3.bf16.msra.mxu0 %v2988_v11  ;;  %v15026_v45 = vsub.f32 %v15024_v51, %v15025_v6 }
 0x8f2   : > { %v2728_v38 = vmul.f32 1.442695, %v2709_v62  ;;  %1966 = vadd.xlane.f32.xlu1 %v11414_v55  ;;  %8976 = vpow2.f32 %v2726_v9 }
 0x8f3   : > { %v2990_v19 = vpop.permute.xlu0 %2989  ;;  %v2992_v33 = vpop.permute.xlu1 %2991 }
 0x8f4   : > { %8978 = vpow2.f32 %v2728_v38  ;;  %8439 = vmatprep.subr.bf16.mxu0 %v2990_v19 }
 0x8f5   : > { %1970 = vadd.xlane.f32.xlu0 %v11420_v30  ;;  %8440 = vmatpush3.bf16.msra.mxu0 %v2990_v19 }
 0x8f6   : > { %1972 = vadd.xlane.f32.xlu1 %v11422_v2  ;;  %8441 = vmatprep.subr.bf16.mxu0 %v2992_v33 }
 0x8f7   : > { %v2994_v27 = vpop.permute.xlu0 %2993  ;;  %v3246_v55 = vpop.permute.xlu1 %3245 }
 0x8f9   : > { %1974 = vadd.xlane.f32.xlu0 %v11444_v3  ;;  %8442 = vmatpush3.bf16.msra.mxu0 %v2992_v33 }
 0x8fa   : > { %v11814_v37 = vpop.eup %8972  ;;  %1976 = vadd.xlane.f32.xlu1 %v11446_v56  ;;  %8443 = vmatprep.subr.bf16.mxu0 %v2994_v27  ;;  %v3286_v56 = vsel %vm15018_vm3, %v3246_v55, 0 }
 0x8fb   : > { %v11817_v9 = vpop.eup %8974  ;;  %v3248_v39 = vpop.permute.xlu0 %3247 }
 0x8fc   : > { %v2963_v11 = vpack.c.bf16 %v11814_v37, %v11817_v9  ;;  %v11821_v30 = vpop.eup %8976 }
 0x8fd   : > { %1978 = vadd.xlane.f32.xlu0 %v11441_v42  ;;  %8444 = vmatpush3.bf16.msra.mxu0 %v2994_v27 }
 0x8fe   : > { %v11824_v2 = vpop.eup %8978  ;;  %8445 = vmatprep.mubr.bf16.mxu0 %v2963_v11  ;;  %1980 = vadd.xlane.f32.xlu1 %v11451_v21  ;;  %v3250_v21 = vpop.permute.xlu1 %3249 }
 0x8ff   : > { %v2964_v3 = vpack.c.bf16 %v11824_v2, %v11821_v30  ;;  %8685 = vmatprep.subr.msk.bf16.mxu0 %vm15017_vm14, %v3246_v55  ;;  %vm15020_vm14 = vmmov %vm15018_vm3 }
 0x900   : > { %v3289_v42 = vsel %vm15020_vm14, %v3248_v39, 0  ;;  %vm15031_vm14 = vmmov %vm15018_vm3 }
 0x901   : > { %1982 = vadd.xlane.f32.xlu0 %v11457_v14  ;;  %8446 = vmatmul.mubr.bf16.vlgmr.msra.gmra.mrb[16].mxu0 %v2964_v3  ;;  %v15021_v14 = vld [vmem:[#allocation54_spill] sm:$0xff] }
 0x902   : > { %1984 = vadd.xlane.f32.xlu1 %v11462_v17  ;;  %v15022_v17 = vld [vmem:[#allocation57_spill] sm:$0xff] }
 0x905   : > { %1986 = vadd.xlane.f32.xlu0 %v11467_v60 }
 0x906   : > { %1988 = vadd.xlane.f32.xlu1 %v11460_v57  ;;  %8462 = vmatpush3.bf16.xpose.msra.mxu0 %v3286_v56  ;;  %v15023_v57 = vsub.f32 %v15021_v14, %v15022_v17  ;;  %v9204_v56 = vld [vmem:[%s11171_s12] sm:$0xff]  ;;  %v9205_v17 = vld [vmem:[%s11171_s12 + $0x10] sm:$0xff] }
 0x907   : > { %8686 = vmatprep.subr.msk.bf16.mxu0 %vm15019_vm7, %v3248_v39  ;;  %vm15030_vm7 = vmmov %vm15018_vm3 }
 0x908   : > { %v1776_v60 = vmul.f32 1.442695, %v15023_v57 }
 0x909   : > { %1990 = vadd.xlane.f32.xlu0 %v11476_v34  ;;  %v1778_v34 = vmul.f32 1.442695, %v15026_v45 }
 0x90a   : > { %1992 = vadd.xlane.f32.xlu1 %v11472_v5  ;;  %v15028_v5 = vld [vmem:[#allocation52_spill] sm:$0xff]  ;;  %8980 = vpow2.f32 %v1776_v60 }
 0x90b   : > { %v15029_v61 = vsub.f32 %v15027_v59, %v15028_v5  ;;  %8982 = vpow2.f32 %v1778_v34 }
 0x90d   : > { %1994 = vadd.xlane.f32.xlu0 %v11474_v54  ;;  %v1774_v0 = vmul.f32 1.442695, %v15029_v61  ;;  %v3292_v54 = vsel %vm15030_vm7, %v3250_v21, 0  ;;  %vm15032_vm7 = vmmov %vm15018_vm3 }
 0x90e   : > { %1996 = vadd.xlane.f32.xlu1 %v11481_v35  ;;  %8464 = vmatpush3.bf16.xpose.msra.mxu0 %v3289_v42 }
 0x90f   : > { %8687 = vmatprep.subr.msk.bf16.mxu0 %vm15018_vm3, %v3250_v21  ;;  %8984 = vpow2.f32 %v1774_v0 }
 0x914   : > { %v11852_v35 = vpop.eup %8980 }
 0x915   : > { %v11855_v46 = vpop.eup %8982 }
 0x916   : > { %8466 = vmatpush3.bf16.xpose.msra.mxu0 %v3292_v54 }
 0x919   : > { %v11858_v62 = vpop.eup %8984 }
 0x91f   : > { %2054 = vperm.xlu1 %8939, %v11852_v35  }
 0x920   : > { %v2659_v44 = vpop.permute.xlu1 %2658 }
 0x921   : > { %v2712_v8 = vsub.f32 %v11555_v40, %v2659_v44  ;;  %v2664_v36 = vpop.permute.xlu0 %2663 }
 0x922   : > { %v2713_v38 = vsub.f32 %v11560_v49, %v2664_v36 }
 0x923   : > { %v2734_v19 = vmul.f32 1.442695, %v2712_v8  ;;  %2059 = vperm.xlu1 %8939, %v11855_v46   ;;  %2049 = vperm.xlu0 %8938, %v11858_v62  }
 0x924   : > { %v2736_v33 = vmul.f32 1.442695, %v2713_v38  ;;  %v2649_v27 = vpop.permute.xlu1 %2648 }
 0x925   : > { %v2710_v11 = vsub.f32 %v11565_v22, %v2649_v27  ;;  %v2654_v55 = vpop.permute.xlu0 %2653  ;;  %8986 = vpow2.f32 %v2734_v19 }
 0x926   : > { %v2711_v3 = vsub.f32 %v11570_v24, %v2654_v55  ;;  %8988 = vpow2.f32 %v2736_v33 }
 0x927   : > { %v2730_v40 = vmul.f32 1.442695, %v2710_v11  ;;  %3880 = vrot.lane.b32.xlu1 %v9204_v56, %s9960_s21 }
 0x928   : > { %v2732_v49 = vmul.f32 1.442695, %v2711_v3 }
 0x929   : > { %8990 = vpow2.f32 %v2730_v40  ;;  %v2679_v39 = vpop.permute.xlu0 %2678  ;;  %v2684_v42 = vpop.permute.xlu1 %2683 }
 0x92a   : > { %8992 = vpow2.f32 %v2732_v49  ;;  %v2716_v21 = vsub.f32 %v11575_v10, %v2679_v39  ;;  %v2717_v14 = vsub.f32 %v11580_v13, %v2684_v42 }
 0x92b   : > { %3884 = vrot.lane.b32.xlu1 %v9205_v17, %s9960_s21 }
 0x92c   : > { %v2742_v22 = vmul.f32 1.442695, %v2716_v21  ;;  %v2744_v24 = vmul.f32 1.442695, %v2717_v14 }
 0x92d   : > { %v2669_v57 = vpop.permute.xlu0 %2668  ;;  %v2674_v60 = vpop.permute.xlu1 %2673 }
 0x92e   : > { %v2714_v51 = vsub.f32 %v11585_v15, %v2669_v57  ;;  %v2715_v6 = vsub.f32 %v11590_v43, %v2674_v60  ;;  %8994 = vpow2.f32 %v2742_v22 }
 0x92f   : > { %v11873_v59 = vpop.eup %8986  ;;  %8996 = vpow2.f32 %v2744_v24 }
 0x930   : > { %v2738_v45 = vmul.f32 1.442695, %v2714_v51  ;;  %v2740_v34 = vmul.f32 1.442695, %v2715_v6  ;;  %v11875_v13 = vpop.eup %8988 }
 0x931   : > { %v3252_v10 = vpop.permute.xlu0 %3251  ;;  %v2699_v5 = vpop.permute.xlu1 %2698  ;;  %v2966_v19 = vpack.c.bf16 %v11875_v13, %v11873_v59 }
 0x932   : > { %8998 = vpow2.f32 %v2738_v45  ;;  %8688 = vmatprep.subr.msk.bf16.mxu0 %vm15031_vm14, %v3252_v10  ;;  %v3295_v61 = vsel %vm15018_vm3, %v3252_v10, 0  ;;  %v2720_v43 = vsub.f32 %v11595_v12, %v2699_v5  ;;  %vm15033_vm14 = vmmov %vm15018_vm3 }
 0x933   : > { %v11879_v0 = vpop.eup %8990  ;;  %9000 = vpow2.f32 %v2740_v34  ;;  %8468 = vmatpush3.bf16.xpose.msra.mxu0 %v3295_v61 }
 0x934   : > { %v11881_v15 = vpop.eup %8992  ;;  %v2750_v11 = vmul.f32 1.442695, %v2720_v43 }
 0x935   : > { %v2694_v54 = vpop.permute.xlu0 %2693  ;;  %v2689_v44 = vpop.permute.xlu1 %2688  ;;  %v2965_v8 = vpack.c.bf16 %v11881_v15, %v11879_v0 }
 0x936   : > { %v2719_v36 = vsub.f32 %v11610_v4, %v2694_v54  ;;  %v2718_v38 = vsub.f32 %v11605_v1, %v2689_v44 }
 0x937   : > { %8449 = vmatprep.mubr.bf16.mxu0 %v2965_v8 }
 0x938   : > { %v2748_v33 = vmul.f32 1.442695, %v2719_v36  ;;  %v2746_v27 = vmul.f32 1.442695, %v2718_v38  ;;  %8450 = vmatmul.mubr.bf16.gmra.mrb[20].mxu0 %v2966_v19  ;;  %v11890_v12 = vpop.eup %8994  ;;  %v15045_v38 = vld [vmem:[#allocation53_spill] sm:$0xff]  ;;  %v15046_v19 = vld [vmem:[#allocation55_spill] sm:$0xff] }
 0x939   : > { %v2704_v55 = vpop.permute.xlu0 %2703  ;;  %v3254_v3 = vpop.permute.xlu1 %3253 }
 0x93a   : > { %9002 = vpow2.f32 %v2748_v33  ;;  %v2721_v40 = vsub.f32 %v11599_v31, %v2704_v55  ;;  %8689 = vmatprep.subr.msk.bf16.mxu0 %vm15032_vm7, %v3254_v3  ;;  %v3298_v4 = vsel %vm15033_vm14, %v3254_v3, 0  ;;  %v11895_v1 = vpop.eup %8996  ;;  %vm15034_vm7 = vmmov %vm15018_vm3  ;;  %v15047_v33 = vsub.f32 %v15045_v38, %v15046_v19  ;;  %v15048_v55 = vld [vmem:[#allocation63_spill] sm:$0xff] }
 0x93b   : > { %9004 = vpow2.f32 %v2746_v27  ;;  %8470 = vmatpush3.bf16.xpose.msra.mxu0 %v3298_v4  ;;  %v2968_v31 = vpack.c.bf16 %v11895_v1, %v11890_v12  ;;  %vm15035_vm14 = vmmov %vm15018_vm3  ;;  %v15049_v3 = vsub.f32 %v15048_v55, %v11275_v41  ;;  %v15050_v4 = vld [vmem:[#allocation64_spill] sm:$0xff]  ;;  %v15058_v41 = vld [vmem:[#allocation69_spill] sm:$0xff] }
 0x93c   : > { %v11897_v56 = vpop.eup %8998  ;;  %v2752_v49 = vmul.f32 1.442695, %v2721_v40  ;;  %9006 = vpow2.f32 %v2750_v11  ;;  %v1780_v27 = vmul.f32 1.442695, %v15047_v33  ;;  %v1936_v33 = vld [vmem:[#allocation5 + $0x10] sm:$0xff]  ;;  %15124 = vst [vmem:[#allocation69_spill] sm:$0xff] %v12157_v7 }
 0x93d   : > { %v11899_v39 = vpop.eup %9000  ;;  %v3256_v42 = vpop.permute.xlu0 %3255  ;;  %v1782_v40 = vmul.f32 1.442695, %v15049_v3  ;;  %v1937_v3 = vld [vmem:[#allocation5 + $0x18] sm:$0xff] }
 0x93e   : > { %9008 = vpow2.f32 %v2752_v49  ;;  %v2967_v21 = vpack.c.bf16 %v11899_v39, %v11897_v56  ;;  %8690 = vmatprep.subr.msk.bf16.mxu0 %vm15018_vm3, %v3256_v42  ;;  %v3301_v14 = vsel %vm15034_vm7, %v3256_v42, 0  ;;  %v3258_v17 = vpop.permute.xlu1 %3257  ;;  %vm15036_vm7 = vmmov %vm15018_vm3  ;;  %v15051_v49 = vsub.f32 %v15050_v4, %v11279_v20  ;;  %v15061_v20 = vld [vmem:[#allocation70_spill] sm:$0xff]  ;;  %v15064_v4 = vld [vmem:[#allocation68_spill] sm:$0xff] }
 0x93f   : > { %v3304_v45 = vsel %vm15018_vm3, %v3258_v17, 0  ;;  %9010 = vpow2.f32 %v1780_v27 }
 0x940   : > { %8453 = vmatprep.mubr.bf16.mxu0 %v2967_v21  ;;  %v1784_v42 = vmul.f32 1.442695, %v15051_v49  ;;  %v15052_v21 = vld [vmem:[#allocation58_spill] sm:$0xff]  ;;  %9012 = vpow2.f32 %v1782_v40 }
 0x941   : > { %8454 = vmatmul.mubr.bf16.gmra.mrb[24].mxu0 %v2968_v31  ;;  %v3260_v10 = vpop.permute.xlu0 %3259  ;;  %v15053_v31 = vld [vmem:[#allocation61_spill] sm:$0xff]  ;;  %v15063_v40 = vld [vmem:[#allocation66_spill] sm:$0xff] }
 0x942   : > { %v3230_v34 = vpop.permute.xlu1 %3229  ;;  %v3307_v5 = vsel %vm15038_vm15, %v3260_v10, 0  ;;  %9014 = vpow2.f32 %v1784_v42  ;;  %v15065_v49 = vsub.f32 %v15063_v40, %v15064_v4 }
 0x943   : > { %8472 = vmatpush3.bf16.xpose.msra.mxu0 %v3301_v14  ;;  %v15054_v14 = vsub.f32 %v15052_v21, %v15053_v31  ;;  %v15066_v31 = vld [vmem:[#allocation67_spill] sm:$0xff] }
 0x944   : > { %v11907_v22 = vpop.eup %9002  ;;  %8691 = vmatprep.subr.msk.bf16.mxu0 %vm15035_vm14, %v3258_v17  ;;  %vm15037_vm14 = vmmov %vm15018_vm3  ;;  %v1794_v42 = vmul.f32 1.442695, %v15065_v49 }
 0x945   : > { %v11910_v24 = vpop.eup %9004  ;;  %v3232_v61 = vpop.permute.xlu0 %3231  ;;  %vm15041_vm3 = vmmov %vm15039_vm1  ;;  %v1786_v17 = vmul.f32 1.442695, %v15054_v14 }
 0x946   : > { %v2969_v57 = vpack.c.bf16 %v11907_v22, %v11910_v24  ;;  %v11914_v60 = vpop.eup %9006  ;;  %v3234_v43 = vpop.permute.xlu1 %3233 }
 0x947   : > { %9016 = vpow2.f32 %v1786_v17 }
 0x948   : > { %v11916_v51 = vpop.eup %9008  ;;  %8457 = vmatprep.mubr.bf16.mxu0 %v2969_v57  ;;  %v15055_v57 = vld [vmem:[#allocation59_spill] sm:$0xff] }
 0x949   : > { %v2970_v6 = vpack.c.bf16 %v11916_v51, %v11914_v60  ;;  %v3236_v54 = vpop.permute.xlu0 %3235  ;;  %v11954_v27 = vpop.eup %9010 }
 0x94a   : > { %v3238_v44 = vpop.permute.xlu1 %3237 }
 0x94b   : > { %8458 = vmatmul.mubr.bf16.gmra.mrb[28].mxu0 %v2970_v6  ;;  %v15056_v6 = vld [vmem:[#allocation62_spill] sm:$0xff] }
 0x94c   : > { %8474 = vmatpush3.bf16.xpose.msra.mxu0 %v3304_v45  ;;  %8477 = vmatprep.mubr.msk.bf16.mxu0 %vm15036_vm7, %v3230_v34  ;;  %vm15043_vm7 = vmmov %vm15039_vm1  ;;  %v15057_v45 = vsub.f32 %v15055_v57, %v15056_v6  ;;  %v1953_v57 = vmul.f32 %v11954_v27, %v1937_v3  ;;  %v1938_v6 = vld [vmem:[#allocation5 + $0x20] sm:$0xff] }
 0x94d   : > { %8692 = vmatprep.subr.msk.bf16.mxu0 %vm15037_vm14, %v3260_v10  ;;  %v3240_v8 = vpop.permute.xlu0 %3239  ;;  %vm15044_vm14 = vmmov %vm15039_vm1  ;;  %v1935_v10 = vld [vmem:[#allocation5 + $0x8] sm:$0xff] }
 0x94e   : > { %v3242_v36 = vpop.permute.xlu1 %3241  ;;  %v1788_v34 = vmul.f32 1.442695, %v15057_v45 }
 0x950   : > { %9018 = vpow2.f32 %v1788_v34 }
 0x951   : > { %v3244_v11 = vpop.permute.xlu0 %3243 }
 0x954   : > { %8476 = vmatpush3.bf16.xpose.msra.mxu0 %v3307_v5  ;;  %v1934_v5 = vld [vmem:[#allocation5] sm:$0xff] }
 0x955   : > { %v1950_v19 = vmul.f32 %v11858_v62, %v1934_v5  ;;  %v11964_v62 = vpop.eup %9012  ;;  %v1939_v5 = vld [vmem:[#allocation5 + $0x28] sm:$0xff] }
 0x956   : > { %v11968_v45 = vpop.eup %9014 }
 0x95b   : > { %8478 = vmatmul.mubr.msk.bf16.vlgmr.msra.gmra.mrb[32].mxu0 %vm15039_vm1, %v3232_v61  ;;  %v15059_v61 = vld [vmem:[#allocation71_spill] sm:$0xff] }
 0x95c   : > { %8481 = vmatprep.mubr.msk.bf16.mxu0 %vm15040_vm12, %v3234_v43  ;;  %v15060_v43 = vsub.f32 %v15058_v41, %v15059_v61  ;;  %vm15068_vm12 = vcmask 7168  }
 0x963   : > { %8482 = vmatmul.mubr.msk.bf16.gmra.mrb[36].mxu0 %vm15041_vm3, %v3236_v54  ;;  %v1790_v54 = vmul.f32 1.442695, %v15060_v43 }
 0x964   : > { %8485 = vmatprep.mubr.msk.bf16.mxu0 %vm15042_vm11, %v3238_v44  ;;  %v15062_v44 = vsub.f32 %v15061_v20, %v11321_v26  ;;  %v15067_v26 = vsub.f32 %v15066_v31, %v11300_v16  ;;  %vm15069_vm11 = vmmov %vm15068_vm12  ;;  %v15070_v16 = vsub.f32 %v11344_v50, %v11360_v53  ;;  %v11978_v20 = vpop.eup %9016 }
 0x965   : > { %9020 = vpow2.f32 %v1790_v54  ;;  %vm15072_vm15 = vmmov %vm15069_vm11  ;;  %v1954_v54 = vmul.f32 %v11964_v62, %v1938_v6  ;;  %v11982_v53 = vpop.eup %9018  ;;  %v1944_v6 = vld [vmem:[#allocation5 + $0x50] sm:$0xff] }
 0x966   : > { %v1796_v14 = vmul.f32 1.442695, %v15067_v26  ;;  %v1798_v41 = vmul.f32 1.442695, %v15070_v16  ;;  %vm15073_vm3 = vmmov %vm15069_vm11  ;;  %v1943_v26 = vld [vmem:[#allocation5 + $0x48] sm:$0xff]  ;;  %v1945_v16 = vld [vmem:[#allocation5 + $0x58] sm:$0xff] }
 0x96b   : > { %8486 = vmatmul.mubr.msk.bf16.gmra.mrb[40].mxu0 %vm15043_vm7, %v3240_v8  ;;  %v1792_v8 = vmul.f32 1.442695, %v15062_v44  ;;  %vm15077_vm7 = vmmov %vm15073_vm3 }
 0x96c   : > { %8489 = vmatprep.mubr.msk.bf16.mxu0 %vm15044_vm14, %v3242_v36  ;;  %v1951_v36 = vmul.f32 %v11852_v35, %v1935_v10  ;;  %v1952_v35 = vmul.f32 %v11855_v46, %v1936_v33  ;;  %v15071_v46 = vsub.f32 %v11349_v25, %v11363_v29  ;;  %v15074_v25 = vsub.f32 %v11323_v47, %v11339_v23  ;;  %vm15078_vm14 = vmmov %vm15073_vm3  ;;  %v1942_v47 = vld [vmem:[#allocation5 + $0x40] sm:$0xff] }
 0x96d   : > { %9022 = vpow2.f32 %v1792_v8  ;;  %v1955_v8 = vmul.f32 %v11968_v45, %v1939_v5 }
 0x96e   : > { %9024 = vpow2.f32 %v1794_v42  ;;  %v1800_v43 = vmul.f32 1.442695, %v15071_v46  ;;  %v1802_v29 = vmul.f32 1.442695, %v15074_v25 }
 0x96f   : > { %9026 = vpow2.f32 %v1796_v14  ;;  %v11992_v4 = vpop.eup %9020 }
 0x970   : > { %9028 = vpow2.f32 %v1798_v41  ;;  %v1958_v14 = vmul.f32 %v11992_v4, %v1942_v47 }
 0x971   : > { %9030 = vpow2.f32 %v1800_v43 }
 0x972   : > { %9032 = vpow2.f32 %v1802_v29 }
 0x973   : > { %8490 = vmatmul.mubr.msk.bf16.gmra.mrb[44].mxu0 %vm15039_vm1, %v3244_v11  ;;  %vm15079_vm1 = vmmov %vm15073_vm3 }
 0x977   : > { %v11996_v23 = vpop.eup %9022 }
 0x97e   : > { %v1969_v38 = vpop.xlane.xlu0 %1968 }
 0x97f   : > { %v1999_v11 = vadd.f32 %v1969_v38, %v1951_v36  ;;  %v1967_v55 = vpop.xlane.xlu1 %1966  ;;  %v1940_v36 = vld [vmem:[#allocation5 + $0x30] sm:$0xff] }
 0x980   : > { %v1998_v21 = vadd.f32 %v1967_v55, %v1950_v19  ;;  %v1941_v19 = vld [vmem:[#allocation5 + $0x38] sm:$0xff]  ;;  %v1956_v40 = vmul.f32 %v11978_v20, %v1940_v36 }
 0x981   : > { %2016 = vst.msk [vmem:[#allocation5 + $0x8] sm:$0xff] %vm15068_vm12, %v1999_v11  ;;  %v15075_v11 = vld [vmem:[#allocation72_spill] sm:$0xff]  ;;  %v1957_v42 = vmul.f32 %v11982_v53, %v1941_v19  ;;  %vm15080_vm12 = vmmov %vm15079_vm1 }
 0x982   : > { %2015 = vst.msk [vmem:[#allocation5] sm:$0xff] %vm15069_vm11, %v1998_v21  ;;  %v1971_v17 = vpop.xlane.xlu0 %1970  ;;  %v15076_v55 = vsub.f32 %v11332_v28, %v15075_v11  ;;  %vm15081_vm11 = vmmov %vm15079_vm1 }
 0x983   : > { %v2000_v34 = vadd.f32 %v1971_v17, %v1952_v35  ;;  %v1973_v10 = vpop.xlane.xlu1 %1972  ;;  %v12000_v35 = vpop.eup %9024 }
 0x984   : > { %v2001_v61 = vadd.f32 %v1973_v10, %v1953_v57  ;;  %v1804_v3 = vmul.f32 1.442695, %v15076_v55  ;;  %v1959_v57 = vmul.f32 %v11996_v23, %v1943_v26  ;;  %v1948_v55 = vld [vmem:[#allocation5 + $0x70] sm:$0xff] }
 0x985   : > { %2017 = vst.msk [vmem:[#allocation5 + $0x10] sm:$0xff] %vm15072_vm15, %v2000_v34  ;;  %v12004_v34 = vpop.eup %9026  ;;  %vm15082_vm15 = vmmov %vm15079_vm1 }
 0x986   : > { %2018 = vst.msk [vmem:[#allocation5 + $0x18] sm:$0xff] %vm15073_vm3, %v2001_v61  ;;  %v1975_v44 = vpop.xlane.xlu0 %1974  ;;  %9034 = vpow2.f32 %v1804_v3  ;;  %v1960_v61 = vmul.f32 %v12000_v35, %v1944_v6  ;;  %v12008_v46 = vpop.eup %9028  ;;  %vm15083_vm3 = vmmov %vm15079_vm1 }
 0x987   : > { %v2002_v50 = vadd.f32 %v1975_v44, %v1954_v54  ;;  %v1977_v38 = vpop.xlane.xlu1 %1976  ;;  %v1961_v54 = vmul.f32 %v12004_v34, %v1945_v16  ;;  %v1946_v44 = vld [vmem:[#allocation5 + $0x60] sm:$0xff]  ;;  %v2033_v16 = vld [vmem:[#allocation6 + $0x10] sm:$0xff] }
 0x988   : > { %v2003_v33 = vadd.f32 %v1977_v38, %v1955_v8  ;;  %v12012_v8 = vpop.eup %9030  ;;  %v1947_v38 = vld [vmem:[#allocation5 + $0x68] sm:$0xff]  ;;  %v1962_v25 = vmul.f32 %v12008_v46, %v1946_v44 }
 0x989   : > { %2019 = vst.msk [vmem:[#allocation5 + $0x20] sm:$0xff] %vm15077_vm7, %v2002_v50  ;;  %v12016_v29 = vpop.eup %9032  ;;  %vm15084_vm7 = vmmov %vm15079_vm1  ;;  %v1963_v11 = vmul.f32 %v12012_v8, %v1947_v38 }
 0x98a   : > { %2020 = vst.msk [vmem:[#allocation5 + $0x28] sm:$0xff] %vm15078_vm14, %v2003_v33  ;;  %v1979_v49 = vpop.xlane.xlu0 %1978  ;;  %vm15085_vm14 = vmmov %vm15079_vm1 }
 0x98b   : > { %v2004_v21 = vadd.f32 %v1979_v49, %v1956_v40  ;;  %v1981_v31 = vpop.xlane.xlu1 %1980 }
 0x98c   : > { %v2005_v28 = vadd.f32 %v1981_v31, %v1957_v42  ;;  %v1949_v42 = vld [vmem:[#allocation5 + $0x78] sm:$0xff] }
 0x98d   : > { %2021 = vst.msk [vmem:[#allocation5 + $0x30] sm:$0xff] %vm15079_vm1, %v2004_v21  ;;  %v1964_v21 = vmul.f32 %v12016_v29, %v1948_v55 }
 0x98e   : > { %2022 = vst.msk [vmem:[#allocation5 + $0x38] sm:$0xff] %vm15080_vm12, %v2005_v28  ;;  %v1983_v17 = vpop.xlane.xlu0 %1982  ;;  %vm15086_vm12 = vmmov %vm15079_vm1 }
 0x98f   : > { %v2006_v10 = vadd.f32 %v1983_v17, %v1958_v14  ;;  %v1985_v5 = vpop.xlane.xlu1 %1984 }
 0x990   : > { %v2007_v41 = vadd.f32 %v1985_v5, %v1959_v57  ;;  %v12020_v3 = vpop.eup %9034  ;;  %v2032_v57 = vld [vmem:[#allocation6 + $0x8] sm:$0xff]  ;;  %v2031_v5 = vld [vmem:[#allocation6] sm:$0xff] }
 0x991   : > { %2023 = vst.msk [vmem:[#allocation5 + $0x40] sm:$0xff] %vm15081_vm11, %v2006_v10  ;;  %v1965_v26 = vmul.f32 %v12020_v3, %v1949_v42  ;;  %vm15087_vm11 = vmmov %vm15079_vm1 }
 0x992   : > { %2024 = vst.msk [vmem:[#allocation5 + $0x48] sm:$0xff] %vm15082_vm15, %v2007_v41  ;;  %v1987_v43 = vpop.xlane.xlu0 %1986  ;;  %vm15088_vm15 = vcmask 261120  }
 0x993   : > { %v2008_v36 = vadd.f32 %v1987_v43, %v1960_v61  ;;  %v1989_v50 = vpop.xlane.xlu1 %1988 }
 0x994   : > { %v2009_v19 = vadd.f32 %v1989_v50, %v1961_v54 }
 0x995   : > { %2025 = vst.msk [vmem:[#allocation5 + $0x50] sm:$0xff] %vm15083_vm3, %v2008_v36  ;;  %vm15089_vm3 = vmmov %vm15088_vm15 }
 0x996   : > { %2026 = vst.msk [vmem:[#allocation5 + $0x58] sm:$0xff] %vm15084_vm7, %v2009_v19  ;;  %v1991_v33 = vpop.xlane.xlu0 %1990  ;;  %vm15090_vm7 = vmmov %vm15089_vm3 }
 0x997   : > { %v2010_v40 = vadd.f32 %v1991_v33, %v1962_v25  ;;  %v1993_v49 = vpop.xlane.xlu1 %1992 }
 0x998   : > { %v2011_v47 = vadd.f32 %v1993_v49, %v1963_v11 }
 0x999   : > { %2027 = vst.msk [vmem:[#allocation5 + $0x60] sm:$0xff] %vm15085_vm14, %v2010_v40 }
 0x99a   : > { %2028 = vst.msk [vmem:[#allocation5 + $0x68] sm:$0xff] %vm15079_vm1, %v2011_v47  ;;  %v1995_v31 = vpop.xlane.xlu0 %1994 }
 0x99b   : > { %v2012_v28 = vadd.f32 %v1995_v31, %v1964_v21  ;;  %v1997_v14 = vpop.xlane.xlu1 %1996 }
 0x99c   : > { %v2013_v17 = vadd.f32 %v1997_v14, %v1965_v26 }
 0x99d   : > { %2029 = vst.msk [vmem:[#allocation5 + $0x70] sm:$0xff] %vm15086_vm12, %v2012_v28 }
 0x99e   : > { %2030 = vst.msk [vmem:[#allocation5 + $0x78] sm:$0xff] %vm15087_vm11, %v2013_v17 }
 0x99f   : > { %v2055_v6 = vpop.permute.xlu1 %2054 }
 0x9a0   : > { %v2128_v10 = vmul.f32 %v2055_v6, %v2032_v57 }
 0x9a2   : > { %v2249_v41 = vadd.f32 %v11503_v52, %v2128_v10  ;;  %v2050_v61 = vpop.permute.xlu0 %2049 }
 0x9a3   : > { %v2127_v43 = vmul.f32 %v2050_v61, %v2031_v5  ;;  %v2060_v54 = vpop.permute.xlu1 %2059 }
 0x9a4   : > { %2265 = vst.msk [vmem:[#allocation6 + $0x8] sm:$0xff] %vm15088_vm15, %v2249_v41  ;;  %v2129_v44 = vmul.f32 %v2060_v54, %v2033_v16 }
 0x9a5   : > { %v2248_v36 = vadd.f32 %v11499_v32, %v2127_v43 }
 0x9a6   : > { %v2250_v50 = vadd.f32 %v11497_v63, %v2129_v44 }
 0x9a7   : > { %2264 = vst.msk [vmem:[#allocation6] sm:$0xff] %vm15089_vm3, %v2248_v36  ;;  %v3881_v33 = vpop.permute.xlu1 %3880 }
 0x9a8   : > { %2266 = vst.msk [vmem:[#allocation6 + $0x10] sm:$0xff] %vm15090_vm7, %v2250_v50  ;;  %8493 = vmatprep.subr.bf16.mxu1 %v3881_v33 }
 0x9a9   : > { %8494 = vmatpush3.bf16.msra.mxu1 %v3881_v33 }
 0x9d4   : > { %v12034_v38 = vpop.f32.mrb[16].mxu0 }
 0x9d5   : > { %v12036_v19 = vpop.f32.mrb[17].mxu0 }
 0x9d6   : > { %v12038_v25 = vpop.f32.mrb[18].mxu0 }
 0x9d7   : > { %v12040_v52 = vpop.f32.mrb[19].mxu0 }
 0xa0b   : > { %v12042_v11 = vpop.f32.mrb[20].mxu0 }
 0xa0c   : > { %15091 = vst [vmem:[#allocation54_spill] sm:$0xff] %v12042_v11  ;;  %v12044_v32 = vpop.f32.mrb[21].mxu0 }
 0xa0d   : > { %15092 = vst [vmem:[#allocation57_spill] sm:$0xff] %v12044_v32  ;;  %v12046_v63 = vpop.f32.mrb[22].mxu0 }
 0xa0e   : > { %15093 = vst [vmem:[#allocation49_spill] sm:$0xff] %v12046_v63  ;;  %v12048_v55 = vpop.f32.mrb[23].mxu0  ;;  %v12259_v63 = vld [vmem:[#allocation4 + $0x170] sm:$0xff] }
 0xa0f   : > { %15147 = vst [vmem:[#allocation124_spill] sm:$0xff] %v12259_v63 }
 0xa14   : > { %v12050_v40 = vpop.f32.mrb[24].mxu0 }
 0xa15   : > { %15094 = vst [vmem:[#allocation51_spill] sm:$0xff] %v12050_v40  ;;  %v12052_v49 = vpop.f32.mrb[25].mxu0 }
 0xa16   : > { %15095 = vst [vmem:[#allocation50_spill] sm:$0xff] %v12052_v49  ;;  %v12054_v42 = vpop.f32.mrb[26].mxu0 }
 0xa17   : > { %15096 = vst [vmem:[#allocation52_spill] sm:$0xff] %v12054_v42  ;;  %v12056_v47 = vpop.f32.mrb[27].mxu0 }
 0xa18   : > { %15097 = vst [vmem:[#allocation53_spill] sm:$0xff] %v12056_v47  ;;  %v12167_v47 = vld [vmem:[#allocation4 + $0x108] sm:$0xff] }
 0xa19   : > { %15127 = vst [vmem:[#allocation70_spill] sm:$0xff] %v12167_v47 }
 0xa1e   : > { %v12058_v21 = vpop.f32.mrb[28].mxu0 }
 0xa1f   : > { %15098 = vst [vmem:[#allocation55_spill] sm:$0xff] %v12058_v21  ;;  %v12060_v31 = vpop.f32.mrb[29].mxu0 }
 0xa20   : > { %15099 = vst [vmem:[#allocation63_spill] sm:$0xff] %v12060_v31  ;;  %v12062_v26 = vpop.f32.mrb[30].mxu0 }
 0xa21   : > { %15100 = vst [vmem:[#allocation64_spill] sm:$0xff] %v12062_v26  ;;  %v12064_v28 = vpop.f32.mrb[31].mxu0 }
 0xa22   : > { %15101 = vst [vmem:[#allocation58_spill] sm:$0xff] %v12064_v28 }
 0xa2e   : > { %v8479_v14 = vpop.f32.mrb[32].mxu0 }
 0xa2f   : > { %v12068_v17 = vsel %vm10969_vm5, %v8479_v14, -10000.0  ;;  %v3343_v57 = vpop.f32.mrb[33].mxu0 }
 0xa30   : > { %3443 = vmax.xlane.f32.xlu0 %v12068_v17  ;;  %v8480_v6 = vpop.f32.mrb[34].mxu0  ;;  %v12078_v41 = vsel %vm10975_vm6, %v3343_v57, -10000.0  ;;  %v9206_v57 = vld [vmem:[%s11171_s12 + $0x18] sm:$0xff] }
 0xa31   : > { %v12073_v10 = vsel %vm10994_vm9, %v8480_v6, -10000.0  ;;  %v3346_v5 = vpop.f32.mrb[35].mxu0 }
 0xa32   : > { %3445 = vmax.xlane.f32.xlu1 %v12073_v10  ;;  %v12083_v43 = vsel %vm11002_vm10, %v3346_v5, -10000.0  ;;  %v9207_v5 = vld [vmem:[%s11171_s12 + $0x8] sm:$0xff] }
 0xa34   : > { %3439 = vmax.xlane.f32.xlu0 %v12078_v41 }
 0xa36   : > { %3441 = vmax.xlane.f32.xlu1 %v12083_v43  ;;  %v8483_v54 = vpop.f32.mrb[36].mxu0 }
 0xa37   : > { %v3359_v44 = vpop.f32.mrb[37].mxu0  ;;  %v12092_v26 = vsel %vm11020_vm13, %v8483_v54, -10000.0 }
 0xa38   : > { %v8484_v36 = vpop.f32.mrb[38].mxu0 }
 0xa39   : > { %v3362_v50 = vpop.f32.mrb[39].mxu0 }
 0xa3a   : > { %v12097_v31 = vsel %vm11047_vm4, %v3362_v50, -10000.0  ;;  %v15107_v50 = vld [vmem:[#allocation42_spill] sm:$0xff] }
 0xa3b   : > { %vm15108_vm14 = vnez %v15107_v50  ;;  %v15115_v50 = vld [vmem:[#allocation46_spill] sm:$0xff] }
 0xa3c   : > { %vm15116_vm15 = vnez %v15115_v50  ;;  %v12150_v50 = vld [vmem:[#allocation4 + $0x110] sm:$0xff] }
 0xa3d   : > { %15121 = vst [vmem:[#allocation61_spill] sm:$0xff] %v12150_v50 }
 0xa3e   : > { %v8487_v33 = vpop.f32.mrb[40].mxu0 }
 0xa3f   : > { %v3375_v14 = vpop.f32.mrb[41].mxu0  ;;  %v12106_v42 = vsel %vm14965_vm8, %v8487_v33, -10000.0  ;;  %v15111_v33 = vld [vmem:[#allocation44_spill] sm:$0xff] }
 0xa40   : > { %v8488_v6 = vpop.f32.mrb[42].mxu0  ;;  %v12116_v18 = vsel %vm15108_vm14, %v3375_v14, -10000.0  ;;  %vm15112_vm12 = vnez %v15111_v33 }
 0xa41   : > { %v3378_v58 = vpop.f32.mrb[43].mxu0 }
 0xa46   : > { %v8491_v16 = vpop.f32.mrb[44].mxu0 }
 0xa47   : > { %3886 = vrot.lane.b32.xlu1 %v9206_v57, %s9960_s21  ;;  %v3391_v48 = vpop.f32.mrb[45].mxu0  ;;  %v12102_v57 = vsel %vm11040_vm2, %v3359_v44, -10000.0  ;;  %v15109_v44 = vld [vmem:[#allocation41_spill] sm:$0xff]  ;;  %v12126_v40 = vsel %vm15112_vm12, %v8491_v16, -10000.0  ;;  %v15119_v16 = vld [vmem:[#allocation47_spill] sm:$0xff] }
 0xa48   : > { %v8492_v21 = vpop.f32.mrb[46].mxu0  ;;  %vm15110_vm1 = vnez %v15109_v44  ;;  %v12136_v54 = vsel %vm15116_vm15, %v3391_v48, -10000.0  ;;  %vm15120_vm7 = vnez %v15119_v16 }
 0xa49   : > { %v3394_v61 = vpop.f32.mrb[47].mxu0  ;;  %v12121_v28 = vsel %vm15110_vm1, %v8488_v6, -10000.0  ;;  %v15117_v6 = vld [vmem:[#allocation45_spill] sm:$0xff] }
 0xa4a   : > { %3882 = vrot.lane.b32.xlu0 %v9207_v5, %s9960_s21  ;;  %v12112_v5 = vsel %vm11030_vm0, %v8484_v36, -10000.0  ;;  %v15113_v36 = vld [vmem:[#allocation43_spill] sm:$0xff]  ;;  %vm15118_vm3 = vnez %v15117_v6  ;;  %v12147_v33 = vsel %vm15120_vm7, %v3394_v61, -10000.0  ;;  %vm15125_vm7 = vcmask 7168  }
 0xa4b   : > { %vm15114_vm11 = vnez %v15113_v36  ;;  %v12141_v44 = vsel %vm15118_vm3, %v8492_v21, -10000.0  ;;  %v12152_v36 = vld [vmem:[#allocation4 + $0x118] sm:$0xff]  ;;  %vm15128_vm3 = vmmov %vm15125_vm7 }
 0xa4c   : > { %v12132_v14 = vsel %vm15114_vm11, %v3378_v58, -10000.0  ;;  %v3885_v58 = vpop.permute.xlu1 %3884  ;;  %15122 = vst [vmem:[#allocation59_spill] sm:$0xff] %v12152_v36 }
 0xa69   : > { %3451 = vmax.xlane.f32.xlu0 %v12092_v26 }
 0xa6b   : > { %3449 = vmax.xlane.f32.xlu1 %v12097_v31 }
 0xa6d   : > { %3447 = vmax.xlane.f32.xlu0 %v12102_v57 }
 0xa6f   : > { %3459 = vmax.xlane.f32.xlu1 %v12106_v42 }
 0xa71   : > { %3453 = vmax.xlane.f32.xlu0 %v12112_v5 }
 0xa73   : > { %3455 = vmax.xlane.f32.xlu1 %v12116_v18 }
 0xa75   : > { %3461 = vmax.xlane.f32.xlu0 %v12121_v28 }
 0xa77   : > { %3467 = vmax.xlane.f32.xlu1 %v12126_v40 }
 0xa79   : > { %3457 = vmax.xlane.f32.xlu0 %v12132_v14 }
 0xa7b   : > { %3463 = vmax.xlane.f32.xlu1 %v12136_v54 }
 0xa7d   : > { %3469 = vmax.xlane.f32.xlu0 %v12141_v44 }
 0xa81   : > { %3465 = vmax.xlane.f32.xlu0 %v12147_v33 }
 0xabd   : > { %v3444_v48 = vpop.xlane.xlu0 %3443 }
 0xabe   : > { %v12155_v6 = vmax.f32 %v12150_v50, %v3444_v48 }
 0xabf   : > { %v3446_v21 = vpop.xlane.xlu1 %3445 }
 0xac0   : > { %15123 = vst [vmem:[#allocation62_spill] sm:$0xff] %v12155_v6  ;;  %4100 = vst.msk [vmem:[#allocation4 + $0x110] sm:$0xff] %vm15125_vm7, %v12155_v6  ;;  %v12164_v61 = vmax.f32 %v12152_v36, %v3446_v21  ;;  %3547 = vperm.xlu0 %8938, %v12155_v6   ;;  %v9209_v21 = vld [vmem:[%s11171_s12 + $0x30] sm:$0xff]  ;;  %v9210_v36 = vld [vmem:[%s11171_s12 + $0x28] sm:$0xff] }
 0xac1   : > { %v3440_v16 = vpop.xlane.xlu0 %3439  ;;  %vm15130_vm7 = vmmov %vm15128_vm3 }
 0xac2   : > { %15126 = vst [vmem:[#allocation71_spill] sm:$0xff] %v12164_v61  ;;  %4101 = vst.msk [vmem:[#allocation4 + $0x118] sm:$0xff] %vm15128_vm3, %v12164_v61  ;;  %v12174_v49 = vmax.f32 %v12157_v7, %v3440_v16  ;;  %v9208_v16 = vld [vmem:[%s11171_s12 + $0x20] sm:$0xff]  ;;  %v12206_v7 = vld [vmem:[#allocation4 + $0x128] sm:$0xff] }
 0xac3   : > { %v3442_v50 = vpop.xlane.xlu1 %3441  ;;  %15133 = vst [vmem:[#allocation72_spill] sm:$0xff] %v12206_v7 }
 0xac4   : > { %15129 = vst [vmem:[#allocation66_spill] sm:$0xff] %v12174_v49  ;;  %4098 = vst.msk [vmem:[#allocation4 + $0x100] sm:$0xff] %vm15130_vm7, %v12174_v49  ;;  %v12181_v6 = vmax.f32 %v12167_v47, %v3442_v50  ;;  %3537 = vperm.xlu0 %8938, %v12174_v49   ;;  %v9212_v49 = vld [vmem:[%s11171_s12 + $0x38] sm:$0xff] }
 0xac5   : > { %v3883_v48 = vpop.permute.xlu0 %3882  ;;  %vm15136_vm7 = vmmov %vm15128_vm3 }
 0xac6   : > { %15131 = vst [vmem:[#allocation68_spill] sm:$0xff] %v12181_v6  ;;  %4099 = vst.msk [vmem:[#allocation4 + $0x108] sm:$0xff] %vm15128_vm3, %v12181_v6  ;;  %8495 = vmatprep.subr.bf16.mxu1 %v3883_v48  ;;  %3542 = vperm.xlu1 %8939, %v12181_v6   ;;  %v12211_v6 = vld [vmem:[#allocation4 + $0x120] sm:$0xff] }
 0xac7   : > { %8496 = vmatpush3.bf16.msra.mxu1 %v3883_v48  ;;  %v3887_v50 = vpop.permute.xlu1 %3886  ;;  %v9211_v48 = vld [vmem:[%s10864_s4] sm:$0xff]  ;;  %15135 = vst [vmem:[#allocation115_spill] sm:$0xff] %v12211_v6 }
 0xac8   : > { %8497 = vmatprep.subr.bf16.mxu1 %v3885_v58  ;;  %3888 = vrot.lane.b32.xlu0 %v9208_v16, %s9960_s21  ;;  %v9213_v16 = vld [vmem:[%s10864_s4 + $0x10] sm:$0xff] }
 0xaca   : > { %3552 = vperm.xlu1 %8939, %v12164_v61   ;;  %v9214_v61 = vld [vmem:[%s10864_s4 + $0x8] sm:$0xff] }
 0xacb   : > { %8498 = vmatpush3.bf16.msra.mxu1 %v3885_v58  ;;  %v12204_v58 = vld [vmem:[#allocation4 + $0x130] sm:$0xff] }
 0xacc   : > { %8499 = vmatprep.subr.bf16.mxu1 %v3887_v50  ;;  %3892 = vrot.lane.b32.xlu0 %v9209_v21, %s9960_s21  ;;  %15132 = vst [vmem:[#allocation67_spill] sm:$0xff] %v12204_v58 }
 0xace   : > { %3890 = vrot.lane.b32.xlu1 %v9210_v36, %s9960_s21 }
 0xacf   : > { %8500 = vmatpush3.bf16.msra.mxu1 %v3887_v50 }
 0xad0   : > { %4146 = vrot.lane.b32.xlu0 %v9211_v48, %s9961_s13 }
 0xad2   : > { %3894 = vrot.lane.b32.xlu1 %v9212_v49, %s9960_s21  ;;  %v12230_v49 = vld [vmem:[#allocation4 + $0x138] sm:$0xff] }
 0xad3   : > { %15140 = vst [vmem:[#allocation119_spill] sm:$0xff] %v12230_v49 }
 0xad4   : > { %4150 = vrot.lane.b32.xlu0 %v9213_v16, %s9961_s13  ;;  %v12221_v16 = vld [vmem:[#allocation4 + $0x150] sm:$0xff] }
 0xad5   : > { %15138 = vst [vmem:[#allocation117_spill] sm:$0xff] %v12221_v16 }
 0xad6   : > { %4148 = vrot.lane.b32.xlu1 %v9214_v61, %s9961_s13 }
 0xaf6   : > { %v3452_v21 = vpop.xlane.xlu0 %3451 }
 0xaf7   : > { %v12209_v36 = vmax.f32 %v12204_v58, %v3452_v21 }
 0xaf8   : > { %v3450_v50 = vpop.xlane.xlu1 %3449 }
 0xaf9   : > { %15134 = vst [vmem:[#allocation114_spill] sm:$0xff] %v12209_v36  ;;  %4104 = vst.msk [vmem:[#allocation4 + $0x130] sm:$0xff] %vm15136_vm7, %v12209_v36  ;;  %v12218_v48 = vmax.f32 %v12206_v7, %v3450_v50  ;;  %3567 = vperm.xlu0 %8938, %v12209_v36   ;;  %v12240_v7 = vld [vmem:[#allocation4 + $0x140] sm:$0xff]  ;;  %v12249_v50 = vld [vmem:[#allocation4 + $0x158] sm:$0xff] }
 0xafa   : > { %v3448_v61 = vpop.xlane.xlu0 %3447  ;;  %vm15141_vm7 = vmmov %vm15128_vm3  ;;  %15142 = vst [vmem:[#allocation120_spill] sm:$0xff] %v12240_v7 }
 0xafb   : > { %15137 = vst [vmem:[#allocation116_spill] sm:$0xff] %v12218_v48  ;;  %4103 = vst.msk [vmem:[#allocation4 + $0x128] sm:$0xff] %vm15128_vm3, %v12218_v48  ;;  %v12228_v47 = vmax.f32 %v12211_v6, %v3448_v61 }
 0xafc   : > { %v3460_v58 = vpop.xlane.xlu1 %3459  ;;  %15144 = vst [vmem:[#allocation122_spill] sm:$0xff] %v12249_v50 }
 0xafd   : > { %15139 = vst [vmem:[#allocation118_spill] sm:$0xff] %v12228_v47  ;;  %4102 = vst.msk [vmem:[#allocation4 + $0x120] sm:$0xff] %vm15141_vm7, %v12228_v47  ;;  %3557 = vperm.xlu0 %8938, %v12228_v47   ;;  %v12238_v36 = vmax.f32 %v12221_v16, %v3460_v58  ;;  %v12268_v47 = vld [vmem:[#allocation4 + $0x148] sm:$0xff]  ;;  %v12279_v16 = vld [vmem:[#allocation4 + $0x160] sm:$0xff] }
 0xafe   : > { %v3454_v21 = vpop.xlane.xlu0 %3453  ;;  %vm15145_vm7 = vmmov %vm15128_vm3  ;;  %15149 = vst [vmem:[#allocation126_spill] sm:$0xff] %v12268_v47 }
 0xaff   : > { %v12243_v61 = vmax.f32 %v12230_v49, %v3454_v21  ;;  %4108 = vst.msk [vmem:[#allocation4 + $0x150] sm:$0xff] %vm15128_vm3, %v12238_v36  ;;  %15152 = vst [vmem:[#allocation128_spill] sm:$0xff] %v12279_v16 }
 0xb00   : > { %v3456_v6 = vpop.xlane.xlu1 %3455 }
 0xb01   : > { %15143 = vst [vmem:[#allocation121_spill] sm:$0xff] %v12243_v61  ;;  %4105 = vst.msk [vmem:[#allocation4 + $0x138] sm:$0xff] %vm15145_vm7, %v12243_v61  ;;  %3572 = vperm.xlu1 %8939, %v12243_v61   ;;  %v12257_v58 = vmax.f32 %v12240_v7, %v3456_v6  ;;  %v12288_v61 = vld [vmem:[#allocation4 + $0x178] sm:$0xff] }
 0xb02   : > { %v3462_v21 = vpop.xlane.xlu0 %3461  ;;  %vm15150_vm7 = vmmov %vm15128_vm3  ;;  %15154 = vst [vmem:[#allocation130_spill] sm:$0xff] %v12288_v61 }
 0xb03   : > { %15146 = vst [vmem:[#allocation123_spill] sm:$0xff] %v12257_v58  ;;  %v12262_v11 = vmax.f32 %v12249_v50, %v3462_v21  ;;  %4106 = vst.msk [vmem:[#allocation4 + $0x140] sm:$0xff] %vm15128_vm3, %v12257_v58  ;;  %v12306_v50 = vld [vmem:[#allocation4 + $0x168] sm:$0xff] }
 0xb04   : > { %v3468_v49 = vpop.xlane.xlu1 %3467  ;;  %15158 = vst [vmem:[#allocation133_spill] sm:$0xff] %v12306_v50 }
 0xb05   : > { %15148 = vst [vmem:[#allocation125_spill] sm:$0xff] %v12262_v11  ;;  %4109 = vst.msk [vmem:[#allocation4 + $0x158] sm:$0xff] %vm15150_vm7, %v12262_v11  ;;  %3592 = vperm.xlu0 %8938, %v12262_v11   ;;  %3562 = vperm.xlu1 %8939, %v12218_v48   ;;  %v12277_v6 = vmax.f32 %v12259_v63, %v3468_v49  ;;  %v9219_v63 = vld [vmem:[#allocation3] sm:$0xff] }
 0xb06   : > { %v3458_v21 = vpop.xlane.xlu0 %3457  ;;  %vm15155_vm7 = vmmov %vm15128_vm3 }
 0xb07   : > { %15151 = vst [vmem:[#allocation127_spill] sm:$0xff] %v12277_v6  ;;  %v12282_v7 = vmax.f32 %v12268_v47, %v3458_v21  ;;  %4112 = vst.msk [vmem:[#allocation4 + $0x170] sm:$0xff] %vm15128_vm3, %v12277_v6  ;;  %v9218_v47 = vld [vmem:[%s10864_s4 + $0x28] sm:$0xff] }
 0xb08   : > { %v3464_v11 = vpop.xlane.xlu1 %3463 }
 0xb09   : > { %15153 = vst [vmem:[#allocation129_spill] sm:$0xff] %v12282_v7  ;;  %4107 = vst.msk [vmem:[#allocation4 + $0x148] sm:$0xff] %vm15155_vm7, %v12282_v7  ;;  %3582 = vperm.xlu0 %8938, %v12282_v7   ;;  %3587 = vperm.xlu1 %8939, %v12238_v36   ;;  %v12297_v49 = vmax.f32 %v12279_v16, %v3464_v11  ;;  %v9215_v7 = vld [vmem:[%s10864_s4 + $0x18] sm:$0xff] }
 0xb0a   : > { %v3470_v21 = vpop.xlane.xlu0 %3469  ;;  %vm15159_vm7 = vmmov %vm15128_vm3 }
 0xb0b   : > { %15156 = vst [vmem:[#allocation131_spill] sm:$0xff] %v12297_v49  ;;  %v12300_v32 = vmax.f32 %v12288_v61, %v3470_v21  ;;  %4110 = vst.msk [vmem:[#allocation4 + $0x160] sm:$0xff] %vm15128_vm3, %v12297_v49  ;;  %v9216_v61 = vld [vmem:[%s10864_s4 + $0x20] sm:$0xff] }
 0xb0d   : > { %15157 = vst [vmem:[#allocation132_spill] sm:$0xff] %v12300_v32  ;;  %4113 = vst.msk [vmem:[#allocation4 + $0x178] sm:$0xff] %vm15159_vm7, %v12300_v32  ;;  %3577 = vperm.xlu1 %8939, %v12257_v58   ;;  %3607 = vperm.xlu0 %8938, %v12277_v6   ;;  %vm15161_vm7 = vcmask 261120  }
 0xb0e   : > { %v3466_v11 = vpop.xlane.xlu0 %3465 }
 0xb0f   : > { %v12315_v21 = vmax.f32 %v12306_v50, %v3466_v11  ;;  %v9217_v11 = vld [vmem:[%s10864_s4 + $0x30] sm:$0xff]  ;;  %v9220_v50 = vld [vmem:[%s10864_s4 + $0x38] sm:$0xff] }
 0xb11   : > { %15160 = vst [vmem:[#allocation134_spill] sm:$0xff] %v12315_v21  ;;  %4111 = vst.msk [vmem:[#allocation4 + $0x168] sm:$0xff] %vm15128_vm3, %v12315_v21  ;;  %4152 = vrot.lane.b32.xlu1 %v9215_v7, %s9961_s13  ;;  %3597 = vperm.xlu0 %8938, %v12297_v49   ;;  %v9221_v7 = vld [vmem:[#allocation3 + $0x10] sm:$0xff] }
 0xb12   : > { %vm15162_vm3 = vmmov %vm15161_vm7 }
 0xb13   : > { %vm15163_vm15 = vmmov %vm15162_vm3 }
 0xb14   : > { %vm15165_vm12 = vmmov %vm15162_vm3 }
 0xb15   : > { %3602 = vperm.xlu1 %8939, %v12315_v21   ;;  %4154 = vrot.lane.b32.xlu0 %v9216_v61, %s9961_s13  ;;  %v9222_v21 = vld [vmem:[#allocation3 + $0x8] sm:$0xff]  ;;  %v9223_v61 = vld [vmem:[#allocation3 + $0x20] sm:$0xff] }
 0xb19   : > { %3612 = vperm.xlu1 %8939, %v12300_v32   ;;  %4158 = vrot.lane.b32.xlu0 %v9217_v11, %s9961_s13  ;;  %v9224_v32 = vld [vmem:[#allocation3 + $0x18] sm:$0xff]  ;;  %v9225_v11 = vld [vmem:[#allocation3 + $0x30] sm:$0xff] }
 0xb1d   : > { %4156 = vrot.lane.b32.xlu1 %v9218_v47, %s9961_s13  ;;  %4130 = vrot.lane.b32.xlu0 %v9219_v63, %s9961_s13  ;;  %v9226_v47 = vld [vmem:[#allocation3 + $0x28] sm:$0xff]  ;;  %v9227_v63 = vld [vmem:[#allocation3 + $0x38] sm:$0xff] }
 0xb21   : > { %4160 = vrot.lane.b32.xlu1 %v9220_v50, %s9961_s13  ;;  %4134 = vrot.lane.b32.xlu0 %v9221_v7, %s9961_s13 }
 0xb25   : > { %4132 = vrot.lane.b32.xlu1 %v9222_v21, %s9961_s13  ;;  %4138 = vrot.lane.b32.xlu0 %v9223_v61, %s9961_s13 }
 0xb29   : > { %4136 = vrot.lane.b32.xlu1 %v9224_v32, %s9961_s13  ;;  %4142 = vrot.lane.b32.xlu0 %v9225_v11, %s9961_s13 }
 0xb2d   : > { %4140 = vrot.lane.b32.xlu1 %v9226_v47, %s9961_s13 }
 0xb31   : > { %4144 = vrot.lane.b32.xlu1 %v9227_v63, %s9961_s13 }
 0xb3f   : > { %v3548_v50 = vpop.permute.xlu0 %3547 }
 0xb40   : > { %v3617_v21 = vsub.f32 %v12068_v17, %v3548_v50 }
 0xb42   : > { %v3635_v11 = vmul.f32 1.442695, %v3617_v21 }
 0xb43   : > { %v3538_v7 = vpop.permute.xlu0 %3537 }
 0xb44   : > { %v3615_v49 = vsub.f32 %v12078_v41, %v3538_v7 }
 0xb45   : > { %v3543_v16 = vpop.permute.xlu1 %3542 }
 0xb46   : > { %v3631_v61 = vmul.f32 1.442695, %v3615_v49  ;;  %v3616_v6 = vsub.f32 %v12083_v43, %v3543_v16 }
 0xb47   : > { %v3889_v32 = vpop.permute.xlu0 %3888 }
 0xb48   : > { %v3633_v48 = vmul.f32 1.442695, %v3616_v6  ;;  %2789 = vadd.xlane.f32.xlu0 %v11814_v37  ;;  %8501 = vmatprep.subr.bf16.mxu1 %v3889_v32  ;;  %9036 = vpow2.f32 %v3631_v61 }
 0xb49   : > { %v3553_v47 = vpop.permute.xlu1 %3552  ;;  %8502 = vmatpush3.bf16.msra.mxu1 %v3889_v32 }
 0xb4a   : > { %9038 = vpow2.f32 %v3633_v48  ;;  %v3618_v63 = vsub.f32 %v12073_v10, %v3553_v47  ;;  %v15172_v47 = vld [vmem:[#allocation90_spill] sm:$0xff] }
 0xb4b   : > { %9040 = vpow2.f32 %v3635_v11  ;;  %v3893_v41 = vpop.permute.xlu0 %3892 }
 0xb4c   : > { %v3637_v58 = vmul.f32 1.442695, %v3618_v63  ;;  %2791 = vadd.xlane.f32.xlu0 %v11821_v30  ;;  %v15173_v63 = vld [vmem:[#allocation92_spill] sm:$0xff] }
 0xb4d   : > { %v3891_v17 = vpop.permute.xlu1 %3890 }
 0xb4e   : > { %9042 = vpow2.f32 %v3637_v58  ;;  %8503 = vmatprep.subr.bf16.mxu1 %v3891_v17 }
 0xb4f   : > { %8504 = vmatpush3.bf16.msra.mxu1 %v3891_v17  ;;  %v4147_v10 = vpop.permute.xlu0 %4146  ;;  %v15174_v17 = vsub.f32 %v15172_v47, %v15173_v63  ;;  %v15193_v47 = vld [vmem:[#allocation103_spill] sm:$0xff]  ;;  %v15194_v63 = vld [vmem:[#allocation105_spill] sm:$0xff] }
 0xb50   : > { %2795 = vadd.xlane.f32.xlu0 %v11879_v0  ;;  %8505 = vmatprep.subr.bf16.mxu1 %v3893_v41 }
 0xb51   : > { %v3895_v37 = vpop.permute.xlu1 %3894 }
 0xb52   : > { %v12349_v43 = vpop.eup %9036 }
 0xb53   : > { %8506 = vmatpush3.bf16.msra.mxu1 %v3893_v41  ;;  %v2596_v41 = vmul.f32 1.442695, %v15174_v17  ;;  %v15195_v17 = vsub.f32 %v15193_v47, %v15194_v63 }
 0xb54   : > { %v12351_v16 = vpop.eup %9038  ;;  %2799 = vadd.xlane.f32.xlu0 %v11873_v59  ;;  %8507 = vmatprep.subr.bf16.mxu1 %v3895_v37 }
 0xb55   : > { %2787 = vadd.xlane.f32.xlu1 %v11817_v9  ;;  %v3872_v30 = vpack.c.bf16 %v12351_v16, %v12349_v43  ;;  %v12357_v48 = vpop.eup %9040  ;;  %v4187_v9 = vsel %vm15162_vm3, %v4147_v10, 0  ;;  %v4149_v58 = vpop.permute.xlu1 %4148 }
 0xb57   : > { %8509 = vmatprep.mubr.bf16.mxu1 %v3872_v30  ;;  %8508 = vmatpush3.bf16.msra.mxu1 %v3895_v37  ;;  %v15176_v37 = vld [vmem:[#allocation93_spill] sm:$0xff] }
 0xb58   : > { %v12359_v0 = vpop.eup %9042  ;;  %2803 = vadd.xlane.f32.xlu0 %v11897_v56  ;;  %8693 = vmatprep.subr.msk.bf16.mxu1 %vm15161_vm7, %v4147_v10  ;;  %vm15164_vm7 = vmmov %vm15162_vm3  ;;  %v4151_v56 = vpop.permute.xlu0 %4150 }
 0xb59   : > { %2793 = vadd.xlane.f32.xlu1 %v11824_v2  ;;  %v3873_v59 = vpack.c.bf16 %v12359_v0, %v12357_v48  ;;  %v4190_v2 = vsel %vm15164_vm7, %v4149_v58, 0  ;;  %vm15189_vm7 = vmmov %vm15162_vm3 }
 0xb5b   : > { %8510 = vmatmul.mubr.bf16.vlgmr.msra.gmra.mrb[32].mxu1 %v3873_v59  ;;  %v15178_v59 = vld [vmem:[#allocation95_spill] sm:$0xff] }
 0xb5c   : > { %2807 = vadd.xlane.f32.xlu0 %v11890_v12 }
 0xb5d   : > { %2797 = vadd.xlane.f32.xlu1 %v11881_v15  ;;  %v4193_v15 = vsel %vm15162_vm3, %v4151_v56, 0 }
 0xb60   : > { %2811 = vadd.xlane.f32.xlu0 %v11910_v24  ;;  %8526 = vmatpush3.bf16.xpose.msra.mxu1 %v4187_v9  ;;  %v15179_v9 = vld [vmem:[#allocation97_spill] sm:$0xff] }
 0xb61   : > { %2801 = vadd.xlane.f32.xlu1 %v11875_v13  ;;  %8694 = vmatprep.subr.msk.bf16.mxu1 %vm15163_vm15, %v4149_v58  ;;  %v15180_v58 = vsub.f32 %v15178_v59, %v15179_v9  ;;  %vm15182_vm15 = vmmov %vm15162_vm3  ;;  %v15196_v9 = vld [vmem:[#allocation99_spill] sm:$0xff] }
 0xb64   : > { %2815 = vadd.xlane.f32.xlu0 %v11914_v60  ;;  %v15167_v60 = vld [vmem:[#allocation89_spill] sm:$0xff] }
 0xb65   : > { %2805 = vadd.xlane.f32.xlu1 %v11899_v39 }
 0xb68   : > { %8528 = vmatpush3.bf16.xpose.msra.mxu1 %v4190_v2  ;;  %v2604_v2 = vmul.f32 1.442695, %v15180_v58  ;;  %v15197_v58 = vld [vmem:[#allocation101_spill] sm:$0xff] }
 0xb69   : > { %2809 = vadd.xlane.f32.xlu1 %v11895_v1  ;;  %8695 = vmatprep.subr.msk.bf16.mxu1 %vm15165_vm12, %v4151_v56  ;;  %vm15181_vm12 = vmmov %vm15162_vm3 }
 0xb6d   : > { %2813 = vadd.xlane.f32.xlu1 %v11907_v22  ;;  %v15166_v22 = vld [vmem:[#allocation87_spill] sm:$0xff] }
 0xb6e   : > { %v15168_v6 = vsub.f32 %v15166_v22, %v15167_v60  ;;  %v15184_v60 = vld [vmem:[#allocation65_spill] sm:$0xff] }
 0xb70   : > { %8530 = vmatpush3.bf16.xpose.msra.mxu1 %v4193_v15  ;;  %v2594_v49 = vmul.f32 1.442695, %v15168_v6 }
 0xb71   : > { %2817 = vadd.xlane.f32.xlu1 %v11916_v51 }
 0xb72   : > { %9044 = vpow2.f32 %v2594_v49 }
 0xb78   : > { %v3568_v13 = vpop.permute.xlu0 %3567 }
 0xb79   : > { %v3621_v51 = vsub.f32 %v12092_v26, %v3568_v13 }
 0xb7a   : > { %2064 = vperm.xlu0 %8938, %v11954_v27  }
 0xb7c   : > { %v3558_v12 = vpop.permute.xlu0 %3557 }
 0xb7d   : > { %v3619_v39 = vsub.f32 %v12102_v57, %v3558_v12 }
 0xb7e   : > { %2074 = vperm.xlu0 %8938, %v11968_v45  }
 0xb7f   : > { %v3639_v50 = vmul.f32 1.442695, %v3619_v39 }
 0xb80   : > { %v3573_v24 = vpop.permute.xlu1 %3572 }
 0xb81   : > { %v3622_v1 = vsub.f32 %v12112_v5, %v3573_v24  ;;  %v15170_v5 = vld [vmem:[#allocation88_spill] sm:$0xff]  ;;  %9046 = vpow2.f32 %v3639_v50 }
 0xb82   : > { %2069 = vperm.xlu1 %8939, %v11964_v62   ;;  %2084 = vperm.xlu0 %8938, %v11982_v53   ;;  %v3643_v62 = vmul.f32 1.442695, %v3621_v51  ;;  %v15169_v53 = vld [vmem:[#allocation86_spill] sm:$0xff]  ;;  %v15187_v50 = vld [vmem:[#allocation96_spill] sm:$0xff] }
 0xb83   : > { %v3645_v21 = vmul.f32 1.442695, %v3622_v1  ;;  %v15171_v61 = vsub.f32 %v15169_v53, %v15170_v5  ;;  %v15186_v51 = vld [vmem:[#allocation94_spill] sm:$0xff] }
 0xb84   : > { %v3593_v27 = vpop.permute.xlu0 %3592  ;;  %v3563_v7 = vpop.permute.xlu1 %3562 }
 0xb85   : > { %v3620_v45 = vsub.f32 %v12097_v31, %v3563_v7  ;;  %v2598_v32 = vmul.f32 1.442695, %v15171_v61  ;;  %9048 = vpow2.f32 %v3645_v21  ;;  %v3626_v56 = vsub.f32 %v12121_v28, %v3593_v27  ;;  %v12413_v28 = vpop.eup %9044  ;;  %v15190_v61 = vld [vmem:[#allocation48_spill] sm:$0xff] }
 0xb86   : > { %2079 = vperm.xlu1 %8939, %v11978_v20   ;;  %2094 = vperm.xlu0 %8938, %v11996_v23   ;;  %v15175_v23 = vld [vmem:[#allocation91_spill] sm:$0xff] }
 0xb87   : > { %v3641_v57 = vmul.f32 1.442695, %v3620_v45  ;;  %v15177_v30 = vsub.f32 %v15175_v23, %v15176_v37 }
 0xb88   : > { %v3583_v11 = vpop.permute.xlu0 %3582  ;;  %v3588_v26 = vpop.permute.xlu1 %3587 }
 0xb89   : > { %v3624_v31 = vsub.f32 %v12132_v14, %v3583_v11  ;;  %v3625_v20 = vsub.f32 %v12106_v42, %v3588_v26  ;;  %v2600_v10 = vmul.f32 1.442695, %v15177_v30  ;;  %9050 = vpow2.f32 %v3641_v57 }
 0xb8a   : > { %2089 = vperm.xlu1 %8939, %v11992_v4   ;;  %2104 = vperm.xlu0 %8938, %v12004_v34   ;;  %9052 = vpow2.f32 %v3643_v62  ;;  %v3653_v4 = vmul.f32 1.442695, %v3626_v56 }
 0xb8b   : > { %9054 = vpow2.f32 %v2598_v32  ;;  %v3649_v14 = vmul.f32 1.442695, %v3624_v31  ;;  %v3651_v13 = vmul.f32 1.442695, %v3625_v20  ;;  %v12418_v22 = vpop.eup %9046  ;;  %v15191_v32 = vld [vmem:[#allocation60_spill] sm:$0xff] }
 0xb8c   : > { %v3608_v15 = vpop.permute.xlu0 %3607  ;;  %v3578_v42 = vpop.permute.xlu1 %3577  ;;  %9056 = vpow2.f32 %v2596_v41  ;;  %v15192_v11 = vsub.f32 %v15190_v61, %v15191_v32  ;;  %v2612_v41 = vmul.f32 1.442695, %v15195_v17 }
 0xb8d   : > { %v3623_v12 = vsub.f32 %v12116_v18, %v3578_v42  ;;  %9058 = vpow2.f32 %v2600_v10  ;;  %v3629_v21 = vsub.f32 %v12126_v40, %v3608_v15  ;;  %v15199_v15 = vld [vmem:[#allocation102_spill] sm:$0xff]  ;;  %v15200_v42 = vld [vmem:[#allocation104_spill] sm:$0xff] }
 0xb8e   : > { %2099 = vperm.xlu1 %8939, %v12000_v35   ;;  %2114 = vperm.xlu0 %8938, %v12012_v8   ;;  %9060 = vpow2.f32 %v2604_v2  ;;  %v15183_v35 = vld [vmem:[#allocation56_spill] sm:$0xff]  ;;  %v2606_v26 = vmul.f32 1.442695, %v15192_v11  ;;  %v15198_v2 = vsub.f32 %v15196_v9, %v15197_v58 }
 0xb8f   : > { %v3647_v34 = vmul.f32 1.442695, %v3623_v12  ;;  %9062 = vpow2.f32 %v3649_v14  ;;  %v15185_v8 = vsub.f32 %v15183_v35, %v15184_v60  ;;  %v12425_v49 = vpop.eup %9048  ;;  %v3659_v23 = vmul.f32 1.442695, %v3629_v21 }
 0xb90   : > { %v3598_v39 = vpop.permute.xlu0 %3597  ;;  %v4153_v24 = vpop.permute.xlu1 %4152  ;;  %9064 = vpow2.f32 %v3651_v13  ;;  %v2616_v56 = vmul.f32 1.442695, %v15198_v2  ;;  %v15201_v13 = vsub.f32 %v15199_v15, %v15200_v42 }
 0xb91   : > { %v3627_v1 = vsub.f32 %v12136_v54, %v3598_v39  ;;  %8696 = vmatprep.subr.msk.bf16.mxu1 %vm15181_vm12, %v4153_v24  ;;  %v4196_v18 = vsel %vm15182_vm15, %v4153_v24, 0  ;;  %v2608_v6 = vmul.f32 1.442695, %v15185_v8  ;;  %9066 = vpow2.f32 %v3647_v34  ;;  %vm15202_vm12 = vmmov %vm15162_vm3 }
 0xb92   : > { %2109 = vperm.xlu1 %8939, %v12008_v46   ;;  %2124 = vperm.xlu0 %8938, %v12020_v3   ;;  %v15188_v54 = vsub.f32 %v15186_v51, %v15187_v50  ;;  %9068 = vpow2.f32 %v3653_v4  ;;  %v2610_v12 = vmul.f32 1.442695, %v15201_v13  ;;  %v15207_v51 = vld [vmem:[#allocation113_spill] sm:$0xff]  ;;  %vm15209_vm15 = vmmov %vm15162_vm3 }
 0xb93   : > { %8532 = vmatpush3.bf16.xpose.msra.mxu1 %v4196_v18  ;;  %v12430_v7 = vpop.eup %9050  ;;  %v3655_v45 = vmul.f32 1.442695, %v3627_v1  ;;  %9070 = vpow2.f32 %v2608_v6  ;;  %v15203_v1 = vld [vmem:[#allocation98_spill] sm:$0xff]  ;;  %v15204_v18 = vld [vmem:[#allocation100_spill] sm:$0xff]  ;;  %v15206_v6 = vld [vmem:[#allocation111_spill] sm:$0xff] }
 0xb94   : > { %v2602_v27 = vmul.f32 1.442695, %v15188_v54  ;;  %v3603_v62 = vpop.permute.xlu1 %3602  ;;  %v4155_v57 = vpop.permute.xlu0 %4154  ;;  %v3874_v3 = vpack.c.bf16 %v12430_v7, %v12418_v22  ;;  %v15205_v35 = vsub.f32 %v15203_v1, %v15204_v18  ;;  %v15208_v50 = vsub.f32 %v15206_v6, %v15207_v51  ;;  %v15224_v51 = vld [vmem:[#allocation57_spill] sm:$0xff] }
 0xb95   : > { %v12433_v53 = vpop.eup %9052  ;;  %v3628_v46 = vsub.f32 %v12147_v33, %v3603_v62  ;;  %8697 = vmatprep.subr.msk.bf16.mxu1 %vm15189_vm7, %v4155_v57  ;;  %v4199_v37 = vsel %vm15162_vm3, %v4155_v57, 0  ;;  %vm15216_vm7 = vmmov %vm15162_vm3 }
 0xb96   : > { %v12439_v5 = vpop.eup %9054  ;;  %2119 = vperm.xlu1 %8939, %v12016_v29   ;;  %2869 = vperm.xlu0 %8938, %v12413_v28   ;;  %v3875_v40 = vpack.c.bf16 %v12425_v49, %v12433_v53  ;;  %9072 = vpow2.f32 %v2602_v27  ;;  %v2614_v60 = vmul.f32 1.442695, %v15205_v35  ;;  %v2620_v54 = vmul.f32 1.442695, %v15208_v50 }
 0xb97   : > { %v12448_v33 = vpop.eup %9056  ;;  %v3657_v31 = vmul.f32 1.442695, %v3628_v46  ;;  %8513 = vmatprep.mubr.bf16.mxu1 %v3874_v3  ;;  %9074 = vpow2.f32 %v3655_v45  ;;  %v15210_v46 = vld [vmem:[#allocation107_spill] sm:$0xff]  ;;  %v15211_v3 = vld [vmem:[#allocation109_spill] sm:$0xff] }
 0xb98   : > { %v12453_v20 = vpop.eup %9058  ;;  %8514 = vmatmul.mubr.bf16.gmra.mrb[36].mxu1 %v3875_v40  ;;  %v3613_v29 = vpop.permute.xlu1 %3612  ;;  %v15212_v61 = vsub.f32 %v15210_v46, %v15211_v3  ;;  %v15214_v40 = vld [vmem:[#allocation112_spill] sm:$0xff]  ;;  %v15234_v46 = vld [vmem:[#allocation58_spill] sm:$0xff] }
 0xb99   : > { %v12456_v30 = vpop.eup %9060  ;;  %9076 = vpow2.f32 %v3657_v31  ;;  %v3630_v10 = vsub.f32 %v12141_v44, %v3613_v29  ;;  %v4159_v62 = vpop.permute.xlu0 %4158 }
 0xb9a   : > { %v12459_v59 = vpop.eup %9062  ;;  %9078 = vpow2.f32 %v2606_v26  ;;  %2874 = vperm.xlu1 %8939, %v12448_v33   ;;  %2884 = vperm.xlu0 %8938, %v12453_v20   ;;  %v2624_v32 = vmul.f32 1.442695, %v15212_v61  ;;  %v15213_v26 = vld [vmem:[#allocation110_spill] sm:$0xff]  ;;  %v4205_v42 = vsel %vm15162_vm3, %v4159_v62, 0  ;;  %v2756_v61 = vld [vmem:[#allocation5 + $0x88] sm:$0xff] }
 0xb9b   : > { %v12466_v14 = vpop.eup %9064  ;;  %9080 = vpow2.f32 %v2612_v41  ;;  %v3661_v4 = vmul.f32 1.442695, %v3630_v10  ;;  %8534 = vmatpush3.bf16.xpose.msra.mxu1 %v4199_v37  ;;  %v15215_v47 = vsub.f32 %v15213_v26, %v15214_v40  ;;  %v15217_v37 = vld [vmem:[#allocation106_spill] sm:$0xff]  ;;  %v15218_v10 = vld [vmem:[#allocation108_spill] sm:$0xff]  ;;  %v2772_v40 = vmul.f32 %v12448_v33, %v2756_v61 }
 0xb9c   : > { %v12471_v44 = vpop.eup %9066  ;;  %9082 = vpow2.f32 %v3659_v23  ;;  %v4157_v34 = vpop.permute.xlu1 %4156  ;;  %v15219_v9 = vsub.f32 %v15217_v37, %v15218_v10  ;;  %v15236_v26 = vld [vmem:[#allocation64_spill] sm:$0xff]  ;;  %v15238_v37 = vld [vmem:[#allocation55_spill] sm:$0xff] }
 0xb9d   : > { %v12473_v39 = vpop.eup %9068  ;;  %9084 = vpow2.f32 %v3661_v4  ;;  %v3876_v24 = vpack.c.bf16 %v12459_v59, %v12471_v44  ;;  %8698 = vmatprep.subr.msk.bf16.mxu1 %vm15202_vm12, %v4157_v34  ;;  %v4202_v21 = vsel %vm15209_vm15, %v4157_v34, 0  ;;  %v2618_v63 = vmul.f32 1.442695, %v15215_v47  ;;  %v4131_v13 = vpop.permute.xlu0 %4130  ;;  %vm15220_vm12 = vmmov %vm15162_vm3 }
 0xb9e   : > { %9086 = vpow2.f32 %v2616_v56  ;;  %2879 = vperm.xlu1 %8939, %v12439_v5   ;;  %2894 = vperm.xlu0 %8938, %v12456_v30   ;;  %v3877_v8 = vpack.c.bf16 %v12473_v39, %v12466_v14  ;;  %v12488_v27 = vpop.eup %9070  ;;  %v2622_v58 = vmul.f32 1.442695, %v15219_v9  ;;  %vm15221_vm15 = vmmov %vm15162_vm3 }
 0xb9f   : > { %9088 = vpow2.f32 %v2610_v12  ;;  %8517 = vmatprep.mubr.bf16.mxu1 %v3876_v24 }
 0xba0   : > { %8518 = vmatmul.mubr.bf16.gmra.mrb[40].mxu1 %v3877_v8  ;;  %v12491_v45 = vpop.eup %9072  ;;  %9090 = vpow2.f32 %v2614_v60  ;;  %v4161_v12 = vpop.permute.xlu1 %4160 }
 0xba1   : > { %v12493_v57 = vpop.eup %9074  ;;  %9092 = vpow2.f32 %v2620_v54  ;;  %v4135_v8 = vpop.permute.xlu0 %4134  ;;  %v15230_v54 = vld [vmem:[#allocation50_spill] sm:$0xff] }
 0xba2   : > { %2889 = vperm.xlu1 %8939, %v12491_v45   ;;  %2904 = vperm.xlu0 %8938, %v12488_v27   ;;  %9094 = vpow2.f32 %v2624_v32  ;;  %v15235_v32 = vld [vmem:[#allocation63_spill] sm:$0xff] }
 0xba3   : > { %v12500_v11 = vpop.eup %9076  ;;  %8536 = vmatpush3.bf16.xpose.msra.mxu1 %v4202_v21  ;;  %9096 = vpow2.f32 %v2618_v63  ;;  %v15231_v21 = vld [vmem:[#allocation52_spill] sm:$0xff]  ;;  %v2757_v63 = vld [vmem:[#allocation5 + $0x90] sm:$0xff] }
 0xba4   : > { %v12505_v17 = vpop.eup %9078  ;;  %v3878_v41 = vpack.c.bf16 %v12500_v11, %v12493_v57  ;;  %8699 = vmatprep.subr.msk.bf16.mxu1 %vm15216_vm7, %v4159_v62  ;;  %9098 = vpow2.f32 %v2622_v58  ;;  %vm15222_vm7 = vmmov %vm15162_vm3  ;;  %v4133_v60 = vpop.permute.xlu1 %4132  ;;  %v15233_v62 = vld [vmem:[#allocation51_spill] sm:$0xff]  ;;  %v2773_v10 = vmul.f32 %v12439_v5, %v2757_v63 }
 0xba5   : > { %v12510_v31 = vpop.eup %9080  ;;  %v4208_v18 = vsel %vm15222_vm7, %v4161_v12, 0  ;;  %vm15227_vm7 = vmmov %vm15162_vm3  ;;  %v2759_v58 = vld [vmem:[#allocation5 + $0xa0] sm:$0xff] }
 0xba6   : > { %v12512_v23 = vpop.eup %9082  ;;  %2899 = vperm.xlu1 %8939, %v12505_v17   ;;  %2914 = vperm.xlu0 %8938, %v12510_v31  }
 0xba7   : > { %v12516_v29 = vpop.eup %9084  ;;  %8521 = vmatprep.mubr.bf16.mxu1 %v3878_v41 }
 0xba8   : > { %v12521_v2 = vpop.eup %9086  ;;  %v3879_v56 = vpack.c.bf16 %v12516_v29, %v12512_v23  ;;  %v4137_v6 = vpop.permute.xlu1 %4136 }
 0xba9   : > { %v12525_v15 = vpop.eup %9088 }
 0xbaa   : > { %2909 = vperm.xlu1 %8939, %v12525_v15   ;;  %2924 = vperm.xlu0 %8938, %v12521_v2   ;;  %v12530_v4 = vpop.eup %9090 }
 0xbab   : > { %8522 = vmatmul.mubr.bf16.gmra.mrb[44].mxu1 %v3879_v56  ;;  %v12533_v34 = vpop.eup %9092 }
 0xbac   : > { %8538 = vmatpush3.bf16.xpose.msra.mxu1 %v4205_v42  ;;  %8541 = vmatprep.mubr.msk.bf16.mxu1 %vm15220_vm12, %v4131_v13  ;;  %v12538_v24 = vpop.eup %9094  ;;  %vm15223_vm12 = vmmov %vm15162_vm3  ;;  %v4141_v50 = vpop.permute.xlu1 %4140  ;;  %v2775_v42 = vmul.f32 %v12491_v45, %v2759_v58 }
 0xbad   : > { %8700 = vmatprep.subr.msk.bf16.mxu1 %vm15221_vm15, %v4161_v12  ;;  %v12540_v1 = vpop.eup %9096  ;;  %vm15226_vm15 = vmmov %vm15162_vm3  ;;  %v2761_v12 = vld [vmem:[#allocation5 + $0xb0] sm:$0xff] }
 0xbae   : > { %2919 = vperm.xlu1 %8939, %v12530_v4   ;;  %2934 = vperm.xlu0 %8938, %v12533_v34   ;;  %v12545_v35 = vpop.eup %9098 }
 0xbb0   : > { %v4145_v3 = vpop.permute.xlu1 %4144 }
 0xbb2   : > { %2929 = vperm.xlu1 %8939, %v12540_v1   ;;  %2944 = vperm.xlu0 %8938, %v12538_v24  }
 0xbb4   : > { %8540 = vmatpush3.bf16.xpose.msra.mxu1 %v4208_v18  ;;  %v2755_v18 = vld [vmem:[#allocation5 + $0x80] sm:$0xff] }
 0xbb6   : > { %2939 = vperm.xlu1 %8939, %v12545_v35   ;;  %3118 = vrot.lane.b32.xlu0 %v12040_v52, %s9961_s13  ;;  %v4139_v52 = vpop.permute.xlu0 %4138 }
 0xbba   : > { %3116 = vrot.lane.b32.xlu1 %v12036_v19, %s9961_s13  ;;  %3122 = vrot.lane.b32.xlu0 %v12038_v25, %s9961_s13  ;;  %v15225_v19 = vld [vmem:[#allocation49_spill] sm:$0xff]  ;;  %v15228_v25 = vld [vmem:[#allocation54_spill] sm:$0xff] }
 0xbbb   : > { %8542 = vmatmul.mubr.msk.bf16.vlgmr.msra.gmra.mrb[48].mxu1 %vm15162_vm3, %v4133_v60  ;;  %v2777_v60 = vmul.f32 %v12505_v17, %v2761_v12 }
 0xbbc   : > { %8545 = vmatprep.mubr.msk.bf16.mxu1 %vm15223_vm12, %v4135_v8  ;;  %vm15232_vm12 = vmmov %vm15162_vm3 }
 0xbbe   : > { %3120 = vrot.lane.b32.xlu1 %v12034_v38, %s9961_s13  ;;  %3126 = vrot.lane.b32.xlu0 %v12048_v55, %s9961_s13  ;;  %v15229_v38 = vld [vmem:[#allocation53_spill] sm:$0xff]  ;;  %v4143_v55 = vpop.permute.xlu0 %4142 }
 0xbc2   : > { %3124 = vrot.lane.b32.xlu1 %v15224_v51, %s9961_s13  ;;  %3130 = vrot.lane.b32.xlu0 %v15225_v19, %s9961_s13  ;;  %v2758_v19 = vld [vmem:[#allocation5 + $0x98] sm:$0xff] }
 0xbc3   : > { %8546 = vmatmul.mubr.msk.bf16.gmra.mrb[52].mxu1 %vm15226_vm15, %v4137_v6  ;;  %vm15237_vm15 = vmmov %vm15162_vm3  ;;  %v2771_v6 = vmul.f32 %v12413_v28, %v2755_v18 }
 0xbc4   : > { %8549 = vmatprep.mubr.msk.bf16.mxu1 %vm15227_vm7, %v4139_v52  ;;  %vm15239_vm7 = vcmask 7168   ;;  %v2763_v52 = vld [vmem:[#allocation5 + $0xc0] sm:$0xff] }
 0xbc5   : > { %v2779_v45 = vmul.f32 %v12525_v15, %v2763_v52  ;;  %v2767_v15 = vld [vmem:[#allocation5 + $0xe0] sm:$0xff]  ;;  %v2770_v52 = vld [vmem:[#allocation5 + $0xf8] sm:$0xff] }
 0xbc6   : > { %3128 = vrot.lane.b32.xlu1 %v15228_v25, %s9961_s13  ;;  %3134 = vrot.lane.b32.xlu0 %v15229_v38, %s9961_s13 }
 0xbca   : > { %3132 = vrot.lane.b32.xlu1 %v15230_v54, %s9961_s13  ;;  %3138 = vrot.lane.b32.xlu0 %v15231_v21, %s9961_s13  ;;  %v2760_v21 = vld [vmem:[#allocation5 + $0xa8] sm:$0xff] }
 0xbcb   : > { %8550 = vmatmul.mubr.msk.bf16.gmra.mrb[56].mxu1 %vm15162_vm3, %v4141_v50  ;;  %vm15240_vm3 = vmmov %vm15239_vm7  ;;  %v2774_v50 = vmul.f32 %v12453_v20, %v2758_v19  ;;  %v2783_v20 = vmul.f32 %v12540_v1, %v2767_v15 }
 0xbcc   : > { %8553 = vmatprep.mubr.msk.bf16.mxu1 %vm15232_vm12, %v4143_v55  ;;  %vm15241_vm12 = vmmov %vm15240_vm3  ;;  %v2765_v55 = vld [vmem:[#allocation5 + $0xd0] sm:$0xff] }
 0xbcd   : > { %v2781_v28 = vmul.f32 %v12530_v4, %v2765_v55  ;;  %v2769_v4 = vld [vmem:[#allocation5 + $0xf0] sm:$0xff]  ;;  %v2035_v55 = vld [vmem:[#allocation6 + $0x20] sm:$0xff] }
 0xbce   : > { %3136 = vrot.lane.b32.xlu1 %v15233_v62, %s9961_s13  ;;  %3142 = vrot.lane.b32.xlu0 %v15234_v46, %s9961_s13 }
 0xbd2   : > { %3140 = vrot.lane.b32.xlu1 %v15235_v32, %s9961_s13  ;;  %3146 = vrot.lane.b32.xlu0 %v15236_v26, %s9961_s13  ;;  %v2762_v26 = vld [vmem:[#allocation5 + $0xb8] sm:$0xff] }
 0xbd3   : > { %8554 = vmatmul.mubr.msk.bf16.gmra.mrb[60].mxu1 %vm15237_vm15, %v4145_v3  ;;  %vm15242_vm15 = vmmov %vm15240_vm3  ;;  %v2776_v3 = vmul.f32 %v12456_v30, %v2760_v21  ;;  %v2778_v63 = vmul.f32 %v12488_v27, %v2762_v26  ;;  %v2785_v30 = vmul.f32 %v12545_v35, %v2769_v4  ;;  %v2040_v21 = vld [vmem:[#allocation6 + $0x48] sm:$0xff] }
 0xbd4   : > { %v15260_v26 = vld [vmem:[#allocation81_spill] sm:$0xff] }
 0xbd5   : > { %v2790_v47 = vpop.xlane.xlu0 %2789 }
 0xbd6   : > { %v2820_v41 = vadd.f32 %v2790_v47, %v2772_v40  ;;  %3144 = vrot.lane.b32.xlu1 %v15238_v37, %s9961_s13 }
 0xbd8   : > { %2836 = vst.msk [vmem:[#allocation5 + $0x88] sm:$0xff] %vm15239_vm7, %v2820_v41  ;;  %vm15243_vm7 = vmmov %vm15240_vm3 }
 0xbd9   : > { %v2792_v9 = vpop.xlane.xlu0 %2791 }
 0xbda   : > { %v2821_v56 = vadd.f32 %v2792_v9, %v2773_v10  ;;  %v2764_v10 = vld [vmem:[#allocation5 + $0xc8] sm:$0xff] }
 0xbdb   : > { %v2780_v1 = vmul.f32 %v12510_v31, %v2764_v10  ;;  %v15263_v10 = vld [vmem:[#allocation80_spill] sm:$0xff] }
 0xbdc   : > { %2837 = vst.msk [vmem:[#allocation5 + $0x90] sm:$0xff] %vm15240_vm3, %v2821_v56 }
 0xbdd   : > { %v2796_v13 = vpop.xlane.xlu0 %2795 }
 0xbde   : > { %v2823_v33 = vadd.f32 %v2796_v13, %v2775_v42  ;;  %v2766_v13 = vld [vmem:[#allocation5 + $0xd8] sm:$0xff] }
 0xbdf   : > { %v2782_v12 = vmul.f32 %v12521_v2, %v2766_v13  ;;  %v2046_v13 = vld [vmem:[#allocation6 + $0x78] sm:$0xff] }
 0xbe0   : > { %2839 = vst.msk [vmem:[#allocation5 + $0xa0] sm:$0xff] %vm15241_vm12, %v2823_v33  ;;  %vm15244_vm12 = vmmov %vm15240_vm3  ;;  %v2768_v33 = vld [vmem:[#allocation5 + $0xe8] sm:$0xff] }
 0xbe1   : > { %v2800_v8 = vpop.xlane.xlu0 %2799  ;;  %v2784_v31 = vmul.f32 %v12533_v34, %v2768_v33  ;;  %v15268_v33 = vld [vmem:[#allocation78_spill] sm:$0xff] }
 0xbe2   : > { %v2825_v5 = vadd.f32 %v2800_v8, %v2777_v60  ;;  %v2788_v51 = vpop.xlane.xlu1 %2787  ;;  %v2034_v60 = vld [vmem:[#allocation6 + $0x18] sm:$0xff] }
 0xbe3   : > { %v2819_v25 = vadd.f32 %v2788_v51, %v2771_v6  ;;  %v15250_v51 = vld [vmem:[#allocation73_spill] sm:$0xff] }
 0xbe4   : > { %2841 = vst.msk [vmem:[#allocation5 + $0xb0] sm:$0xff] %vm15242_vm15, %v2825_v5  ;;  %vm15245_vm15 = vmmov %vm15240_vm3 }
 0xbe5   : > { %2835 = vst.msk [vmem:[#allocation5 + $0x80] sm:$0xff] %vm15243_vm7, %v2819_v25  ;;  %v2804_v38 = vpop.xlane.xlu0 %2803  ;;  %vm15246_vm7 = vmmov %vm15240_vm3  ;;  %v2786_v25 = vmul.f32 %v12538_v24, %v2770_v52  ;;  %v15271_v52 = vld [vmem:[#allocation83_spill] sm:$0xff] }
 0xbe6   : > { %v2827_v54 = vadd.f32 %v2804_v38, %v2779_v45  ;;  %v2794_v17 = vpop.xlane.xlu1 %2793  ;;  %v2038_v45 = vld [vmem:[#allocation6 + $0x38] sm:$0xff]  ;;  %v15253_v38 = vld [vmem:[#allocation77_spill] sm:$0xff] }
 0xbe7   : > { %v2822_v62 = vadd.f32 %v2794_v17, %v2774_v50 }
 0xbe8   : > { %2843 = vst.msk [vmem:[#allocation5 + $0xc0] sm:$0xff] %vm15240_vm3, %v2827_v54 }
 0xbe9   : > { %2838 = vst.msk [vmem:[#allocation5 + $0x98] sm:$0xff] %vm15244_vm12, %v2822_v62  ;;  %v2808_v46 = vpop.xlane.xlu0 %2807  ;;  %vm15247_vm12 = vmmov %vm15240_vm3 }
 0xbea   : > { %v2829_v61 = vadd.f32 %v2808_v46, %v2781_v28  ;;  %v2798_v32 = vpop.xlane.xlu1 %2797  ;;  %v2037_v28 = vld [vmem:[#allocation6 + $0x30] sm:$0xff]  ;;  %v15257_v46 = vld [vmem:[#allocation75_spill] sm:$0xff] }
 0xbeb   : > { %v2824_v40 = vadd.f32 %v2798_v32, %v2776_v3  ;;  %v2042_v32 = vld [vmem:[#allocation6 + $0x58] sm:$0xff] }
 0xbec   : > { %2845 = vst.msk [vmem:[#allocation5 + $0xd0] sm:$0xff] %vm15245_vm15, %v2829_v61  ;;  %vm15248_vm15 = vmmov %vm15240_vm3 }
 0xbed   : > { %2840 = vst.msk [vmem:[#allocation5 + $0xa8] sm:$0xff] %vm15246_vm7, %v2824_v40  ;;  %v2812_v47 = vpop.xlane.xlu0 %2811  ;;  %vm15249_vm7 = vmmov %vm15240_vm3 }
 0xbee   : > { %v2831_v41 = vadd.f32 %v2812_v47, %v2783_v20  ;;  %v2802_v37 = vpop.xlane.xlu1 %2801  ;;  %v2039_v20 = vld [vmem:[#allocation6 + $0x40] sm:$0xff]  ;;  %v15261_v47 = vld [vmem:[#allocation74_spill] sm:$0xff] }
 0xbef   : > { %v2826_v9 = vadd.f32 %v2802_v37, %v2778_v63  ;;  %v2044_v37 = vld [vmem:[#allocation6 + $0x68] sm:$0xff] }
 0xbf0   : > { %2847 = vst.msk [vmem:[#allocation5 + $0xe0] sm:$0xff] %vm15240_vm3, %v2831_v41 }
 0xbf1   : > { %2842 = vst.msk [vmem:[#allocation5 + $0xb8] sm:$0xff] %vm15247_vm12, %v2826_v9  ;;  %3700 = vadd.xlane.f32.xlu0 %v12357_v48  ;;  %v2816_v58 = vpop.xlane.xlu0 %2815  ;;  %vm15251_vm12 = vmmov %vm15240_vm3 }
 0xbf2   : > { %v2833_v56 = vadd.f32 %v2816_v58, %v2785_v30  ;;  %v2806_v42 = vpop.xlane.xlu1 %2805  ;;  %v2041_v30 = vld [vmem:[#allocation6 + $0x50] sm:$0xff]  ;;  %v15264_v58 = vld [vmem:[#allocation79_spill] sm:$0xff] }
 0xbf3   : > { %v2828_v27 = vadd.f32 %v2806_v42, %v2780_v1 }
 0xbf4   : > { %2849 = vst.msk [vmem:[#allocation5 + $0xf0] sm:$0xff] %vm15248_vm15, %v2833_v56  ;;  %vm15252_vm15 = vcmask 261120  }
 0xbf5   : > { %2844 = vst.msk [vmem:[#allocation5 + $0xc8] sm:$0xff] %vm15249_vm7, %v2828_v27  ;;  %3698 = vadd.xlane.f32.xlu0 %v12351_v16  ;;  %v2036_v16 = vld [vmem:[#allocation6 + $0x28] sm:$0xff]  ;;  %vm15254_vm7 = vmmov %vm15240_vm3 }
 0xbf6   : > { %v2810_v35 = vpop.xlane.xlu1 %2809  ;;  %v15267_v27 = vld [vmem:[#allocation85_spill] sm:$0xff] }
 0xbf7   : > { %v2830_v18 = vadd.f32 %v2810_v35, %v2782_v12  ;;  %v2043_v35 = vld [vmem:[#allocation6 + $0x60] sm:$0xff] }
 0xbf9   : > { %2846 = vst.msk [vmem:[#allocation5 + $0xd8] sm:$0xff] %vm15240_vm3, %v2830_v18  ;;  %v2065_v48 = vpop.permute.xlu0 %2064  ;;  %3708 = vadd.xlane.f32.xlu0 %v12433_v53  ;;  %vm15255_vm3 = vmmov %vm15252_vm15 }
 0xbfa   : > { %v2130_v8 = vmul.f32 %v2065_v48, %v2034_v60  ;;  %3696 = vadd.xlane.f32.xlu1 %v12349_v43  ;;  %v2814_v6 = vpop.xlane.xlu1 %2813 }
 0xbfb   : > { %v2832_v5 = vadd.f32 %v2814_v6, %v2784_v31  ;;  %v15270_v31 = vld [vmem:[#allocation84_spill] sm:$0xff]  ;;  %v2045_v6 = vld [vmem:[#allocation6 + $0x70] sm:$0xff] }
 0xbfc   : > { %v2251_v2 = vadd.f32 %v15250_v51, %v2130_v8 }
 0xbfd   : > { %2848 = vst.msk [vmem:[#allocation5 + $0xe8] sm:$0xff] %vm15251_vm12, %v2832_v5  ;;  %v2075_v19 = vpop.permute.xlu0 %2074  ;;  %3704 = vadd.xlane.f32.xlu0 %v12418_v22  ;;  %vm15258_vm12 = vmmov %vm15255_vm3 }
 0xbfe   : > { %2267 = vst.msk [vmem:[#allocation6 + $0x18] sm:$0xff] %vm15252_vm15, %v2251_v2  ;;  %v2132_v53 = vmul.f32 %v2075_v19, %v2036_v16  ;;  %3702 = vadd.xlane.f32.xlu1 %v12359_v0  ;;  %v2818_v34 = vpop.xlane.xlu1 %2817  ;;  %v15256_v0 = vld [vmem:[#allocation76_spill] sm:$0xff]  ;;  %vm15259_vm15 = vmmov %vm15255_vm3  ;;  %v15274_v19 = vld [vmem:[#allocation82_spill] sm:$0xff] }
 0xbff   : > { %v2834_v43 = vadd.f32 %v2818_v34, %v2786_v25 }
 0xc00   : > { %v2253_v50 = vadd.f32 %v15253_v38, %v2132_v53 }
 0xc01   : > { %2850 = vst.msk [vmem:[#allocation5 + $0xf8] sm:$0xff] %vm15254_vm7, %v2834_v43  ;;  %v2085_v54 = vpop.permute.xlu0 %2084  ;;  %3716 = vadd.xlane.f32.xlu0 %v12466_v14  ;;  %vm15262_vm7 = vmmov %vm15255_vm3 }
 0xc02   : > { %2269 = vst.msk [vmem:[#allocation6 + $0x28] sm:$0xff] %vm15255_vm3, %v2253_v50  ;;  %v2134_v22 = vmul.f32 %v2085_v54, %v2038_v45  ;;  %3710 = vadd.xlane.f32.xlu1 %v12425_v49  ;;  %v2070_v24 = vpop.permute.xlu1 %2069 }
 0xc03   : > { %v2131_v17 = vmul.f32 %v2070_v24, %v2035_v55 }
 0xc04   : > { %v2255_v62 = vadd.f32 %v15256_v0, %v2134_v22 }
 0xc05   : > { %v2252_v3 = vadd.f32 %v15257_v46, %v2131_v17  ;;  %v2095_v15 = vpop.permute.xlu0 %2094  ;;  %3712 = vadd.xlane.f32.xlu0 %v12471_v44 }
 0xc06   : > { %2271 = vst.msk [vmem:[#allocation6 + $0x38] sm:$0xff] %vm15258_vm12, %v2255_v62  ;;  %v2136_v61 = vmul.f32 %v2095_v15, %v2040_v21  ;;  %3706 = vadd.xlane.f32.xlu1 %v12430_v7  ;;  %v2080_v14 = vpop.permute.xlu1 %2079  ;;  %vm15265_vm12 = vmmov %vm15255_vm3 }
 0xc07   : > { %2268 = vst.msk [vmem:[#allocation6 + $0x20] sm:$0xff] %vm15259_vm15, %v2252_v3  ;;  %v2133_v49 = vmul.f32 %v2080_v14, %v2037_v28  ;;  %vm15266_vm15 = vmmov %vm15255_vm3  ;;  %v2852_v3 = vld [vmem:[#allocation6 + $0x8] sm:$0xff] }
 0xc08   : > { %v2257_v40 = vadd.f32 %v15260_v26, %v2136_v61  ;;  %v2851_v26 = vld [vmem:[#allocation6] sm:$0xff] }
 0xc09   : > { %v2254_v63 = vadd.f32 %v15261_v47, %v2133_v49  ;;  %v2105_v4 = vpop.permute.xlu0 %2104  ;;  %3724 = vadd.xlane.f32.xlu0 %v12512_v23 }
 0xc0a   : > { %2273 = vst.msk [vmem:[#allocation6 + $0x48] sm:$0xff] %vm15262_vm7, %v2257_v40  ;;  %v2138_v44 = vmul.f32 %v2105_v4, %v2042_v32  ;;  %3718 = vadd.xlane.f32.xlu1 %v12473_v39  ;;  %v2090_v41 = vpop.permute.xlu1 %2089  ;;  %vm15269_vm7 = vmmov %vm15255_vm3  ;;  %v2854_v32 = vld [vmem:[#allocation6 + $0x18] sm:$0xff] }
 0xc0b   : > { %2270 = vst.msk [vmem:[#allocation6 + $0x30] sm:$0xff] %vm15255_vm3, %v2254_v63  ;;  %v2135_v7 = vmul.f32 %v2090_v41, %v2039_v20 }
 0xc0c   : > { %v2259_v9 = vadd.f32 %v15263_v10, %v2138_v44  ;;  %v2856_v44 = vld [vmem:[#allocation6 + $0x28] sm:$0xff] }
 0xc0d   : > { %v2256_v1 = vadd.f32 %v15264_v58, %v2135_v7  ;;  %v2115_v56 = vpop.permute.xlu0 %2114  ;;  %3720 = vadd.xlane.f32.xlu0 %v12493_v57 }
 0xc0e   : > { %2275 = vst.msk [vmem:[#allocation6 + $0x58] sm:$0xff] %vm15265_vm12, %v2259_v9  ;;  %v2140_v23 = vmul.f32 %v2115_v56, %v2044_v37  ;;  %3714 = vadd.xlane.f32.xlu1 %v12459_v59  ;;  %v2100_v42 = vpop.permute.xlu1 %2099  ;;  %vm15272_vm12 = vmmov %vm15255_vm3  ;;  %v2853_v37 = vld [vmem:[#allocation6 + $0x10] sm:$0xff] }
 0xc0f   : > { %2272 = vst.msk [vmem:[#allocation6 + $0x40] sm:$0xff] %vm15266_vm15, %v2256_v1  ;;  %v2137_v39 = vmul.f32 %v2100_v42, %v2041_v30  ;;  %vm15273_vm15 = vmmov %vm15255_vm3  ;;  %v2858_v1 = vld [vmem:[#allocation6 + $0x38] sm:$0xff]  ;;  %v2855_v42 = vld [vmem:[#allocation6 + $0x20] sm:$0xff] }
 0xc10   : > { %v2261_v12 = vadd.f32 %v15267_v27, %v2140_v23 }
 0xc11   : > { %v2258_v18 = vadd.f32 %v15268_v33, %v2137_v39  ;;  %v2125_v60 = vpop.permute.xlu0 %2124 }
 0xc12   : > { %2277 = vst.msk [vmem:[#allocation6 + $0x68] sm:$0xff] %vm15269_vm7, %v2261_v12  ;;  %v2142_v48 = vmul.f32 %v2125_v60, %v2046_v13  ;;  %3726 = vadd.xlane.f32.xlu1 %v12516_v29  ;;  %v2110_v57 = vpop.permute.xlu1 %2109  ;;  %vm15275_vm7 = vmmov %vm15255_vm3  ;;  %v2857_v60 = vld [vmem:[#allocation6 + $0x30] sm:$0xff] }
 0xc13   : > { %2274 = vst.msk [vmem:[#allocation6 + $0x50] sm:$0xff] %vm15255_vm3, %v2258_v18  ;;  %v2139_v59 = vmul.f32 %v2110_v57, %v2043_v35  ;;  %vm3180_vm3 = vcmask 523520   ;;  %v2860_v35 = vld [vmem:[#allocation6 + $0x48] sm:$0xff] }
 0xc14   : > { %v2263_v8 = vadd.f32 %v15270_v31, %v2142_v48 }
 0xc15   : > { %v2260_v5 = vadd.f32 %v15271_v52, %v2139_v59  ;;  %v2870_v16 = vpop.permute.xlu0 %2869 }
 0xc16   : > { %2279 = vst.msk [vmem:[#allocation6 + $0x78] sm:$0xff] %vm15272_vm12, %v2263_v8  ;;  %3722 = vadd.xlane.f32.xlu1 %v12500_v11  ;;  %v2120_v51 = vpop.permute.xlu1 %2119  ;;  %v2947_v20 = vmul.f32 %v2870_v16, %v2851_v26  ;;  %v2862_v8 = vld [vmem:[#allocation6 + $0x58] sm:$0xff]  ;;  %vm15307_vm12 = vcmask 7168  }
 0xc17   : > { %2276 = vst.msk [vmem:[#allocation6 + $0x60] sm:$0xff] %vm15273_vm15, %v2260_v5  ;;  %v2141_v2 = vmul.f32 %v2120_v51, %v2045_v6  ;;  %v2859_v5 = vld [vmem:[#allocation6 + $0x40] sm:$0xff]  ;;  %vm15314_vm15 = vmmov %vm15307_vm12 }
 0xc19   : > { %v2262_v29 = vadd.f32 %v15274_v19, %v2141_v2  ;;  %v2885_v25 = vpop.permute.xlu0 %2884 }
 0xc1a   : > { %v2875_v53 = vpop.permute.xlu1 %2874  ;;  %v2950_v40 = vmul.f32 %v2885_v25, %v2854_v32 }
 0xc1b   : > { %2278 = vst.msk [vmem:[#allocation6 + $0x70] sm:$0xff] %vm15275_vm7, %v2262_v29  ;;  %v2948_v15 = vmul.f32 %v2875_v53, %v2852_v3  ;;  %v2864_v29 = vld [vmem:[#allocation6 + $0x68] sm:$0xff]  ;;  %vm15321_vm7 = vmmov %vm15307_vm12 }
 0xc1d   : > { %v2895_v34 = vpop.permute.xlu0 %2894 }
 0xc1e   : > { %v2880_v43 = vpop.permute.xlu1 %2879  ;;  %v2952_v7 = vmul.f32 %v2895_v34, %v2856_v44  ;;  %v2861_v34 = vld [vmem:[#allocation6 + $0x50] sm:$0xff]  ;;  %v2863_v3 = vld [vmem:[#allocation6 + $0x60] sm:$0xff] }
 0xc1f   : > { %v2949_v10 = vmul.f32 %v2880_v43, %v2853_v37  ;;  %v15280_v37 = vld [vmem:[#allocation68_spill] sm:$0xff] }
 0xc21   : > { %v2905_v45 = vpop.permute.xlu0 %2904 }
 0xc22   : > { %v2890_v38 = vpop.permute.xlu1 %2889  ;;  %v2954_v23 = vmul.f32 %v2905_v45, %v2858_v1  ;;  %v2865_v32 = vld [vmem:[#allocation6 + $0x70] sm:$0xff] }
 0xc23   : > { %v2951_v39 = vmul.f32 %v2890_v38, %v2855_v42  ;;  %v15283_v1 = vld [vmem:[#allocation114_spill] sm:$0xff] }
 0xc25   : > { %v2915_v50 = vpop.permute.xlu0 %2914 }
 0xc26   : > { %v2900_v55 = vpop.permute.xlu1 %2899  ;;  %v2956_v18 = vmul.f32 %v2915_v50, %v2860_v35 }
 0xc27   : > { %v2953_v48 = vmul.f32 %v2900_v55, %v2857_v60  ;;  %v2866_v55 = vld [vmem:[#allocation6 + $0x78] sm:$0xff] }
 0xc28   : > { %v15289_v60 = vld [vmem:[#allocation118_spill] sm:$0xff] }
 0xc29   : > { %v2925_v54 = vpop.permute.xlu0 %2924 }
 0xc2a   : > { %v2910_v22 = vpop.permute.xlu1 %2909  ;;  %v2958_v52 = vmul.f32 %v2925_v54, %v2862_v8 }
 0xc2b   : > { %v2955_v16 = vmul.f32 %v2910_v22, %v2859_v5  ;;  %v3666_v5 = vld [vmem:[#allocation5 + $0x110] sm:$0xff] }
 0xc2d   : > { %v12661_v24 = vpop.permute.xlu0 %2934 }
 0xc2e   : > { %v12663_v11 = vpop.f32.mrb[32].mxu1  ;;  %v12665_v17 = vpop.permute.xlu1 %2919  ;;  %v2960_v53 = vmul.f32 %v12661_v24, %v2864_v29  ;;  %v15297_v29 = vld [vmem:[#allocation121_spill] sm:$0xff] }
 0xc2f   : > { %v12667_v21 = vpop.f32.mrb[33].mxu1  ;;  %v2957_v43 = vmul.f32 %v12665_v17, %v2861_v34 }
 0xc30   : > { %v12669_v0 = vpop.f32.mrb[34].mxu1 }
 0xc31   : > { %v12671_v62 = vpop.permute.xlu0 %2944  ;;  %v12673_v28 = vpop.f32.mrb[35].mxu1 }
 0xc32   : > { %v12675_v46 = vpop.permute.xlu1 %2929  ;;  %v2962_v22 = vmul.f32 %v12671_v62, %v2866_v55 }
 0xc35   : > { %v3119_v61 = vpop.permute.xlu0 %3118 }
 0xc36   : > { %v3165_v14 = vadd.f32 %v3119_v61, %v2948_v15  ;;  %v12677_v49 = vpop.permute.xlu1 %2939  ;;  %v2959_v15 = vmul.f32 %v12675_v46, %v2863_v3  ;;  %v15276_v46 = vld [vmem:[#allocation61_spill] sm:$0xff] }
 0xc37   : > { %v2961_v26 = vmul.f32 %v12677_v49, %v2865_v32  ;;  %v15279_v49 = vld [vmem:[#allocation70_spill] sm:$0xff] }
 0xc38   : > { %3182 = vst.msk [vmem:[#allocation6 + $0x8] sm:$0xff] %vm3180_vm3, %v3165_v14 }
 0xc39   : > { %v3123_v47 = vpop.permute.xlu0 %3122 }
 0xc3a   : > { %v3167_v63 = vadd.f32 %v3123_v47, %v2950_v40  ;;  %v3117_v4 = vpop.permute.xlu1 %3116  ;;  %v15277_v47 = vld [vmem:[#allocation62_spill] sm:$0xff] }
 0xc3b   : > { %v3164_v41 = vadd.f32 %v3117_v4, %v2947_v20 }
 0xc3c   : > { %3184 = vst.msk [vmem:[#allocation6 + $0x18] sm:$0xff] %vm3180_vm3, %v3167_v63  ;;  %v15278_v63 = vsub.f32 %v15276_v46, %v15277_v47  ;;  %v3670_v47 = vld [vmem:[#allocation5 + $0x130] sm:$0xff] }
 0xc3d   : > { %3181 = vst.msk [vmem:[#allocation6] sm:$0xff] %vm3180_vm3, %v3164_v41  ;;  %v3127_v9 = vpop.permute.xlu0 %3126 }
 0xc3e   : > { %v3169_v30 = vadd.f32 %v3127_v9, %v2952_v7  ;;  %v3121_v58 = vpop.permute.xlu1 %3120  ;;  %v3507_v4 = vmul.f32 1.442695, %v15278_v63 }
 0xc3f   : > { %v3166_v56 = vadd.f32 %v3121_v58, %v2949_v10  ;;  %v15281_v10 = vsub.f32 %v15279_v49, %v15280_v37  ;;  %v15282_v58 = vld [vmem:[#allocation67_spill] sm:$0xff]  ;;  %v15308_v37 = vld [vmem:[#allocation124_spill] sm:$0xff] }
 0xc40   : > { %3186 = vst.msk [vmem:[#allocation6 + $0x28] sm:$0xff] %vm3180_vm3, %v3169_v30  ;;  %9100 = vpow2.f32 %v3507_v4  ;;  %v3664_v49 = vld [vmem:[#allocation5 + $0x100] sm:$0xff] }
 0xc41   : > { %3183 = vst.msk [vmem:[#allocation6 + $0x10] sm:$0xff] %vm3180_vm3, %v3166_v56  ;;  %v3131_v13 = vpop.permute.xlu0 %3130  ;;  %v3505_v9 = vmul.f32 1.442695, %v15281_v10  ;;  %v15284_v56 = vsub.f32 %v15282_v58, %v15283_v1  ;;  %v15309_v10 = vld [vmem:[#allocation127_spill] sm:$0xff]  ;;  %v15311_v1 = vld [vmem:[#allocation122_spill] sm:$0xff] }
 0xc42   : > { %v3171_v27 = vadd.f32 %v3131_v13, %v2954_v23  ;;  %v3125_v12 = vpop.permute.xlu1 %3124  ;;  %v15286_v13 = vld [vmem:[#allocation66_spill] sm:$0xff] }
 0xc43   : > { %v3168_v33 = vadd.f32 %v3125_v12, %v2951_v39  ;;  %9102 = vpow2.f32 %v3505_v9  ;;  %v3515_v23 = vmul.f32 1.442695, %v15284_v56  ;;  %v15285_v39 = vld [vmem:[#allocation69_spill] sm:$0xff]  ;;  %v15310_v9 = vsub.f32 %v15308_v37, %v15309_v10  ;;  %v3672_v10 = vld [vmem:[#allocation5 + $0x140] sm:$0xff] }
 0xc44   : > { %3188 = vst.msk [vmem:[#allocation6 + $0x38] sm:$0xff] %vm3180_vm3, %v3171_v27  ;;  %v15287_v27 = vsub.f32 %v15285_v39, %v15286_v13  ;;  %v15312_v56 = vld [vmem:[#allocation125_spill] sm:$0xff] }
 0xc45   : > { %3185 = vst.msk [vmem:[#allocation6 + $0x20] sm:$0xff] %vm3180_vm3, %v3168_v33  ;;  %v3135_v57 = vpop.permute.xlu0 %3134  ;;  %9104 = vpow2.f32 %v3515_v23  ;;  %v3531_v58 = vmul.f32 1.442695, %v15310_v9  ;;  %v15313_v23 = vsub.f32 %v15311_v1, %v15312_v56 }
 0xc46   : > { %v3173_v59 = vadd.f32 %v3135_v57, %v2956_v18  ;;  %v3129_v31 = vpop.permute.xlu1 %3128  ;;  %v3503_v12 = vmul.f32 1.442695, %v15287_v27  ;;  %v15288_v18 = vld [vmem:[#allocation115_spill] sm:$0xff] }
 0xc47   : > { %v3170_v6 = vadd.f32 %v3129_v31, %v2953_v48  ;;  %v15290_v48 = vsub.f32 %v15288_v18, %v15289_v60  ;;  %v15292_v31 = vld [vmem:[#allocation71_spill] sm:$0xff]  ;;  %v3525_v39 = vmul.f32 1.442695, %v15313_v23 }
 0xc48   : > { %3190 = vst.msk [vmem:[#allocation6 + $0x48] sm:$0xff] %vm3180_vm3, %v3173_v59  ;;  %v15291_v59 = vld [vmem:[#allocation59_spill] sm:$0xff]  ;;  %9106 = vpow2.f32 %v3503_v12 }
 0xc49   : > { %3187 = vst.msk [vmem:[#allocation6 + $0x30] sm:$0xff] %vm3180_vm3, %v3170_v6  ;;  %v3139_v51 = vpop.permute.xlu0 %3138  ;;  %v3511_v57 = vmul.f32 1.442695, %v15290_v48  ;;  %v15293_v8 = vsub.f32 %v15291_v59, %v15292_v31  ;;  %v3668_v60 = vld [vmem:[#allocation5 + $0x120] sm:$0xff]  ;;  %v3667_v31 = vld [vmem:[#allocation5 + $0x118] sm:$0xff] }
 0xc4a   : > { %v3175_v2 = vadd.f32 %v3139_v51, %v2958_v52  ;;  %v3133_v19 = vpop.permute.xlu1 %3132  ;;  %v12734_v52 = vpop.eup %9100 }
 0xc4b   : > { %v3172_v25 = vadd.f32 %v3133_v19, %v2955_v16  ;;  %v3509_v6 = vmul.f32 1.442695, %v15293_v8  ;;  %9108 = vpow2.f32 %v3511_v57  ;;  %v15294_v16 = vld [vmem:[#allocation117_spill] sm:$0xff]  ;;  %v15296_v19 = vld [vmem:[#allocation119_spill] sm:$0xff]  ;;  %v3682_v34 = vmul.f32 %v12734_v52, %v3666_v5  ;;  %v15315_v8 = vld [vmem:[#allocation128_spill] sm:$0xff] }
 0xc4c   : > { %3192 = vst.msk [vmem:[#allocation6 + $0x58] sm:$0xff] %vm3180_vm3, %v3175_v2  ;;  %v15295_v51 = vsub.f32 %v15294_v16, %v12238_v36  ;;  %v15302_v36 = vld [vmem:[#allocation123_spill] sm:$0xff] }
 0xc4d   : > { %3189 = vst.msk [vmem:[#allocation6 + $0x40] sm:$0xff] %vm3180_vm3, %v3172_v25  ;;  %v3143_v45 = vpop.permute.xlu0 %3142  ;;  %9110 = vpow2.f32 %v3509_v6  ;;  %v15298_v25 = vsub.f32 %v15296_v19, %v15297_v29  ;;  %v15316_v6 = vld [vmem:[#allocation131_spill] sm:$0xff]  ;;  %v15319_v19 = vld [vmem:[#allocation129_spill] sm:$0xff] }
 0xc4e   : > { %v3177_v38 = vadd.f32 %v3143_v45, %v2960_v53  ;;  %v3137_v50 = vpop.permute.xlu1 %3136  ;;  %v3523_v2 = vmul.f32 1.442695, %v15295_v51  ;;  %v15317_v5 = vsub.f32 %v15315_v8, %v15316_v6 }
 0xc4f   : > { %v3174_v54 = vadd.f32 %v3137_v50, %v2957_v43  ;;  %v3517_v53 = vmul.f32 1.442695, %v15298_v25  ;;  %v12743_v43 = vpop.eup %9102  ;;  %v3665_v50 = vld [vmem:[#allocation5 + $0x108] sm:$0xff] }
 0xc50   : > { %3194 = vst.msk [vmem:[#allocation6 + $0x68] sm:$0xff] %vm3180_vm3, %v3177_v38  ;;  %9112 = vpow2.f32 %v3523_v2  ;;  %v3527_v16 = vmul.f32 1.442695, %v15317_v5  ;;  %v15318_v2 = vld [vmem:[#allocation126_spill] sm:$0xff] }
 0xc51   : > { %3191 = vst.msk [vmem:[#allocation6 + $0x50] sm:$0xff] %vm3180_vm3, %v3174_v54  ;;  %v3147_v24 = vpop.permute.xlu0 %3146  ;;  %9114 = vpow2.f32 %v3517_v53  ;;  %v15320_v29 = vsub.f32 %v15318_v2, %v15319_v19 }
 0xc52   : > { %v3179_v61 = vadd.f32 %v3147_v24, %v2962_v22  ;;  %v3141_v14 = vpop.permute.xlu1 %3140  ;;  %v15301_v22 = vld [vmem:[#allocation120_spill] sm:$0xff] }
 0xc53   : > { %v3176_v17 = vadd.f32 %v3141_v14, %v2959_v15  ;;  %v15303_v3 = vsub.f32 %v15301_v22, %v15302_v36  ;;  %v15305_v14 = vld [vmem:[#allocation116_spill] sm:$0xff]  ;;  %v3521_v25 = vmul.f32 1.442695, %v15320_v29  ;;  %v3678_v29 = vld [vmem:[#allocation5 + $0x170] sm:$0xff] }
 0xc54   : > { %3196 = vst.msk [vmem:[#allocation6 + $0x78] sm:$0xff] %vm3180_vm3, %v3179_v61  ;;  %v15304_v61 = vld [vmem:[#allocation72_spill] sm:$0xff] }
 0xc55   : > { %3193 = vst.msk [vmem:[#allocation6 + $0x60] sm:$0xff] %vm3180_vm3, %v3176_v17  ;;  %v3519_v15 = vmul.f32 1.442695, %v15303_v3  ;;  %v15306_v17 = vsub.f32 %v15304_v61, %v15305_v14  ;;  %v15323_v14 = vld [vmem:[#allocation130_spill] sm:$0xff] }
 0xc56   : > { %v3145_v40 = vpop.permute.xlu1 %3144 }
 0xc57   : > { %v3178_v62 = vadd.f32 %v3145_v40, %v2961_v26  ;;  %v3513_v32 = vmul.f32 1.442695, %v15306_v17  ;;  %v3681_v40 = vmul.f32 %v12743_v43, %v3665_v50  ;;  %9116 = vpow2.f32 %v3519_v15  ;;  %v3671_v15 = vld [vmem:[#allocation5 + $0x138] sm:$0xff]  ;;  %v15324_v17 = vld [vmem:[#allocation132_spill] sm:$0xff] }
 0xc59   : > { %3195 = vst.msk [vmem:[#allocation6 + $0x70] sm:$0xff] %vm3180_vm3, %v3178_v62  ;;  %v12761_v62 = vpop.eup %9104  ;;  %9118 = vpow2.f32 %v3513_v32  ;;  %vm15322_vm3 = vmmov %vm15321_vm7  ;;  %v15325_v32 = vsub.f32 %v15323_v14, %v15324_v17 }
 0xc5a   : > { %v12763_v63 = vpop.eup %9106  ;;  %v3686_v13 = vmul.f32 %v12761_v62, %v3670_v47  ;;  %9120 = vpow2.f32 %v3531_v58 }
 0xc5b   : > { %v12773_v27 = vpop.eup %9108  ;;  %v3680_v18 = vmul.f32 %v12763_v63, %v3664_v49  ;;  %9122 = vpow2.f32 %v3525_v39 }
 0xc5c   : > { %v12776_v48 = vpop.eup %9110  ;;  %v3684_v53 = vmul.f32 %v12773_v27, %v3668_v60  ;;  %9124 = vpow2.f32 %v3527_v16  ;;  %v15329_v60 = vld [vmem:[#allocation133_spill] sm:$0xff] }
 0xc5d   : > { %v3683_v50 = vmul.f32 %v12776_v48, %v3667_v31  ;;  %9126 = vpow2.f32 %v3521_v25 }
 0xc6b   : > { %v12700_v20 = vpop.f32.mrb[36].mxu1 }
 0xc6c   : > { %v12705_v44 = vpop.f32.mrb[37].mxu1 }
 0xc6d   : > { %v12707_v41 = vpop.f32.mrb[38].mxu1 }
 0xc6e   : > { %v12709_v7 = vpop.f32.mrb[39].mxu1 }
 0xc73   : > { %v12714_v30 = vpop.f32.mrb[40].mxu1 }
 0xc74   : > { %v12719_v42 = vpop.f32.mrb[41].mxu1 }
 0xc75   : > { %v12724_v35 = vpop.f32.mrb[42].mxu1 }
 0xc76   : > { %v12726_v33 = vpop.f32.mrb[43].mxu1 }
 0xc7e   : > { %v12745_v45 = vpop.f32.mrb[44].mxu1  ;;  %v3701_v38 = vpop.xlane.xlu0 %3700 }
 0xc7f   : > { %15299 = vst [vmem:[#allocation87_spill] sm:$0xff] %v12745_v45  ;;  %v3730_v55 = vadd.f32 %v3701_v38, %v3682_v34  ;;  %v12747_v54 = vpop.f32.mrb[45].mxu1  ;;  %v12786_v34 = vpop.eup %9112  ;;  %v13026_v45 = vld [vmem:[#allocation4 + $0x1c8] sm:$0xff] }
 0xc80   : > { %15300 = vst [vmem:[#allocation89_spill] sm:$0xff] %v12747_v54  ;;  %v12752_v24 = vpop.f32.mrb[46].mxu1  ;;  %v12790_v22 = vpop.eup %9114 }
 0xc81   : > { %3746 = vst.msk [vmem:[#allocation5 + $0x110] sm:$0xff] %vm15307_vm12, %v3730_v55  ;;  %v12758_v26 = vpop.f32.mrb[47].mxu1  ;;  %v3674_v55 = vld [vmem:[#allocation5 + $0x150] sm:$0xff]  ;;  %vm15326_vm12 = vmmov %vm15322_vm3  ;;  %v12797_v47 = vpop.eup %9116  ;;  %v3687_v37 = vmul.f32 %v12790_v22, %v3671_v15 }
 0xc82   : > { %v3699_v46 = vpop.xlane.xlu0 %3698  ;;  %v12801_v9 = vpop.eup %9118  ;;  %v3688_v16 = vmul.f32 %v12797_v47, %v3672_v10 }
 0xc83   : > { %v3729_v4 = vadd.f32 %v3699_v46, %v3681_v40  ;;  %v3533_v40 = vmul.f32 1.442695, %v15325_v32  ;;  %v3690_v46 = vmul.f32 %v12786_v34, %v3674_v55 }
 0xc85   : > { %3745 = vst.msk [vmem:[#allocation5 + $0x108] sm:$0xff] %vm15314_vm15, %v3729_v4  ;;  %vm15327_vm15 = vmmov %vm15322_vm3  ;;  %9128 = vpow2.f32 %v3533_v40 }
 0xc86   : > { %v3709_v12 = vpop.xlane.xlu0 %3708 }
 0xc87   : > { %v3734_v57 = vadd.f32 %v3709_v12, %v3686_v13  ;;  %v3697_v59 = vpop.xlane.xlu1 %3696  ;;  %v3669_v13 = vld [vmem:[#allocation5 + $0x128] sm:$0xff] }
 0xc88   : > { %v3728_v51 = vadd.f32 %v3697_v59, %v3680_v18  ;;  %v3685_v19 = vmul.f32 %v12801_v9, %v3669_v13 }
 0xc89   : > { %3750 = vst.msk [vmem:[#allocation5 + $0x130] sm:$0xff] %vm15321_vm7, %v3734_v57  ;;  %v15330_v57 = vld [vmem:[#allocation134_spill] sm:$0xff]  ;;  %vm15332_vm7 = vmmov %vm15322_vm3 }
 0xc8a   : > { %3744 = vst.msk [vmem:[#allocation5 + $0x100] sm:$0xff] %vm15322_vm3, %v3728_v51  ;;  %v3705_v38 = vpop.xlane.xlu0 %3704  ;;  %v15331_v59 = vsub.f32 %v15329_v60, %v15330_v57  ;;  %v12817_v51 = vpop.eup %9120 }
 0xc8b   : > { %v3732_v36 = vadd.f32 %v3705_v38, %v3684_v53  ;;  %v3703_v3 = vpop.xlane.xlu1 %3702  ;;  %v12822_v25 = vpop.eup %9122  ;;  %v3694_v14 = vmul.f32 %v12817_v51, %v3678_v29  ;;  %v3679_v53 = vld [vmem:[#allocation5 + $0x178] sm:$0xff] }
 0xc8c   : > { %v3731_v61 = vadd.f32 %v3703_v3, %v3683_v50  ;;  %v3529_v31 = vmul.f32 1.442695, %v15331_v59  ;;  %v12835_v17 = vpop.eup %9124 }
 0xc8d   : > { %3748 = vst.msk [vmem:[#allocation5 + $0x120] sm:$0xff] %vm15326_vm12, %v3732_v36  ;;  %v3675_v36 = vld [vmem:[#allocation5 + $0x158] sm:$0xff] }
 0xc8e   : > { %3747 = vst.msk [vmem:[#allocation5 + $0x118] sm:$0xff] %vm15327_vm15, %v3731_v61  ;;  %v8543_v4 = vpop.f32.mrb[48].mxu1  ;;  %v3717_v49 = vpop.xlane.xlu0 %3716  ;;  %9130 = vpow2.f32 %v3529_v31 }
 0xc8f   : > { %v12805_v1 = vsel %vm10969_vm5, %v8543_v4, -10000.0  ;;  %v4244_v56 = vpop.f32.mrb[49].mxu1  ;;  %v3738_v23 = vadd.f32 %v3717_v49, %v3690_v46  ;;  %v3711_v39 = vpop.xlane.xlu1 %3710  ;;  %vm15334_vm5 = vmmov %vm15322_vm3  ;;  %v3691_v46 = vmul.f32 %v12822_v25, %v3675_v36  ;;  %v3676_v4 = vld [vmem:[#allocation5 + $0x160] sm:$0xff] }
 0xc90   : > { %4344 = vmax.xlane.f32.xlu0 %v12805_v1  ;;  %v8544_v12 = vpop.f32.mrb[50].mxu1  ;;  %v3735_v18 = vadd.f32 %v3711_v39, %v3687_v37  ;;  %v12826_v38 = vsel %vm10975_vm6, %v4244_v56, -10000.0  ;;  %v12840_v49 = vpop.eup %9126  ;;  %v3673_v39 = vld [vmem:[#allocation5 + $0x148] sm:$0xff]  ;;  %vm15340_vm6 = vmmov %vm15322_vm3  ;;  %v3692_v59 = vmul.f32 %v12835_v17, %v3676_v4 }
 0xc91   : > { %3754 = vst.msk [vmem:[#allocation5 + $0x150] sm:$0xff] %vm15332_vm7, %v3738_v23  ;;  %v12814_v6 = vsel %vm10994_vm9, %v8544_v12, -10000.0  ;;  %v4247_v5 = vpop.f32.mrb[51].mxu1  ;;  %vm15337_vm9 = vmmov %vm15322_vm3  ;;  %v3689_v8 = vmul.f32 %v12840_v49, %v3673_v39  ;;  %v3677_v37 = vld [vmem:[#allocation5 + $0x168] sm:$0xff] }
 0xc92   : > { %3751 = vst.msk [vmem:[#allocation5 + $0x138] sm:$0xff] %vm15334_vm5, %v3735_v18  ;;  %4346 = vmax.xlane.f32.xlu1 %v12814_v6  ;;  %v3713_v2 = vpop.xlane.xlu0 %3712  ;;  %v12831_v61 = vsel %vm11002_vm10, %v4247_v5, -10000.0  ;;  %vm15343_vm10 = vmmov %vm15322_vm3  ;;  %v12856_v5 = vpop.eup %9128  ;;  %v9232_v18 = vld [vmem:[%s11171_s12 + $0x18] sm:$0xff] }
 0xc93   : > { %v3736_v50 = vadd.f32 %v3713_v2, %v3688_v16  ;;  %v3707_v55 = vpop.xlane.xlu1 %3706  ;;  %v3695_v15 = vmul.f32 %v12856_v5, %v3679_v53 }
 0xc94   : > { %4340 = vmax.xlane.f32.xlu0 %v12826_v38  ;;  %v3733_v3 = vadd.f32 %v3707_v55, %v3685_v19 }
 0xc95   : > { %3752 = vst.msk [vmem:[#allocation5 + $0x140] sm:$0xff] %vm15337_vm9, %v3736_v50 }
 0xc96   : > { %3749 = vst.msk [vmem:[#allocation5 + $0x128] sm:$0xff] %vm15322_vm3, %v3733_v3  ;;  %4342 = vmax.xlane.f32.xlu1 %v12831_v61  ;;  %v8547_v32 = vpop.f32.mrb[52].mxu1  ;;  %v3725_v40 = vpop.xlane.xlu0 %3724 }
 0xc97   : > { %v12844_v10 = vsel %vm11020_vm13, %v8547_v32, -10000.0  ;;  %v4260_v58 = vpop.f32.mrb[53].mxu1  ;;  %v3742_v56 = vadd.f32 %v3725_v40, %v3694_v14  ;;  %v3719_v23 = vpop.xlane.xlu1 %3718  ;;  %vm15346_vm13 = vmmov %vm15322_vm3 }
 0xc98   : > { %15339 = vst [vmem:[#allocation86_spill] sm:$0xff] %v12844_v10  ;;  %4352 = vmax.xlane.f32.xlu0 %v12844_v10  ;;  %v8548_v13 = vpop.f32.mrb[54].mxu1  ;;  %v3739_v12 = vadd.f32 %v3719_v23, %v3691_v46  ;;  %v12860_v2 = vsel %vm11040_vm2, %v4260_v58, -10000.0  ;;  %v12871_v14 = vpop.eup %9130 }
 0xc99   : > { %3758 = vst.msk [vmem:[#allocation5 + $0x170] sm:$0xff] %vm15340_vm6, %v3742_v56  ;;  %v12850_v60 = vsel %vm11030_vm0, %v8548_v13, -10000.0  ;;  %v4263_v57 = vpop.f32.mrb[55].mxu1  ;;  %vm15347_vm0 = vmmov %vm15322_vm3 }
 0xc9a   : > { %15342 = vst [vmem:[#allocation88_spill] sm:$0xff] %v12850_v60  ;;  %3755 = vst.msk [vmem:[#allocation5 + $0x158] sm:$0xff] %vm15343_vm10, %v3739_v12  ;;  %4354 = vmax.xlane.f32.xlu1 %v12850_v60  ;;  %v3721_v31 = vpop.xlane.xlu0 %3720  ;;  %v12865_v36 = vsel %vm11047_vm4, %v4263_v57, -10000.0  ;;  %v3693_v12 = vmul.f32 %v12871_v14, %v3677_v37  ;;  %v9230_v37 = vld [vmem:[%s11171_s12 + $0x10] sm:$0xff] }
 0xc9b   : > { %v3740_v19 = vadd.f32 %v3721_v31, %v3692_v59  ;;  %v3715_v29 = vpop.xlane.xlu1 %3714  ;;  %vm15352_vm2 = vmmov %vm15347_vm0 }
 0xc9c   : > { %4348 = vmax.xlane.f32.xlu0 %v12860_v2  ;;  %v3737_v50 = vadd.f32 %v3715_v29, %v3689_v8  ;;  %vm15357_vm4 = vmmov %vm15347_vm0  ;;  %v15358_v29 = vld [vmem:[#allocation44_spill] sm:$0xff]  ;;  %v12931_v8 = vld [vmem:[#allocation4 + $0x198] sm:$0xff] }
 0xc9d   : > { %3756 = vst.msk [vmem:[#allocation5 + $0x160] sm:$0xff] %vm15346_vm13, %v3740_v19  ;;  %vm15370_vm12 = vmmov %vm15347_vm0 }
 0xc9e   : > { %3753 = vst.msk [vmem:[#allocation5 + $0x148] sm:$0xff] %vm15347_vm0, %v3737_v50  ;;  %4350 = vmax.xlane.f32.xlu1 %v12865_v36  ;;  %v8551_v3 = vpop.f32.mrb[56].mxu1  ;;  %vm15371_vm15 = vmmov %vm15347_vm0 }
 0xc9f   : > { %v12875_v40 = vsel %vm14965_vm8, %v8551_v3, -10000.0  ;;  %v4276_v46 = vpop.f32.mrb[57].mxu1  ;;  %v3727_v4 = vpop.xlane.xlu1 %3726  ;;  %vm15359_vm8 = vnez %v15358_v29  ;;  %v15361_v3 = vld [vmem:[#allocation46_spill] sm:$0xff]  ;;  %vm15373_vm7 = vmmov %vm15347_vm0 }
 0xca0   : > { %15349 = vst [vmem:[#allocation90_spill] sm:$0xff] %v12875_v40  ;;  %4360 = vmax.xlane.f32.xlu0 %v12875_v40  ;;  %v8552_v58 = vpop.f32.mrb[58].mxu1  ;;  %v3743_v56 = vadd.f32 %v3727_v4, %v3695_v15  ;;  %v12887_v57 = vsel %vm15108_vm14, %v4276_v46, -10000.0  ;;  %vm15362_vm14 = vnez %v15361_v3  ;;  %v9228_v46 = vld [vmem:[%s11171_s12] sm:$0xff]  ;;  %v9229_v4 = vld [vmem:[%s11171_s12 + $0x8] sm:$0xff]  ;;  %vm15374_vm5 = vmmov %vm15347_vm0 }
 0xca1   : > { %v12880_v39 = vsel %vm15110_vm1, %v8552_v58, -10000.0  ;;  %v4279_v13 = vpop.f32.mrb[59].mxu1  ;;  %15354 = vst [vmem:[#allocation91_spill] sm:$0xff] %v12887_v57  ;;  %v9231_v58 = vld [vmem:[%s11171_s12 + $0x20] sm:$0xff]  ;;  %vm15376_vm9 = vmmov %vm15347_vm0  ;;  %v13006_v40 = vld [vmem:[#allocation4 + $0x1d8] sm:$0xff] }
 0xca2   : > { %15351 = vst [vmem:[#allocation92_spill] sm:$0xff] %v12880_v39  ;;  %3759 = vst.msk [vmem:[#allocation5 + $0x178] sm:$0xff] %vm15352_vm2, %v3743_v56  ;;  %4362 = vmax.xlane.f32.xlu1 %v12880_v39  ;;  %v12892_v16 = vsel %vm15114_vm11, %v4279_v13, -10000.0  ;;  %v15364_v56 = vld [vmem:[#allocation45_spill] sm:$0xff]  ;;  %v15367_v13 = vld [vmem:[#allocation47_spill] sm:$0xff] }
 0xca3   : > { %v3723_v59 = vpop.xlane.xlu1 %3722  ;;  %15356 = vst [vmem:[#allocation93_spill] sm:$0xff] %v12892_v16  ;;  %vm15365_vm1 = vnez %v15364_v56  ;;  %vm15368_vm11 = vnez %v15367_v13  ;;  %v12956_v56 = vld [vmem:[#allocation4 + $0x1b0] sm:$0xff]  ;;  %vm15377_vm3 = vmmov %vm15347_vm0 }
 0xca4   : > { %4356 = vmax.xlane.f32.xlu0 %v12887_v57  ;;  %v3741_v31 = vadd.f32 %v3723_v59, %v3693_v12  ;;  %v12929_v59 = vld [vmem:[#allocation4 + $0x190] sm:$0xff]  ;;  %15372 = vst [vmem:[#allocation94_spill] sm:$0xff] %v12956_v56  ;;  %vm15379_vm6 = vmmov %vm15347_vm0 }
 0xca5   : > { %vm15380_vm10 = vmmov %vm15347_vm0 }
 0xca6   : > { %3757 = vst.msk [vmem:[#allocation5 + $0x168] sm:$0xff] %vm15357_vm4, %v3741_v31  ;;  %4358 = vmax.xlane.f32.xlu1 %v12892_v16  ;;  %v8555_v19 = vpop.f32.mrb[60].mxu1  ;;  %v13016_v16 = vld [vmem:[#allocation4 + $0x1c0] sm:$0xff]  ;;  %vm15383_vm13 = vmmov %vm15347_vm0 }
 0xca7   : > { %v12898_v53 = vsel %vm15359_vm8, %v8555_v19, -10000.0  ;;  %v4292_v50 = vpop.f32.mrb[61].mxu1  ;;  %15382 = vst [vmem:[#allocation103_spill] sm:$0xff] %v13016_v16  ;;  %vm15385_vm2 = vmmov %vm15347_vm0 }
 0xca8   : > { %15360 = vst [vmem:[#allocation95_spill] sm:$0xff] %v12898_v53  ;;  %4368 = vmax.xlane.f32.xlu0 %v12898_v53  ;;  %v8556_v55 = vpop.f32.mrb[62].mxu1  ;;  %v12903_v15 = vsel %vm15362_vm14, %v4292_v50, -10000.0  ;;  %v12936_v50 = vld [vmem:[#allocation4 + $0x180] sm:$0xff]  ;;  %vm15386_vm4 = vmmov %vm15347_vm0 }
 0xca9   : > { %15363 = vst [vmem:[#allocation97_spill] sm:$0xff] %v12903_v15  ;;  %v4295_v32 = vpop.f32.mrb[63].mxu1  ;;  %v12917_v23 = vsel %vm15365_vm1, %v8556_v55, -10000.0  ;;  %vm15387_vm8 = vmmov %vm15347_vm0 }
 0xcaa   : > { %15366 = vst [vmem:[#allocation56_spill] sm:$0xff] %v12917_v23  ;;  %v12922_v12 = vsel %vm15368_vm11, %v4295_v32, -10000.0  ;;  %vm15388_vm14 = vmmov %vm15347_vm0 }
 0xcab   : > { %15369 = vst [vmem:[#allocation65_spill] sm:$0xff] %v12922_v12  ;;  %vm15389_vm1 = vmmov %vm15347_vm0 }
 0xcac   : > { %4364 = vmax.xlane.f32.xlu0 %v12903_v15  ;;  %v12996_v15 = vld [vmem:[#allocation4 + $0x1d0] sm:$0xff]  ;;  %vm15390_vm11 = vmmov %vm15347_vm0 }
 0xcad   : > { %15378 = vst [vmem:[#allocation48_spill] sm:$0xff] %v12996_v15 }
 0xcb7   : > { %4781 = vrot.lane.b32.xlu1 %v9228_v46, %s9961_s13  ;;  %v12946_v46 = vld [vmem:[#allocation4 + $0x188] sm:$0xff] }
 0xcbb   : > { %4783 = vrot.lane.b32.xlu1 %v9229_v4, %s9961_s13  ;;  %v12976_v4 = vld [vmem:[#allocation4 + $0x1a0] sm:$0xff] }
 0xcc2   : > { %3778 = vperm.xlu0 %8938, %v12763_v63   ;;  %v9233_v63 = vld [vmem:[%s11171_s12 + $0x28] sm:$0xff] }
 0xcc6   : > { %4785 = vrot.lane.b32.xlu0 %v9230_v37, %s9961_s13 }
 0xcca   : > { %4789 = vrot.lane.b32.xlu0 %v9231_v58, %s9961_s13 }
 0xcdf   : > { %4370 = vmax.xlane.f32.xlu1 %v12917_v23  ;;  %v12986_v23 = vld [vmem:[#allocation4 + $0x1a8] sm:$0xff] }
 0xce3   : > { %4366 = vmax.xlane.f32.xlu1 %v12922_v12 }
 0xcf4   : > { %4787 = vrot.lane.b32.xlu1 %v9232_v18, %s9961_s13 }
 0xcf8   : > { %4791 = vrot.lane.b32.xlu1 %v9233_v63, %s9961_s13 }
 0xd1d   : > { %v4345_v31 = vpop.xlane.xlu0 %4344 }
 0xd1e   : > { %v12934_v19 = vmax.f32 %v12929_v59, %v4345_v31  ;;  %v12966_v31 = vld [vmem:[#allocation4 + $0x1b8] sm:$0xff] }
 0xd1f   : > { %v4347_v29 = vpop.xlane.xlu1 %4346 }
 0xd20   : > { %5001 = vst.msk [vmem:[#allocation4 + $0x190] sm:$0xff] %vm15370_vm12, %v12934_v19  ;;  %v12943_v3 = vmax.f32 %v12931_v8, %v4347_v29  ;;  %4448 = vperm.xlu0 %8938, %v12934_v19   ;;  %vm4081_vm12 = vcmask 785920  }
 0xd21   : > { %v4341_v32 = vpop.xlane.xlu0 %4340 }
 0xd22   : > { %5002 = vst.msk [vmem:[#allocation4 + $0x198] sm:$0xff] %vm15371_vm15, %v12943_v3  ;;  %v12953_v37 = vmax.f32 %v12936_v50, %v4341_v32  ;;  %4453 = vperm.xlu1 %8939, %v12943_v3   ;;  %vm15421_vm15 = vmmov %vm15347_vm0 }
 0xd23   : > { %v4343_v58 = vpop.xlane.xlu1 %4342 }
 0xd24   : > { %4999 = vst.msk [vmem:[#allocation4 + $0x180] sm:$0xff] %vm15373_vm7, %v12953_v37  ;;  %v12963_v18 = vmax.f32 %v12946_v46, %v4343_v58  ;;  %4438 = vperm.xlu0 %8938, %v12953_v37   ;;  %vm15422_vm7 = vmmov %vm15347_vm0 }
 0xd25   : > { %v4353_v63 = vpop.xlane.xlu0 %4352 }
 0xd26   : > { %5000 = vst.msk [vmem:[#allocation4 + $0x188] sm:$0xff] %vm15374_vm5, %v12963_v18  ;;  %v12973_v32 = vmax.f32 %v12956_v56, %v4353_v63  ;;  %4443 = vperm.xlu1 %8939, %v12963_v18   ;;  %v9235_v56 = vld [vmem:[%s11171_s12 + $0x38] sm:$0xff]  ;;  %vm15423_vm5 = vmmov %vm15347_vm0 }
 0xd27   : > { %v4355_v55 = vpop.xlane.xlu1 %4354 }
 0xd28   : > { %15375 = vst [vmem:[#allocation96_spill] sm:$0xff] %v12973_v32  ;;  %5005 = vst.msk [vmem:[#allocation4 + $0x1b0] sm:$0xff] %vm15376_vm9, %v12973_v32  ;;  %v12983_v13 = vmax.f32 %v12966_v31, %v4355_v55  ;;  %4468 = vperm.xlu0 %8938, %v12973_v32  }
 0xd29   : > { %v4349_v29 = vpop.xlane.xlu0 %4348  ;;  %vm15424_vm9 = vmmov %vm15347_vm0 }
 0xd2a   : > { %5006 = vst.msk [vmem:[#allocation4 + $0x1b8] sm:$0xff] %vm15377_vm3, %v12983_v13  ;;  %v12993_v12 = vmax.f32 %v12976_v4, %v4349_v29  ;;  %4473 = vperm.xlu1 %8939, %v12983_v13   ;;  %vm15425_vm3 = vmmov %vm15347_vm0 }
 0xd2b   : > { %v4351_v58 = vpop.xlane.xlu1 %4350 }
 0xd2c   : > { %5003 = vst.msk [vmem:[#allocation4 + $0x1a0] sm:$0xff] %vm15379_vm6, %v12993_v12  ;;  %v13003_v53 = vmax.f32 %v12986_v23, %v4351_v58  ;;  %4458 = vperm.xlu0 %8938, %v12993_v12   ;;  %vm15426_vm6 = vmmov %vm15347_vm0 }
 0xd2d   : > { %v4361_v63 = vpop.xlane.xlu0 %4360 }
 0xd2e   : > { %5004 = vst.msk [vmem:[#allocation4 + $0x1a8] sm:$0xff] %vm15380_vm10, %v13003_v53  ;;  %v13013_v39 = vmax.f32 %v12996_v15, %v4361_v63  ;;  %4463 = vperm.xlu1 %8939, %v13003_v53   ;;  %vm15427_vm10 = vmmov %vm15347_vm0 }
 0xd2f   : > { %v4363_v55 = vpop.xlane.xlu1 %4362 }
 0xd30   : > { %15381 = vst [vmem:[#allocation60_spill] sm:$0xff] %v13013_v39  ;;  %5009 = vst.msk [vmem:[#allocation4 + $0x1d0] sm:$0xff] %vm15383_vm13, %v13013_v39  ;;  %v13023_v57 = vmax.f32 %v13006_v40, %v4363_v55  ;;  %4488 = vperm.xlu0 %8938, %v13013_v39   ;;  %v13036_v55 = vld [vmem:[#allocation4 + $0x1f0] sm:$0xff] }
 0xd31   : > { %v4357_v29 = vpop.xlane.xlu0 %4356  ;;  %vm15428_vm13 = vmmov %vm15347_vm0 }
 0xd32   : > { %5010 = vst.msk [vmem:[#allocation4 + $0x1d8] sm:$0xff] %vm15347_vm0, %v13023_v57  ;;  %v13033_v10 = vmax.f32 %v13016_v16, %v4357_v29  ;;  %4493 = vperm.xlu1 %8939, %v13023_v57   ;;  %v13054_v16 = vld [vmem:[#allocation4 + $0x1e0] sm:$0xff] }
 0xd33   : > { %v4359_v58 = vpop.xlane.xlu1 %4358 }
 0xd34   : > { %15384 = vst [vmem:[#allocation105_spill] sm:$0xff] %v13033_v10  ;;  %5007 = vst.msk [vmem:[#allocation4 + $0x1c0] sm:$0xff] %vm15385_vm2, %v13033_v10  ;;  %v13043_v63 = vmax.f32 %v13026_v45, %v4359_v58  ;;  %4478 = vperm.xlu0 %8938, %v13033_v10   ;;  %v9234_v10 = vld [vmem:[%s11171_s12 + $0x30] sm:$0xff] }
 0xd35   : > { %v4369_v29 = vpop.xlane.xlu0 %4368  ;;  %vm15429_vm2 = vmmov %vm15347_vm0 }
 0xd36   : > { %5008 = vst.msk [vmem:[#allocation4 + $0x1c8] sm:$0xff] %vm15386_vm4, %v13043_v63  ;;  %v13051_v32 = vmax.f32 %v13036_v55, %v4369_v29  ;;  %4483 = vperm.xlu1 %8939, %v13043_v63   ;;  %vm15430_vm4 = vmmov %vm15347_vm0 }
 0xd37   : > { %v4782_v39 = vpop.permute.xlu1 %4781 }
 0xd38   : > { %v4402_v58 = vsub.f32 %v13036_v55, %v13051_v32  ;;  %5013 = vst.msk [vmem:[#allocation4 + $0x1f0] sm:$0xff] %vm15387_vm8, %v13051_v32  ;;  %4793 = vrot.lane.b32.xlu0 %v9234_v10, %s9961_s13  ;;  %8557 = vmatprep.subr.bf16.mxu0 %v4782_v39  ;;  %v15417_v55 = vld [vmem:[#allocation95_spill] sm:$0xff]  ;;  %vm15431_vm8 = vmmov %vm15347_vm0 }
 0xd39   : > { %v4365_v15 = vpop.xlane.xlu0 %4364  ;;  %8558 = vmatpush3.bf16.msra.mxu0 %v4782_v39 }
 0xd3a   : > { %v13063_v29 = vmax.f32 %v13054_v16, %v4365_v15  ;;  %4795 = vrot.lane.b32.xlu1 %v9235_v56, %s9961_s13 }
 0xd3b   : > { %v4784_v60 = vpop.permute.xlu1 %4783 }
 0xd3c   : > { %v4400_v54 = vsub.f32 %v13054_v16, %v13063_v29  ;;  %5011 = vst.msk [vmem:[#allocation4 + $0x1e0] sm:$0xff] %vm15388_vm14, %v13063_v29  ;;  %4498 = vperm.xlu0 %8938, %v13063_v29   ;;  %8559 = vmatprep.subr.bf16.mxu0 %v4784_v60  ;;  %vm15432_vm14 = vmmov %vm15347_vm0 }
 0xd3d   : > { %8560 = vmatpush3.bf16.msra.mxu0 %v4784_v60 }
 0xd40   : > { %4508 = vperm.xlu0 %8938, %v13051_v32   ;;  %v4428_v32 = vmul.f32 1.442695, %v4400_v54 }
 0xd41   : > { %v13073_v10 = vpop.permute.xlu0 %3778 }
 0xd44   : > { %3783 = vperm.xlu0 %8938, %v12743_v43   ;;  %v4339_v43 = vld [vmem:[#allocation4 + $0x1f8] sm:$0xff] }
 0xd45   : > { %v4786_v39 = vpop.permute.xlu0 %4785 }
 0xd46   : > { %8561 = vmatprep.subr.bf16.mxu0 %v4786_v39 }
 0xd47   : > { %8562 = vmatpush3.bf16.msra.mxu0 %v4786_v39 }
 0xd48   : > { %3793 = vperm.xlu0 %8938, %v12776_v48  }
 0xd49   : > { %v4790_v60 = vpop.permute.xlu0 %4789 }
 0xd4c   : > { %3803 = vperm.xlu0 %8938, %v12801_v9   ;;  %v4337_v9 = vld [vmem:[#allocation4 + $0x1e8] sm:$0xff] }
 0xd50   : > { %3813 = vperm.xlu0 %8938, %v12790_v22  }
 0xd54   : > { %3823 = vperm.xlu0 %8938, %v12840_v49  }
 0xd58   : > { %3833 = vperm.xlu0 %8938, %v12822_v25  }
 0xd5c   : > { %3843 = vperm.xlu0 %8938, %v12871_v14  }
 0xd60   : > { %3853 = vperm.xlu0 %8938, %v12856_v5  }
 0xd64   : > { %4019 = vrot.lane.b32.xlu0 %v12673_v28, %s9960_s21  ;;  %v15391_v28 = vsub.f32 %v12936_v50, %v12953_v37 }
 0xd68   : > { %4023 = vrot.lane.b32.xlu0 %v12669_v0, %s9960_s21 }
 0xd6c   : > { %4027 = vrot.lane.b32.xlu0 %v12709_v7, %s9960_s21  ;;  %v4371_v48 = vpop.xlane.xlu1 %4370  ;;  %v4404_v7 = vmul.f32 1.442695, %v15391_v28 }
 0xd6d   : > { %v4387_v22 = vmax.f32 %v4339_v43, %v4371_v48 }
 0xd6e   : > { %9132 = vpow2.f32 %v4404_v7  ;;  %v15401_v7 = vld [vmem:[#allocation88_spill] sm:$0xff] }
 0xd6f   : > { %5014 = vst.msk [vmem:[#allocation4 + $0x1f8] sm:$0xff] %vm15389_vm1, %v4387_v22  ;;  %v4403_v50 = vsub.f32 %v4339_v43, %v4387_v22  ;;  %vm15433_vm1 = vmmov %vm15347_vm0 }
 0xd70   : > { %4031 = vrot.lane.b32.xlu0 %v12707_v41, %s9960_s21  ;;  %v4367_v25 = vpop.xlane.xlu1 %4366  ;;  %v15392_v41 = vsub.f32 %v12931_v8, %v12943_v3 }
 0xd71   : > { %v4385_v49 = vmax.f32 %v4337_v9, %v4367_v25 }
 0xd72   : > { %v4410_v5 = vmul.f32 1.442695, %v15392_v41  ;;  %v15403_v41 = vld [vmem:[#allocation96_spill] sm:$0xff] }
 0xd73   : > { %5012 = vst.msk [vmem:[#allocation4 + $0x1e8] sm:$0xff] %vm15390_vm11, %v4385_v49  ;;  %4503 = vperm.xlu1 %8939, %v4385_v49   ;;  %vm15434_vm11 = vmmov %vm15347_vm0 }
 0xd74   : > { %4035 = vrot.lane.b32.xlu0 %v12726_v33, %s9960_s21  ;;  %v4788_v0 = vpop.permute.xlu1 %4787  ;;  %9134 = vpow2.f32 %v4410_v5  ;;  %v15393_v33 = vsub.f32 %v12986_v23, %v13003_v53 }
 0xd75   : > { %8563 = vmatprep.subr.bf16.mxu0 %v4788_v0 }
 0xd76   : > { %8564 = vmatpush3.bf16.msra.mxu0 %v4788_v0  ;;  %v4414_v15 = vmul.f32 1.442695, %v15393_v33 }
 0xd77   : > { %4513 = vperm.xlu1 %8939, %v4387_v22   ;;  %8565 = vmatprep.subr.bf16.mxu0 %v4790_v60 }
 0xd78   : > { %4039 = vrot.lane.b32.xlu0 %v12724_v35, %s9960_s21  ;;  %v4792_v14 = vpop.permute.xlu1 %4791  ;;  %v15394_v35 = vsub.f32 %v12966_v31, %v12983_v13  ;;  %9136 = vpow2.f32 %v4414_v15 }
 0xd7a   : > { %8566 = vmatpush3.bf16.msra.mxu0 %v4790_v60  ;;  %v4418_v8 = vmul.f32 1.442695, %v15394_v35  ;;  %v15406_v35 = vld [vmem:[#allocation87_spill] sm:$0xff] }
 0xd7b   : > { %3788 = vperm.xlu1 %8939, %v12734_v52   ;;  %8567 = vmatprep.subr.bf16.mxu0 %v4792_v14  ;;  %v13115_v52 = vpop.eup %9132 }
 0xd7c   : > { %4043 = vrot.lane.b32.xlu0 %v12758_v26, %s9960_s21  ;;  %9138 = vpow2.f32 %v4418_v8  ;;  %v15395_v26 = vsub.f32 %v13006_v40, %v13023_v57  ;;  %v4434_v40 = vmul.f32 1.442695, %v4403_v50  ;;  %v4401_v57 = vsub.f32 %v4337_v9, %v4385_v49  ;;  %v15410_v50 = vld [vmem:[#allocation91_spill] sm:$0xff] }
 0xd7e   : > { %8568 = vmatpush3.bf16.msra.mxu0 %v4792_v14  ;;  %v4426_v53 = vmul.f32 1.442695, %v15395_v26  ;;  %v15405_v14 = vld [vmem:[#allocation86_spill] sm:$0xff]  ;;  %v15407_v26 = vld [vmem:[#allocation48_spill] sm:$0xff] }
 0xd7f   : > { %3798 = vperm.xlu1 %8939, %v12773_v27   ;;  %v13122_v27 = vpop.eup %9134 }
 0xd80   : > { %4047 = vrot.lane.b32.xlu0 %v12752_v24, %s9960_s21  ;;  %9140 = vpow2.f32 %v4426_v53  ;;  %v15396_v24 = vsub.f32 %v13026_v45, %v13043_v63  ;;  %v15408_v53 = vld [vmem:[#allocation60_spill] sm:$0xff] }
 0xd82   : > { %v4422_v23 = vmul.f32 1.442695, %v15396_v24  ;;  %v15409_v24 = vsub.f32 %v15407_v26, %v15408_v53 }
 0xd83   : > { %3808 = vperm.xlu1 %8939, %v12761_v62   ;;  %v13129_v62 = vpop.eup %9136 }
 0xd84   : > { %4679 = vperm.xlu0 %8938, %v13115_v52   ;;  %9142 = vpow2.f32 %v4422_v23  ;;  %v4424_v23 = vmul.f32 1.442695, %v15409_v24 }
 0xd85   : > { %9144 = vpow2.f32 %v4434_v40 }
 0xd86   : > { %v13133_v3 = vpop.eup %9138 }
 0xd87   : > { %3818 = vperm.xlu1 %8939, %v12797_v47   ;;  %v4430_v47 = vmul.f32 1.442695, %v4401_v57 }
 0xd88   : > { %4694 = vperm.xlu0 %8938, %v13122_v27  }
 0xd89   : > { %9146 = vpow2.f32 %v4430_v47 }
 0xd8a   : > { %v13137_v45 = vpop.eup %9140 }
 0xd8b   : > { %3828 = vperm.xlu1 %8939, %v12786_v34  }
 0xd8c   : > { %4704 = vperm.xlu0 %8938, %v13129_v62  }
 0xd8e   : > { %v13141_v34 = vpop.eup %9142 }
 0xd8f   : > { %3838 = vperm.xlu1 %8939, %v12835_v17   ;;  %v13146_v37 = vpop.eup %9144 }
 0xd90   : > { %4714 = vperm.xlu0 %8938, %v13133_v3  }
 0xd93   : > { %3848 = vperm.xlu1 %8939, %v12817_v51   ;;  %v13151_v17 = vpop.eup %9146 }
 0xd94   : > { %4734 = vperm.xlu0 %8938, %v13137_v45  }
 0xd97   : > { %4017 = vrot.lane.b32.xlu1 %v12667_v21, %s9960_s21 }
 0xd98   : > { %4724 = vperm.xlu0 %8938, %v13141_v34  }
 0xd9b   : > { %4021 = vrot.lane.b32.xlu1 %v12663_v11, %s9960_s21 }
 0xd9c   : > { %4754 = vperm.xlu0 %8938, %v13146_v37  }
 0xd9f   : > { %v4449_v51 = vpop.permute.xlu0 %4448  ;;  %4025 = vrot.lane.b32.xlu1 %v12705_v44, %s9960_s21  ;;  %v15397_v44 = vsub.f32 %v12946_v46, %v12963_v18 }
 0xda0   : > { %4744 = vperm.xlu0 %8938, %v13151_v17  }
 0xda1   : > { %v4454_v56 = vpop.permute.xlu1 %4453  ;;  %v4406_v43 = vmul.f32 1.442695, %v15397_v44 }
 0xda2   : > { %v4519_v22 = vsub.f32 %v12814_v6, %v4454_v56 }
 0xda3   : > { %v4439_v13 = vpop.permute.xlu0 %4438  ;;  %4029 = vrot.lane.b32.xlu1 %v12700_v20, %s9960_s21  ;;  %v15398_v20 = vsub.f32 %v12929_v59, %v12934_v19 }
 0xda4   : > { %v4516_v21 = vsub.f32 %v12826_v38, %v4439_v13  ;;  %v4538_v18 = vmul.f32 1.442695, %v4519_v22  ;;  %v15411_v13 = vld [vmem:[#allocation93_spill] sm:$0xff] }
 0xda5   : > { %v4444_v31 = vpop.permute.xlu1 %4443  ;;  %v4408_v38 = vmul.f32 1.442695, %v15398_v20 }
 0xda6   : > { %v4532_v63 = vmul.f32 1.442695, %v4516_v21  ;;  %v4517_v11 = vsub.f32 %v12831_v61, %v4444_v31  ;;  %v4518_v61 = vsub.f32 %v12805_v1, %v4449_v51  ;;  %v15400_v1 = vld [vmem:[#allocation89_spill] sm:$0xff] }
 0xda7   : > { %v4469_v39 = vpop.permute.xlu0 %4468  ;;  %4033 = vrot.lane.b32.xlu1 %v12719_v42, %s9960_s21  ;;  %v15399_v42 = vsub.f32 %v12976_v4, %v12993_v12 }
 0xda8   : > { %v4534_v48 = vmul.f32 1.442695, %v4517_v11  ;;  %9148 = vpow2.f32 %v4532_v63  ;;  %v4536_v59 = vmul.f32 1.442695, %v4518_v61  ;;  %v4522_v33 = vsub.f32 %v15405_v14, %v4469_v39 }
 0xda9   : > { %v4474_v9 = vpop.permute.xlu1 %4473  ;;  %v4412_v46 = vmul.f32 1.442695, %v15399_v42 }
 0xdaa   : > { %9150 = vpow2.f32 %v4534_v48  ;;  %v4523_v60 = vsub.f32 %v15401_v7, %v4474_v9  ;;  %v4544_v31 = vmul.f32 1.442695, %v4522_v33 }
 0xdab   : > { %v4459_v25 = vpop.permute.xlu0 %4458  ;;  %4037 = vrot.lane.b32.xlu1 %v12714_v30, %s9960_s21  ;;  %9152 = vpow2.f32 %v4406_v43  ;;  %v15412_v43 = vld [vmem:[#allocation92_spill] sm:$0xff] }
 0xdac   : > { %v4520_v6 = vsub.f32 %v12860_v2, %v4459_v25  ;;  %9154 = vpow2.f32 %v4408_v38  ;;  %v15402_v2 = vld [vmem:[#allocation94_spill] sm:$0xff]  ;;  %v4546_v57 = vmul.f32 1.442695, %v4523_v60  ;;  %v4432_v60 = vmul.f32 1.442695, %v4402_v58 }
 0xdad   : > { %v4464_v49 = vpop.permute.xlu1 %4463  ;;  %9156 = vpow2.f32 %v4412_v46  ;;  %v15404_v5 = vsub.f32 %v15402_v2, %v15403_v41  ;;  %v15413_v38 = vld [vmem:[#allocation90_spill] sm:$0xff]  ;;  %v15414_v46 = vld [vmem:[#allocation103_spill] sm:$0xff] }
 0xdae   : > { %v4521_v0 = vsub.f32 %v12865_v36, %v4464_v49  ;;  %v4540_v28 = vmul.f32 1.442695, %v4520_v6  ;;  %9158 = vpow2.f32 %v4538_v18  ;;  %v15415_v6 = vld [vmem:[#allocation105_spill] sm:$0xff] }
 0xdaf   : > { %v4489_v19 = vpop.permute.xlu0 %4488  ;;  %4041 = vrot.lane.b32.xlu1 %v15400_v1, %s9960_s21  ;;  %v4416_v36 = vmul.f32 1.442695, %v15404_v5  ;;  %v15416_v18 = vsub.f32 %v15414_v46, %v15415_v6 }
 0xdb0   : > { %v4542_v30 = vmul.f32 1.442695, %v4521_v0  ;;  %v4526_v61 = vsub.f32 %v15413_v38, %v4489_v19 }
 0xdb1   : > { %v4494_v12 = vpop.permute.xlu1 %4493  ;;  %v4420_v49 = vmul.f32 1.442695, %v15416_v18  ;;  %v3765_v18 = vld [vmem:[#allocation6 + $0x28] sm:$0xff] }
 0xdb2   : > { %9160 = vpow2.f32 %v4542_v30  ;;  %v13180_v4 = vpop.eup %9148  ;;  %v4527_v48 = vsub.f32 %v15412_v43, %v4494_v12  ;;  %v4552_v30 = vmul.f32 1.442695, %v4526_v61  ;;  %v3761_v43 = vld [vmem:[#allocation6 + $0x8] sm:$0xff]  ;;  %v3763_v61 = vld [vmem:[#allocation6 + $0x18] sm:$0xff] }
 0xdb3   : > { %9162 = vpow2.f32 %v4536_v59  ;;  %v4479_v15 = vpop.permute.xlu0 %4478  ;;  %4045 = vrot.lane.b32.xlu1 %v15406_v35, %s9960_s21 }
 0xdb4   : > { %v9151_v8 = vpop.eup %9150  ;;  %9164 = vpow2.f32 %v4540_v28  ;;  %v4524_v40 = vsub.f32 %v15410_v50, %v4479_v15  ;;  %v4554_v59 = vmul.f32 1.442695, %v4527_v48 }
 0xdb5   : > { %v4484_v47 = vpop.permute.xlu1 %4483  ;;  %v4773_v51 = vpack.c.bf16 %v9151_v8, %v13180_v4  ;;  %v13193_v56 = vpop.eup %9152  ;;  %9166 = vpow2.f32 %v4416_v36 }
 0xdb6   : > { %v4525_v21 = vsub.f32 %v15411_v13, %v4484_v47  ;;  %9168 = vpow2.f32 %v4424_v23  ;;  %v4548_v11 = vmul.f32 1.442695, %v4524_v40  ;;  %v13197_v44 = vpop.eup %9154 }
 0xdb7   : > { %v4794_v63 = vpop.permute.xlu0 %4793  ;;  %4684 = vperm.xlu1 %8939, %v13193_v56   ;;  %8573 = vmatprep.mubr.bf16.mxu0 %v4773_v51  ;;  %9170 = vpow2.f32 %v4546_v57  ;;  %v13200_v9 = vpop.eup %9156 }
 0xdb8   : > { %v4550_v39 = vmul.f32 1.442695, %v4525_v21  ;;  %8569 = vmatprep.subr.bf16.mxu0 %v4794_v63  ;;  %v13202_v20 = vpop.eup %9158 }
 0xdb9   : > { %8570 = vmatpush3.bf16.msra.mxu0 %v4794_v63  ;;  %v4796_v22 = vpop.permute.xlu1 %4795 }
 0xdba   : > { %9172 = vpow2.f32 %v4550_v39  ;;  %8571 = vmatprep.subr.bf16.mxu0 %v4796_v22 }
 0xdbb   : > { %9174 = vpow2.f32 %v4544_v31  ;;  %v4499_v25 = vpop.permute.xlu0 %4498  ;;  %4689 = vperm.xlu1 %8939, %v13197_v44  }
 0xdbc   : > { %v13206_v42 = vpop.eup %9160  ;;  %9176 = vpow2.f32 %v4548_v11 }
 0xdbd   : > { %v9163_v0 = vpop.eup %9162  ;;  %8572 = vmatpush3.bf16.msra.mxu0 %v4796_v22  ;;  %9178 = vpow2.f32 %v4420_v49 }
 0xdbe   : > { %v9165_v1 = vpop.eup %9164  ;;  %v4774_v28 = vpack.c.bf16 %v13202_v20, %v9163_v0  ;;  %9180 = vpow2.f32 %v4554_v59 }
 0xdbf   : > { %v4509_v7 = vpop.permute.xlu0 %4508  ;;  %4699 = vperm.xlu1 %8939, %v13200_v9   ;;  %4601 = vadd.xlane.f32.xlu0 %v9163_v0  ;;  %v4775_v19 = vpack.c.bf16 %v13206_v42, %v9165_v1  ;;  %v13217_v12 = vpop.eup %9166  ;;  %9182 = vpow2.f32 %v4552_v30 }
 0xdc0   : > { %8574 = vmatmul.mubr.bf16.vlgmr.msra.gmra.mrb[48].mxu0 %v4774_v28  ;;  %v13219_v2 = vpop.eup %9168  ;;  %9184 = vpow2.f32 %v4432_v60  ;;  %v4530_v58 = vsub.f32 %v15417_v55, %v4509_v7 }
 0xdc1   : > { %8577 = vmatprep.mubr.bf16.mxu0 %v4775_v19  ;;  %v13221_v41 = vpop.eup %9170  ;;  %9186 = vpow2.f32 %v4428_v32  ;;  %v3769_v19 = vld [vmem:[#allocation6 + $0x48] sm:$0xff] }
 0xdc2   : > { %v4560_v24 = vmul.f32 1.442695, %v4530_v58  ;;  %v15419_v32 = vld [vmem:[#allocation65_spill] sm:$0xff] }
 0xdc3   : > { %v3784_v5 = vpop.permute.xlu0 %3783  ;;  %4709 = vperm.xlu1 %8939, %v13217_v12   ;;  %4599 = vadd.xlane.f32.xlu0 %v9151_v8  ;;  %v15418_v8 = vld [vmem:[#allocation97_spill] sm:$0xff] }
 0xdc4   : > { %v13224_v36 = vpop.eup %9172  ;;  %v4528_v53 = vsub.f32 %v15418_v8, %v4499_v25  ;;  %9188 = vpow2.f32 %v4560_v24  ;;  %v3857_v48 = vmul.f32 %v3784_v5, %v3761_v43  ;;  %v15420_v8 = vld [vmem:[#allocation56_spill] sm:$0xff]  ;;  %v3775_v43 = vld [vmem:[#allocation6 + $0x78] sm:$0xff] }
 0xdc5   : > { %v9175_v14 = vpop.eup %9174 }
 0xdc6   : > { %v9177_v33 = vpop.eup %9176  ;;  %v4776_v15 = vpack.c.bf16 %v13221_v41, %v9175_v14  ;;  %v4556_v23 = vmul.f32 1.442695, %v4528_v53 }
 0xdc7   : > { %v3794_v35 = vpop.permute.xlu0 %3793  ;;  %4729 = vperm.xlu1 %8939, %v13219_v2   ;;  %4609 = vadd.xlane.f32.xlu0 %v9175_v14  ;;  %v4777_v26 = vpack.c.bf16 %v13224_v36, %v9177_v33  ;;  %v13234_v16 = vpop.eup %9178 }
 0xdc8   : > { %8578 = vmatmul.mubr.bf16.gmra.mrb[52].mxu0 %v4776_v15  ;;  %v13236_v54 = vpop.eup %9180  ;;  %9190 = vpow2.f32 %v4556_v23  ;;  %v3859_v25 = vmul.f32 %v3794_v35, %v3763_v61  ;;  %v3773_v23 = vld [vmem:[#allocation6 + $0x68] sm:$0xff] }
 0xdc9   : > { %8581 = vmatprep.mubr.bf16.mxu0 %v4777_v26  ;;  %v9183_v50 = vpop.eup %9182 }
 0xdca   : > { %v13239_v40 = vpop.eup %9184  ;;  %v4778_v57 = vpack.c.bf16 %v13236_v54, %v9183_v50 }
 0xdcb   : > { %v3804_v29 = vpop.permute.xlu0 %3803  ;;  %4719 = vperm.xlu1 %8939, %v13234_v16   ;;  %4605 = vadd.xlane.f32.xlu0 %v9165_v1  ;;  %v13243_v51 = vpop.eup %9186  ;;  %v3767_v1 = vld [vmem:[#allocation6 + $0x38] sm:$0xff] }
 0xdcc   : > { %v3861_v49 = vmul.f32 %v3804_v29, %v3765_v18 }
 0xdce   : > { %v13246_v21 = vpop.eup %9188 }
 0xdcf   : > { %v3814_v47 = vpop.permute.xlu0 %3813  ;;  %4749 = vperm.xlu1 %8939, %v13239_v40   ;;  %4617 = vadd.xlane.f32.xlu0 %v9183_v50 }
 0xdd0   : > { %8582 = vmatmul.mubr.bf16.gmra.mrb[56].mxu0 %v4778_v57  ;;  %v3863_v28 = vmul.f32 %v3814_v47, %v3767_v1 }
 0xdd2   : > { %v9191_v63 = vpop.eup %9190 }
 0xdd3   : > { %v3824_v13 = vpop.permute.xlu0 %3823  ;;  %4739 = vperm.xlu1 %8939, %v13243_v51   ;;  %4613 = vadd.xlane.f32.xlu0 %v9177_v33  ;;  %v3771_v33 = vld [vmem:[#allocation6 + $0x58] sm:$0xff] }
 0xdd4   : > { %v3865_v60 = vmul.f32 %v3824_v13, %v3769_v19 }
 0xdd7   : > { %v3834_v31 = vpop.permute.xlu0 %3833  ;;  %4625 = vadd.xlane.f32.xlu0 %v13246_v21 }
 0xdd8   : > { %v3867_v35 = vmul.f32 %v3834_v31, %v3771_v33 }
 0xddb   : > { %v3844_v11 = vpop.permute.xlu0 %3843  ;;  %4621 = vadd.xlane.f32.xlu0 %v9191_v63 }
 0xddc   : > { %v3869_v57 = vmul.f32 %v3844_v11, %v3773_v23 }
 0xddf   : > { %v3854_v39 = vpop.permute.xlu0 %3853 }
 0xde3   : > { %v4020_v22 = vpop.permute.xlu0 %4019 }
 0xde4   : > { %v4066_v38 = vadd.f32 %v4020_v22, %v3857_v48  ;;  %v3871_v48 = vmul.f32 %v3854_v39, %v3775_v43 }
 0xde6   : > { %4083 = vst.msk [vmem:[#allocation6 + $0x8] sm:$0xff] %vm4081_vm12, %v4066_v38 }
 0xde7   : > { %v4024_v46 = vpop.permute.xlu0 %4023 }
 0xde8   : > { %v4068_v6 = vadd.f32 %v4024_v46, %v3859_v25 }
 0xdea   : > { %4085 = vst.msk [vmem:[#allocation6 + $0x18] sm:$0xff] %vm4081_vm12, %v4068_v6 }
 0xdeb   : > { %v4028_v0 = vpop.permute.xlu0 %4027 }
 0xdec   : > { %v4070_v59 = vadd.f32 %v4028_v0, %v3861_v49  ;;  %v3760_v49 = vld [vmem:[#allocation6] sm:$0xff] }
 0xdee   : > { %4087 = vst.msk [vmem:[#allocation6 + $0x28] sm:$0xff] %vm4081_vm12, %v4070_v59  ;;  %v3762_v59 = vld [vmem:[#allocation6 + $0x10] sm:$0xff] }
 0xdef   : > { %v4032_v30 = vpop.permute.xlu0 %4031 }
 0xdf0   : > { %v4072_v7 = vadd.f32 %v4032_v30, %v3863_v28 }
 0xdf2   : > { %4089 = vst.msk [vmem:[#allocation6 + $0x38] sm:$0xff] %vm4081_vm12, %v4072_v7  ;;  %v4504_v5 = vpop.permute.xlu1 %4503 }
 0xdf3   : > { %v4529_v55 = vsub.f32 %v15419_v32, %v4504_v5  ;;  %v4036_v58 = vpop.permute.xlu0 %4035 }
 0xdf4   : > { %v4074_v14 = vadd.f32 %v4036_v58, %v3865_v60  ;;  %v3766_v60 = vld [vmem:[#allocation6 + $0x30] sm:$0xff] }
 0xdf5   : > { %v4558_v15 = vmul.f32 1.442695, %v4529_v55  ;;  %v3768_v55 = vld [vmem:[#allocation6 + $0x40] sm:$0xff] }
 0xdf6   : > { %4091 = vst.msk [vmem:[#allocation6 + $0x48] sm:$0xff] %vm4081_vm12, %v4074_v14  ;;  %v4514_v26 = vpop.permute.xlu1 %4513 }
 0xdf7   : > { %9192 = vpow2.f32 %v4558_v15  ;;  %v4531_v53 = vsub.f32 %v15420_v8, %v4514_v26  ;;  %v4040_v24 = vpop.permute.xlu0 %4039  ;;  %4597 = vadd.xlane.f32.xlu1 %v13180_v4 }
 0xdf8   : > { %v4076_v29 = vadd.f32 %v4040_v24, %v3867_v35  ;;  %v3770_v35 = vld [vmem:[#allocation6 + $0x50] sm:$0xff] }
 0xdf9   : > { %v4562_v50 = vmul.f32 1.442695, %v4531_v53 }
 0xdfa   : > { %4093 = vst.msk [vmem:[#allocation6 + $0x58] sm:$0xff] %vm4081_vm12, %v4076_v29  ;;  %v3789_v47 = vpop.permute.xlu1 %3788  ;;  %v3772_v29 = vld [vmem:[#allocation6 + $0x60] sm:$0xff] }
 0xdfb   : > { %9194 = vpow2.f32 %v4562_v50  ;;  %v4044_v13 = vpop.permute.xlu0 %4043  ;;  %4603 = vadd.xlane.f32.xlu1 %v13202_v20  ;;  %v3858_v1 = vmul.f32 %v3789_v47, %v3762_v59 }
 0xdfc   : > { %v4078_v31 = vadd.f32 %v4044_v13, %v3869_v57  ;;  %v3774_v13 = vld [vmem:[#allocation6 + $0x70] sm:$0xff] }
 0xdfe   : > { %4095 = vst.msk [vmem:[#allocation6 + $0x68] sm:$0xff] %vm4081_vm12, %v4078_v31  ;;  %v3799_v22 = vpop.permute.xlu1 %3798 }
 0xdff   : > { %v4048_v38 = vpop.permute.xlu0 %4047  ;;  %4611 = vadd.xlane.f32.xlu1 %v13221_v41 }
 0xe00   : > { %v4080_v4 = vadd.f32 %v4048_v38, %v3871_v48 }
 0xe01   : > { %v9193_v61 = vpop.eup %9192 }
 0xe02   : > { %4097 = vst.msk [vmem:[#allocation6 + $0x78] sm:$0xff] %vm4081_vm12, %v4080_v4  ;;  %v3809_v11 = vpop.permute.xlu1 %3808  ;;  %v4779_v25 = vpack.c.bf16 %v9193_v61, %v9191_v63  ;;  %v3856_v63 = vmul.f32 %v13073_v10, %v3760_v49 }
 0xe03   : > { %4607 = vadd.xlane.f32.xlu1 %v13206_v42  ;;  %v3862_v5 = vmul.f32 %v3809_v11, %v3766_v60  ;;  %v4567_v11 = vld [vmem:[#allocation5 + $0x190] sm:$0xff] }
 0xe04   : > { %8585 = vmatprep.mubr.bf16.mxu0 %v4779_v25  ;;  %v4583_v25 = vmul.f32 %v13197_v44, %v4567_v11 }
 0xe05   : > { %v9195_v46 = vpop.eup %9194 }
 0xe06   : > { %v3819_v20 = vpop.permute.xlu1 %3818  ;;  %v4780_v6 = vpack.c.bf16 %v9195_v46, %v13246_v21 }
 0xe07   : > { %4619 = vadd.xlane.f32.xlu1 %v13236_v54  ;;  %v3764_v54 = vld [vmem:[#allocation6 + $0x20] sm:$0xff]  ;;  %v3864_v14 = vmul.f32 %v3819_v20, %v3768_v55  ;;  %v4566_v20 = vld [vmem:[#allocation5 + $0x188] sm:$0xff] }
 0xe08   : > { %8586 = vmatmul.mubr.bf16.gmra.mrb[60].mxu0 %v4780_v6  ;;  %v3860_v30 = vmul.f32 %v3799_v22, %v3764_v54 }
 0xe0a   : > { %v3829_v39 = vpop.permute.xlu1 %3828 }
 0xe0b   : > { %4615 = vadd.xlane.f32.xlu1 %v13224_v36  ;;  %v13269_v36 = vpop.permute.xlu0 %4679  ;;  %v3866_v26 = vmul.f32 %v3829_v39, %v3770_v35  ;;  %v4582_v39 = vmul.f32 %v13193_v56, %v4566_v20  ;;  %v4570_v20 = vld [vmem:[#allocation5 + $0x1a8] sm:$0xff] }
 0xe0e   : > { %v3839_v41 = vpop.permute.xlu1 %3838 }
 0xe0f   : > { %4627 = vadd.xlane.f32.xlu1 %v9195_v46  ;;  %v13272_v58 = vpop.permute.xlu0 %4694  ;;  %v3868_v23 = vmul.f32 %v3839_v41, %v3772_v29 }
 0xe12   : > { %v3849_v18 = vpop.permute.xlu1 %3848 }
 0xe13   : > { %4623 = vadd.xlane.f32.xlu1 %v9193_v61  ;;  %v13276_v8 = vpop.permute.xlu0 %4704  ;;  %v3870_v31 = vmul.f32 %v3849_v18, %v3774_v13  ;;  %v4571_v18 = vld [vmem:[#allocation5 + $0x1b0] sm:$0xff]  ;;  %v4568_v13 = vld [vmem:[#allocation5 + $0x198] sm:$0xff] }
 0xe16   : > { %v4018_v0 = vpop.permute.xlu1 %4017 }
 0xe17   : > { %v4065_v42 = vadd.f32 %v4018_v0, %v3856_v63  ;;  %v13279_v47 = vpop.permute.xlu0 %4714  ;;  %v4587_v63 = vmul.f32 %v13217_v12, %v4571_v18  ;;  %v4573_v12 = vld [vmem:[#allocation5 + $0x1c0] sm:$0xff] }
 0xe18   : > { %v4589_v60 = vmul.f32 %v13234_v16, %v4573_v12 }
 0xe19   : > { %4082 = vst.msk [vmem:[#allocation6] sm:$0xff] %vm4081_vm12, %v4065_v42  ;;  %v4569_v42 = vld [vmem:[#allocation5 + $0x1a0] sm:$0xff] }
 0xe1a   : > { %v4022_v21 = vpop.permute.xlu1 %4021  ;;  %v4585_v44 = vmul.f32 %v13200_v9, %v4569_v42 }
 0xe1b   : > { %v4067_v28 = vadd.f32 %v4022_v21, %v3858_v1  ;;  %v13283_v22 = vpop.permute.xlu0 %4734 }
 0xe1d   : > { %4084 = vst.msk [vmem:[#allocation6 + $0x10] sm:$0xff] %vm4081_vm12, %v4067_v28  ;;  %v4575_v28 = vld [vmem:[#allocation5 + $0x1d0] sm:$0xff] }
 0xe1e   : > { %v4026_v7 = vpop.permute.xlu1 %4025  ;;  %v4591_v56 = vmul.f32 %v13219_v2, %v4575_v28  ;;  %v4577_v2 = vld [vmem:[#allocation5 + $0x1e0] sm:$0xff]  ;;  %v4580_v28 = vld [vmem:[#allocation5 + $0x1f8] sm:$0xff] }
 0xe1f   : > { %v4069_v19 = vadd.f32 %v4026_v7, %v3860_v30  ;;  %v13285_v38 = vpop.permute.xlu0 %4724 }
 0xe21   : > { %4086 = vst.msk [vmem:[#allocation6 + $0x20] sm:$0xff] %vm4081_vm12, %v4069_v19 }
 0xe22   : > { %v4030_v10 = vpop.permute.xlu1 %4029 }
 0xe23   : > { %v4071_v32 = vadd.f32 %v4030_v10, %v3862_v5  ;;  %v13287_v4 = vpop.permute.xlu0 %4754  ;;  %v4579_v10 = vld [vmem:[#allocation5 + $0x1f0] sm:$0xff] }
 0xe24   : > { %v4595_v55 = vmul.f32 %v13239_v40, %v4579_v10 }
 0xe25   : > { %4088 = vst.msk [vmem:[#allocation6 + $0x30] sm:$0xff] %vm4081_vm12, %v4071_v32 }
 0xe26   : > { %v4034_v33 = vpop.permute.xlu1 %4033 }
 0xe27   : > { %v4073_v15 = vadd.f32 %v4034_v33, %v3864_v14  ;;  %v13289_v61 = vpop.permute.xlu0 %4744 }
 0xe29   : > { %4090 = vst.msk [vmem:[#allocation6 + $0x40] sm:$0xff] %vm4081_vm12, %v4073_v15  ;;  %v4593_v15 = vmul.f32 %v13243_v51, %v4577_v2 }
 0xe2a   : > { %v4038_v53 = vpop.permute.xlu1 %4037 }
 0xe2b   : > { %v4075_v24 = vadd.f32 %v4038_v53, %v3866_v26 }
 0xe2d   : > { %4092 = vst.msk [vmem:[#allocation6 + $0x50] sm:$0xff] %vm4081_vm12, %v4075_v24 }
 0xe2e   : > { %v4042_v50 = vpop.permute.xlu1 %4041 }
 0xe2f   : > { %v4077_v57 = vadd.f32 %v4042_v50, %v3868_v23  ;;  %v4565_v23 = vld [vmem:[#allocation5 + $0x180] sm:$0xff] }
 0xe30   : > { %v4581_v50 = vmul.f32 %v13115_v52, %v4565_v23  ;;  %v4586_v52 = vmul.f32 %v13129_v62, %v4570_v20  ;;  %v4663_v23 = vld [vmem:[#allocation6 + $0x10] sm:$0xff] }
 0xe31   : > { %4094 = vst.msk [vmem:[#allocation6 + $0x60] sm:$0xff] %vm4081_vm12, %v4077_v57 }
 0xe32   : > { %v4046_v43 = vpop.permute.xlu1 %4045 }
 0xe33   : > { %v4079_v48 = vadd.f32 %v4046_v43, %v3870_v31  ;;  %v4584_v31 = vmul.f32 %v13122_v27, %v4568_v13 }
 0xe35   : > { %4096 = vst.msk [vmem:[#allocation6 + $0x70] sm:$0xff] %vm4081_vm12, %v4079_v48  ;;  %v4572_v48 = vld [vmem:[#allocation5 + $0x1b8] sm:$0xff]  ;;  %vm15435_vm12 = vmmov %vm15347_vm0 }
 0xe36   : > { %v13296_v1 = vpop.permute.xlu1 %4684 }
 0xe3a   : > { %v13302_v30 = vpop.permute.xlu1 %4689 }
 0xe3e   : > { %v13306_v9 = vpop.permute.xlu1 %4699 }
 0xe42   : > { %v13312_v35 = vpop.permute.xlu1 %4709 }
 0xe46   : > { %v13315_v53 = vpop.permute.xlu1 %4729 }
 0xe4a   : > { %v13317_v24 = vpop.permute.xlu1 %4719 }
 0xe4c   : > { %v4602_v46 = vpop.xlane.xlu0 %4601 }
 0xe4d   : > { %v4631_v6 = vadd.f32 %v4602_v46, %v4583_v25  ;;  %v4588_v25 = vmul.f32 %v13133_v3, %v4572_v48  ;;  %v4574_v3 = vld [vmem:[#allocation5 + $0x1c8] sm:$0xff] }
 0xe4e   : > { %v13319_v29 = vpop.permute.xlu1 %4749  ;;  %v4590_v62 = vmul.f32 %v13141_v34, %v4574_v3 }
 0xe4f   : > { %4647 = vst.msk [vmem:[#allocation5 + $0x190] sm:$0xff] %vm15421_vm15, %v4631_v6  ;;  %vm4982_vm15 = vcmask 1048320  }
 0xe50   : > { %v4600_v41 = vpop.xlane.xlu0 %4599 }
 0xe51   : > { %v4630_v49 = vadd.f32 %v4600_v41, %v4582_v39  ;;  %v4576_v41 = vld [vmem:[#allocation5 + $0x1d8] sm:$0xff] }
 0xe52   : > { %v13321_v40 = vpop.permute.xlu1 %4739 }
 0xe53   : > { %4646 = vst.msk [vmem:[#allocation5 + $0x188] sm:$0xff] %vm15422_vm7, %v4630_v49  ;;  %v4592_v49 = vmul.f32 %v13137_v45, %v4576_v41 }
 0xe54   : > { %v4610_v0 = vpop.xlane.xlu0 %4609 }
 0xe55   : > { %v4635_v59 = vadd.f32 %v4610_v0, %v4587_v63 }
 0xe57   : > { %4651 = vst.msk [vmem:[#allocation5 + $0x1b0] sm:$0xff] %vm15423_vm5, %v4635_v59 }
 0xe58   : > { %v4606_v21 = vpop.xlane.xlu0 %4605 }
 0xe59   : > { %v4633_v54 = vadd.f32 %v4606_v21, %v4585_v44 }
 0xe5b   : > { %4649 = vst.msk [vmem:[#allocation5 + $0x1a0] sm:$0xff] %vm15424_vm9, %v4633_v54 }
 0xe5c   : > { %v4618_v7 = vpop.xlane.xlu0 %4617 }
 0xe5d   : > { %v4639_v19 = vadd.f32 %v4618_v7, %v4591_v56  ;;  %v4596_v56 = vmul.f32 %v13146_v37, %v4580_v28 }
 0xe5f   : > { %4655 = vst.msk [vmem:[#allocation5 + $0x1d0] sm:$0xff] %vm15425_vm3, %v4639_v19  ;;  %v4578_v19 = vld [vmem:[#allocation5 + $0x1e8] sm:$0xff] }
 0xe60   : > { %v4614_v5 = vpop.xlane.xlu0 %4613  ;;  %v4594_v10 = vmul.f32 %v13151_v17, %v4578_v19 }
 0xe61   : > { %v4637_v32 = vadd.f32 %v4614_v5, %v4589_v60 }
 0xe63   : > { %4653 = vst.msk [vmem:[#allocation5 + $0x1c0] sm:$0xff] %vm15426_vm6, %v4637_v32 }
 0xe64   : > { %v4626_v14 = vpop.xlane.xlu0 %4625 }
 0xe65   : > { %v4643_v33 = vadd.f32 %v4626_v14, %v4595_v55 }
 0xe67   : > { %4659 = vst.msk [vmem:[#allocation5 + $0x1f0] sm:$0xff] %vm15427_vm10, %v4643_v33 }
 0xe68   : > { %v4622_v26 = vpop.xlane.xlu0 %4621 }
 0xe69   : > { %v4641_v16 = vadd.f32 %v4622_v26, %v4593_v15 }
 0xe6b   : > { %4657 = vst.msk [vmem:[#allocation5 + $0x1e0] sm:$0xff] %vm15428_vm13, %v4641_v16 }
 0xe84   : > { %v4598_v57 = vpop.xlane.xlu1 %4597 }
 0xe85   : > { %v4629_v51 = vadd.f32 %v4598_v57, %v4581_v50  ;;  %v4759_v50 = vmul.f32 %v13302_v30, %v4663_v23  ;;  %v4664_v57 = vld [vmem:[#allocation6 + $0x18] sm:$0xff] }
 0xe87   : > { %4645 = vst.msk [vmem:[#allocation5 + $0x180] sm:$0xff] %vm15347_vm0, %v4629_v51  ;;  %v4661_v51 = vld [vmem:[#allocation6] sm:$0xff] }
 0xe88   : > { %v4604_v43 = vpop.xlane.xlu1 %4603 }
 0xe89   : > { %v4632_v11 = vadd.f32 %v4604_v43, %v4584_v31  ;;  %v4760_v31 = vmul.f32 %v13272_v58, %v4664_v57 }
 0xe8b   : > { %4648 = vst.msk [vmem:[#allocation5 + $0x198] sm:$0xff] %vm15429_vm2, %v4632_v11 }
 0xe8c   : > { %v4612_v46 = vpop.xlane.xlu1 %4611 }
 0xe8d   : > { %v4636_v6 = vadd.f32 %v4612_v46, %v4588_v25  ;;  %v4757_v25 = vmul.f32 %v13269_v36, %v4661_v51  ;;  %v4662_v46 = vld [vmem:[#allocation6 + $0x8] sm:$0xff] }
 0xe8f   : > { %4652 = vst.msk [vmem:[#allocation5 + $0x1b8] sm:$0xff] %vm15430_vm4, %v4636_v6  ;;  %v4758_v6 = vmul.f32 %v13296_v1, %v4662_v46 }
 0xe90   : > { %v4608_v39 = vpop.xlane.xlu1 %4607 }
 0xe91   : > { %v4634_v18 = vadd.f32 %v4608_v39, %v4586_v52  ;;  %v4667_v52 = vld [vmem:[#allocation6 + $0x30] sm:$0xff] }
 0xe92   : > { %v4763_v41 = vmul.f32 %v13312_v35, %v4667_v52 }
 0xe93   : > { %4650 = vst.msk [vmem:[#allocation5 + $0x1a8] sm:$0xff] %vm15431_vm8, %v4634_v18  ;;  %v8575_v27 = vpop.f32.mrb[48].mxu0  ;;  %v4668_v18 = vld [vmem:[#allocation6 + $0x38] sm:$0xff] }
 0xe94   : > { %v4839_v63 = vpop.f32.mrb[49].mxu0  ;;  %4922 = vrot.lane.b32.xlu1 %v8575_v27, %s9959_s1  ;;  %v4620_v0 = vpop.xlane.xlu1 %4619 }
 0xe95   : > { %v4640_v42 = vadd.f32 %v4620_v0, %v4592_v49  ;;  %v8576_v59 = vpop.f32.mrb[50].mxu0  ;;  %v4764_v49 = vmul.f32 %v13279_v47, %v4668_v18 }
 0xe96   : > { %4924 = vrot.lane.b32.xlu0 %v8576_v59, %s9959_s1  ;;  %v4842_v44 = vpop.f32.mrb[51].mxu0 }
 0xe97   : > { %4656 = vst.msk [vmem:[#allocation5 + $0x1d8] sm:$0xff] %vm15432_vm14, %v4640_v42  ;;  %v4666_v42 = vld [vmem:[#allocation6 + $0x28] sm:$0xff] }
 0xe98   : > { %4918 = vrot.lane.b32.xlu1 %v4839_v63, %s9959_s1  ;;  %v4616_v21 = vpop.xlane.xlu1 %4615  ;;  %v4665_v63 = vld [vmem:[#allocation6 + $0x20] sm:$0xff]  ;;  %v4762_v35 = vmul.f32 %v13276_v8, %v4666_v42 }
 0xe99   : > { %v4638_v54 = vadd.f32 %v4616_v21, %v4590_v62  ;;  %v4761_v1 = vmul.f32 %v13306_v9, %v4665_v63  ;;  %v4671_v62 = vld [vmem:[#allocation6 + $0x50] sm:$0xff] }
 0xe9a   : > { %4920 = vrot.lane.b32.xlu0 %v4842_v44, %s9959_s1  ;;  %v4767_v47 = vmul.f32 %v13315_v53, %v4671_v62 }
 0xe9b   : > { %4654 = vst.msk [vmem:[#allocation5 + $0x1c8] sm:$0xff] %vm15433_vm1, %v4638_v54  ;;  %v8579_v45 = vpop.f32.mrb[52].mxu0  ;;  %v4672_v54 = vld [vmem:[#allocation6 + $0x58] sm:$0xff] }
 0xe9c   : > { %v4855_v7 = vpop.f32.mrb[53].mxu0  ;;  %4930 = vrot.lane.b32.xlu1 %v8579_v45, %s9959_s1  ;;  %v4628_v12 = vpop.xlane.xlu1 %4627  ;;  %v4768_v9 = vmul.f32 %v13283_v22, %v4672_v54 }
 0xe9d   : > { %v4644_v60 = vadd.f32 %v4628_v12, %v4596_v56  ;;  %v8580_v5 = vpop.f32.mrb[54].mxu0 }
 0xe9e   : > { %4932 = vrot.lane.b32.xlu0 %v8580_v5, %s9959_s1  ;;  %v4858_v34 = vpop.f32.mrb[55].mxu0 }
 0xe9f   : > { %4660 = vst.msk [vmem:[#allocation5 + $0x1f8] sm:$0xff] %vm15434_vm11, %v4644_v60  ;;  %v4670_v60 = vld [vmem:[#allocation6 + $0x48] sm:$0xff] }
 0xea0   : > { %4926 = vrot.lane.b32.xlu1 %v4855_v7, %s9959_s1  ;;  %v4624_v32 = vpop.xlane.xlu1 %4623  ;;  %v4669_v7 = vld [vmem:[#allocation6 + $0x40] sm:$0xff]  ;;  %v4766_v53 = vmul.f32 %v13285_v38, %v4670_v60 }
 0xea1   : > { %v4642_v55 = vadd.f32 %v4624_v32, %v4594_v10  ;;  %v4765_v8 = vmul.f32 %v13317_v24, %v4669_v7  ;;  %v4673_v32 = vld [vmem:[#allocation6 + $0x60] sm:$0xff]  ;;  %v4674_v24 = vld [vmem:[#allocation6 + $0x68] sm:$0xff] }
 0xea2   : > { %4928 = vrot.lane.b32.xlu0 %v4858_v34, %s9959_s1 }
 0xea3   : > { %4658 = vst.msk [vmem:[#allocation5 + $0x1e8] sm:$0xff] %vm15435_vm12, %v4642_v55  ;;  %v8583_v37 = vpop.f32.mrb[56].mxu0  ;;  %v4769_v55 = vmul.f32 %v13321_v40, %v4673_v32 }
 0xea4   : > { %v4871_v14 = vpop.f32.mrb[57].mxu0  ;;  %4938 = vrot.lane.b32.xlu1 %v8583_v37, %s9959_s1 }
 0xea5   : > { %v8584_v2 = vpop.f32.mrb[58].mxu0 }
 0xea6   : > { %4940 = vrot.lane.b32.xlu0 %v8584_v2, %s9959_s1  ;;  %v4874_v33 = vpop.f32.mrb[59].mxu0 }
 0xea8   : > { %4934 = vrot.lane.b32.xlu1 %v4871_v14, %s9959_s1  ;;  %v4770_v14 = vmul.f32 %v13289_v61, %v4674_v24 }
 0xeaa   : > { %4936 = vrot.lane.b32.xlu0 %v4874_v33, %s9959_s1  ;;  %v4675_v33 = vld [vmem:[#allocation6 + $0x70] sm:$0xff] }
 0xeab   : > { %v4771_v38 = vmul.f32 %v13319_v29, %v4675_v33 }
 0xedb   : > { %v8587_v17 = vpop.f32.mrb[60].mxu0 }
 0xedc   : > { %v4887_v15 = vpop.f32.mrb[61].mxu0 }
 0xedd   : > { %4942 = vrot.lane.b32.xlu1 %v4887_v15, %s9959_s1  ;;  %v8588_v26 = vpop.f32.mrb[62].mxu0 }
 0xede   : > { %v4890_v16 = vpop.f32.mrb[63].mxu0 }
 0xedf   : > { %4944 = vrot.lane.b32.xlu0 %v4890_v16, %s9959_s1 }
 0xee1   : > { %4946 = vrot.lane.b32.xlu1 %v8587_v17, %s9959_s1 }
 0xee3   : > { %4948 = vrot.lane.b32.xlu0 %v8588_v26, %s9959_s1  ;;  %v4676_v26 = vld [vmem:[#allocation6 + $0x78] sm:$0xff] }
 0xee4   : > { %v4772_v23 = vmul.f32 %v13287_v4, %v4676_v26 }
 0xf06   : > { %v4923_v13 = vpop.permute.xlu1 %4922 }
 0xf07   : > { %v4968_v43 = vadd.f32 %v4923_v13, %v4759_v50 }
 0xf08   : > { %v4925_v48 = vpop.permute.xlu0 %4924 }
 0xf09   : > { %4985 = vst.msk [vmem:[#allocation6 + $0x10] sm:$0xff] %vm4982_vm15, %v4968_v43  ;;  %v4969_v11 = vadd.f32 %v4925_v48, %v4760_v31 }
 0xf0a   : > { %v4919_v20 = vpop.permute.xlu1 %4918 }
 0xf0b   : > { %4986 = vst.msk [vmem:[#allocation6 + $0x18] sm:$0xff] %vm4982_vm15, %v4969_v11  ;;  %v4966_v30 = vadd.f32 %v4919_v20, %v4757_v25 }
 0xf0c   : > { %v4921_v39 = vpop.permute.xlu0 %4920 }
 0xf0d   : > { %4983 = vst.msk [vmem:[#allocation6] sm:$0xff] %vm4982_vm15, %v4966_v30  ;;  %v4967_v58 = vadd.f32 %v4921_v39, %v4758_v6 }
 0xf0e   : > { %v4931_v27 = vpop.permute.xlu1 %4930 }
 0xf0f   : > { %4984 = vst.msk [vmem:[#allocation6 + $0x8] sm:$0xff] %vm4982_vm15, %v4967_v58  ;;  %v4972_v36 = vadd.f32 %v4931_v27, %v4763_v41 }
 0xf10   : > { %v4933_v0 = vpop.permute.xlu0 %4932 }
 0xf11   : > { %4989 = vst.msk [vmem:[#allocation6 + $0x30] sm:$0xff] %vm4982_vm15, %v4972_v36  ;;  %v4973_v3 = vadd.f32 %v4933_v0, %v4764_v49 }
 0xf12   : > { %v4927_v59 = vpop.permute.xlu1 %4926 }
 0xf13   : > { %4990 = vst.msk [vmem:[#allocation6 + $0x38] sm:$0xff] %vm4982_vm15, %v4973_v3  ;;  %v4970_v44 = vadd.f32 %v4927_v59, %v4761_v1 }
 0xf14   : > { %v4929_v21 = vpop.permute.xlu0 %4928 }
 0xf15   : > { %4987 = vst.msk [vmem:[#allocation6 + $0x20] sm:$0xff] %vm4982_vm15, %v4970_v44  ;;  %v4971_v28 = vadd.f32 %v4929_v21, %v4762_v35 }
 0xf16   : > { %v4939_v45 = vpop.permute.xlu1 %4938 }
 0xf17   : > { %4988 = vst.msk [vmem:[#allocation6 + $0x28] sm:$0xff] %vm4982_vm15, %v4971_v28  ;;  %v4976_v56 = vadd.f32 %v4939_v45, %v4767_v47 }
 0xf18   : > { %v4941_v12 = vpop.permute.xlu0 %4940 }
 0xf19   : > { %4993 = vst.msk [vmem:[#allocation6 + $0x50] sm:$0xff] %vm4982_vm15, %v4976_v56  ;;  %v4977_v19 = vadd.f32 %v4941_v12, %v4768_v9 }
 0xf1a   : > { %v4935_v5 = vpop.permute.xlu1 %4934 }
 0xf1b   : > { %4994 = vst.msk [vmem:[#allocation6 + $0x58] sm:$0xff] %vm4982_vm15, %v4977_v19  ;;  %v4974_v34 = vadd.f32 %v4935_v5, %v4765_v8 }
 0xf1c   : > { %v4937_v10 = vpop.permute.xlu0 %4936 }
 0xf1d   : > { %4991 = vst.msk [vmem:[#allocation6 + $0x40] sm:$0xff] %vm4982_vm15, %v4974_v34  ;;  %v4975_v22 = vadd.f32 %v4937_v10, %v4766_v53 }
 0xf1f   : > { %4992 = vst.msk [vmem:[#allocation6 + $0x48] sm:$0xff] %vm4982_vm15, %v4975_v22 }
 0xf4f   : > { %v4943_v37 = vpop.permute.xlu1 %4942 }
 0xf50   : > { %v4978_v2 = vadd.f32 %v4943_v37, %v4769_v55 }
 0xf51   : > { %v4945_v17 = vpop.permute.xlu0 %4944 }
 0xf52   : > { %4995 = vst.msk [vmem:[#allocation6 + $0x60] sm:$0xff] %vm4982_vm15, %v4978_v2  ;;  %v4979_v15 = vadd.f32 %v4945_v17, %v4770_v14 }
 0xf53   : > { %v4947_v16 = vpop.permute.xlu1 %4946 }
 0xf54   : > { %4996 = vst.msk [vmem:[#allocation6 + $0x68] sm:$0xff] %vm4982_vm15, %v4979_v15  ;;  %v4980_v50 = vadd.f32 %v4947_v16, %v4771_v38 }
 0xf55   : > { %v4949_v40 = vpop.permute.xlu0 %4948 }
 0xf56   : > { %4997 = vst.msk [vmem:[#allocation6 + $0x70] sm:$0xff] %vm4982_vm15, %v4980_v50  ;;  %v4981_v57 = vadd.f32 %v4949_v40, %v4772_v23 }
 0xf58   : > { %4998 = vst.msk [vmem:[#allocation6 + $0x78] sm:$0xff] %vm4982_vm15, %v4981_v57 }
 0xf59 PF: > { %s15436_s10 = sld [smem:[#allocation28_spill]]  ;;  %s15437_s23 = sld [smem:[#allocation27_spill]] }
 0xf5f   : > { %p7926_p3 = scmp.ne.s32.totalorder %s15437_s23, %s15436_s10 }
 0xf61   : > { %5018 = sbr.rel (%p7926_p3) target bundleno = 5298 (0x14b2), region = 116 }
 0xf68   : > { %v5037_v61 = vld [vmem:[#allocation5 + $0x10] sm:$0xff]  ;;  %v5035_v29 = vld [vmem:[#allocation5] sm:$0xff]  ;;  %v5038_v13 = vld [vmem:[#allocation5 + $0x18] sm:$0xff]  ;;  %v9962_v51 = vmov 0   ;;  %vm5163_vm7 = vcmask 261120   ;;  %vm5325_vm5 = vcmask 523520  }
 0xf69   : > { %9237 = vset.pattern.permute.xlu1 %v9962_v51  ;;  %9236 = vset.pattern.permute.xlu0 %v9962_v51  ;;  %9326 = vrcp.f32 %v5037_v61  ;;  %v5036_v4 = vld [vmem:[#allocation5 + $0x8] sm:$0xff]  ;;  %v5197_v43 = vld [vmem:[#allocation5 + $0x80] sm:$0xff]  ;;  %v5200_v48 = vld [vmem:[#allocation5 + $0x98] sm:$0xff]  ;;  %vm5487_vm9 = vcmask 785920   ;;  %vm5649_vm3 = vcmask 1048320   ;;  %s15438_s9 = sld [smem:[#allocation173_spill]] }
 0xf6a   : > { %9328 = vrcp.f32 %v5035_v29  ;;  %6367 = vmatprep.mubr.bf16.mxu1 %v9962_v51  ;;  %v5198_v31 = vld [vmem:[#allocation5 + $0x88] sm:$0xff]  ;;  %v5199_v11 = vld [vmem:[#allocation5 + $0x90] sm:$0xff]  ;;  %v5039_v30 = vld [vmem:[#allocation5 + $0x20] sm:$0xff]  ;;  %s15455_s8 = sld [smem:[#allocation174_spill]]  ;;  %s15456_s24 = sld [smem:[#allocation175_spill]] }
 0xf6b   : > { %9330 = vrcp.f32 %v5038_v13  ;;  %v5040_v20 = vld [vmem:[#allocation5 + $0x28] sm:$0xff]  ;;  %v5042_v39 = vld [vmem:[#allocation5 + $0x38] sm:$0xff]  ;;  %v5041_v58 = vld [vmem:[#allocation5 + $0x30] sm:$0xff]  ;;  %s15466_s1 = sld [smem:[#allocation177_spill]]  ;;  %s15534_s10 = sld [smem:[#allocation179_spill]] }
 0xf6c   : > { %9332 = vrcp.f32 %v5036_v4  ;;  %v5360_v27 = vld [vmem:[#allocation5 + $0x108] sm:$0xff]  ;;  %v5359_v36 = vld [vmem:[#allocation5 + $0x100] sm:$0xff]  ;;  %v5362_v0 = vld [vmem:[#allocation5 + $0x118] sm:$0xff] }
 0xf6d   : > { %9334 = vrcp.f32 %v5198_v31  ;;  %v5361_v1 = vld [vmem:[#allocation5 + $0x110] sm:$0xff]  ;;  %v5202_v59 = vld [vmem:[#allocation5 + $0xa8] sm:$0xff]  ;;  %v5201_v35 = vld [vmem:[#allocation5 + $0xa0] sm:$0xff] }
 0xf6e   : > { %9336 = vrcp.f32 %v5197_v43  ;;  %v5204_v21 = vld [vmem:[#allocation5 + $0xb8] sm:$0xff]  ;;  %v5203_v47 = vld [vmem:[#allocation5 + $0xb0] sm:$0xff]  ;;  %v5522_v45 = vld [vmem:[#allocation5 + $0x188] sm:$0xff] }
 0xf6f   : > { %9338 = vrcp.f32 %v5200_v48  ;;  %v5521_v9 = vld [vmem:[#allocation5 + $0x180] sm:$0xff]  ;;  %v5524_v8 = vld [vmem:[#allocation5 + $0x198] sm:$0xff]  ;;  %v5523_v19 = vld [vmem:[#allocation5 + $0x190] sm:$0xff] }
 0xf70   : > { %9340 = vrcp.f32 %v5199_v11  ;;  %v9238_v56 = vld [vmem:[#allocation17] sm:$0xff]   ;;  %v9239_v60 = vld [vmem:[#allocation17 + $0x8] sm:$0xff]   ;;  %v9240_v22 = vld [vmem:[#allocation17 + $0x10] sm:$0xff]  }
 0xf71   : > { %9342 = vrcp.f32 %v5040_v20  ;;  %8589 = vmatprep.subr.bf16.mxu0 %v9238_v56  ;;  %v5044_v34 = vld [vmem:[#allocation5 + $0x48] sm:$0xff]  ;;  %v5043_v10 = vld [vmem:[#allocation5 + $0x40] sm:$0xff]  ;;  %v5046_v24 = vld [vmem:[#allocation5 + $0x58] sm:$0xff] }
 0xf72   : > { %9344 = vrcp.f32 %v5039_v30  ;;  %8590 = vmatpush3.bf16.msra.mxu0 %v9238_v56  ;;  %v5045_v37 = vld [vmem:[#allocation5 + $0x50] sm:$0xff]  ;;  %v9241_v14 = vld [vmem:[#allocation17 + $0x18] sm:$0xff]   ;;  %v5364_v17 = vld [vmem:[#allocation5 + $0x128] sm:$0xff] }
 0xf73   : > { %v9327_v25 = vpop.eup %9326  ;;  %9346 = vrcp.f32 %v5042_v39  ;;  %8591 = vmatprep.subr.bf16.mxu0 %v9239_v60  ;;  %v5363_v38 = vld [vmem:[#allocation5 + $0x120] sm:$0xff]  ;;  %v5366_v23 = vld [vmem:[#allocation5 + $0x138] sm:$0xff]  ;;  %v5365_v50 = vld [vmem:[#allocation5 + $0x130] sm:$0xff] }
 0xf74   : > { %v9329_v46 = vpop.eup %9328  ;;  %5079 = vperm.xlu1 %9237, %v9327_v25   ;;  %9348 = vrcp.f32 %v5041_v58  ;;  %v9242_v15 = vld [vmem:[#allocation17 + $0x20] sm:$0xff]   ;;  %v9243_v40 = vld [vmem:[#allocation17 + $0x28] sm:$0xff]   ;;  %v9244_v13 = vld [vmem:[#allocation17 + $0x30] sm:$0xff]  }
 0xf75   : > { %v9331_v6 = vpop.eup %9330  ;;  %5069 = vperm.xlu0 %9236, %v9329_v46   ;;  %9350 = vrcp.f32 %v5360_v27  ;;  %v5206_v29 = vld [vmem:[#allocation5 + $0xc8] sm:$0xff]  ;;  %v5205_v4 = vld [vmem:[#allocation5 + $0xc0] sm:$0xff]  ;;  %v5208_v11 = vld [vmem:[#allocation5 + $0xd8] sm:$0xff] }
 0xf76   : > { %v9333_v52 = vpop.eup %9332  ;;  %9352 = vrcp.f32 %v5359_v36  ;;  %8592 = vmatpush3.bf16.msra.mxu0 %v9239_v60  ;;  %v9245_v48 = vld [vmem:[#allocation17 + $0x38] sm:$0xff]   ;;  %v5207_v46 = vld [vmem:[#allocation5 + $0xd0] sm:$0xff] }
 0xf77   : > { %v9335_v41 = vpop.eup %9334  ;;  %9354 = vrcp.f32 %v5362_v0  ;;  %8593 = vmatprep.subr.bf16.mxu0 %v9240_v22  ;;  %v5211_v60 = vld [vmem:[#allocation5 + $0xf0] sm:$0xff] }
 0xf78   : > { %5084 = vperm.xlu1 %9237, %v9331_v6   ;;  %v9337_v18 = vpop.eup %9336  ;;  %9356 = vrcp.f32 %v5361_v1  ;;  %v5526_v6 = vld [vmem:[#allocation5 + $0x1a8] sm:$0xff]  ;;  %v5050_v1 = vld [vmem:[#allocation5 + $0x78] sm:$0xff] }
 0xf79   : > { %5074 = vperm.xlu0 %9236, %v9333_v52   ;;  %v9339_v49 = vpop.eup %9338  ;;  %9358 = vrcp.f32 %v5202_v59  ;;  %v5525_v52 = vld [vmem:[#allocation5 + $0x1a0] sm:$0xff] }
 0xf7a   : > { %v9341_v63 = vpop.eup %9340  ;;  %9360 = vrcp.f32 %v5201_v35  ;;  %8594 = vmatpush3.bf16.msra.mxu0 %v9240_v22  ;;  %v5368_v35 = vld [vmem:[#allocation5 + $0x148] sm:$0xff] }
 0xf7b   : > { %v9343_v3 = vpop.eup %9342  ;;  %9362 = vrcp.f32 %v5204_v21  ;;  %8595 = vmatprep.subr.bf16.mxu0 %v9241_v14 }
 0xf7c   : > { %5236 = vperm.xlu1 %9237, %v9335_v41   ;;  %v9345_v42 = vpop.eup %9344  ;;  %9364 = vrcp.f32 %v5203_v47  ;;  %v5528_v41 = vld [vmem:[#allocation5 + $0x1b8] sm:$0xff] }
 0xf7d   : > { %5231 = vperm.xlu0 %9236, %v9337_v18   ;;  %v9347_v44 = vpop.eup %9346  ;;  %9366 = vrcp.f32 %v5522_v45  ;;  %v5527_v18 = vld [vmem:[#allocation5 + $0x1b0] sm:$0xff]  ;;  %v5370_v47 = vld [vmem:[#allocation5 + $0x158] sm:$0xff] }
 0xf7e   : > { %v9349_v62 = vpop.eup %9348  ;;  %9368 = vrcp.f32 %v5521_v9  ;;  %8596 = vmatpush3.bf16.msra.mxu0 %v9241_v14  ;;  %v5210_v9 = vld [vmem:[#allocation5 + $0xe8] sm:$0xff] }
 0xf7f   : > { %v9351_v28 = vpop.eup %9350  ;;  %9370 = vrcp.f32 %v5524_v8  ;;  %8597 = vmatprep.subr.bf16.mxu0 %v9242_v15  ;;  %v5212_v8 = vld [vmem:[#allocation5 + $0xf8] sm:$0xff]  ;;  %v5372_v14 = vld [vmem:[#allocation5 + $0x168] sm:$0xff] }
 0xf80   : > { %5246 = vperm.xlu1 %9237, %v9339_v49   ;;  %v9353_v54 = vpop.eup %9352  ;;  %9372 = vrcp.f32 %v5523_v19  ;;  %v5048_v49 = vld [vmem:[#allocation5 + $0x68] sm:$0xff] }
 0xf81   : > { %5241 = vperm.xlu0 %9236, %v9341_v63   ;;  %v9355_v7 = vpop.eup %9354  ;;  %9374 = vrcp.f32 %v5044_v34  ;;  %v5047_v63 = vld [vmem:[#allocation5 + $0x60] sm:$0xff] }
 0xf82   : > { %v9357_v12 = vpop.eup %9356  ;;  %9376 = vrcp.f32 %v5043_v10  ;;  %8598 = vmatpush3.bf16.msra.mxu0 %v9242_v15  ;;  %v5529_v10 = vld [vmem:[#allocation5 + $0x1c0] sm:$0xff] }
 0xf83   : > { %v9359_v5 = vpop.eup %9358  ;;  %9378 = vrcp.f32 %v5046_v24  ;;  %8599 = vmatprep.subr.bf16.mxu0 %v9243_v40  ;;  %v5531_v24 = vld [vmem:[#allocation5 + $0x1d0] sm:$0xff] }
 0xf84   : > { %5094 = vperm.xlu1 %9237, %v9343_v3   ;;  %v9361_v53 = vpop.eup %9360  ;;  %9380 = vrcp.f32 %v5045_v37 }
 0xf85   : > { %5089 = vperm.xlu0 %9236, %v9345_v42   ;;  %v9363_v32 = vpop.eup %9362  ;;  %9382 = vrcp.f32 %v5364_v17  ;;  %v5049_v42 = vld [vmem:[#allocation5 + $0x70] sm:$0xff] }
 0xf86   : > { %v9365_v55 = vpop.eup %9364  ;;  %9384 = vrcp.f32 %v5363_v38  ;;  %8600 = vmatpush3.bf16.msra.mxu0 %v9243_v40  ;;  %v5374_v38 = vld [vmem:[#allocation5 + $0x178] sm:$0xff]  ;;  %v5533_v40 = vld [vmem:[#allocation5 + $0x1e0] sm:$0xff] }
 0xf87   : > { %v9367_v2 = vpop.eup %9366  ;;  %9386 = vrcp.f32 %v5366_v23  ;;  %8601 = vmatprep.subr.bf16.mxu0 %v9244_v13  ;;  %v5534_v23 = vld [vmem:[#allocation5 + $0x1e8] sm:$0xff] }
 0xf88   : > { %5104 = vperm.xlu1 %9237, %v9347_v44   ;;  %v9369_v33 = vpop.eup %9368  ;;  %9388 = vrcp.f32 %v5365_v50 }
 0xf89   : > { %5099 = vperm.xlu0 %9236, %v9349_v62   ;;  %v9371_v26 = vpop.eup %9370  ;;  %9390 = vrcp.f32 %v5206_v29  ;;  %v5367_v62 = vld [vmem:[#allocation5 + $0x140] sm:$0xff] }
 0xf8a   : > { %v9373_v16 = vpop.eup %9372  ;;  %8602 = vmatpush3.bf16.msra.mxu0 %v9244_v13  ;;  %9392 = vrcp.f32 %v5205_v4  ;;  %v5535_v13 = vld [vmem:[#allocation5 + $0x1f0] sm:$0xff] }
 0xf8b   : > { %v9375_v57 = vpop.eup %9374  ;;  %8603 = vmatprep.subr.bf16.mxu0 %v9245_v48  ;;  %9394 = vrcp.f32 %v5208_v11 }
 0xf8c   : > { %5398 = vperm.xlu1 %9237, %v9351_v28   ;;  %v9377_v61 = vpop.eup %9376  ;;  %9396 = vrcp.f32 %v5207_v46 }
 0xf8d   : > { %5393 = vperm.xlu0 %9236, %v9353_v54   ;;  %v9379_v31 = vpop.eup %9378  ;;  %9398 = vrcp.f32 %v5526_v6  ;;  %v5369_v54 = vld [vmem:[#allocation5 + $0x150] sm:$0xff]  ;;  %v5019_v6 = vld [vmem:[#allocation6] sm:$0xff] }
 0xf8e   : > { %v9381_v43 = vpop.eup %9380  ;;  %8604 = vmatpush3.bf16.msra.mxu0 %v9245_v48  ;;  %9400 = vrcp.f32 %v5525_v52 }
 0xf8f   : > { %v9383_v25 = vpop.eup %9382  ;;  %9402 = vrcp.f32 %v5528_v41 }
 0xf90   : > { %5408 = vperm.xlu1 %9237, %v9355_v7   ;;  %v9385_v20 = vpop.eup %9384  ;;  %9404 = vrcp.f32 %v5527_v18  ;;  %v5209_v7 = vld [vmem:[#allocation5 + $0xe0] sm:$0xff]  ;;  %v5020_v18 = vld [vmem:[#allocation6 + $0x8] sm:$0xff] }
 0xf91   : > { %5403 = vperm.xlu0 %9236, %v9357_v12   ;;  %v9387_v30 = vpop.eup %9386  ;;  %9406 = vrcp.f32 %v5048_v49 }
 0xf92   : > { %v9389_v39 = vpop.eup %9388  ;;  %9408 = vrcp.f32 %v5047_v63 }
 0xf93   : > { %v9391_v58 = vpop.eup %9390  ;;  %9410 = vrcp.f32 %v5050_v1 }
 0xf94   : > { %5256 = vperm.xlu1 %9237, %v9359_v5   ;;  %v9393_v27 = vpop.eup %9392  ;;  %9412 = vrcp.f32 %v5049_v42 }
 0xf95   : > { %5251 = vperm.xlu0 %9236, %v9361_v53   ;;  %v9395_v36 = vpop.eup %9394  ;;  %9414 = vrcp.f32 %v5368_v35  ;;  %v5530_v53 = vld [vmem:[#allocation5 + $0x1c8] sm:$0xff] }
 0xf96   : > { %v9397_v0 = vpop.eup %9396  ;;  %9416 = vrcp.f32 %v5367_v62 }
 0xf97   : > { %v9399_v3 = vpop.eup %9398  ;;  %9418 = vrcp.f32 %v5370_v47  ;;  %v5024_v47 = vld [vmem:[#allocation6 + $0x28] sm:$0xff] }
 0xf98   : > { %5266 = vperm.xlu1 %9237, %v9363_v32   ;;  %v9401_v59 = vpop.eup %9400  ;;  %9420 = vrcp.f32 %v5369_v54  ;;  %v5532_v32 = vld [vmem:[#allocation5 + $0x1d8] sm:$0xff] }
 0xf99   : > { %5261 = vperm.xlu0 %9236, %v9365_v55   ;;  %v9403_v44 = vpop.eup %9402  ;;  %9422 = vrcp.f32 %v5210_v9 }
 0xf9a   : > { %v9405_v21 = vpop.eup %9404  ;;  %9424 = vrcp.f32 %v5209_v7 }
 0xf9b   : > { %v9407_v28 = vpop.eup %9406  ;;  %9426 = vrcp.f32 %v5212_v8 }
 0xf9c   : > { %5560 = vperm.xlu1 %9237, %v9367_v2   ;;  %v9409_v45 = vpop.eup %9408  ;;  %9428 = vrcp.f32 %v5211_v60  ;;  %v5025_v60 = vld [vmem:[#allocation6 + $0x30] sm:$0xff] }
 0xf9d   : > { %5555 = vperm.xlu0 %9236, %v9369_v33   ;;  %v9411_v56 = vpop.eup %9410  ;;  %9430 = vrcp.f32 %v5530_v53  ;;  %v5371_v33 = vld [vmem:[#allocation5 + $0x160] sm:$0xff] }
 0xf9e   : > { %v9413_v12 = vpop.eup %9412  ;;  %9432 = vrcp.f32 %v5529_v10 }
 0xf9f   : > { %v9415_v19 = vpop.eup %9414  ;;  %9434 = vrcp.f32 %v5532_v32 }
 0xfa0   : > { %5570 = vperm.xlu1 %9237, %v9371_v26   ;;  %v9417_v5 = vpop.eup %9416  ;;  %9436 = vrcp.f32 %v5531_v24  ;;  %v5373_v26 = vld [vmem:[#allocation5 + $0x170] sm:$0xff] }
 0xfa1   : > { %5565 = vperm.xlu0 %9236, %v9373_v16   ;;  %v9419_v34 = vpop.eup %9418  ;;  %9438 = vrcp.f32 %v5372_v14 }
 0xfa2   : > { %v9421_v22 = vpop.eup %9420  ;;  %9440 = vrcp.f32 %v5371_v33 }
 0xfa3   : > { %v9423_v55 = vpop.eup %9422  ;;  %9442 = vrcp.f32 %v5374_v38 }
 0xfa4   : > { %5114 = vperm.xlu1 %9237, %v9375_v57   ;;  %v9425_v37 = vpop.eup %9424  ;;  %9444 = vrcp.f32 %v5373_v26 }
 0xfa5   : > { %5109 = vperm.xlu0 %9236, %v9377_v61   ;;  %v9427_v2 = vpop.eup %9426  ;;  %9446 = vrcp.f32 %v5534_v23  ;;  %v5536_v61 = vld [vmem:[#allocation5 + $0x1f8] sm:$0xff] }
 0xfa6   : > { %v9429_v17 = vpop.eup %9428  ;;  %9448 = vrcp.f32 %v5533_v40 }
 0xfa7   : > { %v9431_v15 = vpop.eup %9430  ;;  %9450 = vrcp.f32 %v5536_v61 }
 0xfa8   : > { %5124 = vperm.xlu1 %9237, %v9379_v31   ;;  %v9433_v16 = vpop.eup %9432  ;;  %9452 = vrcp.f32 %v5535_v13 }
 0xfa9   : > { %5119 = vperm.xlu0 %9236, %v9381_v43   ;;  %v9435_v50 = vpop.eup %9434 }
 0xfaa   : > { %v9437_v57 = vpop.eup %9436 }
 0xfab   : > { %v9439_v29 = vpop.eup %9438 }
 0xfac   : > { %5418 = vperm.xlu1 %9237, %v9383_v25   ;;  %v9441_v4 = vpop.eup %9440 }
 0xfad   : > { %5413 = vperm.xlu0 %9236, %v9385_v20   ;;  %v9443_v31 = vpop.eup %9442  ;;  %v5021_v20 = vld [vmem:[#allocation6 + $0x10] sm:$0xff] }
 0xfae   : > { %v9445_v43 = vpop.eup %9444 }
 0xfaf   : > { %v9447_v48 = vpop.eup %9446 }
 0xfb0   : > { %5428 = vperm.xlu1 %9237, %v9387_v30   ;;  %v9449_v11 = vpop.eup %9448 }
 0xfb1   : > { %5423 = vperm.xlu0 %9236, %v9389_v39   ;;  %v9451_v25 = vpop.eup %9450 }
 0xfb2   : > { %v9453_v46 = vpop.eup %9452 }
 0xfb4   : > { %5276 = vperm.xlu1 %9237, %v9391_v58   ;;  %v5022_v58 = vld [vmem:[#allocation6 + $0x18] sm:$0xff] }
 0xfb5   : > { %5271 = vperm.xlu0 %9236, %v9393_v27  }
 0xfb8   : > { %5286 = vperm.xlu1 %9237, %v9395_v36  }
 0xfb9   : > { %5281 = vperm.xlu0 %9236, %v9397_v0  }
 0xfbc   : > { %5580 = vperm.xlu1 %9237, %v9399_v3  }
 0xfbd   : > { %5575 = vperm.xlu0 %9236, %v9401_v59  }
 0xfc0   : > { %5590 = vperm.xlu1 %9237, %v9403_v44  }
 0xfc1   : > { %5585 = vperm.xlu0 %9236, %v9405_v21  }
 0xfc4   : > { %5134 = vperm.xlu1 %9237, %v9407_v28  }
 0xfc5   : > { %5129 = vperm.xlu0 %9236, %v9409_v45   ;;  %v5023_v45 = vld [vmem:[#allocation6 + $0x20] sm:$0xff] }
 0xfc8   : > { %5144 = vperm.xlu1 %9237, %v9411_v56  }
 0xfc9   : > { %5139 = vperm.xlu0 %9236, %v9413_v12  }
 0xfcc   : > { %5438 = vperm.xlu1 %9237, %v9415_v19   ;;  %v5026_v19 = vld [vmem:[#allocation6 + $0x38] sm:$0xff] }
 0xfcd   : > { %5433 = vperm.xlu0 %9236, %v9417_v5  }
 0xfd0   : > { %5448 = vperm.xlu1 %9237, %v9419_v34  }
 0xfd1   : > { %5443 = vperm.xlu0 %9236, %v9421_v22  }
 0xfd4   : > { %5296 = vperm.xlu1 %9237, %v9423_v55  }
 0xfd5   : > { %5291 = vperm.xlu0 %9236, %v9425_v37  }
 0xfd8   : > { %5306 = vperm.xlu1 %9237, %v9427_v2  }
 0xfd9   : > { %5301 = vperm.xlu0 %9236, %v9429_v17  }
 0xfdc   : > { %5600 = vperm.xlu1 %9237, %v9431_v15  }
 0xfdd   : > { %5595 = vperm.xlu0 %9236, %v9433_v16  }
 0xfe0   : > { %5610 = vperm.xlu1 %9237, %v9435_v50  }
 0xfe1   : > { %5605 = vperm.xlu0 %9236, %v9437_v57  }
 0xfe4   : > { %5458 = vperm.xlu1 %9237, %v9439_v29  }
 0xfe5   : > { %5453 = vperm.xlu0 %9236, %v9441_v4  }
 0xfe8   : > { %5468 = vperm.xlu1 %9237, %v9443_v31  }
 0xfe9   : > { %5463 = vperm.xlu0 %9236, %v9445_v43  }
 0xfec   : > { %5620 = vperm.xlu1 %9237, %v9447_v48  }
 0xfed   : > { %5615 = vperm.xlu0 %9236, %v9449_v11  }
 0xff0   : > { %5630 = vperm.xlu1 %9237, %v9451_v25  }
 0xff1   : > { %5625 = vperm.xlu0 %9236, %v9453_v46  }
 0xff3   : > { %v5080_v30 = vpop.permute.xlu1 %5079 }
 0xff4   : > { %v5149_v52 = vmul.f32 %v5080_v30, %v5021_v20  ;;  %v5070_v39 = vpop.permute.xlu0 %5069 }
 0xff5   : > { %v5147_v41 = vmul.f32 %v5070_v39, %v5019_v6 }
 0xff6   : > { %5166 = vst.msk [vmem:[#allocation6 + $0x10] sm:$0xff] %vm5163_vm7, %v5149_v52 }
 0xff7   : > { %5164 = vst.msk [vmem:[#allocation6] sm:$0xff] %vm5163_vm7, %v5147_v41  ;;  %v5085_v27 = vpop.permute.xlu1 %5084 }
 0xff8   : > { %v5150_v49 = vmul.f32 %v5085_v27, %v5022_v58  ;;  %v5075_v36 = vpop.permute.xlu0 %5074 }
 0xff9   : > { %v5148_v63 = vmul.f32 %v5075_v36, %v5020_v18  ;;  %v5027_v36 = vld [vmem:[#allocation6 + $0x40] sm:$0xff] }
 0xffa   : > { %5167 = vst.msk [vmem:[#allocation6 + $0x18] sm:$0xff] %vm5163_vm7, %v5150_v49  ;;  %v5028_v49 = vld [vmem:[#allocation6 + $0x48] sm:$0xff] }
 0xffb   : > { %5165 = vst.msk [vmem:[#allocation6 + $0x8] sm:$0xff] %vm5163_vm7, %v5148_v63  ;;  %v5237_v0 = vpop.permute.xlu1 %5236 }
 0xffc   : > { %v5232_v1 = vpop.permute.xlu0 %5231 }
 0xffd   : > { %v5182_v44 = vld [vmem:[#allocation6 + $0x10] sm:$0xff] }
 0xffe   : > { %v5180_v3 = vld [vmem:[#allocation6] sm:$0xff] }
 0xfff   : > { %v5309_v42 = vmul.f32 %v5232_v1, %v5180_v3  ;;  %v5247_v59 = vpop.permute.xlu1 %5246 }
0x1000   : > { %v5242_v35 = vpop.permute.xlu0 %5241 }
0x1001   : > { %5326 = vst.msk [vmem:[#allocation6] sm:$0xff] %vm5325_vm5, %v5309_v42  ;;  %v5183_v62 = vld [vmem:[#allocation6 + $0x18] sm:$0xff]  ;;  %v5311_v21 = vmul.f32 %v5242_v35, %v5182_v44  ;;  %v5029_v35 = vld [vmem:[#allocation6 + $0x50] sm:$0xff] }
0x1002   : > { %v5181_v28 = vld [vmem:[#allocation6 + $0x8] sm:$0xff]  ;;  %v5312_v54 = vmul.f32 %v5247_v59, %v5183_v62  ;;  %v5030_v42 = vld [vmem:[#allocation6 + $0x58] sm:$0xff] }
0x1003   : > { %v5310_v9 = vmul.f32 %v5237_v0, %v5181_v28  ;;  %5328 = vst.msk [vmem:[#allocation6 + $0x10] sm:$0xff] %vm5325_vm5, %v5311_v21  ;;  %v5095_v56 = vpop.permute.xlu1 %5094 }
0x1004   : > { %5329 = vst.msk [vmem:[#allocation6 + $0x18] sm:$0xff] %vm5325_vm5, %v5312_v54  ;;  %v5152_v7 = vmul.f32 %v5095_v56, %v5024_v47  ;;  %v5090_v12 = vpop.permute.xlu0 %5089 }
0x1005   : > { %5327 = vst.msk [vmem:[#allocation6 + $0x8] sm:$0xff] %vm5325_vm5, %v5310_v9  ;;  %v5151_v8 = vmul.f32 %v5090_v12, %v5023_v45 }
0x1006   : > { %5169 = vst.msk [vmem:[#allocation6 + $0x28] sm:$0xff] %vm5163_vm7, %v5152_v7 }
0x1007   : > { %5168 = vst.msk [vmem:[#allocation6 + $0x20] sm:$0xff] %vm5163_vm7, %v5151_v8  ;;  %v5105_v5 = vpop.permute.xlu1 %5104 }
0x1008   : > { %v5154_v53 = vmul.f32 %v5105_v5, %v5026_v19  ;;  %v5100_v34 = vpop.permute.xlu0 %5099  ;;  %v5342_v24 = vld [vmem:[#allocation6] sm:$0xff] }
0x1009   : > { %v5153_v10 = vmul.f32 %v5100_v34, %v5025_v60 }
0x100a   : > { %5171 = vst.msk [vmem:[#allocation6 + $0x38] sm:$0xff] %vm5163_vm7, %v5154_v53  ;;  %v5344_v15 = vld [vmem:[#allocation6 + $0x10] sm:$0xff] }
0x100b   : > { %5170 = vst.msk [vmem:[#allocation6 + $0x30] sm:$0xff] %vm5163_vm7, %v5153_v10  ;;  %v5399_v22 = vpop.permute.xlu1 %5398  ;;  %v5345_v33 = vld [vmem:[#allocation6 + $0x18] sm:$0xff] }
0x100c   : > { %v5343_v32 = vld [vmem:[#allocation6 + $0x8] sm:$0xff]  ;;  %v5394_v55 = vpop.permute.xlu0 %5393 }
0x100d   : > { %v5472_v37 = vmul.f32 %v5399_v22, %v5343_v32  ;;  %v5471_v14 = vmul.f32 %v5394_v55, %v5342_v24  ;;  %v5185_v23 = vld [vmem:[#allocation6 + $0x28] sm:$0xff] }
0x100e   : > { %v5184_v57 = vld [vmem:[#allocation6 + $0x20] sm:$0xff] }
0x100f   : > { %5489 = vst.msk [vmem:[#allocation6 + $0x8] sm:$0xff] %vm5487_vm9, %v5472_v37  ;;  %5488 = vst.msk [vmem:[#allocation6] sm:$0xff] %vm5487_vm9, %v5471_v14  ;;  %v5409_v2 = vpop.permute.xlu1 %5408 }
0x1010   : > { %v5474_v17 = vmul.f32 %v5409_v2, %v5345_v33  ;;  %v5404_v38 = vpop.permute.xlu0 %5403 }
0x1011   : > { %v5473_v26 = vmul.f32 %v5404_v38, %v5344_v15  ;;  %v5187_v13 = vld [vmem:[#allocation6 + $0x38] sm:$0xff] }
0x1012   : > { %5491 = vst.msk [vmem:[#allocation6 + $0x18] sm:$0xff] %vm5487_vm9, %v5474_v17  ;;  %v5186_v43 = vld [vmem:[#allocation6 + $0x30] sm:$0xff] }
0x1013   : > { %5490 = vst.msk [vmem:[#allocation6 + $0x10] sm:$0xff] %vm5487_vm9, %v5473_v26  ;;  %v5257_v16 = vpop.permute.xlu1 %5256 }
0x1014   : > { %v5314_v50 = vmul.f32 %v5257_v16, %v5185_v23  ;;  %v5252_v40 = vpop.permute.xlu0 %5251 }
0x1015   : > { %v5313_v61 = vmul.f32 %v5252_v40, %v5184_v57 }
0x1016   : > { %5331 = vst.msk [vmem:[#allocation6 + $0x28] sm:$0xff] %vm5325_vm5, %v5314_v50  ;;  %v5505_v25 = vld [vmem:[#allocation6 + $0x8] sm:$0xff]  ;;  %v5504_v6 = vld [vmem:[#allocation6] sm:$0xff] }
0x1017   : > { %5330 = vst.msk [vmem:[#allocation6 + $0x20] sm:$0xff] %vm5325_vm5, %v5313_v61  ;;  %v5267_v29 = vpop.permute.xlu1 %5266 }
0x1018   : > { %v5316_v4 = vmul.f32 %v5267_v29, %v5187_v13  ;;  %v5262_v31 = vpop.permute.xlu0 %5261 }
0x1019   : > { %v5315_v48 = vmul.f32 %v5262_v31, %v5186_v43  ;;  %v5507_v39 = vld [vmem:[#allocation6 + $0x18] sm:$0xff] }
0x101a   : > { %5333 = vst.msk [vmem:[#allocation6 + $0x38] sm:$0xff] %vm5325_vm5, %v5316_v4  ;;  %v5506_v18 = vld [vmem:[#allocation6 + $0x10] sm:$0xff] }
0x101b   : > { %5332 = vst.msk [vmem:[#allocation6 + $0x30] sm:$0xff] %vm5325_vm5, %v5315_v48  ;;  %v5561_v11 = vpop.permute.xlu1 %5560 }
0x101c   : > { %v5634_v46 = vmul.f32 %v5561_v11, %v5505_v25  ;;  %v5556_v20 = vpop.permute.xlu0 %5555 }
0x101d   : > { %v5633_v30 = vmul.f32 %v5556_v20, %v5504_v6  ;;  %v5347_v7 = vld [vmem:[#allocation6 + $0x28] sm:$0xff]  ;;  %v5031_v6 = vld [vmem:[#allocation6 + $0x60] sm:$0xff] }
0x101e   : > { %5651 = vst.msk [vmem:[#allocation6 + $0x8] sm:$0xff] %vm5649_vm3, %v5634_v46  ;;  %v5346_v60 = vld [vmem:[#allocation6 + $0x20] sm:$0xff]  ;;  %v5032_v20 = vld [vmem:[#allocation6 + $0x68] sm:$0xff] }
0x101f   : > { %5650 = vst.msk [vmem:[#allocation6] sm:$0xff] %vm5649_vm3, %v5633_v30  ;;  %v5571_v52 = vpop.permute.xlu1 %5570 }
0x1020   : > { %v5636_v41 = vmul.f32 %v5571_v52, %v5507_v39  ;;  %v5566_v58 = vpop.permute.xlu0 %5565 }
0x1021   : > { %v5635_v27 = vmul.f32 %v5566_v58, %v5506_v18  ;;  %v5349_v34 = vld [vmem:[#allocation6 + $0x38] sm:$0xff] }
0x1022   : > { %5653 = vst.msk [vmem:[#allocation6 + $0x18] sm:$0xff] %vm5649_vm3, %v5636_v41  ;;  %v5348_v32 = vld [vmem:[#allocation6 + $0x30] sm:$0xff]  ;;  %v5034_v58 = vld [vmem:[#allocation6 + $0x78] sm:$0xff] }
0x1023   : > { %5652 = vst.msk [vmem:[#allocation6 + $0x10] sm:$0xff] %vm5649_vm3, %v5635_v27  ;;  %v5115_v63 = vpop.permute.xlu1 %5114  ;;  %v5033_v27 = vld [vmem:[#allocation6 + $0x70] sm:$0xff] }
0x1024   : > { %v5156_v0 = vmul.f32 %v5115_v63, %v5028_v49  ;;  %v5110_v1 = vpop.permute.xlu0 %5109 }
0x1025   : > { %v5155_v3 = vmul.f32 %v5110_v1, %v5027_v36  ;;  %v5667_v59 = vld [vmem:[#allocation6 + $0x8] sm:$0xff] }
0x1026   : > { %5173 = vst.msk [vmem:[#allocation6 + $0x48] sm:$0xff] %vm5163_vm7, %v5156_v0  ;;  %v5666_v44 = vld [vmem:[#allocation6] sm:$0xff] }
0x1027   : > { %5172 = vst.msk [vmem:[#allocation6 + $0x40] sm:$0xff] %vm5163_vm7, %v5155_v3  ;;  %v5125_v62 = vpop.permute.xlu1 %5124  ;;  %v5682_v21 = vpack.c.bf16 %v5667_v59, %v5666_v44 }
0x1028   : > { %v5158_v47 = vmul.f32 %v5125_v62, %v5030_v42  ;;  %v5120_v28 = vpop.permute.xlu0 %5119 }
0x1029   : > { %v5157_v54 = vmul.f32 %v5120_v28, %v5029_v35  ;;  %8605 = vmatprep.mubr.bf16.mxu0 %v5682_v21  ;;  %v5669_v45 = vld [vmem:[#allocation6 + $0x18] sm:$0xff] }
0x102a   : > { %5175 = vst.msk [vmem:[#allocation6 + $0x58] sm:$0xff] %vm5163_vm7, %v5158_v47  ;;  %v5668_v9 = vld [vmem:[#allocation6 + $0x10] sm:$0xff] }
0x102b   : > { %5174 = vst.msk [vmem:[#allocation6 + $0x50] sm:$0xff] %vm5163_vm7, %v5157_v54  ;;  %v5419_v56 = vpop.permute.xlu1 %5418  ;;  %v5683_v12 = vpack.c.bf16 %v5669_v45, %v5668_v9 }
0x102c   : > { %v5476_v8 = vmul.f32 %v5419_v56, %v5347_v7  ;;  %v5414_v19 = vpop.permute.xlu0 %5413 }
0x102d   : > { %v5475_v5 = vmul.f32 %v5414_v19, %v5346_v60  ;;  %8606 = vmatmul.mubr.bf16.vlgmr.msra.gmra.mrb[0].mxu0 %v5683_v12  ;;  %v5189_v37 = vld [vmem:[#allocation6 + $0x48] sm:$0xff] }
0x102e   : > { %5493 = vst.msk [vmem:[#allocation6 + $0x28] sm:$0xff] %vm5487_vm9, %v5476_v8  ;;  %v5188_v33 = vld [vmem:[#allocation6 + $0x40] sm:$0xff] }
0x102f   : > { %5492 = vst.msk [vmem:[#allocation6 + $0x20] sm:$0xff] %vm5487_vm9, %v5475_v5  ;;  %v5429_v53 = vpop.permute.xlu1 %5428 }
0x1030   : > { %v5478_v10 = vmul.f32 %v5429_v53, %v5349_v34  ;;  %v5424_v22 = vpop.permute.xlu0 %5423 }
0x1031   : > { %v5477_v55 = vmul.f32 %v5424_v22, %v5348_v32  ;;  %v5191_v15 = vld [vmem:[#allocation6 + $0x58] sm:$0xff] }
0x1032   : > { %5495 = vst.msk [vmem:[#allocation6 + $0x38] sm:$0xff] %vm5487_vm9, %v5478_v10  ;;  %v5190_v23 = vld [vmem:[#allocation6 + $0x50] sm:$0xff] }
0x1033   : > { %5494 = vst.msk [vmem:[#allocation6 + $0x30] sm:$0xff] %vm5487_vm9, %v5477_v55  ;;  %v5277_v24 = vpop.permute.xlu1 %5276 }
0x1034   : > { %v5318_v14 = vmul.f32 %v5277_v24, %v5189_v37  ;;  %v5272_v2 = vpop.permute.xlu0 %5271 }
0x1035   : > { %v5317_v17 = vmul.f32 %v5272_v2, %v5188_v33  ;;  %v5509_v57 = vld [vmem:[#allocation6 + $0x28] sm:$0xff] }
0x1036   : > { %5335 = vst.msk [vmem:[#allocation6 + $0x48] sm:$0xff] %vm5325_vm5, %v5318_v14  ;;  %v5508_v13 = vld [vmem:[#allocation6 + $0x20] sm:$0xff] }
0x1037   : > { %5334 = vst.msk [vmem:[#allocation6 + $0x40] sm:$0xff] %vm5325_vm5, %v5317_v17  ;;  %v5287_v38 = vpop.permute.xlu1 %5286 }
0x1038   : > { %v5320_v26 = vmul.f32 %v5287_v38, %v5191_v15  ;;  %v5282_v16 = vpop.permute.xlu0 %5281 }
0x1039   : > { %v5319_v50 = vmul.f32 %v5282_v16, %v5190_v23  ;;  %v5511_v43 = vld [vmem:[#allocation6 + $0x38] sm:$0xff] }
0x103a   : > { %5337 = vst.msk [vmem:[#allocation6 + $0x58] sm:$0xff] %vm5325_vm5, %v5320_v26  ;;  %v5510_v25 = vld [vmem:[#allocation6 + $0x30] sm:$0xff] }
0x103b   : > { %5336 = vst.msk [vmem:[#allocation6 + $0x50] sm:$0xff] %vm5325_vm5, %v5319_v50  ;;  %v5581_v40 = vpop.permute.xlu1 %5580 }
0x103c   : > { %v5638_v61 = vmul.f32 %v5581_v40, %v5509_v57  ;;  %v5576_v29 = vpop.permute.xlu0 %5575 }
0x103d   : > { %v5637_v4 = vmul.f32 %v5576_v29, %v5508_v13  ;;  %v5351_v44 = vld [vmem:[#allocation6 + $0x48] sm:$0xff] }
0x103e   : > { %5655 = vst.msk [vmem:[#allocation6 + $0x28] sm:$0xff] %vm5649_vm3, %v5638_v61  ;;  %v5350_v28 = vld [vmem:[#allocation6 + $0x40] sm:$0xff] }
0x103f   : > { %5654 = vst.msk [vmem:[#allocation6 + $0x20] sm:$0xff] %vm5649_vm3, %v5637_v4  ;;  %v5591_v31 = vpop.permute.xlu1 %5590 }
0x1040   : > { %v5640_v48 = vmul.f32 %v5591_v31, %v5511_v43  ;;  %v5586_v11 = vpop.permute.xlu0 %5585 }
0x1041   : > { %v5639_v46 = vmul.f32 %v5586_v11, %v5510_v25  ;;  %v5353_v9 = vld [vmem:[#allocation6 + $0x58] sm:$0xff] }
0x1042   : > { %5657 = vst.msk [vmem:[#allocation6 + $0x38] sm:$0xff] %vm5649_vm3, %v5640_v48  ;;  %v5352_v12 = vld [vmem:[#allocation6 + $0x50] sm:$0xff] }
0x1043   : > { %5656 = vst.msk [vmem:[#allocation6 + $0x30] sm:$0xff] %vm5649_vm3, %v5639_v46  ;;  %v5135_v30 = vpop.permute.xlu1 %5134 }
0x1044   : > { %v5160_v52 = vmul.f32 %v5135_v30, %v5032_v20  ;;  %v5130_v39 = vpop.permute.xlu0 %5129 }
0x1045   : > { %v5159_v41 = vmul.f32 %v5130_v39, %v5031_v6  ;;  %v5671_v18 = vld [vmem:[#allocation6 + $0x28] sm:$0xff] }
0x1046   : > { %5177 = vst.msk [vmem:[#allocation6 + $0x68] sm:$0xff] %vm5163_vm7, %v5160_v52  ;;  %v5670_v49 = vld [vmem:[#allocation6 + $0x20] sm:$0xff] }
0x1047   : > { %5176 = vst.msk [vmem:[#allocation6 + $0x60] sm:$0xff] %vm5163_vm7, %v5159_v41  ;;  %v5145_v36 = vpop.permute.xlu1 %5144  ;;  %v5684_v63 = vpack.c.bf16 %v5671_v18, %v5670_v49 }
0x1048   : > { %v5162_v0 = vmul.f32 %v5145_v36, %v5034_v58  ;;  %v5140_v1 = vpop.permute.xlu0 %5139 }
0x1049   : > { %v5161_v3 = vmul.f32 %v5140_v1, %v5033_v27  ;;  %8609 = vmatprep.mubr.bf16.mxu0 %v5684_v63  ;;  %v5673_v42 = vld [vmem:[#allocation6 + $0x38] sm:$0xff] }
0x104a   : > { %5179 = vst.msk [vmem:[#allocation6 + $0x78] sm:$0xff] %vm5163_vm7, %v5162_v0  ;;  %v5672_v59 = vld [vmem:[#allocation6 + $0x30] sm:$0xff] }
0x104b   : > { %5178 = vst.msk [vmem:[#allocation6 + $0x70] sm:$0xff] %vm5163_vm7, %v5161_v3  ;;  %v5439_v35 = vpop.permute.xlu1 %5438  ;;  %v5685_v62 = vpack.c.bf16 %v5673_v42, %v5672_v59 }
0x104c   : > { %v5480_v21 = vmul.f32 %v5439_v35, %v5351_v44  ;;  %v5434_v47 = vpop.permute.xlu0 %5433 }
0x104d   : > { %v5479_v54 = vmul.f32 %v5434_v47, %v5350_v28  ;;  %8610 = vmatmul.mubr.bf16.gmra.mrb[4].mxu0 %v5685_v62  ;;  %v5193_v60 = vld [vmem:[#allocation6 + $0x68] sm:$0xff] }
0x104e   : > { %5497 = vst.msk [vmem:[#allocation6 + $0x48] sm:$0xff] %vm5487_vm9, %v5480_v21  ;;  %v5192_v34 = vld [vmem:[#allocation6 + $0x60] sm:$0xff] }
0x104f   : > { %5496 = vst.msk [vmem:[#allocation6 + $0x40] sm:$0xff] %vm5487_vm9, %v5479_v54  ;;  %v5449_v45 = vpop.permute.xlu1 %5448 }
0x1050   : > { %v5482_v56 = vmul.f32 %v5449_v45, %v5353_v9  ;;  %v5444_v7 = vpop.permute.xlu0 %5443 }
0x1051   : > { %v5481_v8 = vmul.f32 %v5444_v7, %v5352_v12  ;;  %v5195_v32 = vld [vmem:[#allocation6 + $0x78] sm:$0xff]  ;;  %v13460_v7 = vld [vmem:[%s15438_s9] ss:$0 sm:$0xff] }
0x1052   : > { %5499 = vst.msk [vmem:[#allocation6 + $0x58] sm:$0xff] %vm5487_vm9, %v5482_v56  ;;  %v5194_v37 = vld [vmem:[#allocation6 + $0x70] sm:$0xff] }
0x1053   : > { %5498 = vst.msk [vmem:[#allocation6 + $0x50] sm:$0xff] %vm5487_vm9, %v5481_v8  ;;  %v5297_v19 = vpop.permute.xlu1 %5296 }
0x1054   : > { %v5322_v5 = vmul.f32 %v5297_v19, %v5193_v60  ;;  %v5292_v53 = vpop.permute.xlu0 %5291  ;;  %v5858_v19 = vld [vmem:[%s10330_s6] sm:$0xff] }
0x1055   : > { %v5321_v10 = vmul.f32 %v5292_v53, %v5192_v34  ;;  %v5513_v33 = vld [vmem:[#allocation6 + $0x48] sm:$0xff] }
0x1056   : > { %5339 = vst.msk [vmem:[#allocation6 + $0x68] sm:$0xff] %vm5325_vm5, %v5322_v5  ;;  %v5512_v15 = vld [vmem:[#allocation6 + $0x40] sm:$0xff]  ;;  %v5859_v34 = vld [vmem:[%s10330_s6 + $0x8] sm:$0xff] }
0x1057   : > { %5338 = vst.msk [vmem:[#allocation6 + $0x60] sm:$0xff] %vm5325_vm5, %v5321_v10  ;;  %v5307_v22 = vpop.permute.xlu1 %5306 }
0x1058   : > { %v5324_v55 = vmul.f32 %v5307_v22, %v5195_v32  ;;  %v5302_v24 = vpop.permute.xlu0 %5301 }
0x1059   : > { %v5323_v14 = vmul.f32 %v5302_v24, %v5194_v37  ;;  %v5515_v23 = vld [vmem:[#allocation6 + $0x58] sm:$0xff] }
0x105a   : > { %5341 = vst.msk [vmem:[#allocation6 + $0x78] sm:$0xff] %vm5325_vm5, %v5324_v55  ;;  %v5514_v57 = vld [vmem:[#allocation6 + $0x50] sm:$0xff] }
0x105b   : > { %5340 = vst.msk [vmem:[#allocation6 + $0x70] sm:$0xff] %vm5325_vm5, %v5323_v14  ;;  %v5601_v2 = vpop.permute.xlu1 %5600  ;;  %v5860_v55 = vld [vmem:[%s10330_s6 + $0x10] sm:$0xff] }
0x105c   : > { %v5642_v17 = vmul.f32 %v5601_v2, %v5513_v33  ;;  %v5596_v38 = vpop.permute.xlu0 %5595  ;;  %v5861_v2 = vld [vmem:[%s10330_s6 + $0x18] sm:$0xff] }
0x105d   : > { %v5641_v26 = vmul.f32 %v5596_v38, %v5512_v15  ;;  %v5355_v13 = vld [vmem:[#allocation6 + $0x68] sm:$0xff]  ;;  %v5862_v15 = vld [vmem:[%s10330_s6 + $0x20] sm:$0xff] }
0x105e   : > { %5659 = vst.msk [vmem:[#allocation6 + $0x48] sm:$0xff] %vm5649_vm3, %v5642_v17  ;;  %v5354_v43 = vld [vmem:[#allocation6 + $0x60] sm:$0xff] }
0x105f   : > { %5658 = vst.msk [vmem:[#allocation6 + $0x40] sm:$0xff] %vm5649_vm3, %v5641_v26  ;;  %v5611_v16 = vpop.permute.xlu1 %5610 }
0x1060   : > { %v5644_v50 = vmul.f32 %v5611_v16, %v5515_v23  ;;  %v5606_v40 = vpop.permute.xlu0 %5605 }
0x1061   : > { %v5643_v61 = vmul.f32 %v5606_v40, %v5514_v57  ;;  %v5357_v20 = vld [vmem:[#allocation6 + $0x78] sm:$0xff] }
0x1062   : > { %5661 = vst.msk [vmem:[#allocation6 + $0x58] sm:$0xff] %vm5649_vm3, %v5644_v50  ;;  %v5356_v39 = vld [vmem:[#allocation6 + $0x70] sm:$0xff]  ;;  %v5863_v50 = vld [vmem:[%s10330_s6 + $0x28] sm:$0xff] }
0x1063   : > { %5660 = vst.msk [vmem:[#allocation6 + $0x50] sm:$0xff] %vm5649_vm3, %v5643_v61  ;;  %v5459_v29 = vpop.permute.xlu1 %5458 }
0x1064   : > { %v5484_v4 = vmul.f32 %v5459_v29, %v5355_v13  ;;  %v5454_v31 = vpop.permute.xlu0 %5453  ;;  %v5864_v29 = vld [vmem:[%s10330_s6 + $0x30] sm:$0xff] }
0x1065   : > { %v5483_v48 = vmul.f32 %v5454_v31, %v5354_v43  ;;  %v5675_v11 = vld [vmem:[#allocation6 + $0x48] sm:$0xff]  ;;  %v5865_v31 = vld [vmem:[%s10330_s6 + $0x38] sm:$0xff] }
0x1066   : > { %5501 = vst.msk [vmem:[#allocation6 + $0x68] sm:$0xff] %vm5487_vm9, %v5484_v4  ;;  %v5674_v25 = vld [vmem:[#allocation6 + $0x40] sm:$0xff] }
0x1067   : > { %5500 = vst.msk [vmem:[#allocation6 + $0x60] sm:$0xff] %vm5487_vm9, %v5483_v48  ;;  %v5469_v46 = vpop.permute.xlu1 %5468  ;;  %v5686_v6 = vpack.c.bf16 %v5675_v11, %v5674_v25 }
0x1068   : > { %v5486_v30 = vmul.f32 %v5469_v46, %v5357_v20  ;;  %v5464_v52 = vpop.permute.xlu0 %5463  ;;  %v5866_v46 = vld [vmem:[%s10330_s6 + $0x40] sm:$0xff] }
0x1069   : > { %v5485_v41 = vmul.f32 %v5464_v52, %v5356_v39  ;;  %8613 = vmatprep.mubr.bf16.mxu0 %v5686_v6  ;;  %v5677_v58 = vld [vmem:[#allocation6 + $0x58] sm:$0xff]  ;;  %v5867_v52 = vld [vmem:[%s10330_s6 + $0x48] sm:$0xff] }
0x106a   : > { %5503 = vst.msk [vmem:[#allocation6 + $0x78] sm:$0xff] %vm5487_vm9, %v5486_v30  ;;  %v5676_v18 = vld [vmem:[#allocation6 + $0x50] sm:$0xff] }
0x106b   : > { %5502 = vst.msk [vmem:[#allocation6 + $0x70] sm:$0xff] %vm5487_vm9, %v5485_v41  ;;  %v5621_v27 = vpop.permute.xlu1 %5620  ;;  %v5687_v49 = vpack.c.bf16 %v5677_v58, %v5676_v18  ;;  %v5868_v18 = vld [vmem:[%s10330_s6 + $0x50] sm:$0xff] }
0x106c   : > { %v5616_v36 = vpop.permute.xlu0 %5615 }
0x106d   : > { %v5517_v63 = vld [vmem:[#allocation6 + $0x68] sm:$0xff]  ;;  %8614 = vmatmul.mubr.bf16.gmra.mrb[8].mxu0 %v5687_v49 }
0x106e   : > { %v5646_v0 = vmul.f32 %v5621_v27, %v5517_v63  ;;  %v5516_v1 = vld [vmem:[#allocation6 + $0x60] sm:$0xff] }
0x106f   : > { %v5645_v3 = vmul.f32 %v5616_v36, %v5516_v1  ;;  %v5631_v42 = vpop.permute.xlu1 %5630  ;;  %v5869_v36 = vld [vmem:[%s10330_s6 + $0x58] sm:$0xff] }
0x1070   : > { %5663 = vst.msk [vmem:[#allocation6 + $0x68] sm:$0xff] %vm5649_vm3, %v5646_v0  ;;  %v5626_v44 = vpop.permute.xlu0 %5625 }
0x1071   : > { %5662 = vst.msk [vmem:[#allocation6 + $0x60] sm:$0xff] %vm5649_vm3, %v5645_v3  ;;  %v5519_v59 = vld [vmem:[#allocation6 + $0x78] sm:$0xff] }
0x1072   : > { %v5648_v35 = vmul.f32 %v5631_v42, %v5519_v59  ;;  %v5518_v62 = vld [vmem:[#allocation6 + $0x70] sm:$0xff]  ;;  %v5870_v42 = vld [vmem:[%s10330_s6 + $0x60] sm:$0xff] }
0x1073   : > { %v5647_v21 = vmul.f32 %v5626_v44, %v5518_v62  ;;  %v5871_v62 = vld [vmem:[%s10330_s6 + $0x68] sm:$0xff] }
0x1074   : > { %5665 = vst.msk [vmem:[#allocation6 + $0x78] sm:$0xff] %vm5649_vm3, %v5648_v35 }
0x1075   : > { %5664 = vst.msk [vmem:[#allocation6 + $0x70] sm:$0xff] %vm5649_vm3, %v5647_v21 }
0x1077   : > { %v5679_v47 = vld [vmem:[#allocation6 + $0x68] sm:$0xff] }
0x1078   : > { %v5678_v28 = vld [vmem:[#allocation6 + $0x60] sm:$0xff] }
0x1079   : > { %v5688_v54 = vpack.c.bf16 %v5679_v47, %v5678_v28 }
0x107b   : > { %8617 = vmatprep.mubr.bf16.mxu0 %v5688_v54  ;;  %v5681_v45 = vld [vmem:[#allocation6 + $0x78] sm:$0xff]  ;;  %v5872_v54 = vld [vmem:[%s10330_s6 + $0x70] sm:$0xff] }
0x107c   : > { %v5680_v9 = vld [vmem:[#allocation6 + $0x70] sm:$0xff] }
0x107d   : > { %v5689_v56 = vpack.c.bf16 %v5681_v45, %v5680_v9 }
0x107f   : > { %8618 = vmatmul.mubr.bf16.gmra.mrb[12].mxu0 %v5689_v56  ;;  %v5873_v56 = vld [vmem:[%s10330_s6 + $0x78] sm:$0xff] }
0x1080   : > { %6480 = vmatprep.mubr.bf16.mxu0 %v9962_v51 }
0x1100   : > { %v8607_v12 = vpop.f32.mrb[0].mxu0 }
0x1101   : > { %v5795_v8 = vpop.f32.mrb[1].mxu0  ;;  %v5804_v10 = vadd.f32 %v8607_v12, %v13460_v7 }
0x1102   : > { %v5796_v60 = vadd.f32 %v13460_v7, %v5795_v8  ;;  %v8608_v5 = vpop.f32.mrb[2].mxu0 }
0x1103   : > { %v5798_v53 = vpop.f32.mrb[3].mxu0  ;;  %v13473_v37 = vadd.f32 %v5860_v55, %v5804_v10  ;;  %v5807_v14 = vadd.f32 %v8608_v5, %v13460_v7  ;;  %v9250_v5 = vld [vmem:[#allocation18 + $0xc] ss:$16 sps:$4 sm:$0xff]   ;;  %v9254_v10 = vld [vmem:[#allocation18 + $0x28] ss:$16 sps:$4 sm:$0xff]  }
0x1104   : > { %v13466_v22 = vadd.f32 %v5858_v19, %v5796_v60  ;;  %v5799_v32 = vadd.f32 %v13460_v7, %v5798_v53  ;;  %v9246_v19 = vld [vmem:[#allocation18 + $0x4] ss:$16 sps:$4 sm:$0xff]   ;;  %v9248_v60 = vld [vmem:[#allocation18 + $0x8] ss:$16 sps:$4 sm:$0xff]   ;;  %v9251_v53 = vld [vmem:[#allocation18] ss:$16 sps:$4 sm:$0xff]   ;;  %6448 = vmatprep.subr.bf16.mxu0 %v9250_v5 }
0x1105   : > { %15441 = vst [vmem:[#allocation137_spill] sm:$0xff] %v13473_v37  ;;  %v13479_v33 = vadd.f32 %v5861_v2, %v5807_v14  ;;  %6335 = vmatprep.subr.bf16.mxu1 %v9246_v19  ;;  %6449 = vmatpush1.bf16.msra.mxu0 %v9248_v60  ;;  %v9287_v19 = vld [vmem:[#allocation18 + $0xc0] ss:$16 sps:$4 sm:$0xff]   ;;  %v9284_v5 = vld [vmem:[#allocation18 + $0xc8] ss:$16 sps:$4 sm:$0xff]  }
0x1106   : > { %15439 = vst [vmem:[#allocation135_spill] sm:$0xff] %v13466_v22  ;;  %v13470_v24 = vadd.f32 %v5859_v34, %v5799_v32  ;;  %5892 = vadd.xlane.f32.xlu0 %v13466_v22  ;;  %v9256_v34 = vld [vmem:[#allocation18 + $0x2c] ss:$16 sps:$4 sm:$0xff]   ;;  %6336 = vmatpush1.bf16.msra.mxu1 %v9251_v53  ;;  %v9257_v32 = vld [vmem:[#allocation18 + $0x20] ss:$16 sps:$4 sm:$0xff]  }
0x1107   : > { %15442 = vst [vmem:[#allocation138_spill] sm:$0xff] %v13479_v33  ;;  %6450 = vmatprep.subr.bf16.mxu0 %v9256_v34  ;;  %v9288_v53 = vld [vmem:[#allocation18 + $0xe4] ss:$16 sps:$4 sm:$0xff]  }
0x1108   : > { %15440 = vst [vmem:[#allocation136_spill] sm:$0xff] %v13470_v24  ;;  %5894 = vadd.xlane.f32.xlu1 %v13470_v24 }
0x1109   : > { %6451 = vmatpush1.bf16.msra.mxu0 %v9254_v10 }
0x110a   : > { %5896 = vadd.xlane.f32.xlu0 %v13473_v37 }
0x110e   : > { %5898 = vadd.xlane.f32.xlu0 %v13479_v33 }
0x1120   : > { %v8611_v17 = vpop.f32.mrb[4].mxu0 }
0x1121   : > { %v5811_v38 = vpop.f32.mrb[5].mxu0  ;;  %v5820_v40 = vadd.f32 %v8611_v17, %v13460_v7 }
0x1122   : > { %v5812_v26 = vadd.f32 %v13460_v7, %v5811_v38  ;;  %v8612_v16 = vpop.f32.mrb[6].mxu0 }
0x1123   : > { %v5814_v23 = vpop.f32.mrb[7].mxu0  ;;  %v5823_v13 = vadd.f32 %v8612_v16, %v13460_v7  ;;  %v13495_v43 = vadd.f32 %v5864_v29, %v5820_v40 }
0x1124   : > { %v13486_v57 = vadd.f32 %v5862_v15, %v5812_v26  ;;  %v5815_v61 = vadd.f32 %v13460_v7, %v5814_v23 }
0x1125   : > { %15445 = vst [vmem:[#allocation141_spill] sm:$0xff] %v13495_v43  ;;  %v13498_v48 = vadd.f32 %v5865_v31, %v5823_v13 }
0x1126   : > { %15443 = vst [vmem:[#allocation139_spill] sm:$0xff] %v13486_v57  ;;  %v13491_v4 = vadd.f32 %v5863_v50, %v5815_v61  ;;  %5900 = vadd.xlane.f32.xlu1 %v13486_v57 }
0x1127   : > { %15446 = vst [vmem:[#allocation142_spill] sm:$0xff] %v13498_v48 }
0x1128   : > { %15444 = vst [vmem:[#allocation140_spill] sm:$0xff] %v13491_v4  ;;  %5902 = vadd.xlane.f32.xlu0 %v13491_v4 }
0x112a   : > { %5904 = vadd.xlane.f32.xlu1 %v13495_v43 }
0x112c   : > { %5906 = vadd.xlane.f32.xlu0 %v13498_v48 }
0x1140   : > { %v8615_v11 = vpop.f32.mrb[8].mxu0 }
0x1141   : > { %v5827_v25 = vpop.f32.mrb[9].mxu0  ;;  %v5836_v39 = vadd.f32 %v8615_v11, %v13460_v7 }
0x1142   : > { %v5828_v20 = vadd.f32 %v13460_v7, %v5827_v25  ;;  %v8616_v6 = vpop.f32.mrb[10].mxu0  ;;  %v9258_v25 = vld [vmem:[#allocation18 + $0x44] ss:$16 sps:$4 sm:$0xff]  }
0x1143   : > { %v5830_v30 = vpop.f32.mrb[11].mxu0  ;;  %v5839_v27 = vadd.f32 %v8616_v6, %v13460_v7  ;;  %v13515_v63 = vadd.f32 %v5868_v18, %v5836_v39  ;;  %v9263_v6 = vld [vmem:[#allocation18 + $0x40] ss:$16 sps:$4 sm:$0xff]   ;;  %v9266_v39 = vld [vmem:[#allocation18 + $0x68] ss:$16 sps:$4 sm:$0xff]  }
0x1144   : > { %v13506_v41 = vadd.f32 %v5866_v46, %v5828_v20  ;;  %v5831_v58 = vadd.f32 %v13460_v7, %v5830_v30  ;;  %v9262_v46 = vld [vmem:[#allocation18 + $0x4c] ss:$16 sps:$4 sm:$0xff]   ;;  %v9260_v20 = vld [vmem:[#allocation18 + $0x48] ss:$16 sps:$4 sm:$0xff]   ;;  %v9264_v30 = vld [vmem:[#allocation18 + $0x64] ss:$16 sps:$4 sm:$0xff]  }
0x1145   : > { %15449 = vst [vmem:[#allocation145_spill] sm:$0xff] %v13515_v63  ;;  %v13518_v0 = vadd.f32 %v5869_v36, %v5839_v27  ;;  %6452 = vmatprep.subr.bf16.mxu0 %v9262_v46  ;;  %v9270_v18 = vld [vmem:[#allocation18 + $0x84] ss:$16 sps:$4 sm:$0xff]   ;;  %v9274_v27 = vld [vmem:[#allocation18 + $0x8c] ss:$16 sps:$4 sm:$0xff]  }
0x1146   : > { %15447 = vst [vmem:[#allocation143_spill] sm:$0xff] %v13506_v41  ;;  %v13511_v49 = vadd.f32 %v5867_v52, %v5831_v58  ;;  %5908 = vadd.xlane.f32.xlu1 %v13506_v41  ;;  %6453 = vmatpush1.bf16.msra.mxu0 %v9260_v20  ;;  %v9268_v52 = vld [vmem:[#allocation18 + $0x6c] ss:$16 sps:$4 sm:$0xff]   ;;  %v9269_v58 = vld [vmem:[#allocation18 + $0x60] ss:$16 sps:$4 sm:$0xff]  }
0x1147   : > { %15450 = vst [vmem:[#allocation146_spill] sm:$0xff] %v13518_v0  ;;  %6454 = vmatprep.subr.bf16.mxu0 %v9268_v52  ;;  %v9272_v36 = vld [vmem:[#allocation18 + $0x88] ss:$16 sps:$4 sm:$0xff]  }
0x1148   : > { %15448 = vst [vmem:[#allocation144_spill] sm:$0xff] %v13511_v49  ;;  %5910 = vadd.xlane.f32.xlu0 %v13511_v49 }
0x114a   : > { %5912 = vadd.xlane.f32.xlu1 %v13515_v63  ;;  %6455 = vmatpush1.bf16.msra.mxu0 %v9266_v39 }
0x114b   : > { %6456 = vmatprep.subr.bf16.mxu0 %v9274_v27 }
0x114c   : > { %5914 = vadd.xlane.f32.xlu0 %v13518_v0 }
0x114e   : > { %6457 = vmatpush1.bf16.msra.mxu0 %v9272_v36 }
0x1152   : > { %v8619_v1 = vpop.f32.mrb[12].mxu0 }
0x1153   : > { %v5843_v3 = vpop.f32.mrb[13].mxu0  ;;  %v5852_v21 = vadd.f32 %v8619_v1, %v13460_v7  ;;  %v9275_v1 = vld [vmem:[#allocation18 + $0x80] ss:$16 sps:$4 sm:$0xff]  }
0x1154   : > { %v5844_v59 = vadd.f32 %v13460_v7, %v5843_v3  ;;  %v8620_v35 = vpop.f32.mrb[14].mxu0 }
0x1155   : > { %v5846_v44 = vpop.f32.mrb[15].mxu0  ;;  %v5855_v45 = vadd.f32 %v8620_v35, %v13460_v7  ;;  %v13535_v12 = vadd.f32 %v5872_v54, %v5852_v21  ;;  %v9286_v54 = vld [vmem:[#allocation18 + $0xcc] ss:$16 sps:$4 sm:$0xff]  }
0x1156   : > { %v13526_v47 = vadd.f32 %v5870_v42, %v5844_v59  ;;  %v5847_v28 = vadd.f32 %v13460_v7, %v5846_v44  ;;  %v9252_v7 = vld [vmem:[#allocation18 + $0x24] ss:$16 sps:$4 sm:$0xff]   ;;  %v9280_v59 = vld [vmem:[#allocation18 + $0xac] ss:$16 sps:$4 sm:$0xff]   ;;  %v9278_v44 = vld [vmem:[#allocation18 + $0xa8] ss:$16 sps:$4 sm:$0xff]  }
0x1157   : > { %15453 = vst [vmem:[#allocation149_spill] sm:$0xff] %v13535_v12  ;;  %v13538_v8 = vadd.f32 %v5873_v56, %v5855_v45  ;;  %6337 = vmatprep.subr.bf16.mxu1 %v9252_v7  ;;  %v9276_v42 = vld [vmem:[#allocation18 + $0xa4] ss:$16 sps:$4 sm:$0xff]   ;;  %6458 = vmatprep.subr.bf16.mxu0 %v9280_v59 }
0x1158   : > { %15451 = vst [vmem:[#allocation147_spill] sm:$0xff] %v13526_v47  ;;  %v13531_v9 = vadd.f32 %v5871_v62, %v5847_v28  ;;  %5916 = vadd.xlane.f32.xlu1 %v13526_v47  ;;  %6338 = vmatpush1.bf16.msra.mxu1 %v9257_v32  ;;  %v9281_v62 = vld [vmem:[#allocation18 + $0xa0] ss:$16 sps:$4 sm:$0xff]   ;;  %v9282_v28 = vld [vmem:[#allocation18 + $0xc4] ss:$16 sps:$4 sm:$0xff]  }
0x1159   : > { %15454 = vst [vmem:[#allocation150_spill] sm:$0xff] %v13538_v8  ;;  %6339 = vmatprep.subr.bf16.mxu1 %v9258_v25  ;;  %6459 = vmatpush1.bf16.msra.mxu0 %v9278_v44  ;;  %v9292_v32 = vld [vmem:[#allocation18 + $0xec] ss:$16 sps:$4 sm:$0xff]  }
0x115a   : > { %15452 = vst [vmem:[#allocation148_spill] sm:$0xff] %v13531_v9  ;;  %5918 = vadd.xlane.f32.xlu0 %v13531_v9  ;;  %6460 = vmatprep.subr.bf16.mxu0 %v9286_v54 }
0x115c   : > { %5920 = vadd.xlane.f32.xlu1 %v13535_v12  ;;  %6340 = vmatpush1.bf16.msra.mxu1 %v9263_v6 }
0x115d   : > { %6341 = vmatprep.subr.bf16.mxu1 %v9264_v30  ;;  %6461 = vmatpush1.bf16.msra.mxu0 %v9284_v5 }
0x115e   : > { %5922 = vadd.xlane.f32.xlu0 %v13538_v8  ;;  %6462 = vmatprep.subr.bf16.mxu0 %v9292_v32 }
0x1160   : > { %6342 = vmatpush1.bf16.msra.mxu1 %v9269_v58 }
0x1161   : > { %6343 = vmatprep.subr.bf16.mxu1 %v9270_v18 }
0x1164   : > { %6344 = vmatpush1.bf16.msra.mxu1 %v9275_v1 }
0x1165   : > { %6345 = vmatprep.subr.bf16.mxu1 %v9276_v42 }
0x1168   : > { %6346 = vmatpush1.bf16.msra.mxu1 %v9281_v62 }
0x1169   : > { %6347 = vmatprep.subr.bf16.mxu1 %v9282_v28 }
0x116c   : > { %6348 = vmatpush1.bf16.msra.mxu1 %v9287_v19 }
0x116d   : > { %6349 = vmatprep.subr.bf16.mxu1 %v9288_v53 }
0x1193   : > { %v5893_v55 = vpop.xlane.xlu0 %5892 }
0x1194   : > { %v5925_v14 = vmul.f32 0.0078125, %v5893_v55 }
0x1195   : > { %v5895_v2 = vpop.xlane.xlu1 %5894 }
0x1196   : > { %v13543_v17 = vsub.f32 %v13466_v22, %v5925_v14  ;;  %v5926_v38 = vmul.f32 0.0078125, %v5895_v2 }
0x1197   : > { %v5897_v15 = vpop.xlane.xlu0 %5896 }
0x1198   : > { %v13546_v26 = vsub.f32 %v13470_v24, %v5926_v38  ;;  %v5927_v16 = vmul.f32 0.0078125, %v5897_v15  ;;  %v5957_v23 = vmul.f32 %v13543_v17, %v13543_v17  ;;  %v9293_v15 = vld [vmem:[#allocation18 + $0xe0] ss:$16 sps:$4 sm:$0xff]  }
0x1199   : > { %6350 = vmatpush1.bf16.msra.mxu1 %v9293_v15 }
0x119a   : > { %v13551_v50 = vsub.f32 %v13473_v37, %v5927_v16  ;;  %5973 = vadd.xlane.f32.xlu1 %v5957_v23  ;;  %v5958_v40 = vmul.f32 %v13546_v26, %v13546_v26  ;;  %v9290_v16 = vld [vmem:[#allocation18 + $0xe8] ss:$16 sps:$4 sm:$0xff]  }
0x119b   : > { %v5899_v61 = vpop.xlane.xlu0 %5898  ;;  %6463 = vmatpush1.bf16.msra.mxu0 %v9290_v16 }
0x119c   : > { %v5928_v29 = vmul.f32 0.0078125, %v5899_v61  ;;  %5975 = vadd.xlane.f32.xlu0 %v5958_v40  ;;  %v5959_v13 = vmul.f32 %v13551_v50, %v13551_v50 }
0x119e   : > { %v13558_v31 = vsub.f32 %v13479_v33, %v5928_v29  ;;  %5977 = vadd.xlane.f32.xlu1 %v5959_v13 }
0x11a0   : > { %v5960_v11 = vmul.f32 %v13558_v31, %v13558_v31 }
0x11a2   : > { %5979 = vadd.xlane.f32.xlu0 %v5960_v11 }
0x11b3   : > { %v5901_v3 = vpop.xlane.xlu1 %5900 }
0x11b4   : > { %v5929_v35 = vmul.f32 0.0078125, %v5901_v3 }
0x11b5   : > { %v5903_v21 = vpop.xlane.xlu0 %5902 }
0x11b6   : > { %v13563_v45 = vsub.f32 %v13486_v57, %v5929_v35  ;;  %v5930_v56 = vmul.f32 0.0078125, %v5903_v21 }
0x11b7   : > { %v5905_v60 = vpop.xlane.xlu1 %5904 }
0x11b8   : > { %v13566_v7 = vsub.f32 %v13491_v4, %v5930_v56  ;;  %v5931_v34 = vmul.f32 0.0078125, %v5905_v60  ;;  %v5961_v10 = vmul.f32 %v13563_v45, %v13563_v45 }
0x11b9   : > { %v5907_v55 = vpop.xlane.xlu0 %5906 }
0x11ba   : > { %v13571_v14 = vsub.f32 %v13495_v43, %v5931_v34  ;;  %v5932_v2 = vmul.f32 0.0078125, %v5907_v55  ;;  %5981 = vadd.xlane.f32.xlu1 %v5961_v10  ;;  %v5962_v38 = vmul.f32 %v13566_v7, %v13566_v7 }
0x11bc   : > { %v13576_v23 = vsub.f32 %v13498_v48, %v5932_v2  ;;  %5983 = vadd.xlane.f32.xlu0 %v5962_v38  ;;  %v5963_v40 = vmul.f32 %v13571_v14, %v13571_v14 }
0x11be   : > { %5985 = vadd.xlane.f32.xlu1 %v5963_v40  ;;  %v5964_v61 = vmul.f32 %v13576_v23, %v13576_v23 }
0x11c0   : > { %5987 = vadd.xlane.f32.xlu0 %v5964_v61 }
0x11d3   : > { %v5909_v29 = vpop.xlane.xlu1 %5908 }
0x11d4   : > { %v5933_v13 = vmul.f32 0.0078125, %v5909_v29 }
0x11d5   : > { %v5911_v11 = vpop.xlane.xlu0 %5910 }
0x11d6   : > { %v13583_v25 = vsub.f32 %v13506_v41, %v5933_v13  ;;  %v5934_v46 = vmul.f32 0.0078125, %v5911_v11 }
0x11d7   : > { %v5913_v20 = vpop.xlane.xlu1 %5912 }
0x11d8   : > { %v13586_v6 = vsub.f32 %v13511_v49, %v5934_v46  ;;  %v5935_v30 = vmul.f32 0.0078125, %v5913_v20  ;;  %v5965_v52 = vmul.f32 %v13583_v25, %v13583_v25 }
0x11d9   : > { %v5915_v39 = vpop.xlane.xlu0 %5914 }
0x11da   : > { %v13591_v58 = vsub.f32 %v13515_v63, %v5935_v30  ;;  %v5936_v18 = vmul.f32 0.0078125, %v5915_v39  ;;  %5989 = vadd.xlane.f32.xlu1 %v5965_v52  ;;  %v5966_v27 = vmul.f32 %v13586_v6, %v13586_v6  ;;  %v13625_v52 = vld [vmem:[%s15455_s8] ss:$0 sm:$0xff] }
0x11dc   : > { %v13596_v36 = vsub.f32 %v13518_v0, %v5936_v18  ;;  %5991 = vadd.xlane.f32.xlu0 %v5966_v27  ;;  %v5967_v1 = vmul.f32 %v13591_v58, %v13591_v58 }
0x11de   : > { %5993 = vadd.xlane.f32.xlu1 %v5967_v1  ;;  %v5968_v3 = vmul.f32 %v13596_v36, %v13596_v36 }
0x11e0   : > { %5995 = vadd.xlane.f32.xlu0 %v5968_v3 }
0x11e5   : > { %v5917_v42 = vpop.xlane.xlu1 %5916 }
0x11e6   : > { %v5937_v59 = vmul.f32 0.0078125, %v5917_v42  ;;  %v13633_v42 = vld [vmem:[%s15456_s24] ss:$0 sm:$0xff] }
0x11e7   : > { %v5919_v35 = vpop.xlane.xlu0 %5918 }
0x11e8   : > { %v13603_v44 = vsub.f32 %v13526_v47, %v5937_v59  ;;  %v5938_v62 = vmul.f32 0.0078125, %v5919_v35 }
0x11e9   : > { %v5921_v21 = vpop.xlane.xlu1 %5920 }
0x11ea   : > { %v13606_v28 = vsub.f32 %v13531_v9, %v5938_v62  ;;  %v5939_v54 = vmul.f32 0.0078125, %v5921_v21  ;;  %v5969_v56 = vmul.f32 %v13603_v44, %v13603_v44 }
0x11eb   : > { %v5923_v19 = vpop.xlane.xlu0 %5922 }
0x11ec   : > { %v13611_v60 = vsub.f32 %v13535_v12, %v5939_v54  ;;  %v5940_v5 = vmul.f32 0.0078125, %v5923_v19  ;;  %5997 = vadd.xlane.f32.xlu1 %v5969_v56  ;;  %v5970_v53 = vmul.f32 %v13606_v28, %v13606_v28 }
0x11ee   : > { %v13616_v34 = vsub.f32 %v13538_v8, %v5940_v5  ;;  %5999 = vadd.xlane.f32.xlu0 %v5970_v53  ;;  %v5971_v10 = vmul.f32 %v13611_v60, %v13611_v60 }
0x11f0   : > { %6001 = vadd.xlane.f32.xlu1 %v5971_v10  ;;  %v5972_v32 = vmul.f32 %v13616_v34, %v13616_v34 }
0x11f2   : > { %6003 = vadd.xlane.f32.xlu0 %v5972_v32 }
0x1227   : > { %v5974_v55 = vpop.xlane.xlu1 %5973 }
0x1228   : > { %v6005_v2 = vmul.f32 0.0078125, %v5974_v55 }
0x1229   : > { %v5976_v38 = vpop.xlane.xlu0 %5975 }
0x122a   : > { %v6021_v15 = vadd.f32 1e-05, %v6005_v2  ;;  %v6006_v16 = vmul.f32 0.0078125, %v5976_v38 }
0x122b   : > { %v5978_v40 = vpop.xlane.xlu1 %5977 }
0x122c   : > { %9454 = vrsqrt.f32 %v6021_v15  ;;  %v6022_v61 = vadd.f32 1e-05, %v6006_v16  ;;  %v6007_v29 = vmul.f32 0.0078125, %v5978_v40 }
0x122e   : > { %9456 = vrsqrt.f32 %v6022_v61  ;;  %v6023_v13 = vadd.f32 1e-05, %v6007_v29 }
0x122f   : > { %v5980_v11 = vpop.xlane.xlu0 %5979 }
0x1230   : > { %9458 = vrsqrt.f32 %v6023_v13  ;;  %v6008_v46 = vmul.f32 0.0078125, %v5980_v11 }
0x1232   : > { %v6024_v20 = vadd.f32 1e-05, %v6008_v46 }
0x1234   : > { %9460 = vrsqrt.f32 %v6024_v20 }
0x1236   : > { %v9455_v30 = vpop.eup %9454 }
0x1237   : > { %v6053_v39 = vmul.f32 %v9455_v30, %v13543_v17 }
0x1238   : > { %v9457_v18 = vpop.eup %9456 }
0x1239   : > { %v6054_v27 = vmul.f32 %v9457_v18, %v13546_v26  ;;  %v6075_v1 = vmul.f32 %v13625_v52, %v6053_v39 }
0x123a   : > { %v9459_v3 = vpop.eup %9458 }
0x123b   : > { %v6076_v59 = vmul.f32 %v13625_v52, %v6054_v27  ;;  %v6097_v35 = vadd.f32 %v13633_v42, %v6075_v1  ;;  %v6055_v21 = vmul.f32 %v9459_v3, %v13551_v50 }
0x123d   : > { %v6098_v62 = vadd.f32 %v13633_v42, %v6076_v59  ;;  %v6077_v56 = vmul.f32 %v13625_v52, %v6055_v21 }
0x123e   : > { %v9461_v17 = vpop.eup %9460 }
0x123f   : > { %v6113_v54 = vpack.c.bf16 %v6098_v62, %v6097_v35  ;;  %v6056_v26 = vmul.f32 %v9461_v17, %v13558_v31  ;;  %v6099_v53 = vadd.f32 %v13633_v42, %v6077_v56 }
0x1241   : > { %6368 = vmatmul.mubr.bf16.vlgmr.msra.gmra.mrb[0].mxu1 %v6113_v54  ;;  %6481 = vmatmul.mubr.bf16.vlgmr.msra.gmra.mrb[16].mxu0 %v6113_v54  ;;  %v6078_v19 = vmul.f32 %v13625_v52, %v6056_v26 }
0x1242   : > { %6377 = vmatprep.mubr.bf16.mxu1 %v9962_v51  ;;  %6490 = vmatprep.mubr.bf16.mxu0 %v9962_v51 }
0x1243   : > { %v6100_v5 = vadd.f32 %v13633_v42, %v6078_v19 }
0x1245   : > { %v6114_v50 = vpack.c.bf16 %v6100_v5, %v6099_v53 }
0x1247   : > { %v5982_v10 = vpop.xlane.xlu1 %5981 }
0x1248   : > { %v6009_v32 = vmul.f32 0.0078125, %v5982_v10 }
0x1249   : > { %6378 = vmatmul.mubr.bf16.gmra.mrb[4].mxu1 %v6114_v50  ;;  %6491 = vmatmul.mubr.bf16.gmra.mrb[20].mxu0 %v6114_v50  ;;  %v5984_v31 = vpop.xlane.xlu0 %5983 }
0x124a   : > { %v6025_v55 = vadd.f32 1e-05, %v6009_v32  ;;  %v6010_v2 = vmul.f32 0.0078125, %v5984_v31  ;;  %6387 = vmatprep.mubr.bf16.mxu1 %v9962_v51  ;;  %6500 = vmatprep.mubr.bf16.mxu0 %v9962_v51 }
0x124b   : > { %v5986_v38 = vpop.xlane.xlu1 %5985 }
0x124c   : > { %9462 = vrsqrt.f32 %v6025_v55  ;;  %v6026_v15 = vadd.f32 1e-05, %v6010_v2  ;;  %v6011_v16 = vmul.f32 0.0078125, %v5986_v38 }
0x124d   : > { %v5988_v40 = vpop.xlane.xlu0 %5987 }
0x124e   : > { %9464 = vrsqrt.f32 %v6026_v15  ;;  %v6027_v61 = vadd.f32 1e-05, %v6011_v16  ;;  %v6012_v29 = vmul.f32 0.0078125, %v5988_v40 }
0x1250   : > { %9466 = vrsqrt.f32 %v6027_v61  ;;  %v6028_v13 = vadd.f32 1e-05, %v6012_v29 }
0x1252   : > { %9468 = vrsqrt.f32 %v6028_v13 }
0x1256   : > { %v9463_v11 = vpop.eup %9462 }
0x1257   : > { %v6057_v46 = vmul.f32 %v9463_v11, %v13563_v45 }
0x1258   : > { %v9465_v20 = vpop.eup %9464 }
0x1259   : > { %v6058_v30 = vmul.f32 %v9465_v20, %v13566_v7  ;;  %v6079_v39 = vmul.f32 %v13625_v52, %v6057_v46 }
0x125a   : > { %v9467_v18 = vpop.eup %9466 }
0x125b   : > { %v6080_v27 = vmul.f32 %v13625_v52, %v6058_v30  ;;  %v6101_v3 = vadd.f32 %v13633_v42, %v6079_v39  ;;  %v6059_v35 = vmul.f32 %v9467_v18, %v13571_v14 }
0x125c   : > { %v9469_v1 = vpop.eup %9468 }
0x125d   : > { %v6102_v59 = vadd.f32 %v13633_v42, %v6080_v27  ;;  %v6060_v62 = vmul.f32 %v9469_v1, %v13576_v23  ;;  %v6081_v7 = vmul.f32 %v13625_v52, %v6059_v35 }
0x125f   : > { %v6115_v21 = vpack.c.bf16 %v6102_v59, %v6101_v3  ;;  %v6082_v45 = vmul.f32 %v13625_v52, %v6060_v62  ;;  %v6103_v54 = vadd.f32 %v13633_v42, %v6081_v7 }
0x1261   : > { %6388 = vmatmul.mubr.bf16.gmra.mrb[8].mxu1 %v6115_v21  ;;  %6501 = vmatmul.mubr.bf16.gmra.mrb[24].mxu0 %v6115_v21  ;;  %v6104_v17 = vadd.f32 %v13633_v42, %v6082_v45 }
0x1262   : > { %6397 = vmatprep.mubr.bf16.mxu1 %v9962_v51  ;;  %6510 = vmatprep.mubr.bf16.mxu0 %v9962_v51 }
0x1263   : > { %v6116_v56 = vpack.c.bf16 %v6104_v17, %v6103_v54 }
0x1267   : > { %v5990_v26 = vpop.xlane.xlu1 %5989 }
0x1268   : > { %v6013_v14 = vmul.f32 0.0078125, %v5990_v26 }
0x1269   : > { %6398 = vmatmul.mubr.bf16.gmra.mrb[12].mxu1 %v6116_v56  ;;  %6511 = vmatmul.mubr.bf16.gmra.mrb[28].mxu0 %v6116_v56  ;;  %v5992_v23 = vpop.xlane.xlu0 %5991 }
0x126a   : > { %v6029_v19 = vadd.f32 1e-05, %v6013_v14  ;;  %v6014_v5 = vmul.f32 0.0078125, %v5992_v23  ;;  %6407 = vmatprep.mubr.bf16.mxu1 %v9962_v51  ;;  %6520 = vmatprep.mubr.bf16.mxu0 %v9962_v51 }
0x126b   : > { %v5994_v53 = vpop.xlane.xlu1 %5993 }
0x126c   : > { %9470 = vrsqrt.f32 %v6029_v19  ;;  %v6030_v10 = vadd.f32 1e-05, %v6014_v5  ;;  %v6015_v50 = vmul.f32 0.0078125, %v5994_v53 }
0x126d   : > { %v5996_v32 = vpop.xlane.xlu0 %5995 }
0x126e   : > { %9472 = vrsqrt.f32 %v6030_v10  ;;  %v6031_v31 = vadd.f32 1e-05, %v6015_v50  ;;  %v6016_v55 = vmul.f32 0.0078125, %v5996_v32 }
0x1270   : > { %9474 = vrsqrt.f32 %v6031_v31  ;;  %v6032_v2 = vadd.f32 1e-05, %v6016_v55 }
0x1272   : > { %9476 = vrsqrt.f32 %v6032_v2 }
0x1276   : > { %v9471_v38 = vpop.eup %9470 }
0x1277   : > { %v6061_v15 = vmul.f32 %v9471_v38, %v13583_v25 }
0x1278   : > { %v9473_v16 = vpop.eup %9472 }
0x1279   : > { %v5998_v40 = vpop.xlane.xlu1 %5997  ;;  %v6062_v61 = vmul.f32 %v9473_v16, %v13586_v6  ;;  %v6083_v29 = vmul.f32 %v13625_v52, %v6061_v15  ;;  %v9294_v16 = vld [vmem:[#allocation20 + $0x40] sm:$0xff]  }
0x127a   : > { %v9475_v13 = vpop.eup %9474  ;;  %v6017_v11 = vmul.f32 0.0078125, %v5998_v40  ;;  %v13690_v40 = vld [vmem:[#allocation20 + $0xc0] sm:$0xff]   ;;  %8173 = vmatprep.subr.bf16.mxu1 %v9294_v16 }
0x127b   : > { %v6000_v46 = vpop.xlane.xlu0 %5999  ;;  %v6084_v20 = vmul.f32 %v13625_v52, %v6062_v61  ;;  %v6105_v1 = vadd.f32 %v13633_v42, %v6083_v29  ;;  %v6063_v25 = vmul.f32 %v9475_v13, %v13591_v58  ;;  %v9296_v61 = vld [vmem:[#allocation20] sm:$0xff]   ;;  %8237 = vmatprep.subr.bf16.mxu0 %v13690_v40  ;;  %v9298_v13 = vld [vmem:[#allocation20 + $0x48] sm:$0xff]  }
0x127c   : > { %v9477_v30 = vpop.eup %9476  ;;  %v6033_v39 = vadd.f32 1e-05, %v6017_v11  ;;  %v6018_v18 = vmul.f32 0.0078125, %v6000_v46  ;;  %v13694_v29 = vld [vmem:[#allocation20 + $0x80] sm:$0xff]   ;;  %8174 = vmatpush3.bf16.msra.mxu1 %v9296_v61  ;;  %v13700_v11 = vld [vmem:[#allocation20 + $0xc8] sm:$0xff]  }
0x127d   : > { %v6002_v27 = vpop.xlane.xlu1 %6001  ;;  %v6106_v3 = vadd.f32 %v13633_v42, %v6084_v20  ;;  %v6064_v59 = vmul.f32 %v9477_v30, %v13596_v36  ;;  %v6085_v54 = vmul.f32 %v13625_v52, %v6063_v25  ;;  %8238 = vmatpush3.bf16.msra.mxu0 %v13694_v29  ;;  %v13702_v46 = vld [vmem:[#allocation20 + $0x88] sm:$0xff]   ;;  %8175 = vmatprep.subr.bf16.mxu1 %v9298_v13  ;;  %v9302_v20 = vld [vmem:[#allocation20 + $0x50] sm:$0xff]   ;;  %v9310_v25 = vld [vmem:[#allocation20 + $0x60] sm:$0xff]  }
0x127e   : > { %9478 = vrsqrt.f32 %v6033_v39  ;;  %v6034_v6 = vadd.f32 1e-05, %v6018_v18  ;;  %v6019_v35 = vmul.f32 0.0078125, %v6002_v27  ;;  %8239 = vmatprep.subr.bf16.mxu0 %v13700_v11  ;;  %v13706_v30 = vld [vmem:[#allocation20 + $0xd0] sm:$0xff]   ;;  %v9306_v18 = vld [vmem:[#allocation20 + $0x58] sm:$0xff]  }
0x127f   : > { %v6004_v62 = vpop.xlane.xlu0 %6003  ;;  %v6117_v21 = vpack.c.bf16 %v6106_v3, %v6105_v1  ;;  %v6086_v45 = vmul.f32 %v13625_v52, %v6064_v59  ;;  %v6107_v36 = vadd.f32 %v13633_v42, %v6085_v54  ;;  %v13709_v39 = vld [vmem:[#allocation20 + $0x90] sm:$0xff]   ;;  %v13712_v27 = vld [vmem:[#allocation20 + $0xd8] sm:$0xff]   ;;  %v13718_v59 = vld [vmem:[#allocation20 + $0xe0] sm:$0xff]  }
0x1280   : > { %9480 = vrsqrt.f32 %v6034_v6  ;;  %v6035_v7 = vadd.f32 1e-05, %v6019_v35  ;;  %v6020_v17 = vmul.f32 0.0078125, %v6004_v62  ;;  %v9308_v1 = vld [vmem:[#allocation20 + $0x18] sm:$0xff]   ;;  %15458 = vst [vmem:[#allocation152_spill] sm:$0xff] %v13718_v59  ;;  %v9312_v6 = vld [vmem:[#allocation20 + $0x20] sm:$0xff]  }
0x1281   : > { %6408 = vmatmul.mubr.bf16.gmra.mrb[16].mxu1 %v6117_v21  ;;  %6521 = vmatmul.mubr.bf16.gmra.mrb[32].mxu0 %v6117_v21  ;;  %v6108_v58 = vadd.f32 %v13633_v42, %v6086_v45  ;;  %v13714_v3 = vld [vmem:[#allocation20 + $0x98] sm:$0xff]   ;;  %v13720_v35 = vld [vmem:[#allocation20 + $0xa0] sm:$0xff]   ;;  %v9314_v62 = vld [vmem:[#allocation20 + $0x68] sm:$0xff]  }
0x1282   : > { %9482 = vrsqrt.f32 %v6035_v7  ;;  %v6036_v26 = vadd.f32 1e-05, %v6020_v17  ;;  %6417 = vmatprep.mubr.bf16.mxu1 %v9962_v51  ;;  %6530 = vmatprep.mubr.bf16.mxu0 %v9962_v51  ;;  %15457 = vst [vmem:[#allocation151_spill] sm:$0xff] %v13714_v3  ;;  %15459 = vst [vmem:[#allocation153_spill] sm:$0xff] %v13720_v35  ;;  %v13724_v21 = vld [vmem:[#allocation20 + $0xe8] sm:$0xff]   ;;  %v9318_v17 = vld [vmem:[#allocation20 + $0x70] sm:$0xff]  }
0x1283   : > { %v6118_v56 = vpack.c.bf16 %v6108_v58, %v6107_v36  ;;  %8240 = vmatpush3.bf16.msra.mxu0 %v13702_v46  ;;  %15460 = vst [vmem:[#allocation154_spill] sm:$0xff] %v13724_v21  ;;  %v9316_v45 = vld [vmem:[#allocation20 + $0x28] sm:$0xff]   ;;  %v13729_v54 = vld [vmem:[#allocation20 + $0xf0] sm:$0xff]   ;;  %v9322_v36 = vld [vmem:[#allocation20 + $0x78] sm:$0xff]  }
0x1284   : > { %9484 = vrsqrt.f32 %v6036_v26  ;;  %8241 = vmatprep.subr.bf16.mxu0 %v13706_v30  ;;  %v13726_v7 = vld [vmem:[#allocation20 + $0xa8] sm:$0xff]   ;;  %15462 = vst [vmem:[#allocation156_spill] sm:$0xff] %v13729_v54  ;;  %v9320_v26 = vld [vmem:[#allocation20 + $0x30] sm:$0xff]  }
0x1285   : > { %15461 = vst [vmem:[#allocation155_spill] sm:$0xff] %v13726_v7  ;;  %v13732_v58 = vld [vmem:[#allocation20 + $0xb0] sm:$0xff]  }
0x1286   : > { %15463 = vst [vmem:[#allocation157_spill] sm:$0xff] %v13732_v58 }
0x1287   : > { %8242 = vmatpush3.bf16.msra.mxu0 %v13709_v39 }
0x1288   : > { %v9479_v14 = vpop.eup %9478  ;;  %8243 = vmatprep.subr.bf16.mxu0 %v13712_v27 }
0x1289   : > { %6418 = vmatmul.mubr.bf16.gmra.mrb[20].mxu1 %v6118_v56  ;;  %6531 = vmatmul.mubr.bf16.gmra.mrb[36].mxu0 %v6118_v56  ;;  %v6065_v23 = vmul.f32 %v9479_v14, %v13603_v44  ;;  %v13735_v56 = vld [vmem:[#allocation20 + $0xf8] sm:$0xff]  }
0x128a   : > { %v9481_v19 = vpop.eup %9480  ;;  %6427 = vmatprep.mubr.bf16.mxu1 %v9962_v51  ;;  %6540 = vmatprep.mubr.bf16.mxu0 %v9962_v51  ;;  %15464 = vst [vmem:[#allocation158_spill] sm:$0xff] %v13735_v56  ;;  %v9324_v14 = vld [vmem:[#allocation20 + $0x38] sm:$0xff]  }
0x128b   : > { %v6066_v5 = vmul.f32 %v9481_v19, %v13606_v28  ;;  %v6087_v53 = vmul.f32 %v13625_v52, %v6065_v23  ;;  %8244 = vmatpush3.bf16.msra.mxu0 %v13714_v3  ;;  %v13738_v23 = vld [vmem:[#allocation20 + $0xb8] sm:$0xff]   ;;  %v6155_v19 = vlaneseq }
0x128c   : > { %v9483_v10 = vpop.eup %9482  ;;  %8245 = vmatprep.subr.bf16.mxu0 %v13718_v59  ;;  %15465 = vst [vmem:[#allocation159_spill] sm:$0xff] %v13738_v23 }
0x128d   : > { %v6088_v50 = vmul.f32 %v13625_v52, %v6066_v5  ;;  %v6109_v31 = vadd.f32 %v13633_v42, %v6087_v53  ;;  %v6067_v2 = vmul.f32 %v9483_v10, %v13611_v60  ;;  %v6156_v5 = vshrl.u32 %v6155_v19, 7 }
0x128e   : > { %v9485_v32 = vpop.eup %9484 }
0x128f   : > { %v6110_v55 = vadd.f32 %v13633_v42, %v6088_v50  ;;  %v6068_v44 = vmul.f32 %v9485_v32, %v13616_v34  ;;  %v6089_v28 = vmul.f32 %v13625_v52, %v6067_v2  ;;  %8246 = vmatpush3.bf16.msra.mxu0 %v13720_v35  ;;  %v6157_v53 = vsub.s32 0, %v6156_v5  ;;  %v6153_v50 = vld [vmem:[%s15466_s1] sm:$0xf] }
0x1290   : > { %8247 = vmatprep.subr.bf16.mxu0 %v13724_v21  ;;  %v6165_v10 = vsub.s32 2, %v6156_v5  ;;  %v6169_v2 = vsub.s32 3, %v6156_v5 }
0x1291   : > { %v6119_v38 = vpack.c.bf16 %v6110_v55, %v6109_v31  ;;  %v6090_v15 = vmul.f32 %v13625_v52, %v6068_v44  ;;  %v6111_v34 = vadd.f32 %v13633_v42, %v6089_v28  ;;  %v13746_v32 = vrot.slane %v6153_v50, %v6157_v53 }
0x1292   : > { %v13748_v31 = vrot.slane %v6153_v50, %v6165_v10  ;;  %v6161_v55 = vsub.s32 1, %v6156_v5  ;;  %v13754_v13 = vrot.slane %v6153_v50, %v6169_v2 }
0x1293   : > { %6428 = vmatmul.mubr.bf16.gmra.mrb[24].mxu1 %v6119_v38  ;;  %6541 = vmatmul.mubr.bf16.gmra.mrb[40].mxu0 %v6119_v38  ;;  %v6112_v60 = vadd.f32 %v13633_v42, %v6090_v15  ;;  %v9304_v42 = vld [vmem:[#allocation20 + $0x10] sm:$0xff]  }
0x1294   : > { %6437 = vmatprep.mubr.bf16.mxu1 %v9962_v51  ;;  %6550 = vmatprep.mubr.bf16.mxu0 %v9962_v51  ;;  %v9300_v51 = vld [vmem:[#allocation20 + $0x8] sm:$0xff]   ;;  %v13752_v16 = vrot.slane %v6153_v50, %v6161_v55 }
0x1295   : > { %v6120_v52 = vpack.c.bf16 %v6112_v60, %v6111_v34  ;;  %8176 = vmatpush3.bf16.msra.mxu1 %v9300_v51  ;;  %8248 = vmatpush3.bf16.msra.mxu0 %v13726_v7 }
0x1296   : > { %8177 = vmatprep.subr.bf16.mxu1 %v9302_v20  ;;  %8249 = vmatprep.subr.bf16.mxu0 %v13729_v54 }
0x1299   : > { %8178 = vmatpush3.bf16.msra.mxu1 %v9304_v42  ;;  %8250 = vmatpush3.bf16.msra.mxu0 %v13732_v58 }
0x129a   : > { %8179 = vmatprep.subr.bf16.mxu1 %v9306_v18  ;;  %8251 = vmatprep.subr.bf16.mxu0 %v13735_v56 }
0x129b   : > { %6438 = vmatmul.mubr.bf16.gmra.mrb[28].mxu1 %v6120_v52  ;;  %6551 = vmatmul.mubr.bf16.gmra.mrb[44].mxu0 %v6120_v52 }
0x129d   : > { %8180 = vmatpush3.bf16.msra.mxu1 %v9308_v1  ;;  %8252 = vmatpush3.bf16.msra.mxu0 %v13738_v23 }
0x129e   : > { %8181 = vmatprep.subr.bf16.mxu1 %v9310_v25 }
0x12a1   : > { %8182 = vmatpush3.bf16.msra.mxu1 %v9312_v6 }
0x12a2   : > { %8183 = vmatprep.subr.bf16.mxu1 %v9314_v62 }
0x12a5   : > { %8184 = vmatpush3.bf16.msra.mxu1 %v9316_v45 }
0x12a6   : > { %8185 = vmatprep.subr.bf16.mxu1 %v9318_v17 }
0x12a9   : > { %8186 = vmatpush3.bf16.msra.mxu1 %v9320_v26 }
0x12aa   : > { %8187 = vmatprep.subr.bf16.mxu1 %v9322_v36 }
0x12ad   : > { %8188 = vmatpush3.bf16.msra.mxu1 %v9324_v14 }
0x12ae   : > { %8653 = vmatprep.subr.bf16.mxu1 %v13690_v40 }
0x1314   : > { %v6369_v44 = vpop.f32.mrb[0].mxu1  ;;  %v6482_v38 = vpop.f32.mrb[16].mxu0 }
0x1315   : > { %v6370_v15 = vadd.f32 %v6369_v44, %v13746_v32  ;;  %v6483_v28 = vadd.f32 %v6482_v38, %v13748_v31  ;;  %v6371_v40 = vpop.f32.mrb[1].mxu1  ;;  %v6484_v61 = vpop.f32.mrb[17].mxu0 }
0x1316   : > { %v6373_v60 = vpop.f32.mrb[2].mxu1  ;;  %v6486_v34 = vpop.f32.mrb[18].mxu0  ;;  %v13758_v18 = vadd.f32 %v6371_v40, %v13752_v16  ;;  %v13761_v17 = vadd.f32 %v6484_v61, %v13754_v13 }
0x1317   : > { %v6689_v52 = vmul.f32 0.044715, %v6370_v15  ;;  %v6691_v51 = vmul.f32 0.044715, %v6483_v28  ;;  %v6374_v20 = vadd.f32 %v6373_v60, %v13746_v32  ;;  %v6375_v6 = vpop.f32.mrb[3].mxu1  ;;  %v6487_v26 = vadd.f32 %v6486_v34, %v13748_v31  ;;  %v6488_v36 = vpop.f32.mrb[19].mxu0 }
0x1318   : > { %v6625_v62 = vmul.f32 0.7978846, %v6370_v15  ;;  %v6627_v14 = vmul.f32 0.7978846, %v6483_v28  ;;  %v13765_v53 = vadd.f32 %v6375_v6, %v13752_v16  ;;  %v6690_v2 = vmul.f32 0.044715, %v13758_v18 }
0x1319   : > { %v6753_v42 = vmul.f32 %v6689_v52, %v6370_v15  ;;  %v6755_v1 = vmul.f32 %v6691_v51, %v6483_v28  ;;  %v6693_v25 = vmul.f32 0.044715, %v6374_v20  ;;  %v13769_v44 = vadd.f32 %v6488_v36, %v13754_v13 }
0x131a   : > { %v6629_v60 = vmul.f32 0.7978846, %v6374_v20  ;;  %v6695_v52 = vmul.f32 0.044715, %v6487_v26  ;;  %v6754_v36 = vmul.f32 %v6690_v2, %v13758_v18  ;;  %v6631_v12 = vmul.f32 0.7978846, %v6487_v26 }
0x131b   : > { %v6817_v45 = vadd.f32 1.0, %v6753_v42  ;;  %v6819_v19 = vadd.f32 1.0, %v6755_v1  ;;  %v6757_v5 = vmul.f32 %v6693_v25, %v6374_v20  ;;  %v6692_v42 = vmul.f32 0.044715, %v13761_v17 }
0x131c   : > { %v6379_v10 = vpop.f32.mrb[4].mxu1  ;;  %v6492_v50 = vpop.f32.mrb[20].mxu0  ;;  %v6759_v8 = vmul.f32 %v6695_v52, %v6487_v26 }
0x131d   : > { %v6881_v55 = vmul.f32 %v6817_v45, %v6625_v62  ;;  %v6381_v38 = vpop.f32.mrb[5].mxu1  ;;  %v6494_v40 = vpop.f32.mrb[21].mxu0  ;;  %v6883_v61 = vmul.f32 %v6819_v19, %v6627_v14  ;;  %v6821_v34 = vadd.f32 1.0, %v6757_v5  ;;  %v6694_v62 = vmul.f32 0.044715, %v13765_v53 }
0x131e   : > { %v6383_v51 = vpop.f32.mrb[6].mxu1  ;;  %v6496_v1 = vpop.f32.mrb[22].mxu0  ;;  %v6696_v14 = vmul.f32 0.044715, %v13769_v44  ;;  %v6823_v19 = vadd.f32 1.0, %v6759_v8  ;;  %v13776_v5 = vadd.f32 %v6379_v10, %v13746_v32  ;;  %v13779_v9 = vadd.f32 %v6381_v38, %v13752_v16 }
0x131f   : > { %v6385_v25 = vpop.f32.mrb[7].mxu1  ;;  %9486 = vtanh.f32 %v6881_v55  ;;  %v6885_v6 = vmul.f32 %v6821_v34, %v6629_v60  ;;  %v6498_v45 = vpop.f32.mrb[23].mxu0  ;;  %v6756_v55 = vmul.f32 %v6692_v42, %v13761_v17  ;;  %v6561_v60 = vmul.f32 0.5, %v6370_v15 }
0x1320   : > { %9488 = vtanh.f32 %v6883_v61  ;;  %v6887_v34 = vmul.f32 %v6823_v19, %v6631_v12  ;;  %v6758_v52 = vmul.f32 %v6694_v62, %v13765_v53  ;;  %v6818_v61 = vadd.f32 1.0, %v6754_v36 }
0x1321   : > { %9490 = vtanh.f32 %v6885_v6  ;;  %v6760_v2 = vmul.f32 %v6696_v14, %v13769_v44  ;;  %v13785_v47 = vadd.f32 %v6492_v50, %v13748_v31  ;;  %v6698_v8 = vmul.f32 0.044715, %v13779_v9 }
0x1322   : > { %v6563_v6 = vmul.f32 0.5, %v6483_v28  ;;  %9492 = vtanh.f32 %v6887_v34  ;;  %v6697_v10 = vmul.f32 0.044715, %v13776_v5  ;;  %v13790_v38 = vadd.f32 %v6494_v40, %v13754_v13 }
0x1323   : > { %15467 = vst [vmem:[#allocation160_spill] sm:$0xff] %v13785_v47  ;;  %v6626_v15 = vmul.f32 0.7978846, %v13758_v18  ;;  %v6820_v12 = vadd.f32 1.0, %v6756_v55  ;;  %v6762_v42 = vmul.f32 %v6698_v8, %v13779_v9  ;;  %v13795_v62 = vadd.f32 %v6383_v51, %v13746_v32 }
0x1324   : > { %v6628_v50 = vmul.f32 0.7978846, %v13761_v17  ;;  %v6565_v36 = vmul.f32 0.5, %v6374_v20  ;;  %v6567_v14 = vmul.f32 0.5, %v6487_v26  ;;  %v6822_v19 = vadd.f32 1.0, %v6758_v52 }
0x1325   : > { %v6882_v28 = vmul.f32 %v6818_v61, %v6626_v15  ;;  %v6824_v34 = vadd.f32 1.0, %v6760_v2  ;;  %v6699_v0 = vmul.f32 0.044715, %v13785_v47  ;;  %v13800_v40 = vadd.f32 %v6385_v25, %v13752_v16 }
0x1326   : > { %v6630_v55 = vmul.f32 0.7978846, %v13765_v53  ;;  %v6632_v8 = vmul.f32 0.7978846, %v13769_v44  ;;  %v6761_v51 = vmul.f32 %v6697_v10, %v13776_v5  ;;  %v6700_v49 = vmul.f32 0.044715, %v13790_v38 }
0x1327   : > { %v6884_v20 = vmul.f32 %v6820_v12, %v6628_v50  ;;  %v6633_v26 = vmul.f32 0.7978846, %v13776_v5  ;;  %v6826_v52 = vadd.f32 1.0, %v6762_v42  ;;  %v6701_v61 = vmul.f32 0.044715, %v13795_v62 }
0x1328   : > { %v6886_v15 = vmul.f32 %v6822_v19, %v6630_v55  ;;  %v6634_v25 = vmul.f32 0.7978846, %v13779_v9  ;;  %v13810_v48 = vadd.f32 %v6496_v1, %v13748_v31  ;;  %v6702_v43 = vmul.f32 0.044715, %v13800_v40 }
0x1329   : > { %v9487_v63 = vpop.eup %9486  ;;  %v6888_v57 = vmul.f32 %v6824_v34, %v6632_v8  ;;  %v6763_v33 = vmul.f32 %v6699_v0, %v13785_v47  ;;  %v6825_v12 = vadd.f32 1.0, %v6761_v51  ;;  %v6764_v50 = vmul.f32 %v6700_v49, %v13790_v38 }
0x132a   : > { %v9489_v41 = vpop.eup %9488  ;;  %15468 = vst [vmem:[#allocation161_spill] sm:$0xff] %v13810_v48  ;;  %v7009_v4 = vadd.f32 1.0, %v9487_v63  ;;  %v6766_v42 = vmul.f32 %v6702_v43, %v13800_v40  ;;  %v13817_v37 = vadd.f32 %v6498_v45, %v13754_v13  ;;  %v6890_v1 = vmul.f32 %v6826_v52, %v6634_v25 }
0x132b   : > { %v9491_v2 = vpop.eup %9490  ;;  %v7011_v19 = vadd.f32 1.0, %v9489_v41  ;;  %v6765_v24 = vmul.f32 %v6701_v61, %v13795_v62  ;;  %v6703_v63 = vmul.f32 0.044715, %v13810_v48  ;;  %v6638_v34 = vmul.f32 0.7978846, %v13800_v40 }
0x132c   : > { %v7013_v10 = vadd.f32 1.0, %v9491_v2  ;;  %v9493_v22 = vpop.eup %9492  ;;  %v6830_v0 = vadd.f32 1.0, %v6766_v42  ;;  %9494 = vtanh.f32 %v6882_v28  ;;  %v13824_v8 = vmul.f32 %v7009_v4, %v6561_v60 }
0x132d   : > { %v7015_v49 = vadd.f32 1.0, %v9493_v22  ;;  %v6704_v43 = vmul.f32 0.044715, %v13817_v37  ;;  %9496 = vtanh.f32 %v6886_v15  ;;  %v6827_v45 = vadd.f32 1.0, %v6763_v33 }
0x132e   : > { %v13819_v55 = vmul.f32 %v7013_v10, %v6565_v36  ;;  %v6828_v41 = vadd.f32 1.0, %v6764_v50  ;;  %v6894_v36 = vmul.f32 %v6830_v0, %v6638_v34  ;;  %9498 = vtanh.f32 %v6884_v20 }
0x132f   : > { %v13827_v51 = vmul.f32 %v7011_v19, %v6563_v6  ;;  %v13829_v52 = vmul.f32 %v7015_v49, %v6567_v14  ;;  %9500 = vtanh.f32 %v6888_v57  ;;  %v6635_v28 = vmul.f32 0.7978846, %v13785_v47 }
0x1330   : > { %v6829_v4 = vadd.f32 1.0, %v6765_v24  ;;  %v6767_v22 = vmul.f32 %v6703_v63, %v13810_v48  ;;  %9502 = vtanh.f32 %v6890_v1  ;;  %v6636_v33 = vmul.f32 0.7978846, %v13790_v38 }
0x1331   : > { %v6768_v20 = vmul.f32 %v6704_v43, %v13817_v37  ;;  %9504 = vtanh.f32 %v6894_v36  ;;  %v13839_v15 = vmul.f32 %v6825_v12, %v6633_v26  ;;  %v13841_v25 = vmul.f32 %v6827_v45, %v6635_v28 }
0x1332   : > { %v6637_v24 = vmul.f32 0.7978846, %v13795_v62  ;;  %v13847_v19 = vmul.f32 %v6828_v41, %v6636_v33  ;;  %v6639_v1 = vmul.f32 0.7978846, %v13810_v48  ;;  %v6562_v63 = vmul.f32 0.5, %v13758_v18 }
0x1333   : > { %v6831_v12 = vadd.f32 1.0, %v6767_v22  ;;  %v6640_v0 = vmul.f32 0.7978846, %v13817_v37  ;;  %v6566_v49 = vmul.f32 0.5, %v13765_v53  ;;  %v6832_v43 = vadd.f32 1.0, %v6768_v20 }
0x1334   : > { %v6389_v60 = vpop.f32.mrb[8].mxu1  ;;  %v6502_v2 = vpop.f32.mrb[24].mxu0  ;;  %v13854_v26 = vmul.f32 %v6829_v4, %v6637_v24  ;;  %v6564_v45 = vmul.f32 0.5, %v13761_v17  ;;  %v6568_v41 = vmul.f32 0.5, %v13769_v44  ;;  %v6574_v53 = vmul.f32 0.5, %v13800_v40 }
0x1335   : > { %v6391_v14 = vpop.f32.mrb[9].mxu1  ;;  %v6504_v57 = vpop.f32.mrb[25].mxu0  ;;  %v13845_v10 = vadd.f32 %v6389_v60, %v13746_v32  ;;  %v13852_v34 = vadd.f32 %v6502_v2, %v13748_v31  ;;  %v6570_v2 = vmul.f32 0.5, %v13779_v9  ;;  %v13876_v6 = vmul.f32 %v6831_v12, %v6639_v1 }
0x1336   : > { %v6393_v50 = vpop.f32.mrb[10].mxu1  ;;  %v6506_v42 = vpop.f32.mrb[26].mxu0  ;;  %v13861_v36 = vadd.f32 %v6391_v14, %v13752_v16  ;;  %v13865_v60 = vadd.f32 %v6504_v57, %v13754_v13  ;;  %v13882_v9 = vmul.f32 0.5, %v13790_v38  ;;  %v6896_v56 = vmul.f32 %v6832_v43, %v6640_v0 }
0x1337   : > { %15469 = vst [vmem:[#allocation162_spill] sm:$0xff] %v13845_v10  ;;  %v9495_v28 = vpop.eup %9494  ;;  %v6705_v18 = vmul.f32 0.044715, %v13845_v10  ;;  %v6395_v4 = vpop.f32.mrb[11].mxu1  ;;  %v6707_v17 = vmul.f32 0.044715, %v13852_v34  ;;  %v13871_v44 = vadd.f32 %v6393_v50, %v13746_v32  ;;  %v13874_v14 = vadd.f32 %v6506_v42, %v13748_v31 }
0x1338   : > { %v6508_v22 = vpop.f32.mrb[27].mxu0  ;;  %v9497_v33 = vpop.eup %9496  ;;  %v7010_v20 = vadd.f32 1.0, %v9495_v28  ;;  %v13879_v61 = vmul.f32 0.7978846, %v13845_v10  ;;  %15470 = vst [vmem:[#allocation163_spill] sm:$0xff] %v13882_v9  ;;  %v13886_v42 = vmul.f32 0.5, %v13817_v37  ;;  %9506 = vtanh.f32 %v13847_v19 }
0x1339   : > { %v9499_v24 = vpop.eup %9498  ;;  %v7014_v57 = vadd.f32 1.0, %v9497_v33  ;;  %v6706_v50 = vmul.f32 0.044715, %v13861_v36  ;;  %v6708_v38 = vmul.f32 0.044715, %v13865_v60  ;;  %v6769_v43 = vmul.f32 %v6705_v18, %v13845_v10 }
0x133a   : > { %v9501_v23 = vpop.eup %9500  ;;  %v7012_v58 = vadd.f32 1.0, %v9499_v24  ;;  %15471 = vst [vmem:[#allocation164_spill] sm:$0xff] %v13886_v42  ;;  %v7074_v33 = vmul.f32 %v7010_v20, %v6562_v63  ;;  %v6771_v37 = vmul.f32 %v6707_v17, %v13852_v34  ;;  %v6709_v24 = vmul.f32 0.044715, %v13871_v44 }
0x133b   : > { %v9503_v12 = vpop.eup %9502  ;;  %v7078_v7 = vmul.f32 %v7014_v57, %v6566_v49  ;;  %v7016_v21 = vadd.f32 1.0, %v9501_v23  ;;  %v6711_v42 = vmul.f32 0.044715, %v13874_v14  ;;  %v13906_v57 = vadd.f32 %v6395_v4, %v13752_v16 }
0x133c   : > { %v6399_v40 = vpop.f32.mrb[12].mxu1  ;;  %v6512_v28 = vpop.f32.mrb[28].mxu0  ;;  %v7076_v49 = vmul.f32 %v7012_v58, %v6564_v45  ;;  %v6643_v48 = vmul.f32 0.7978846, %v13852_v34  ;;  %v6642_v18 = vmul.f32 0.7978846, %v13861_v36  ;;  %v6770_v47 = vmul.f32 %v6706_v50, %v13861_v36 }
0x133d   : > { %v13888_v54 = vpop.f32.mrb[13].mxu1  ;;  %v13890_v1 = vpop.f32.mrb[29].mxu0  ;;  %v7138_v23 = vpack.c.bf16 %v7078_v7, %v7074_v33  ;;  %v7080_v20 = vmul.f32 %v7016_v21, %v6568_v41  ;;  %v7018_v10 = vadd.f32 1.0, %v9503_v12  ;;  %v15474_v21 = vpack.c.bf16 %v13819_v55, %v13824_v8 }
0x133e   : > { %v13893_v35 = vpop.f32.mrb[14].mxu1  ;;  %v13895_v9 = vpop.f32.mrb[30].mxu0  ;;  %v6773_v7 = vmul.f32 %v6709_v24, %v13871_v44  ;;  %v6710_v58 = vmul.f32 0.044715, %v13906_v57  ;;  %v6833_v4 = vadd.f32 1.0, %v6769_v43  ;;  %v6835_v12 = vadd.f32 1.0, %v6771_v37 }
0x133f   : > { %v9505_v0 = vpop.eup %9504  ;;  %v13901_v59 = vpop.f32.mrb[15].mxu1  ;;  %7464 = vmatprep.mubr.bf16.mxu1 %v7138_v23  ;;  %v7140_v3 = vpack.c.bf16 %v7080_v20, %v7076_v49  ;;  %v7082_v45 = vmul.f32 %v7018_v10, %v6570_v2  ;;  %v6775_v50 = vmul.f32 %v6711_v42, %v13874_v14  ;;  %9508 = vtanh.f32 %v6896_v56 }
0x1340   : > { %15472 = vst [vmem:[#allocation165_spill] sm:$0xff] %v13901_v59  ;;  %v13903_v63 = vpop.f32.mrb[31].mxu0  ;;  %v7022_v17 = vadd.f32 1.0, %v9505_v0  ;;  %v6772_v59 = vmul.f32 %v6708_v38, %v13865_v60  ;;  %7465 = vmatmul.mubr.bf16.vlgmr.msra.gmra.mrb[32].mxu1 %v15474_v21  ;;  %v13927_v8 = vadd.f32 %v6399_v40, %v13746_v32  ;;  %v13930_v10 = vadd.f32 %v6512_v28, %v13748_v31  ;;  %v15477_v21 = vld [vmem:[#allocation160_spill] sm:$0xff] }
0x1341   : > { %15473 = vst [vmem:[#allocation166_spill] sm:$0xff] %v13903_v63  ;;  %v13913_v63 = vadd.f32 %v6508_v22, %v13754_v13  ;;  %7561 = vmatprep.mubr.bf16.mxu0 %v7140_v3  ;;  %8661 = vmatpush3.bf16.msra.mxu1 %v13694_v29  ;;  %v15475_v22 = vpack.c.bf16 %v13829_v52, %v13827_v51  ;;  %v6834_v3 = vadd.f32 1.0, %v6770_v47  ;;  %v6644_v2 = vmul.f32 0.7978846, %v13865_v60 }
0x1342   : > { %v7086_v41 = vmul.f32 %v7022_v17, %v6574_v53  ;;  %8654 = vmatprep.subr.bf16.mxu1 %v13700_v11  ;;  %v6836_v19 = vadd.f32 1.0, %v6772_v59  ;;  %v6645_v53 = vmul.f32 0.7978846, %v13871_v44  ;;  %v6837_v51 = vadd.f32 1.0, %v6773_v7  ;;  %v9507_v37 = vpop.eup %9506 }
0x1343   : > { %7562 = vmatmul.mubr.bf16.vlgmr.msra.gmra.mrb[48].mxu0 %v15475_v22  ;;  %v6712_v29 = vmul.f32 0.044715, %v13913_v63  ;;  %v6774_v52 = vmul.f32 %v6710_v58, %v13906_v57  ;;  %9510 = vtanh.f32 %v13839_v15  ;;  %v13939_v56 = vmul.f32 %v6833_v4, %v13879_v61 }
0x1344   : > { %v7142_v55 = vpack.c.bf16 %v7086_v41, %v7082_v45  ;;  %v6647_v40 = vmul.f32 0.7978846, %v13874_v14  ;;  %v6839_v11 = vadd.f32 1.0, %v6775_v50  ;;  %9512 = vtanh.f32 %v13854_v26  ;;  %v15479_v41 = vld [vmem:[#allocation151_spill] sm:$0xff]  ;;  %v15480_v50 = vld [vmem:[#allocation161_spill] sm:$0xff] }
0x1345   : > { %8662 = vmatpush3.bf16.msra.mxu1 %v13702_v46  ;;  %v13944_v47 = vmul.f32 %v6835_v12, %v6643_v48  ;;  %v6713_v59 = vmul.f32 0.044715, %v13927_v8  ;;  %v6715_v28 = vmul.f32 0.044715, %v13930_v10  ;;  %9514 = vtanh.f32 %v13841_v25 }
0x1346   : > { %7472 = vmatprep.mubr.bf16.mxu1 %v7142_v55  ;;  %8655 = vmatprep.subr.bf16.mxu1 %v13706_v30  ;;  %v13950_v15 = vmul.f32 %v6834_v3, %v6642_v18  ;;  %v13952_v61 = vmul.f32 %v6836_v19, %v6644_v2  ;;  %v6776_v42 = vmul.f32 %v6712_v29, %v13913_v63  ;;  %9516 = vtanh.f32 %v13876_v6  ;;  %v15481_v3 = vld [vmem:[#allocation152_spill] sm:$0xff]  ;;  %v15482_v19 = vld [vmem:[#allocation163_spill] sm:$0xff] }
0x1347   : > { %v13956_v26 = vmul.f32 %v6837_v51, %v6645_v53  ;;  %v6838_v48 = vadd.f32 1.0, %v6774_v52  ;;  %v13960_v46 = vadd.f32 %v13888_v54, %v13752_v16  ;;  %v13964_v25 = vadd.f32 %v13890_v1, %v13754_v13  ;;  %v15478_v58 = vld [vmem:[#allocation165_spill] sm:$0xff]  ;;  %v15483_v53 = vld [vmem:[#allocation164_spill] sm:$0xff] }
0x1348   : > { %v13966_v30 = vmul.f32 %v6839_v11, %v6647_v40  ;;  %v6646_v33 = vmul.f32 0.7978846, %v13906_v57  ;;  %v6648_v38 = vmul.f32 0.7978846, %v13913_v63  ;;  %v13972_v6 = vadd.f32 %v13893_v35, %v13746_v32  ;;  %v15484_v40 = vld [vmem:[#allocation166_spill] sm:$0xff] }
0x1349   : > { %8663 = vmatpush3.bf16.msra.mxu1 %v13709_v39  ;;  %v6777_v0 = vmul.f32 %v6713_v59, %v13927_v8  ;;  %v6779_v54 = vmul.f32 %v6715_v28, %v13930_v10  ;;  %v6569_v43 = vmul.f32 0.5, %v13776_v5  ;;  %v13980_v1 = vadd.f32 %v13895_v9, %v13748_v31  ;;  %v9509_v49 = vpop.eup %9508 }
0x134a   : > { %8656 = vmatprep.subr.bf16.mxu1 %v13712_v27  ;;  %v6840_v24 = vadd.f32 1.0, %v6776_v42  ;;  %v6649_v23 = vmul.f32 0.7978846, %v13927_v8  ;;  %v13985_v35 = vmul.f32 0.7978846, %v13930_v10  ;;  %v6573_v39 = vmul.f32 0.5, %v13795_v62 }
0x134b   : > { %15476 = vst [vmem:[#allocation167_spill] sm:$0xff] %v13980_v1  ;;  %v6902_v20 = vmul.f32 %v6838_v48, %v6646_v33  ;;  %v7020_v18 = vadd.f32 1.0, %v9507_v37  ;;  %v6714_v5 = vmul.f32 0.044715, %v13960_v46  ;;  %v6716_v17 = vmul.f32 0.044715, %v13964_v25 }
0x134c   : > { %v7024_v9 = vadd.f32 1.0, %v9509_v49  ;;  %v6571_v7 = vmul.f32 0.5, %v15477_v21  ;;  %v6717_v27 = vmul.f32 0.044715, %v13972_v6  ;;  %v13994_v45 = vadd.f32 %v15478_v58, %v13752_v16  ;;  %v15485_v58 = vld [vmem:[#allocation153_spill] sm:$0xff] }
0x134d   : > { %8664 = vmatpush3.bf16.msra.mxu1 %v15479_v41  ;;  %v9511_v4 = vpop.eup %9510  ;;  %v6841_v62 = vadd.f32 1.0, %v6777_v0  ;;  %v6843_v12 = vadd.f32 1.0, %v6779_v54  ;;  %v6575_v22 = vmul.f32 0.5, %v15480_v50  ;;  %v6719_v55 = vmul.f32 0.044715, %v13980_v1 }
0x134e   : > { %8657 = vmatprep.subr.bf16.mxu1 %v15481_v3  ;;  %v9513_v2 = vpop.eup %9512  ;;  %v7084_v29 = vmul.f32 %v7020_v18, %v15482_v19  ;;  %v7088_v51 = vmul.f32 %v7024_v9, %v15483_v53  ;;  %v7017_v52 = vadd.f32 1.0, %v9511_v4  ;;  %v14004_v11 = vadd.f32 %v15484_v40, %v13754_v13  ;;  %v15486_v19 = vld [vmem:[#allocation154_spill] sm:$0xff] }
0x134f   : > { %v9515_v59 = vpop.eup %9514  ;;  %v7021_v28 = vadd.f32 1.0, %v9513_v2  ;;  %v6650_v42 = vmul.f32 0.7978846, %v13960_v46  ;;  %v6778_v48 = vmul.f32 %v6714_v5, %v13960_v46  ;;  %v6780_v33 = vmul.f32 %v6716_v17, %v13964_v25 }
0x1350   : > { %v9517_v0 = vpop.eup %9516  ;;  %v7144_v54 = vpack.c.bf16 %v7088_v51, %v7084_v29  ;;  %v7019_v37 = vadd.f32 1.0, %v9515_v59  ;;  %v6781_v49 = vmul.f32 %v6717_v27, %v13972_v6  ;;  %v6718_v18 = vmul.f32 0.044715, %v13994_v45 }
0x1351   : > { %8665 = vmatpush3.bf16.msra.mxu1 %v15485_v58  ;;  %v7081_v41 = vmul.f32 %v7017_v52, %v6569_v43  ;;  %v7085_v4 = vmul.f32 %v7021_v28, %v6573_v39  ;;  %v7023_v50 = vadd.f32 1.0, %v9517_v0  ;;  %v6783_v3 = vmul.f32 %v6719_v55, %v13980_v1  ;;  %v15491_v58 = vld [vmem:[#allocation157_spill] sm:$0xff] }
0x1352   : > { %8658 = vmatprep.subr.bf16.mxu1 %v15486_v19  ;;  %v6904_v17 = vmul.f32 %v6840_v24, %v6648_v38  ;;  %7569 = vmatprep.mubr.bf16.mxu0 %v7144_v54  ;;  %v14014_v29 = vmul.f32 %v6841_v62, %v6649_v23  ;;  %v6652_v27 = vmul.f32 0.7978846, %v13964_v25  ;;  %v6720_v53 = vmul.f32 0.044715, %v14004_v11  ;;  %v15487_v62 = vld [vmem:[#allocation155_spill] sm:$0xff] }
0x1353   : > { %v7141_v43 = vpack.c.bf16 %v7085_v4, %v7081_v41  ;;  %v7083_v39 = vmul.f32 %v7019_v37, %v6571_v7  ;;  %v7087_v52 = vmul.f32 %v7023_v50, %v6575_v22  ;;  %9518 = vtanh.f32 %v13950_v15  ;;  %v15488_v7 = vld [vmem:[#allocation156_spill] sm:$0xff] }
0x1354   : > { %v6409_v9 = vpop.f32.mrb[16].mxu1  ;;  %v6522_v21 = vpop.f32.mrb[32].mxu0  ;;  %v6842_v38 = vadd.f32 1.0, %v6778_v48  ;;  %v6844_v24 = vadd.f32 1.0, %v6780_v33  ;;  %v6845_v23 = vadd.f32 1.0, %v6781_v49  ;;  %9520 = vtanh.f32 %v6902_v20 }
0x1355   : > { %v6411_v2 = vpop.f32.mrb[17].mxu1  ;;  %v6524_v5 = vpop.f32.mrb[33].mxu0  ;;  %8666 = vmatpush3.bf16.msra.mxu1 %v15487_v62  ;;  %v7143_v28 = vpack.c.bf16 %v7087_v52, %v7083_v39  ;;  %v6847_v0 = vadd.f32 1.0, %v6783_v3  ;;  %v6782_v54 = vmul.f32 %v6718_v18, %v13994_v45  ;;  %9522 = vtanh.f32 %v13952_v61 }
0x1356   : > { %v6413_v51 = vpop.f32.mrb[18].mxu1  ;;  %v14018_v40 = vpop.f32.mrb[34].mxu0  ;;  %7473 = vmatmul.mubr.bf16.gmra.mrb[36].mxu1 %v7141_v43  ;;  %8659 = vmatprep.subr.bf16.mxu1 %v15488_v7  ;;  %v14030_v15 = vmul.f32 %v6843_v12, %v13985_v35  ;;  %v6653_v22 = vmul.f32 0.7978846, %v13972_v6  ;;  %v6784_v48 = vmul.f32 %v6720_v53, %v14004_v11  ;;  %9524 = vtanh.f32 %v6904_v17 }
0x1357   : > { %v14021_v55 = vpop.f32.mrb[19].mxu1  ;;  %v14023_v59 = vpop.f32.mrb[35].mxu0  ;;  %7570 = vmatmul.mubr.bf16.gmra.mrb[52].mxu0 %v7143_v28  ;;  %v6655_v20 = vmul.f32 0.7978846, %v13980_v1  ;;  %v6654_v33 = vmul.f32 0.7978846, %v13994_v45  ;;  %v14037_v37 = vadd.f32 %v6409_v9, %v13746_v32  ;;  %9526 = vtanh.f32 %v13939_v56 }
0x1358   : > { %v14040_v61 = vmul.f32 %v6842_v38, %v6650_v42  ;;  %v14042_v49 = vmul.f32 %v6844_v24, %v6652_v27  ;;  %v14045_v35 = vadd.f32 %v6522_v21, %v13748_v31  ;;  %9528 = vtanh.f32 %v13956_v26  ;;  %v15492_v21 = vld [vmem:[#allocation158_spill] sm:$0xff] }
0x1359   : > { %15489 = vst [vmem:[#allocation160_spill] sm:$0xff] %v14037_v37  ;;  %8667 = vmatpush3.bf16.msra.mxu1 %v15491_v58  ;;  %v14053_v41 = vmul.f32 %v6845_v23, %v6653_v22  ;;  %v14055_v9 = vmul.f32 %v6847_v0, %v6655_v20  ;;  %v6846_v56 = vadd.f32 1.0, %v6782_v54  ;;  %9530 = vtanh.f32 %v13944_v47 }
0x135a   : > { %15490 = vst [vmem:[#allocation165_spill] sm:$0xff] %v14045_v35  ;;  %8660 = vmatprep.subr.bf16.mxu1 %v15492_v21  ;;  %v6656_v26 = vmul.f32 0.7978846, %v14004_v11  ;;  %v6848_v50 = vadd.f32 1.0, %v6784_v48  ;;  %v6578_v3 = vmul.f32 0.5, %v13861_v36  ;;  %9532 = vtanh.f32 %v13966_v30 }
0x135b   : > { %v6582_v27 = vmul.f32 0.5, %v13906_v57  ;;  %v6580_v47 = vmul.f32 0.5, %v13865_v60  ;;  %v6721_v53 = vmul.f32 0.044715, %v14037_v37  ;;  %v14074_v43 = vadd.f32 %v6411_v2, %v13752_v16  ;;  %v15497_v57 = vld [vmem:[#allocation159_spill] sm:$0xff] }
0x135c   : > { %v14048_v12 = vpop.f32.mrb[20].mxu1  ;;  %v14050_v18 = vpop.f32.mrb[36].mxu0  ;;  %v6584_v52 = vmul.f32 0.5, %v13913_v63  ;;  %v6723_v36 = vmul.f32 0.044715, %v14045_v35  ;;  %v14081_v30 = vadd.f32 %v6524_v5, %v13754_v13  ;;  %v14084_v38 = vadd.f32 %v6413_v51, %v13746_v32  ;;  %v15498_v63 = vld [vmem:[#allocation162_spill] sm:$0xff] }
0x135d   : > { %v14058_v42 = vpop.f32.mrb[21].mxu1  ;;  %v14060_v4 = vpop.f32.mrb[37].mxu0  ;;  %8668 = vmatpush3.bf16.msra.mxu1 %v15497_v57  ;;  %v14087_v24 = vmul.f32 %v6846_v56, %v6654_v33  ;;  %v14090_v2 = vmul.f32 0.7978846, %v14037_v37  ;;  %v14093_v23 = vmul.f32 0.7978846, %v14045_v35  ;;  %v14098_v0 = vmul.f32 %v6848_v50, %v6656_v26 }
0x135e   : > { %v14066_v19 = vpop.f32.mrb[22].mxu1  ;;  %v14068_v17 = vpop.f32.mrb[38].mxu0  ;;  %15495 = vst [vmem:[#allocation152_spill] sm:$0xff] %v14081_v30  ;;  %15496 = vst [vmem:[#allocation163_spill] sm:$0xff] %v14084_v38  ;;  %v6577_v62 = vmul.f32 0.5, %v15498_v63  ;;  %v6581_v54 = vmul.f32 0.5, %v13871_v44  ;;  %v14103_v7 = vadd.f32 %v14018_v40, %v13748_v31  ;;  %v6785_v20 = vmul.f32 %v6721_v53, %v14037_v37 }
0x135f   : > { %15493 = vst [vmem:[#allocation151_spill] sm:$0xff] %v14068_v17  ;;  %v14076_v39 = vpop.f32.mrb[23].mxu1  ;;  %v9519_v60 = vpop.eup %9518  ;;  %v6579_v33 = vmul.f32 0.5, %v13852_v34  ;;  %v6722_v58 = vmul.f32 0.044715, %v14074_v43  ;;  %v6787_v26 = vmul.f32 %v6723_v36, %v14045_v35  ;;  %v14115_v37 = vadd.f32 %v14021_v55, %v13752_v16 }
0x1360   : > { %15494 = vst [vmem:[#allocation161_spill] sm:$0xff] %v14076_v39  ;;  %v14096_v28 = vpop.f32.mrb[39].mxu0  ;;  %v9521_v5 = vpop.eup %9520  ;;  %v7026_v51 = vadd.f32 1.0, %v9519_v60  ;;  %15500 = vst [vmem:[#allocation166_spill] sm:$0xff] %v14103_v7  ;;  %v6724_v50 = vmul.f32 0.044715, %v14081_v30  ;;  %v14119_v36 = vadd.f32 %v14023_v59, %v13754_v13  ;;  %9534 = vtanh.f32 %v14040_v61 }
0x1361   : > { %15499 = vst [vmem:[#allocation164_spill] sm:$0xff] %v14096_v28  ;;  %v9523_v22 = vpop.eup %9522  ;;  %v7030_v48 = vadd.f32 1.0, %v9521_v5  ;;  %v6725_v44 = vmul.f32 0.044715, %v14084_v38  ;;  %v6583_v5 = vmul.f32 0.5, %v13874_v14  ;;  %v6786_v17 = vmul.f32 %v6722_v58, %v14074_v43 }
0x1362   : > { %v9525_v56 = vpop.eup %9524  ;;  %v7028_v21 = vadd.f32 1.0, %v9523_v22  ;;  %v7090_v60 = vmul.f32 %v7026_v51, %v6578_v3  ;;  %v6727_v34 = vmul.f32 0.044715, %v14103_v7  ;;  %15501 = vst [vmem:[#allocation153_spill] sm:$0xff] %v14119_v36  ;;  %v6788_v59 = vmul.f32 %v6724_v50, %v14081_v30 }
0x1363   : > { %v9527_v57 = vpop.eup %9526  ;;  %v7094_v40 = vmul.f32 %v7030_v48, %v6582_v27  ;;  %v7032_v63 = vadd.f32 1.0, %v9525_v56  ;;  %v6789_v1 = vmul.f32 %v6725_v44, %v14084_v38  ;;  %v6726_v50 = vmul.f32 0.044715, %v14115_v37 }
0x1364   : > { %v9529_v28 = vpop.eup %9528  ;;  %v7025_v53 = vadd.f32 1.0, %v9527_v57  ;;  %v7092_v51 = vmul.f32 %v7028_v21, %v6580_v47  ;;  %v6791_v58 = vmul.f32 %v6727_v34, %v14103_v7  ;;  %v6728_v44 = vmul.f32 0.044715, %v14119_v36 }
0x1365   : > { %v9531_v3 = vpop.eup %9530  ;;  %v7146_v27 = vpack.c.bf16 %v7094_v40, %v7090_v60  ;;  %v7096_v14 = vmul.f32 %v7032_v63, %v6584_v52  ;;  %v7029_v48 = vadd.f32 1.0, %v9529_v28  ;;  %v6849_v63 = vadd.f32 1.0, %v6785_v20 }
0x1366   : > { %v14121_v22 = vpop.f32.mrb[24].mxu1  ;;  %v14123_v35 = vpop.f32.mrb[40].mxu0  ;;  %v7027_v55 = vadd.f32 1.0, %v9531_v3  ;;  %v7089_v52 = vmul.f32 %v7025_v53, %v6577_v62  ;;  %v6851_v3 = vadd.f32 1.0, %v6787_v26  ;;  %v6658_v62 = vmul.f32 0.7978846, %v14074_v43 }
0x1367   : > { %15502 = vst [vmem:[#allocation154_spill] sm:$0xff] %v14121_v22  ;;  %15503 = vst [vmem:[#allocation155_spill] sm:$0xff] %v14123_v35  ;;  %v14125_v56 = vpop.f32.mrb[25].mxu1  ;;  %v14127_v57 = vpop.f32.mrb[41].mxu0  ;;  %7480 = vmatprep.mubr.bf16.mxu1 %v7146_v27  ;;  %v7148_v47 = vpack.c.bf16 %v7096_v14, %v7092_v51  ;;  %v7093_v28 = vmul.f32 %v7029_v48, %v6581_v54  ;;  %v6850_v54 = vadd.f32 1.0, %v6786_v17  ;;  %v6853_v20 = vadd.f32 1.0, %v6789_v1 }
0x1368   : > { %v9533_v39 = vpop.eup %9532  ;;  %v14132_v22 = vpop.f32.mrb[26].mxu1  ;;  %9536 = vtanh.f32 %v14087_v24  ;;  %v14148_v34 = vadd.f32 %v14048_v12, %v13746_v32  ;;  %v6855_v51 = vadd.f32 1.0, %v6791_v58  ;;  %v6790_v26 = vmul.f32 %v6726_v50, %v14115_v37 }
0x1369   : > { %15504 = vst [vmem:[#allocation156_spill] sm:$0xff] %v14132_v22  ;;  %v14134_v35 = vpop.f32.mrb[42].mxu0  ;;  %v7031_v21 = vadd.f32 1.0, %v9533_v39  ;;  %v14136_v60 = vpop.f32.mrb[27].mxu1  ;;  %7577 = vmatprep.mubr.bf16.mxu0 %v7148_v47  ;;  %v7145_v22 = vpack.c.bf16 %v7093_v28, %v7089_v52  ;;  %v6852_v39 = vadd.f32 1.0, %v6788_v59  ;;  %9538 = vtanh.f32 %v14042_v49 }
0x136a   : > { %15505 = vst [vmem:[#allocation157_spill] sm:$0xff] %v14134_v35  ;;  %v14138_v40 = vpop.f32.mrb[43].mxu0  ;;  %v7091_v35 = vmul.f32 %v7027_v55, %v6579_v33  ;;  %15506 = vst [vmem:[#allocation158_spill] sm:$0xff] %v14148_v34  ;;  %v6792_v33 = vmul.f32 %v6728_v44, %v14119_v36  ;;  %v6660_v1 = vmul.f32 0.7978846, %v14081_v30  ;;  %9540 = vtanh.f32 %v14098_v0  ;;  %v15511_v30 = vld [vmem:[#allocation164_spill] sm:$0xff] }
0x136b   : > { %v7095_v27 = vmul.f32 %v7031_v21, %v6583_v5  ;;  %7481 = vmatmul.mubr.bf16.gmra.mrb[40].mxu1 %v7145_v22  ;;  %v6661_v61 = vmul.f32 0.7978846, %v14084_v38  ;;  %v14169_v49 = vmul.f32 %v6849_v63, %v14090_v2  ;;  %v14172_v22 = vmul.f32 %v6851_v3, %v14093_v23 }
0x136c   : > { %v14174_v14 = vmul.f32 %v6850_v54, %v6658_v62  ;;  %v6663_v48 = vmul.f32 0.7978846, %v14103_v7  ;;  %v14179_v0 = vmul.f32 %v6852_v39, %v6660_v1  ;;  %v6729_v59 = vmul.f32 0.044715, %v14148_v34  ;;  %v9535_v54 = vpop.eup %9534 }
0x136d   : > { %v7147_v53 = vpack.c.bf16 %v7095_v27, %v7091_v35  ;;  %v14162_v35 = vadd.f32 %v14050_v18, %v13748_v31  ;;  %v14181_v18 = vmul.f32 %v6853_v20, %v6661_v61  ;;  %9542 = vtanh.f32 %v14014_v29 }
0x136e   : > { %v14153_v17 = vpop.f32.mrb[28].mxu1  ;;  %v14155_v5 = vpop.f32.mrb[44].mxu0  ;;  %v14189_v23 = vmul.f32 %v6855_v51, %v6663_v48  ;;  %v6854_v52 = vadd.f32 1.0, %v6790_v26  ;;  %v6856_v28 = vadd.f32 1.0, %v6792_v33  ;;  %9544 = vtanh.f32 %v14053_v41 }
0x136f   : > { %7578 = vmatmul.mubr.bf16.gmra.mrb[56].mxu0 %v7147_v53  ;;  %15507 = vst [vmem:[#allocation159_spill] sm:$0xff] %v14162_v35  ;;  %v14164_v12 = vpop.f32.mrb[29].mxu1  ;;  %v14166_v24 = vpop.f32.mrb[45].mxu0  ;;  %v6662_v63 = vmul.f32 0.7978846, %v14115_v37  ;;  %9546 = vtanh.f32 %v14030_v15  ;;  %v14199_v29 = vadd.f32 %v14058_v42, %v13752_v16  ;;  %v6586_v44 = vmul.f32 0.5, %v13960_v46 }
0x1370   : > { %v14177_v55 = vpop.f32.mrb[30].mxu1  ;;  %v14185_v47 = vpop.f32.mrb[46].mxu0  ;;  %v6731_v58 = vmul.f32 0.044715, %v14162_v35  ;;  %v6664_v50 = vmul.f32 0.7978846, %v14119_v36  ;;  %9548 = vtanh.f32 %v14055_v9  ;;  %v6793_v62 = vmul.f32 %v6729_v59, %v14148_v34 }
0x1371   : > { %v14187_v2 = vpop.f32.mrb[31].mxu1  ;;  %v14192_v21 = vpop.f32.mrb[47].mxu0  ;;  %v6590_v3 = vmul.f32 0.5, %v13994_v45  ;;  %v6588_v41 = vmul.f32 0.5, %v13964_v25  ;;  %v6592_v27 = vmul.f32 0.5, %v14004_v11  ;;  %v6585_v15 = vmul.f32 0.5, %v13927_v8 }
0x1372   : > { %v14209_v39 = vmul.f32 %v6854_v52, %v6662_v63  ;;  %v14211_v42 = vmul.f32 %v6856_v28, %v6664_v50  ;;  %v6665_v53 = vmul.f32 0.7978846, %v14148_v34  ;;  %v14216_v46 = vadd.f32 %v14060_v4, %v13754_v13  ;;  %v9537_v45 = vpop.eup %9536  ;;  %v15508_v59 = vld [vmem:[#allocation167_spill] sm:$0xff] }
0x1373   : > { %v7034_v9 = vadd.f32 1.0, %v9535_v54  ;;  %v6795_v25 = vmul.f32 %v6731_v58, %v14162_v35  ;;  %v6730_v11 = vmul.f32 0.044715, %v14199_v29  ;;  %v14222_v8 = vadd.f32 %v14066_v19, %v13746_v32  ;;  %v9539_v20 = vpop.eup %9538  ;;  %v15509_v28 = vld [vmem:[#allocation151_spill] sm:$0xff] }
0x1374   : > { %v7038_v51 = vadd.f32 1.0, %v9537_v45  ;;  %v6667_v26 = vmul.f32 0.7978846, %v14162_v35  ;;  %v6589_v33 = vmul.f32 0.5, %v13972_v6  ;;  %v6587_v1 = vmul.f32 0.5, %v13930_v10  ;;  %v9541_v4 = vpop.eup %9540 }
0x1375   : > { %v7036_v61 = vadd.f32 1.0, %v9539_v20  ;;  %v6857_v48 = vadd.f32 1.0, %v6793_v62  ;;  %v6591_v52 = vmul.f32 0.5, %v15508_v59  ;;  %v14230_v63 = vadd.f32 %v15509_v28, %v13748_v31  ;;  %v15510_v20 = vld [vmem:[#allocation161_spill] sm:$0xff] }
0x1376   : > { %v7098_v58 = vmul.f32 %v7034_v9, %v6586_v44  ;;  %v7102_v19 = vmul.f32 %v7038_v51, %v6590_v3  ;;  %v7040_v50 = vadd.f32 1.0, %v9541_v4  ;;  %v6732_v54 = vmul.f32 0.044715, %v14216_v46 }
0x1377   : > { %v9543_v45 = vpop.eup %9542  ;;  %v6859_v35 = vadd.f32 1.0, %v6795_v25  ;;  %v6794_v6 = vmul.f32 %v6730_v11, %v14199_v29  ;;  %v6733_v10 = vmul.f32 0.044715, %v14222_v8  ;;  %v14237_v62 = vadd.f32 %v15510_v20, %v13752_v16 }
0x1378   : > { %v9545_v59 = vpop.eup %9544  ;;  %v7150_v34 = vpack.c.bf16 %v7102_v19, %v7098_v58  ;;  %v7100_v7 = vmul.f32 %v7036_v61, %v6588_v41  ;;  %v7104_v28 = vmul.f32 %v7040_v50, %v6592_v27  ;;  %v7033_v38 = vadd.f32 1.0, %v9543_v45 }
0x1379   : > { %v9547_v44 = vpop.eup %9546  ;;  %v14239_v3 = vmul.f32 %v6857_v48, %v6665_v53  ;;  %v7037_v9 = vadd.f32 1.0, %v9545_v59  ;;  %v6666_v51 = vmul.f32 0.7978846, %v14199_v29  ;;  %v6735_v25 = vmul.f32 0.044715, %v14230_v63 }
0x137a   : > { %v9549_v11 = vpop.eup %9548  ;;  %7488 = vmatprep.mubr.bf16.mxu1 %v7150_v34  ;;  %v7152_v4 = vpack.c.bf16 %v7104_v28, %v7100_v7  ;;  %v7035_v36 = vadd.f32 1.0, %v9547_v44  ;;  %v6796_v20 = vmul.f32 %v6732_v54, %v14216_v46  ;;  %v14246_v58 = vadd.f32 %v15511_v30, %v13754_v13  ;;  %v15512_v7 = vld [vmem:[#allocation155_spill] sm:$0xff] }
0x137b   : > { %v7097_v41 = vmul.f32 %v7033_v38, %v6585_v15  ;;  %v7101_v27 = vmul.f32 %v7037_v9, %v6589_v33  ;;  %v7039_v61 = vadd.f32 1.0, %v9549_v11  ;;  %v6668_v53 = vmul.f32 0.7978846, %v14216_v46  ;;  %v15513_v33 = vld [vmem:[#allocation154_spill] sm:$0xff] }
0x137c   : > { %7585 = vmatprep.mubr.bf16.mxu0 %v7152_v4  ;;  %v6858_v48 = vadd.f32 1.0, %v6794_v6  ;;  %v6797_v19 = vmul.f32 %v6733_v10, %v14222_v8  ;;  %v6734_v50 = vmul.f32 0.044715, %v14237_v62  ;;  %v6543_v34 = vadd.f32 %v15512_v7, %v13748_v31 }
0x137d   : > { %v7149_v45 = vpack.c.bf16 %v7101_v27, %v7097_v41  ;;  %v7099_v54 = vmul.f32 %v7035_v36, %v6587_v1  ;;  %v7103_v59 = vmul.f32 %v7039_v61, %v6591_v52  ;;  %v6799_v30 = vmul.f32 %v6735_v25, %v14230_v63 }
0x137e   : > { %v6860_v28 = vadd.f32 1.0, %v6796_v20  ;;  %v6669_v38 = vmul.f32 0.7978846, %v14222_v8  ;;  %v6736_v15 = vmul.f32 0.044715, %v14246_v58  ;;  %v14258_v6 = vadd.f32 %v15513_v33, %v13746_v32 }
0x137f   : > { %v14260_v10 = vmul.f32 %v6859_v35, %v6667_v26  ;;  %7489 = vmatmul.mubr.bf16.gmra.mrb[44].mxu1 %v7149_v45  ;;  %v7151_v44 = vpack.c.bf16 %v7103_v59, %v7099_v54  ;;  %v6671_v9 = vmul.f32 0.7978846, %v14230_v63  ;;  %v6739_v11 = vmul.f32 0.044715, %v6543_v34  ;;  %v15516_v26 = vld [vmem:[#allocation157_spill] sm:$0xff] }
0x1380   : > { %15514 = vst [vmem:[#allocation162_spill] sm:$0xff] %v14258_v6  ;;  %v14263_v36 = vmul.f32 %v6858_v48, %v6666_v51  ;;  %v6861_v1 = vadd.f32 1.0, %v6797_v19  ;;  %v6798_v52 = vmul.f32 %v6734_v50, %v14237_v62  ;;  %v14268_v25 = vadd.f32 %v14125_v56, %v13752_v16  ;;  %v15517_v50 = vld [vmem:[#allocation156_spill] sm:$0xff] }
0x1381   : > { %7586 = vmatmul.mubr.bf16.gmra.mrb[60].mxu0 %v7151_v44  ;;  %v6863_v4 = vadd.f32 1.0, %v6799_v30  ;;  %v6803_v20 = vmul.f32 %v6739_v11, %v6543_v34  ;;  %v14272_v35 = vadd.f32 %v14127_v57, %v13754_v13  ;;  %v6547_v41 = vadd.f32 %v15516_v26, %v13748_v31 }
0x1382   : > { %v14276_v27 = vmul.f32 %v6860_v28, %v6668_v53  ;;  %v6670_v51 = vmul.f32 0.7978846, %v14237_v62  ;;  %v6800_v61 = vmul.f32 %v6736_v15, %v14246_v58  ;;  %v6737_v48 = vmul.f32 0.044715, %v14258_v6 }
0x1383   : > { %15515 = vst [vmem:[#allocation167_spill] sm:$0xff] %v14272_v35  ;;  %v6672_v56 = vmul.f32 0.7978846, %v14246_v58  ;;  %v6867_v19 = vadd.f32 1.0, %v6803_v20  ;;  %v14284_v7 = vadd.f32 %v15517_v50, %v13746_v32  ;;  %v14288_v57 = vadd.f32 %v14136_v60, %v13752_v16 }
0x1384   : > { %v14290_v45 = vmul.f32 %v6861_v1, %v6669_v38  ;;  %v6862_v53 = vadd.f32 1.0, %v6798_v52  ;;  %v6675_v54 = vmul.f32 0.7978846, %v6543_v34  ;;  %v6738_v59 = vmul.f32 0.044715, %v14268_v25 }
0x1385   : > { %v14293_v30 = vmul.f32 %v6863_v4, %v6671_v9  ;;  %v6673_v28 = vmul.f32 0.7978846, %v14258_v6  ;;  %v6740_v15 = vmul.f32 0.044715, %v14272_v35  ;;  %v6743_v33 = vmul.f32 0.044715, %v6547_v41 }
0x1386   : > { %v6864_v44 = vadd.f32 1.0, %v6800_v61  ;;  %v6801_v11 = vmul.f32 %v6737_v48, %v14258_v6  ;;  %v6931_v20 = vmul.f32 %v6867_v19, %v6675_v54  ;;  %v14300_v60 = vadd.f32 %v14138_v40, %v13754_v13 }
0x1387   : > { %v6741_v38 = vmul.f32 0.044715, %v14284_v7  ;;  %v6807_v1 = vmul.f32 %v6743_v33, %v6547_v41  ;;  %v6742_v52 = vmul.f32 0.044715, %v14288_v57  ;;  %v14306_v9 = vadd.f32 %v14153_v17, %v13746_v32 }
0x1388   : > { %15518 = vst [vmem:[#allocation151_spill] sm:$0xff] %v14300_v60  ;;  %v14308_v4 = vmul.f32 %v6862_v53, %v6670_v51  ;;  %v14310_v26 = vmul.f32 0.5, %v6543_v34  ;;  %v6674_v61 = vmul.f32 0.7978846, %v14268_v25  ;;  %v6802_v48 = vmul.f32 %v6738_v59, %v14268_v25 }
0x1389   : > { %v6804_v40 = vmul.f32 %v6740_v15, %v14272_v35  ;;  %v6679_v19 = vmul.f32 0.7978846, %v6547_v41  ;;  %v6871_v50 = vadd.f32 1.0, %v6807_v1  ;;  %v6744_v54 = vmul.f32 0.044715, %v14300_v60 }
0x138a   : > { %v6865_v33 = vadd.f32 1.0, %v6801_v11  ;;  %9550 = vtanh.f32 %v6931_v20  ;;  %v6745_v6 = vmul.f32 0.044715, %v14306_v9  ;;  %v14319_v17 = vadd.f32 %v14155_v5, %v13748_v31 }
0x138b   : > { %v6805_v34 = vmul.f32 %v6741_v38, %v14284_v7  ;;  %v6935_v51 = vmul.f32 %v6871_v50, %v6679_v19  ;;  %v6806_v53 = vmul.f32 %v6742_v52, %v14288_v57  ;;  %v14325_v59 = vadd.f32 %v14164_v12, %v13752_v16 }
0x138c   : > { %15519 = vst [vmem:[#allocation161_spill] sm:$0xff] %v14319_v17  ;;  %v14327_v15 = vmul.f32 %v6864_v44, %v6672_v56  ;;  %v6866_v1 = vadd.f32 1.0, %v6802_v48  ;;  %v6676_v11 = vmul.f32 0.7978846, %v14272_v35  ;;  %v14332_v20 = vadd.f32 %v14166_v24, %v13754_v13 }
0x138d   : > { %v6868_v5 = vadd.f32 1.0, %v6804_v40  ;;  %9552 = vtanh.f32 %v6935_v51  ;;  %v6808_v38 = vmul.f32 %v6744_v54, %v14300_v60  ;;  %v14337_v52 = vadd.f32 %v14177_v55, %v13746_v32 }
0x138e   : > { %15520 = vst [vmem:[#allocation164_spill] sm:$0xff] %v14332_v20  ;;  %v6677_v12 = vmul.f32 0.7978846, %v14284_v7  ;;  %v6615_v19 = vmul.f32 0.5, %v6547_v41  ;;  %v6809_v56 = vmul.f32 %v6745_v6, %v14306_v9  ;;  %v6747_v44 = vmul.f32 0.044715, %v14319_v17 }
0x138f   : > { %v14342_v48 = vmul.f32 %v6865_v33, %v6673_v28  ;;  %v6869_v50 = vadd.f32 1.0, %v6805_v34  ;;  %v6870_v24 = vadd.f32 1.0, %v6806_v53  ;;  %v6746_v40 = vmul.f32 0.044715, %v14325_v59 }
0x1390   : > { %v6678_v51 = vmul.f32 0.7978846, %v14288_v57  ;;  %v6748_v54 = vmul.f32 0.044715, %v14332_v20  ;;  %v14349_v32 = vadd.f32 %v14185_v47, %v13748_v31  ;;  %v14353_v55 = vadd.f32 %v14187_v2, %v13752_v16 }
0x1391   : > { %v14355_v6 = vmul.f32 %v6866_v1, %v6674_v61  ;;  %v14357_v41 = vmul.f32 %v6868_v5, %v6676_v11  ;;  %v6872_v28 = vadd.f32 1.0, %v6808_v38  ;;  %v6749_v33 = vmul.f32 0.044715, %v14337_v52 }
0x1392   : > { %v6680_v34 = vmul.f32 0.7978846, %v14300_v60  ;;  %v6873_v53 = vadd.f32 1.0, %v6809_v56  ;;  %v6811_v35 = vmul.f32 %v6747_v44, %v14319_v17  ;;  %v14364_v31 = vadd.f32 %v14192_v21, %v13754_v13 }
0x1393   : > { %v14366_v47 = vmul.f32 %v6869_v50, %v6677_v12  ;;  %v14368_v16 = vmul.f32 %v6870_v24, %v6678_v51  ;;  %v6681_v2 = vmul.f32 0.7978846, %v14306_v9  ;;  %v6810_v61 = vmul.f32 %v6746_v40, %v14325_v59 }
0x1394   : > { %v9551_v1 = vpop.eup %9550  ;;  %v6683_v11 = vmul.f32 0.7978846, %v14319_v17  ;;  %v6812_v5 = vmul.f32 %v6748_v54, %v14332_v20  ;;  %v6751_v38 = vmul.f32 0.044715, %v14349_v32  ;;  %v6750_v56 = vmul.f32 0.044715, %v14353_v55 }
0x1395   : > { %v14376_v44 = vmul.f32 %v6872_v28, %v6680_v34  ;;  %v6682_v13 = vmul.f32 0.7978846, %v14325_v59  ;;  %v6684_v21 = vmul.f32 0.7978846, %v14332_v20  ;;  %v6813_v12 = vmul.f32 %v6749_v33, %v14337_v52 }
0x1396   : > { %v14381_v50 = vmul.f32 %v6873_v53, %v6681_v2  ;;  %v6875_v24 = vadd.f32 1.0, %v6811_v35  ;;  %v6752_v40 = vmul.f32 0.044715, %v14364_v31  ;;  %9554 = vtanh.f32 %v14174_v14 }
0x1397   : > { %v9553_v51 = vpop.eup %9552  ;;  %v7059_v54 = vadd.f32 1.0, %v9551_v1  ;;  %v6874_v17 = vadd.f32 1.0, %v6810_v61  ;;  %v6685_v60 = vmul.f32 0.7978846, %v14337_v52  ;;  %9556 = vtanh.f32 %v14209_v39 }
0x1398   : > { %v6876_v28 = vadd.f32 1.0, %v6812_v5  ;;  %v6815_v34 = vmul.f32 %v6751_v38, %v14349_v32  ;;  %v6814_v20 = vmul.f32 %v6750_v56, %v14353_v55  ;;  %9558 = vtanh.f32 %v14179_v0  ;;  %v15521_v56 = vld [vmem:[#allocation152_spill] sm:$0xff] }
0x1399   : > { %v7063_v33 = vadd.f32 1.0, %v9553_v51  ;;  %v6877_v35 = vadd.f32 1.0, %v6813_v12  ;;  %v6594_v53 = vmul.f32 0.5, %v14074_v43  ;;  %9560 = vtanh.f32 %v14211_v42 }
0x139a   : > { %v14392_v14 = vmul.f32 %v6875_v24, %v6683_v11  ;;  %v6687_v2 = vmul.f32 0.7978846, %v14349_v32  ;;  %v6816_v61 = vmul.f32 %v6752_v40, %v14364_v31  ;;  %9562 = vtanh.f32 %v14169_v49 }
0x139b   : > { %v14398_v39 = vmul.f32 %v7059_v54, %v14310_v26  ;;  %v14400_v1 = vmul.f32 %v6874_v17, %v6682_v13  ;;  %v6686_v0 = vmul.f32 0.7978846, %v14353_v55  ;;  %9564 = vtanh.f32 %v14181_v18  ;;  %v15522_v18 = vld [vmem:[#allocation153_spill] sm:$0xff] }
0x139c   : > { %v14404_v43 = vmul.f32 %v6876_v28, %v6684_v21  ;;  %v6879_v42 = vadd.f32 1.0, %v6815_v34  ;;  %v6878_v11 = vadd.f32 1.0, %v6814_v20  ;;  %9566 = vtanh.f32 %v14172_v22  ;;  %v15523_v20 = vld [vmem:[#allocation160_spill] sm:$0xff]  ;;  %v15524_v22 = vld [vmem:[#allocation163_spill] sm:$0xff]  ;;  %v15526_v28 = vld [vmem:[#allocation166_spill] sm:$0xff] }
0x139d   : > { %v14407_v5 = vmul.f32 %v7063_v33, %v6615_v19  ;;  %v14409_v38 = vmul.f32 %v6877_v35, %v6685_v60  ;;  %v6688_v49 = vmul.f32 0.7978846, %v14364_v31  ;;  %9568 = vtanh.f32 %v14189_v23  ;;  %v15525_v23 = vld [vmem:[#allocation165_spill] sm:$0xff] }
0x139e   : > { %v6880_v26 = vadd.f32 1.0, %v6816_v61  ;;  %v6598_v17 = vmul.f32 0.5, %v14115_v37  ;;  %v6596_v13 = vmul.f32 0.5, %v15521_v56  ;;  %9570 = vtanh.f32 %v14263_v36 }
0x139f   : > { %v6600_v21 = vmul.f32 0.5, %v15522_v18  ;;  %v6593_v12 = vmul.f32 0.5, %v15523_v20  ;;  %v6597_v19 = vmul.f32 0.5, %v15524_v22  ;;  %9572 = vtanh.f32 %v14308_v4 }
0x13a0   : > { %v9555_v60 = vpop.eup %9554  ;;  %v14420_v24 = vmul.f32 %v6879_v42, %v6687_v2  ;;  %v6942_v40 = vmul.f32 %v6878_v11, %v6686_v0  ;;  %v6595_v51 = vmul.f32 0.5, %v15525_v23  ;;  %9574 = vtanh.f32 %v14276_v27 }
0x13a1   : > { %v9557_v37 = vpop.eup %9556  ;;  %v7042_v54 = vadd.f32 1.0, %v9555_v60  ;;  %v6599_v36 = vmul.f32 0.5, %v15526_v28  ;;  %9576 = vtanh.f32 %v14327_v15  ;;  %v7163_v34 = vpack.c.bf16 %v14407_v5, %v14398_v39 }
0x13a2   : > { %v9559_v33 = vpop.eup %9558  ;;  %v14428_v35 = vmul.f32 %v6880_v26, %v6688_v49  ;;  %v7046_v4 = vadd.f32 1.0, %v9557_v37  ;;  %v6602_v2 = vmul.f32 0.5, %v14199_v29  ;;  %9578 = vtanh.f32 %v14239_v3 }
0x13a3   : > { %v9561_v61 = vpop.eup %9560  ;;  %v7044_v0 = vadd.f32 1.0, %v9559_v33  ;;  %v6606_v27 = vmul.f32 0.5, %v14237_v62  ;;  %v6604_v42 = vmul.f32 0.5, %v14216_v46  ;;  %9580 = vtanh.f32 %v14290_v45 }
0x13a4   : > { %v9563_v15 = vpop.eup %9562  ;;  %v7106_v11 = vmul.f32 %v7042_v54, %v6594_v53  ;;  %v7110_v56 = vmul.f32 %v7046_v4, %v6598_v17  ;;  %v7048_v18 = vadd.f32 1.0, %v9561_v61  ;;  %9582 = vtanh.f32 %v14260_v10  ;;  %v15527_v17 = vld [vmem:[#allocation158_spill] sm:$0xff] }
0x13a5   : > { %v9565_v49 = vpop.eup %9564  ;;  %v7108_v26 = vmul.f32 %v7044_v0, %v6596_v13  ;;  %v7041_v20 = vadd.f32 1.0, %v9563_v15  ;;  %v6608_v29 = vmul.f32 0.5, %v14246_v58  ;;  %9584 = vtanh.f32 %v14293_v30  ;;  %v15528_v0 = vld [vmem:[#allocation159_spill] sm:$0xff] }
0x13a6   : > { %v9567_v3 = vpop.eup %9566  ;;  %v7154_v22 = vpack.c.bf16 %v7110_v56, %v7106_v11  ;;  %v7112_v62 = vmul.f32 %v7048_v18, %v6600_v21  ;;  %v7045_v60 = vadd.f32 1.0, %v9565_v49  ;;  %9586 = vtanh.f32 %v14355_v6 }
0x13a7   : > { %v9569_v46 = vpop.eup %9568  ;;  %v7105_v45 = vmul.f32 %v7041_v20, %v6593_v12  ;;  %v7043_v53 = vadd.f32 1.0, %v9567_v3  ;;  %v6601_v23 = vmul.f32 0.5, %v15527_v17  ;;  %9588 = vtanh.f32 %v14368_v16 }
0x13a8   : > { %v9571_v10 = vpop.eup %9570  ;;  %7496 = vmatprep.mubr.bf16.mxu1 %v7154_v22  ;;  %v7156_v13 = vpack.c.bf16 %v7112_v62, %v7108_v26  ;;  %v7109_v37 = vmul.f32 %v7045_v60, %v6597_v19  ;;  %v7047_v58 = vadd.f32 1.0, %v9569_v46  ;;  %9590 = vtanh.f32 %v14342_v48 }
0x13a9   : > { %v9573_v30 = vpop.eup %9572  ;;  %v7107_v54 = vmul.f32 %v7043_v53, %v6595_v51  ;;  %v7050_v21 = vadd.f32 1.0, %v9571_v10  ;;  %v6605_v28 = vmul.f32 0.5, %v14222_v8  ;;  %9592 = vtanh.f32 %v14366_v47  ;;  %v15529_v53 = vld [vmem:[#allocation162_spill] sm:$0xff] }
0x13aa   : > { %v9575_v6 = vpop.eup %9574  ;;  %7593 = vmatprep.mubr.bf16.mxu0 %v7156_v13  ;;  %v7153_v12 = vpack.c.bf16 %v7109_v37, %v7105_v45  ;;  %v7111_v33 = vmul.f32 %v7047_v58, %v6599_v36  ;;  %v7054_v4 = vadd.f32 1.0, %v9573_v30  ;;  %9594 = vtanh.f32 %v14400_v1 }
0x13ab   : > { %v9577_v16 = vpop.eup %9576  ;;  %v7114_v61 = vmul.f32 %v7050_v21, %v6602_v2  ;;  %v7052_v19 = vadd.f32 1.0, %v9575_v6  ;;  %v6603_v15 = vmul.f32 0.5, %v15528_v0  ;;  %9596 = vtanh.f32 %v6942_v40 }
0x13ac   : > { %v9579_v48 = vpop.eup %9578  ;;  %7497 = vmatmul.mubr.bf16.gmra.mrb[48].mxu1 %v7153_v12  ;;  %v7155_v51 = vpack.c.bf16 %v7111_v33, %v7107_v54  ;;  %v7118_v11 = vmul.f32 %v7054_v4, %v6606_v27  ;;  %v7056_v8 = vadd.f32 1.0, %v9577_v16  ;;  %9598 = vtanh.f32 %v14381_v50 }
0x13ad   : > { %v9581_v47 = vpop.eup %9580  ;;  %v7116_v56 = vmul.f32 %v7052_v19, %v6604_v42  ;;  %v7049_v18 = vadd.f32 1.0, %v9579_v48  ;;  %v6607_v36 = vmul.f32 0.5, %v14230_v63  ;;  %9600 = vtanh.f32 %v14409_v38  ;;  %v15530_v48 = vld [vmem:[#allocation167_spill] sm:$0xff] }
0x13ae   : > { %v9583_v1 = vpop.eup %9582  ;;  %7594 = vmatmul.mubr.bf16.gmra.mrb[64].mxu0 %v7155_v51  ;;  %v7158_v2 = vpack.c.bf16 %v7118_v11, %v7114_v61  ;;  %v7120_v49 = vmul.f32 %v7056_v8, %v6608_v29  ;;  %v7053_v26 = vadd.f32 1.0, %v9581_v47  ;;  %9602 = vtanh.f32 %v14357_v41  ;;  %v15531_v11 = vld [vmem:[#allocation151_spill] sm:$0xff] }
0x13af   : > { %v9585_v40 = vpop.eup %9584  ;;  %v7113_v20 = vmul.f32 %v7049_v18, %v6601_v23  ;;  %v7051_v27 = vadd.f32 1.0, %v9583_v1  ;;  %v6610_v3 = vmul.f32 0.5, %v14268_v25  ;;  %9604 = vtanh.f32 %v14376_v44 }
0x13b0   : > { %v9587_v50 = vpop.eup %9586  ;;  %7504 = vmatprep.mubr.bf16.mxu1 %v7158_v2  ;;  %v7160_v42 = vpack.c.bf16 %v7120_v49, %v7116_v56  ;;  %v7117_v63 = vmul.f32 %v7053_v26, %v6605_v28  ;;  %v7055_v22 = vadd.f32 1.0, %v9585_v40  ;;  %9606 = vtanh.f32 %v14404_v43 }
0x13b1   : > { %v9589_v38 = vpop.eup %9588  ;;  %v7115_v62 = vmul.f32 %v7051_v27, %v6603_v15  ;;  %v6614_v29 = vmul.f32 0.5, %v14288_v57  ;;  %v7058_v60 = vadd.f32 1.0, %v9587_v50  ;;  %9608 = vtanh.f32 %v14428_v35 }
0x13b2   : > { %v9591_v41 = vpop.eup %9590  ;;  %7601 = vmatprep.mubr.bf16.mxu0 %v7160_v42  ;;  %v7157_v46 = vpack.c.bf16 %v7117_v63, %v7113_v20  ;;  %v7119_v25 = vmul.f32 %v7055_v22, %v6607_v36  ;;  %v7062_v45 = vadd.f32 1.0, %v9589_v38  ;;  %9610 = vtanh.f32 %v14392_v14  ;;  %v15533_v22 = vld [vmem:[#allocation161_spill] sm:$0xff] }
0x13b3   : > { %v9593_v44 = vpop.eup %9592  ;;  %v6609_v17 = vmul.f32 0.5, %v15529_v53  ;;  %v6613_v23 = vmul.f32 0.5, %v14284_v7  ;;  %v7057_v43 = vadd.f32 1.0, %v9591_v41  ;;  %9612 = vtanh.f32 %v14420_v24 }
0x13b4   : > { %v9595_v10 = vpop.eup %9594  ;;  %7505 = vmatmul.mubr.bf16.gmra.mrb[52].mxu1 %v7157_v46  ;;  %v7159_v57 = vpack.c.bf16 %v7119_v25, %v7115_v62  ;;  %v7122_v13 = vmul.f32 %v7058_v60, %v6610_v3  ;;  %v7126_v35 = vmul.f32 %v7062_v45, %v6614_v29  ;;  %v7061_v37 = vadd.f32 1.0, %v9593_v44 }
0x13b5   : > { %v9597_v58 = vpop.eup %9596  ;;  %v6618_v30 = vmul.f32 0.5, %v14325_v59  ;;  %v6622_v54 = vmul.f32 0.5, %v14353_v55  ;;  %v7066_v14 = vadd.f32 1.0, %v9595_v10  ;;  %v7121_v6 = vmul.f32 %v7057_v43, %v6609_v17 }
0x13b6   : > { %v9599_v21 = vpop.eup %9598  ;;  %7602 = vmatmul.mubr.bf16.gmra.mrb[68].mxu0 %v7159_v57  ;;  %v7162_v28 = vpack.c.bf16 %v7126_v35, %v7122_v13  ;;  %v7125_v7 = vmul.f32 %v7061_v37, %v6613_v23  ;;  %v7070_v12 = vadd.f32 1.0, %v9597_v58  ;;  %v6617_v24 = vmul.f32 0.5, %v14306_v9 }
0x13b7   : > { %v9601_v33 = vpop.eup %9600  ;;  %v6621_v4 = vmul.f32 0.5, %v14337_v52  ;;  %v7065_v16 = vadd.f32 1.0, %v9599_v21  ;;  %v7130_v0 = vmul.f32 %v7066_v14, %v6618_v30  ;;  %v6612_v51 = vmul.f32 0.5, %v15530_v48  ;;  %v15532_v52 = vld [vmem:[#allocation164_spill] sm:$0xff]  ;;  %v15535_v21 = vld [vmem:[#allocation135_spill] sm:$0xff] }
0x13b8   : > { %v9603_v61 = vpop.eup %9602  ;;  %7512 = vmatprep.mubr.bf16.mxu1 %v7162_v28  ;;  %v7161_v19 = vpack.c.bf16 %v7125_v7, %v7121_v6  ;;  %v7134_v59 = vmul.f32 %v7070_v12, %v6622_v54  ;;  %v7069_v15 = vadd.f32 1.0, %v9601_v33  ;;  %v6616_v8 = vmul.f32 0.5, %v15531_v11  ;;  %v15536_v7 = vld [vmem:[#allocation136_spill] sm:$0xff] }
0x13b9   : > { %v9605_v55 = vpop.eup %9604  ;;  %v7060_v47 = vadd.f32 1.0, %v9603_v61  ;;  %v7129_v36 = vmul.f32 %v7065_v16, %v6617_v24  ;;  %v6620_v49 = vmul.f32 0.5, %v15532_v52  ;;  %v6624_v26 = vmul.f32 0.5, %v14364_v31 }
0x13ba   : > { %v9607_v56 = vpop.eup %9606  ;;  %v7166_v18 = vpack.c.bf16 %v7134_v59, %v7130_v0  ;;  %v7133_v1 = vmul.f32 %v7069_v15, %v6621_v4  ;;  %v7064_v9 = vadd.f32 1.0, %v9605_v55  ;;  %v6619_v38 = vmul.f32 0.5, %v15533_v22 }
0x13bb   : > { %v9609_v2 = vpop.eup %9608  ;;  %v7068_v40 = vadd.f32 1.0, %v9607_v56  ;;  %v7124_v3 = vmul.f32 %v7060_v47, %v6612_v51  ;;  %v6623_v62 = vmul.f32 0.5, %v14349_v32  ;;  %v14475_v32 = vld [vmem:[%s15534_s10] ss:$0 sm:$0xff]  ;;  %v15537_v56 = vld [vmem:[#allocation137_spill] sm:$0xff] }
0x13bc   : > { %v9611_v20 = vpop.eup %9610  ;;  %7513 = vmatmul.mubr.bf16.gmra.mrb[56].mxu1 %v7161_v19  ;;  %v7165_v27 = vpack.c.bf16 %v7133_v1, %v7129_v36  ;;  %v7128_v50 = vmul.f32 %v7064_v9, %v6616_v8  ;;  %v7072_v42 = vadd.f32 1.0, %v9609_v2  ;;  %v15538_v1 = vld [vmem:[#allocation138_spill] sm:$0xff] }
0x13bd   : > { %v9613_v63 = vpop.eup %9612  ;;  %7520 = vmatprep.mubr.bf16.mxu1 %v7166_v18  ;;  %v7067_v29 = vadd.f32 1.0, %v9611_v20  ;;  %v7132_v41 = vmul.f32 %v7068_v40, %v6620_v49 }
0x13be   : > { %v7164_v60 = vpack.c.bf16 %v7128_v50, %v7124_v3  ;;  %v7136_v46 = vmul.f32 %v7072_v42, %v6624_v26  ;;  %v7071_v25 = vadd.f32 1.0, %v9613_v63 }
0x13bf   : > { %v7131_v31 = vmul.f32 %v7067_v29, %v6619_v38 }
0x13c0   : > { %v7168_v45 = vpack.c.bf16 %v7136_v46, %v7132_v41  ;;  %v7135_v44 = vmul.f32 %v7071_v25, %v6623_v62  ;;  %v15540_v25 = vld [vmem:[#allocation140_spill] sm:$0xff] }
0x13c2   : > { %v7167_v53 = vpack.c.bf16 %v7135_v44, %v7131_v31 }
0x13c4   : > { %7521 = vmatmul.mubr.bf16.gmra.mrb[60].mxu1 %v7165_v27 }
0x13c5   : > { %7609 = vmatprep.mubr.bf16.mxu1 %v7164_v60  ;;  %v15539_v60 = vld [vmem:[#allocation139_spill] sm:$0xff] }
0x13cc   : > { %7610 = vmatmul.mubr.bf16.vlgmr.msra.gmra.mrb[64].mxu1 %v7163_v34 }
0x13cd   : > { %7617 = vmatprep.mubr.bf16.mxu1 %v7168_v45 }
0x13d4   : > { %7618 = vmatmul.mubr.bf16.gmra.mrb[68].mxu1 %v7167_v53 }
0x1413   : > { %v8189_v17 = vpop.f32.mrb[32].mxu1 }
0x1414   : > { %v8190_v23 = vpop.f32.mrb[33].mxu1 }
0x1415   : > { %v8191_v10 = vadd.f32 %v8190_v23, %v8189_v17  ;;  %v8192_v57 = vpop.f32.mrb[34].mxu1 }
0x1416   : > { %v8253_v43 = vpop.f32.mrb[48].mxu0  ;;  %v8193_v35 = vpop.f32.mrb[35].mxu1 }
0x1417   : > { %v8254_v13 = vpop.f32.mrb[49].mxu0  ;;  %v7467_v37 = vadd.f32 %v8191_v10, %v14475_v32  ;;  %v8194_v34 = vadd.f32 %v8193_v35, %v8192_v57 }
0x1418   : > { %v8255_v39 = vadd.f32 %v8254_v13, %v8253_v43  ;;  %v8256_v5 = vpop.f32.mrb[50].mxu0 }
0x1419   : > { %v8257_v58 = vpop.f32.mrb[51].mxu0  ;;  %v7470_v54 = vadd.f32 %v8194_v34, %v14475_v32 }
0x141a   : > { %v7564_v30 = vadd.f32 %v8255_v39, %v7467_v37  ;;  %v8258_v14 = vadd.f32 %v8257_v58, %v8256_v5 }
0x141c   : > { %v7626_v28 = vadd.f32 %v7564_v30, %v15535_v21  ;;  %v7567_v6 = vadd.f32 %v8258_v14, %v7470_v54  ;;  %v15541_v30 = vld [vmem:[#allocation141_spill] sm:$0xff]  ;;  %v15542_v21 = vld [vmem:[#allocation142_spill] sm:$0xff] }
0x141e   : > { %7642 = vst [vmem:[%s10348_s2] sm:$0xff] %v7626_v28  ;;  %v7627_v12 = vadd.f32 %v7567_v6, %v15536_v7 }
0x1420   : > { %7643 = vst [vmem:[%s10348_s2 + $0x8] sm:$0xff] %v7627_v12 }
0x1429   : > { %v8195_v33 = vpop.f32.mrb[36].mxu1 }
0x142a   : > { %v8196_v24 = vpop.f32.mrb[37].mxu1  ;;  %v8259_v4 = vpop.f32.mrb[52].mxu0 }
0x142b   : > { %v8197_v16 = vadd.f32 %v8196_v24, %v8195_v33  ;;  %v8198_v61 = vpop.f32.mrb[38].mxu1  ;;  %v8260_v19 = vpop.f32.mrb[53].mxu0 }
0x142c   : > { %v8199_v0 = vpop.f32.mrb[39].mxu1  ;;  %v8261_v15 = vadd.f32 %v8260_v19, %v8259_v4  ;;  %v8262_v55 = vpop.f32.mrb[54].mxu0 }
0x142d   : > { %v7475_v59 = vadd.f32 %v8197_v16, %v14475_v32  ;;  %v8200_v48 = vadd.f32 %v8199_v0, %v8198_v61  ;;  %v8263_v51 = vpop.f32.mrb[55].mxu0 }
0x142e   : > { %v8264_v47 = vadd.f32 %v8263_v51, %v8262_v55 }
0x142f   : > { %v7572_v11 = vadd.f32 %v8261_v15, %v7475_v59  ;;  %v7478_v8 = vadd.f32 %v8200_v48, %v14475_v32 }
0x1431   : > { %v7628_v18 = vadd.f32 %v7572_v11, %v15537_v56  ;;  %v7575_v36 = vadd.f32 %v8264_v47, %v7478_v8  ;;  %v15543_v11 = vld [vmem:[#allocation143_spill] sm:$0xff] }
0x1433   : > { %7644 = vst [vmem:[%s10348_s2 + $0x10] sm:$0xff] %v7628_v18  ;;  %v7629_v9 = vadd.f32 %v7575_v36, %v15538_v1  ;;  %v15544_v36 = vld [vmem:[#allocation144_spill] sm:$0xff] }
0x1435   : > { %7645 = vst [vmem:[%s10348_s2 + $0x18] sm:$0xff] %v7629_v9 }
0x143e   : > { %v8201_v2 = vpop.f32.mrb[40].mxu1 }
0x143f   : > { %v8202_v52 = vpop.f32.mrb[41].mxu1 }
0x1440   : > { %v8203_v26 = vadd.f32 %v8202_v52, %v8201_v2  ;;  %v8204_v40 = vpop.f32.mrb[42].mxu1 }
0x1441   : > { %v8205_v27 = vpop.f32.mrb[43].mxu1 }
0x1442   : > { %v8265_v49 = vpop.f32.mrb[56].mxu0  ;;  %v7483_v3 = vadd.f32 %v8203_v26, %v14475_v32  ;;  %v8206_v63 = vadd.f32 %v8205_v27, %v8204_v40 }
0x1443   : > { %v8266_v20 = vpop.f32.mrb[57].mxu0 }
0x1444   : > { %v8267_v50 = vadd.f32 %v8266_v20, %v8265_v49  ;;  %v8268_v42 = vpop.f32.mrb[58].mxu0  ;;  %v7486_v62 = vadd.f32 %v8206_v63, %v14475_v32 }
0x1445   : > { %v8269_v22 = vpop.f32.mrb[59].mxu0 }
0x1446   : > { %v7580_v38 = vadd.f32 %v8267_v50, %v7483_v3  ;;  %v8270_v29 = vadd.f32 %v8269_v22, %v8268_v42 }
0x1448   : > { %v7630_v41 = vadd.f32 %v7580_v38, %v15539_v60  ;;  %v7583_v46 = vadd.f32 %v8270_v29, %v7486_v62  ;;  %v15545_v38 = vld [vmem:[#allocation145_spill] sm:$0xff] }
0x144a   : > { %7646 = vst [vmem:[%s10348_s2 + $0x20] sm:$0xff] %v7630_v41  ;;  %v7631_v45 = vadd.f32 %v7583_v46, %v15540_v25  ;;  %v15546_v46 = vld [vmem:[#allocation146_spill] sm:$0xff] }
0x144c   : > { %7647 = vst [vmem:[%s10348_s2 + $0x28] sm:$0xff] %v7631_v45 }
0x1452   : > { %v8207_v31 = vpop.f32.mrb[44].mxu1 }
0x1453   : > { %v8208_v44 = vpop.f32.mrb[45].mxu1 }
0x1454   : > { %v8271_v53 = vpop.f32.mrb[60].mxu0  ;;  %v8209_v17 = vadd.f32 %v8208_v44, %v8207_v31  ;;  %v8210_v23 = vpop.f32.mrb[46].mxu1 }
0x1455   : > { %v8272_v43 = vpop.f32.mrb[61].mxu0  ;;  %v8211_v10 = vpop.f32.mrb[47].mxu1 }
0x1456   : > { %v7491_v57 = vadd.f32 %v8209_v17, %v14475_v32  ;;  %v8273_v13 = vadd.f32 %v8272_v43, %v8271_v53  ;;  %v8274_v35 = vpop.f32.mrb[62].mxu0  ;;  %v8212_v37 = vadd.f32 %v8211_v10, %v8210_v23 }
0x1457   : > { %v8275_v39 = vpop.f32.mrb[63].mxu0 }
0x1458   : > { %v7588_v5 = vadd.f32 %v8273_v13, %v7491_v57  ;;  %v7494_v34 = vadd.f32 %v8212_v37, %v14475_v32  ;;  %v8276_v58 = vadd.f32 %v8275_v39, %v8274_v35 }
0x145a   : > { %v7632_v54 = vadd.f32 %v7588_v5, %v15541_v30  ;;  %v7591_v14 = vadd.f32 %v8276_v58, %v7494_v34 }
0x145c   : > { %7648 = vst [vmem:[%s10348_s2 + $0x30] sm:$0xff] %v7632_v54  ;;  %v7633_v28 = vadd.f32 %v7591_v14, %v15542_v21  ;;  %v15547_v21 = vld [vmem:[#allocation147_spill] sm:$0xff] }
0x145e   : > { %7649 = vst [vmem:[%s10348_s2 + $0x38] sm:$0xff] %v7633_v28 }
0x147f   : > { %v8213_v6 = vpop.f32.mrb[48].mxu1 }
0x1480   : > { %v8214_v7 = vpop.f32.mrb[49].mxu1 }
0x1481   : > { %v8277_v12 = vpop.f32.mrb[64].mxu0  ;;  %v8215_v33 = vadd.f32 %v8214_v7, %v8213_v6  ;;  %v8216_v24 = vpop.f32.mrb[50].mxu1  ;;  %v15548_v7 = vld [vmem:[#allocation148_spill] sm:$0xff] }
0x1482   : > { %v8278_v4 = vpop.f32.mrb[65].mxu0  ;;  %v8217_v16 = vpop.f32.mrb[51].mxu1 }
0x1483   : > { %v7499_v61 = vadd.f32 %v8215_v33, %v14475_v32  ;;  %v8279_v19 = vadd.f32 %v8278_v4, %v8277_v12  ;;  %v8280_v0 = vpop.f32.mrb[66].mxu0  ;;  %v8218_v59 = vadd.f32 %v8217_v16, %v8216_v24 }
0x1484   : > { %v8281_v15 = vpop.f32.mrb[67].mxu0 }
0x1485   : > { %v7596_v55 = vadd.f32 %v8279_v19, %v7499_v61  ;;  %v7502_v48 = vadd.f32 %v8218_v59, %v14475_v32  ;;  %v8282_v51 = vadd.f32 %v8281_v15, %v8280_v0 }
0x1487   : > { %v7634_v8 = vadd.f32 %v7596_v55, %v15543_v11  ;;  %v7599_v47 = vadd.f32 %v8282_v51, %v7502_v48  ;;  %v8219_v56 = vpop.f32.mrb[52].mxu1  ;;  %v15549_v55 = vld [vmem:[#allocation149_spill] sm:$0xff]  ;;  %v15550_v11 = vld [vmem:[#allocation150_spill] sm:$0xff] }
0x1488   : > { %v8220_v18 = vpop.f32.mrb[53].mxu1 }
0x1489   : > { %7650 = vst [vmem:[%s10348_s2 + $0x40] sm:$0xff] %v7634_v8  ;;  %v7635_v1 = vadd.f32 %v7599_v47, %v15544_v36  ;;  %v8283_v9 = vpop.f32.mrb[68].mxu0  ;;  %v8221_v2 = vadd.f32 %v8220_v18, %v8219_v56  ;;  %v8222_v52 = vpop.f32.mrb[54].mxu1 }
0x148a   : > { %v8284_v49 = vpop.f32.mrb[69].mxu0  ;;  %v8223_v26 = vpop.f32.mrb[55].mxu1 }
0x148b   : > { %7651 = vst [vmem:[%s10348_s2 + $0x48] sm:$0xff] %v7635_v1  ;;  %v7507_v40 = vadd.f32 %v8221_v2, %v14475_v32  ;;  %v8285_v20 = vadd.f32 %v8284_v49, %v8283_v9  ;;  %v8286_v27 = vpop.f32.mrb[70].mxu0  ;;  %v8224_v3 = vadd.f32 %v8223_v26, %v8222_v52 }
0x148c   : > { %v8287_v50 = vpop.f32.mrb[71].mxu0 }
0x148d   : > { %v7604_v42 = vadd.f32 %v8285_v20, %v7507_v40  ;;  %v7510_v63 = vadd.f32 %v8224_v3, %v14475_v32  ;;  %v8288_v22 = vadd.f32 %v8287_v50, %v8286_v27 }
0x148f   : > { %v7636_v62 = vadd.f32 %v7604_v42, %v15545_v38  ;;  %v7607_v29 = vadd.f32 %v8288_v22, %v7510_v63  ;;  %v8225_v60 = vpop.f32.mrb[56].mxu1 }
0x1490   : > { %v8226_v41 = vpop.f32.mrb[57].mxu1 }
0x1491   : > { %7652 = vst [vmem:[%s10348_s2 + $0x50] sm:$0xff] %v7636_v62  ;;  %v7637_v25 = vadd.f32 %v7607_v29, %v15546_v46  ;;  %v8227_v45 = vadd.f32 %v8226_v41, %v8225_v60  ;;  %v8228_v31 = vpop.f32.mrb[58].mxu1 }
0x1492   : > { %v8229_v44 = vpop.f32.mrb[59].mxu1 }
0x1493   : > { %7653 = vst [vmem:[%s10348_s2 + $0x58] sm:$0xff] %v7637_v25  ;;  %v8230_v53 = vadd.f32 %v8229_v44, %v8228_v31  ;;  %v7515_v39 = vadd.f32 %v8227_v45, %v14475_v32 }
0x1495   : > { %v7518_v30 = vadd.f32 %v8230_v53, %v14475_v32 }
0x1497   : > { %v8231_v17 = vpop.f32.mrb[60].mxu1 }
0x1498   : > { %v8232_v23 = vpop.f32.mrb[61].mxu1 }
0x1499   : > { %v8233_v43 = vadd.f32 %v8232_v23, %v8231_v17  ;;  %v8234_v10 = vpop.f32.mrb[62].mxu1 }
0x149a   : > { %v8235_v57 = vpop.f32.mrb[63].mxu1 }
0x149b   : > { %v8236_v13 = vadd.f32 %v8235_v57, %v8234_v10  ;;  %v7523_v4 = vadd.f32 %v8233_v43, %v14475_v32 }
0x149d   : > { %v7526_v0 = vadd.f32 %v8236_v13, %v14475_v32 }
0x149f   : > { %v8289_v35 = vpop.f32.mrb[64].mxu1 }
0x14a0   : > { %v8290_v37 = vpop.f32.mrb[65].mxu1 }
0x14a1   : > { %v8291_v5 = vadd.f32 %v8290_v37, %v8289_v35  ;;  %v8292_v34 = vpop.f32.mrb[66].mxu1 }
0x14a2   : > { %v8293_v58 = vpop.f32.mrb[67].mxu1 }
0x14a3   : > { %v7612_v54 = vadd.f32 %v8291_v5, %v7515_v39  ;;  %v8294_v14 = vadd.f32 %v8293_v58, %v8292_v34 }
0x14a5   : > { %v7638_v28 = vadd.f32 %v7612_v54, %v15547_v21  ;;  %v7615_v6 = vadd.f32 %v8294_v14, %v7518_v30 }
0x14a7   : > { %7654 = vst [vmem:[%s10348_s2 + $0x60] sm:$0xff] %v7638_v28  ;;  %v7639_v12 = vadd.f32 %v7615_v6, %v15548_v7  ;;  %v8295_v33 = vpop.f32.mrb[68].mxu1 }
0x14a8   : > { %v8296_v24 = vpop.f32.mrb[69].mxu1 }
0x14a9   : > { %7655 = vst [vmem:[%s10348_s2 + $0x68] sm:$0xff] %v7639_v12  ;;  %v8297_v16 = vadd.f32 %v8296_v24, %v8295_v33  ;;  %v8298_v61 = vpop.f32.mrb[70].mxu1 }
0x14aa   : > { %v8299_v19 = vpop.f32.mrb[71].mxu1 }
0x14ab   : > { %v7620_v59 = vadd.f32 %v8297_v16, %v7523_v4  ;;  %v8300_v15 = vadd.f32 %v8299_v19, %v8298_v61 }
0x14ad   : > { %v7640_v48 = vadd.f32 %v7620_v59, %v15549_v55  ;;  %v7623_v51 = vadd.f32 %v8300_v15, %v7526_v0 }
0x14af   : > { %7656 = vst [vmem:[%s10348_s2 + $0x70] sm:$0xff] %v7640_v48  ;;  %v7641_v8 = vadd.f32 %v7623_v51, %v15550_v11 }
0x14b1   : > { %7657 = vst [vmem:[%s10348_s2 + $0x78] sm:$0xff] %v7641_v8 }
0x14b2 PF: > { %s15551_s23 = sld [smem:[#allocation28_spill]]  ;;  %s15552_s22 = sld [smem:[#allocation29_spill]] }
0x14b3   : > { %s7674_s6 = sshll.u32 %s10348_s2, 4  ;;  %s15553_s24 = sld [smem:[#allocation180_spill]]  ;;  %s14528_s6 = int_to_ptr.vmem [resolvable:$true] %s7674_s6 }
0x14b4   : > { %s7659_s12 = scalar_lea.sflag [#allocation11], %s10326_s5  ;;  %s9812_s1 = scalar_lea.vmem %s14528_s6, 2048 }
0x14b5   : > { %p9813_p0 = scmp.ne.s32.totalorder %s14528_s6, %s9812_s1  ;;  %p15554_p2 = scmp.ne.s32.totalorder %s14842_s28, 0 }
0x14b6   : > { %s9963_s21 = smov [#allocation21]  }
0x14b7   : > { %p9814_p7 = pnand %p9813_p0, %p15554_p2  ;;  %s9816_s2 = sshll.u32 %s9963_s21, 4  ;;  %s9817_s2 = int_to_ptr.vmem [resolvable:$false] %s9816_s2 }
0x14b8   : > { %s8004_s29 = sshll.u32 %s15551_s23, 4  ;;  %s8005_s9 = sshll.u32 %s15552_s22, 5 }
0x14b9   : > { %s7671_s11 = sadd.s32 %s8005_s9, %s8004_s29  ;;  %p9815_p8 = pneg %p9814_p7 }
0x14ba   : > { %s8006_s8 = sshll.u32 %s7671_s11, 7  ;;  %s9818_s13 = scalar_lea.vmem %s9817_s2, 4096 }
0x14bb   : > { %s14533_s3 = scalar_lea.hbm %s15553_s24, %s8006_s8  ;;  %p9819_p1 = scmp.lt.s32.totalorder %s14528_s6, %s9817_s2 }
0x14bc   : > { %p9820_p5 = scmp.lt.s32.totalorder %s9818_s13, %s9812_s1 }
0x14be   : > { %p9821_p10 = por %p9820_p5, %p9819_p1 }
0x14c0   : > { %p9822_p12 = pnand %p9821_p10, %p9815_p8 }
0x14c2   : > { %9825 = shalt.err (!%p9822_p12)
}
0x14c3   : > { %s9826_s10 = scalar_lea.hbm %s14533_s3, 2048  ;;  %s9830_s29 = scalar_lea.hbm %s15553_s24, 8192 }
0x14c4   : > { %p9827_p9 = scmp.ne.s32.totalorder %s14533_s3, %s9826_s10  ;;  %p9831_p4 = scmp.lt.u32.totalorder %s14533_s3, %s15553_s24 }
0x14c5   : > { %p9832_p6 = scmp.lt.u32.totalorder %s9830_s29, %s9826_s10  ;;  %p9834_p0 = scmp.lt.u32.totalorder %s9826_s10, %s14533_s3 }
0x14c6   : > { %p9828_p13 = pnand %p9827_p9, %p15554_p2 }
0x14c7   : > { %p9833_p3 = por %p9832_p6, %p9831_p4 }
0x14c8   : > { %p9829_p11 = pneg %p9828_p13 }
0x14c9   : > { %p9835_p7 = por %p9834_p0, %p9833_p3 }
0x14cb   : > { %p9836_p8 = pnand %p9835_p7, %p9829_p11 }
0x14cd   : > { %9839 = shalt.err (!%p9836_p8)
}
0x14ce   : > { %s9964_s8 = smov 128   ;;  %s9965_s19 = smov 8  }
0x14cf   : > { %8727 = dma.vmem_to_hbm [thread:$0]  (%p15554_p2), %s14528_s6, 2048, %s14533_s3, %s7659_s12, %s9964_s8, %s9964_s8, %s9965_s19  }
0x14d0 PF: > { %p8769_p1 = scmp.ge.s32.totalorder %s9938_s17, 2  ;;  %s7689_s4 = sand.u32 1, %s9902_s25  }
0x14d1   : > { %p15555_p5 = scmp.ne.s32.totalorder %s14843_s20, 0  ;;  %s7690_s1 = scalar_lea.sflag [#allocation11], %s7689_s4 }
0x14d3   : > { %p8753_p10 = pnand %p8769_p1, %p15555_p5 }
0x14d5   : > { %9897 = dma.done.wait (!%p8753_p10), %s7690_s1, 2048  }
0x14d6   : > { %9899 = vsyncadd (!%p8753_p10), %s7690_s1, 4294965248  ;;  %s32_s17 = sadd.s32 1, %s9938_s17   ;;  %s15556_s5 = sld [smem:[#allocation31_spill]] }
0x14d7   : > { %p29_p12 = scmp.ge.s32.totalorder %s32_s17, 10   ;;  %s15557_s6 = smov %s15576_s30 }
0x14d8   : > { %s15558_s25 = smov %s9906_s26  ;;  %s15559_s26 = smov %s9910_s27 }
0x14d9   : > { %s15560_s27 = smov %s10278_s7  ;;  %s15561_s28 = smov %s9926_s14 }
0x14da   : > { %s15562_s29 = smov %s9930_s15  ;;  %s15563_s30 = smov %s9934_s16 }
0x14db   : > { %s15564_s14 = smov %s15568_s18  ;;  %s15566_s16 = smov %s15557_s6 }
0x14dc   : > { %s15565_s15 = smov %s15556_s5  ;;  %31 = sbr.rel (!%p29_p12) target bundleno = 25 (0x19), region = 170 }
0x14e3   :  { %7695 = vsyncpa [#allocation10], 1 }
0x14e4   :  { %7697 = vsyncpa [#allocation10 + $0x1], 1 }
0x14e5   :  { %7698 = vsyncpa [#allocation13], 1 }
0x14e6   :  { %7699 = vsyncpa [#allocation16], 1 }
0x14e7   :  { %7700 = vsyncpa [#allocation19], 1 }
0x14e8   :  { %7701 = vsyncpa [#allocation11], 1 }
0x14e9   :  { %7703 = vsyncpa [#allocation11 + $0x1], 1 }

</bundles_post_ra>
